<compile_context>
chip_gen: v6e
topology: v6e:2x2x1
jax: 0.10.0
libtpu: 0.0.40
codegen_flags: <defaults>
</compile_context>

<pallas_src>
import functools

import jax
import jax.numpy as jnp
from jax.experimental import pallas as pl
from jax.experimental.pallas import tpu as pltpu

_EPS = 1e-5

_vmem_limit_cache = None


def _vmem_limit_bytes():
    """Generation-aware scoped-VMEM budget (~48 MiB v7x, ~96 MiB v5e/v6e)."""
    global _vmem_limit_cache
    if _vmem_limit_cache is None:
        try:
            cap = int(pltpu.get_tpu_info().vmem_capacity_bytes)
            _vmem_limit_cache = int(min(cap * 3 // 4, 96 * 1024 * 1024))
        except Exception:  # CPU / interpret mode / older runtime: safe default
            _vmem_limit_cache = 48 * 1024 * 1024
    return _vmem_limit_cache


def _round_up(x, m):
    return (x + m - 1) // m * m


# ----------------------------------------------------------------------------
# Kernel 1: deconv1 on the 1x1 latent == matmul, fused with BatchNorm + ReLU
# ----------------------------------------------------------------------------
def _head_matmul_bn_relu_kernel(z_ref, w_ref, gamma_ref, beta_ref, o_ref, *, C1):
    # z_ref : (N, 128)     bf16   latent, zero-padded 100 -> 128
    # w_ref : (128, 16*C1) bf16   columns ordered (kh, kw, co)
    # gamma/beta : (1, C1) f32
    # o_ref : (N, 16*C1)   bf16   lane-dense; reshaped to (N, 4, 4, C1) outside
    n = z_ref.shape[0]
    acc = jnp.dot(z_ref[...], w_ref[...], preferred_element_type=jnp.float32)

    # Training-mode BatchNorm2d over (N, 4, 4) per channel (biased variance).
    # Sums are folded per 16 aligned (N, C1) lane slices -- no full-width
    # acc*acc temporary and no channel-major relayout of the big accumulator.
    inv_cnt = 1.0 / (16.0 * n)
    s1 = jnp.zeros((1, C1), jnp.float32)
    s2 = jnp.zeros((1, C1), jnp.float32)
    for s in range(16):
        blk = acc[:, s * C1:(s + 1) * C1]
        s1 = s1 + jnp.sum(blk, axis=0, keepdims=True)
        s2 = s2 + jnp.sum(blk * blk, axis=0, keepdims=True)
    mean = s1 * inv_cnt
    var = s2 * inv_cnt - mean * mean
    scale = gamma_ref[...] * jax.lax.rsqrt(var + _EPS)     # gamma folded
    shift = beta_ref[...] - mean * scale                   # beta folded
    for s in range(16):
        blk = acc[:, s * C1:(s + 1) * C1]
        o_ref[:, s * C1:(s + 1) * C1] = jnp.maximum(
            blk * scale + shift, 0.0).astype(o_ref.dtype)


def _head_block(z, w1m, gamma, beta):
    """deconv1 (1x1 -> 4x4) + BN + ReLU.  z: (N, 100) f32 -> (N, 4, 4, C1) bf16."""
    n = z.shape[0]
    c1 = gamma.shape[-1]                                   # static
    zp = jnp.zeros((n, 128), jnp.bfloat16).at[:, :100].set(z.astype(jnp.bfloat16))
    vmem = pl.BlockSpec(memory_space=pltpu.MemorySpace.VMEM)
    out = pl.pallas_call(
        functools.partial(_head_matmul_bn_relu_kernel, C1=c1),
        out_shape=jax.ShapeDtypeStruct((n, 16 * c1), jnp.bfloat16),
        in_specs=[vmem, vmem, vmem, vmem],
        out_specs=vmem,
        compiler_params=pltpu.CompilerParams(vmem_limit_bytes=_vmem_limit_bytes()),
    )(zp, w1m, gamma, beta)
    return out.reshape(n, 4, 4, c1)


# ----------------------------------------------------------------------------
# Kernel 2: sub-pixel decomposed ConvTranspose2d(4, 2, 1) (+ optional BN+ReLU)
# ----------------------------------------------------------------------------
def _phase_deconv_kernel(xc0_ref, xc1_ref, w_ref, *rest, bn):
    # xc0/xc1 : (H+2, NWb, 2*Cin) bf16  H-leading W-axis im2col of the zero-padded
    #           compact input, for output-column phases c = 0 / 1.
    # w_ref   : (8, 2*Cin, Ct) bf16     phase/tap weights, index = 2*(2r+c)+t.
    # bn=True : rest = (gamma_ref, beta_ref, o_ref); o_ref (4, H, NWb, Ct) bf16
    # bn=False: rest = (o_ref,);                    o_ref (4, H, NWb, Ct) f32 raw acc
    if bn:
        g_ref, b_ref, o_ref = rest
    else:
        (o_ref,) = rest
    H = xc0_ref.shape[0] - 2
    NW = xc0_ref.shape[1]
    k2 = xc0_ref.shape[2]
    ct = w_ref.shape[-1]
    rows = H * NW

    if bn:
        s1 = jnp.zeros((1, ct), jnp.float32)
        s2 = jnp.zeros((1, ct), jnp.float32)

    # 4 phases x 2 taps of (rows, 2*Cin) @ (2*Cin, Ct) MXU matmuls; tap windows
    # are leading-axis slices (no sublane relayout).  BN sums come straight from
    # the f32 accumulator before the bf16 store (single read of o_ref later).
    for p in range(4):
        r, c = divmod(p, 2)
        xc = xc0_ref if c == 0 else xc1_ref
        acc = jnp.zeros((rows, ct), jnp.float32)
        for t in range(2):
            xs = xc[r + t:r + t + H].reshape(rows, k2)
            acc = acc + jnp.dot(xs, w_ref[2 * p + t],
                                preferred_element_type=jnp.float32)
        if bn:
            s1 = s1 + jnp.sum(acc, axis=0, keepdims=True)
            s2 = s2 + jnp.sum(acc * acc, axis=0, keepdims=True)
        o_ref[p] = acc.reshape(H, NW, ct).astype(o_ref.dtype)

    if bn:
        # Training-mode BatchNorm2d: per-channel stats over the full
        # N x (2H) x (2W) output (= all 4 phases), biased variance.
        inv_cnt = 1.0 / (4.0 * rows)
        mean = s1 * inv_cnt
        var = s2 * inv_cnt - mean * mean
        scale = g_ref[...] * jax.lax.rsqrt(var + _EPS)     # gamma folded
        shift = b_ref[...] - mean * scale                  # beta folded
        for p in range(4):
            v = o_ref[p].astype(jnp.float32)
            o_ref[p] = jnp.maximum(v * scale + shift, 0.0).astype(o_ref.dtype)


def _phase_deconv_block(x_nhwc, w_ph, p0, p1=None, *, bn):
    """One ConvTranspose2d(k=4, s=2, p=1) block.

    bn=True : + train-mode BatchNorm (p0=gamma, p1=beta) + ReLU, emits bf16.
    bn=False: raw deconv; bias (p0) + tanh applied in XLA on the real channels
              only, after dropping the zero-padded lanes.  Emits f32.
    x_nhwc: (N, H, W, Cin) -> (N, 2H, 2W, cout).
    """
    n, h, w, cin = x_nhwc.shape
    cp = w_ph.shape[-1]                      # padded channel count  (static)
    cout = p0.shape[-1]                      # real channel count    (static)
    k2 = 2 * cin

    # XLA glue on small tensors: zero-pad by 1, pre-gather the two W-axis taps
    # per output-column phase, then lay out H-leading so the kernel's H-tap
    # slices / reshapes never cross (sublane, lane) tiles.
    xb = x_nhwc.astype(jnp.bfloat16)
    xp = jnp.pad(xb, ((0, 0), (1, 1), (1, 1), (0, 0)))
    xc0 = jnp.concatenate([xp[:, :, 0:w, :], xp[:, :, 1:w + 1, :]], axis=-1)
    xc1 = jnp.concatenate([xp[:, :, 1:w + 1, :], xp[:, :, 2:w + 2, :]], axis=-1)
    xc0 = jnp.transpose(xc0, (1, 0, 2, 3)).reshape(h + 2, n * w, k2)
    xc1 = jnp.transpose(xc1, (1, 0, 2, 3)).reshape(h + 2, n * w, k2)

    ctile = 256 if cp % 256 == 0 else 128    # (on v7x prefer 128 when cp == 256)
    btile = n if bn else 1                   # final layer: batch-parallel grid
    grid = (n // btile, ctile and cp // ctile)

    if bn:
        extra = (jnp.pad(p0, ((0, 0), (0, cp - cout))),
                 jnp.pad(p1, ((0, 0), (0, cp - cout))))
        extra_specs = [pl.BlockSpec((1, ctile), lambda i, j: (0, j)),
                       pl.BlockSpec((1, ctile), lambda i, j: (0, j))]
        out_dtype = jnp.bfloat16
    else:
        extra = ()
        extra_specs = []
        out_dtype = jnp.float32

    ph = pl.pallas_call(
        functools.partial(_phase_deconv_kernel, bn=bn),
        out_shape=jax.ShapeDtypeStruct((4, h, n * w, cp), out_dtype),
        grid=grid,
        in_specs=[
            pl.BlockSpec((h + 2, btile * w, k2), lambda i, j: (0, i, 0)),
            pl.BlockSpec((h + 2, btile * w, k2), lambda i, j: (0, i, 0)),
            pl.BlockSpec((8, k2, ctile), lambda i, j: (0, 0, j)),
        ] + extra_specs,
        out_specs=pl.BlockSpec((4, h, btile * w, ctile), lambda i, j: (0, 0, i, j)),
        compiler_params=pltpu.CompilerParams(
            dimension_semantics=("parallel", "parallel"),
            vmem_limit_bytes=_vmem_limit_bytes()),
    )(xc0, xc1, w_ph, *extra)

    # Interleave phases (XLA glue): out[n, 2h+r, 2w+c, :] = ph[2r+c, h, n*W+w, :].
    out = ph.reshape(2, 2, h, n, w, cp).transpose(3, 2, 0, 4, 1, 5)
    out = out.reshape(n, 2 * h, 2 * w, cp)
    if cp != cout:
        out = out[..., :cout]                # drop zero-padded channels (static)
    if not bn:
        # bias + tanh only on real channels => no EUP work wasted on pad lanes.
        out = jnp.tanh(out.astype(jnp.float32) + p0.reshape(1, 1, 1, cout))
    return out


# ----------------------------------------------------------------------------
# Parameters: init (mirrors generator.__init__ + weight_init(0, .02)) and
# one-time repacking for the kernels (hoisted out of the forward path).
# ----------------------------------------------------------------------------
def init_generator_params(key, d=32):
    dims = [(100, d * 8), (d * 8, d * 4), (d * 4, d * 2), (d * 2, 1)]
    params = {}
    keys = jax.random.split(key, len(dims))
    for i, (cin, cout) in enumerate(dims, start=1):
        w = 0.02 * jax.random.normal(keys[i - 1], (cin, cout, 4, 4), jnp.float32)
        params[f"deconv{i}"] = (w, jnp.zeros((cout,), jnp.float32))  # biases zeroed
        if i < 4:
            params[f"bn{i}"] = (jnp.ones((cout,), jnp.float32),
                                jnp.zeros((cout,), jnp.float32))
    return params


def _make_phase_weights(wt):
    """(Cin, Cout, 4, 4) ConvTranspose2d weight -> (8, 2*Cin, Cout) phase/tap
    weights for the sub-pixel decomposition (block index = 2*(2*r + c) + t;
    rows [u*Cin:(u+1)*Cin] hold W[:, :, 3-(2t+r), 3-(2u+c)])."""
    blocks = []
    for r in range(2):
        for c in range(2):
            for t in range(2):
                rows = [wt[:, :, 3 - (2 * t + r), 3 - (2 * u + c)] for u in (0, 1)]
                blocks.append(jnp.concatenate(rows, axis=0))
    return jnp.stack(blocks, axis=0)


def prepare_generator_params(params):
    """One-time weight repack (bf16 casts, phase weights, channel padding).
    Only arrays are stored (channel counts stay derivable from static shapes)."""
    w1, _ = params["deconv1"]                    # conv bias cancelled by BN
    c1 = w1.shape[1]
    w1m = jnp.transpose(w1, (0, 2, 3, 1)).reshape(100, 16 * c1)   # (ci,(kh,kw,co))
    w1m = jnp.pad(w1m, ((0, 28), (0, 0))).astype(jnp.bfloat16)    # Cin 100 -> 128
    g1, b1 = params["bn1"]
    prepped = {"l1": (w1m,
                      g1.reshape(1, c1).astype(jnp.float32),
                      b1.reshape(1, c1).astype(jnp.float32))}

    for i in (2, 3, 4):
        w, bias = params[f"deconv{i}"]
        cout = w.shape[1]
        cp = _round_up(cout, 128)                # lane-dense stores / MXU tiles
        wp = jnp.pad(_make_phase_weights(w), ((0, 0), (0, 0), (0, cp - cout)))
        wp = wp.astype(jnp.bfloat16)
        if i < 4:
            g, b = params[f"bn{i}"]
            prepped[f"l{i}"] = (wp,
                                g.reshape(1, cout).astype(jnp.float32),
                                b.reshape(1, cout).astype(jnp.float32))
        else:
            prepped[f"l{i}"] = (wp, bias.reshape(1, cout).astype(jnp.float32))
    return prepped


# ----------------------------------------------------------------------------
# Forward pass (img_size == 32 branch) and a pure-JAX f32 reference
# ----------------------------------------------------------------------------
def generator_forward(prepped, z_nchw):
    n = z_nchw.shape[0]
    x = _head_block(z_nchw.reshape(n, 100), *prepped["l1"])    # (N, 4, 4, 8d) bf16
    x = _phase_deconv_block(x, *prepped["l2"], bn=True)        # (N, 8, 8, 4d) bf16
    x = _phase_deconv_block(x, *prepped["l3"], bn=True)        # (N,16,16, 2d) bf16
    x = _phase_deconv_block(x, *prepped["l4"], bn=False)       # (N,32,32, 1) f32
    return jnp.transpose(x, (0, 3, 1, 2))                      # NCHW


def _ref_deconv(x, w, b, stride, padding):
    k = w.shape[-1]
    wf = jnp.transpose(jnp.flip(w, axis=(2, 3)), (2, 3, 0, 1))   # (K,K,Cin,Cout)
    y = jax.lax.conv_general_dilated(
        jnp.transpose(x, (0, 2, 3, 1)), wf, window_strides=(1, 1),
        padding=[(k - 1 - padding,) * 2] * 2, lhs_dilation=(stride, stride),
        dimension_numbers=("NHWC", "HWIO", "NHWC"))
    return jnp.transpose(y + b.reshape(1, 1, 1, -1), (0, 3, 1, 2))


def _ref_bn_relu(x, gamma, beta):
    mean = jnp.mean(x, axis=(0, 2, 3), keepdims=True)
    var = jnp.mean((x - mean) ** 2, axis=(0, 2, 3), keepdims=True)
    y = (x - mean) * jax.lax.rsqrt(var + _EPS)
    return jnp.maximum(y * gamma.reshape(1, -1, 1, 1) + beta.reshape(1, -1, 1, 1), 0.0)


def generator_reference(params, z):
    w, b = params["deconv1"]
    x = _ref_bn_relu(_ref_deconv(z, w, b, 1, 0), *params["bn1"])
    w, b = params["deconv2"]
    x = _ref_bn_relu(_ref_deconv(x, w, b, 2, 1), *params["bn2"])
    w, b = params["deconv3"]
    x = _ref_bn_relu(_ref_deconv(x, w, b, 2, 1), *params["bn3"])
    w, b = params["deconv4"]
    return jnp.tanh(_ref_deconv(x, w, b, 2, 1))


if __name__ == "__main__":
    key = jax.random.PRNGKey(0)
    k_params, k_z = jax.random.split(key)

    d = 32         # scaled-down channel multiplier (reference module uses d=128)
    batch = 2
    params = init_generator_params(k_params, d=d)
    prepped = prepare_generator_params(params)     # hoisted, once per param set
    z = jax.random.normal(k_z, (batch, 100, 1, 1), jnp.float32)

    out = jax.block_until_ready(jax.jit(generator_forward)(prepped, z))

    assert out.shape == (batch, 1, 32, 32), out.shape
    assert bool(jnp.all(jnp.isfinite(out)))
    assert bool(jnp.all(jnp.abs(out) <= 1.0 + 1e-6))          # tanh range

    # Numerical check against a pure-JAX f32 reference of the PyTorch module
    # (train-mode BatchNorm); bf16 matmul operands / activations => loose tol.
    ref = jax.block_until_ready(jax.jit(generator_reference)(params, z))
    err = float(jnp.max(jnp.abs(out - ref)))
    assert err < 5e-2, err

    print("KERNEL_OK")
</pallas_src>

<mosaic_0001>
module attributes {stable_mosaic.version = 11 : i64} {
  func.func @_head_matmul_bn_relu_kernel(%arg0: memref<2x128xbf16, #tpu.memory_space<vmem>>, %arg1: memref<128x4096xbf16, #tpu.memory_space<vmem>>, %arg2: memref<1x256xf32, #tpu.memory_space<vmem>>, %arg3: memref<1x256xf32, #tpu.memory_space<vmem>>, %arg4: memref<2x4096xbf16, #tpu.memory_space<vmem>>) attributes {dimension_semantics = [], scalar_prefetch = 0 : i64, scratch_operands = 0 : i64, tpu.core_type = #tpu.core_type<tc>} {
    %c0 = arith.constant 0 : index
    %c0_0 = arith.constant 0 : index
    %0 = vector.load %arg0[%c0, %c0_0] : memref<2x128xbf16, #tpu.memory_space<vmem>>, vector<2x128xbf16>
    %c0_1 = arith.constant 0 : index
    %c0_2 = arith.constant 0 : index
    %1 = vector.load %arg1[%c0_1, %c0_2] : memref<128x4096xbf16, #tpu.memory_space<vmem>>, vector<128x4096xbf16>
    %cst = arith.constant dense<0.000000e+00> : vector<2x4096xf32>
    %2 = tpu.matmul %0, %1, %cst {dimension_numbers = #tpu.dot_dimension_numbers<[1], [0], [0], [1], [0, 0, 1, 1], [], []>} : vector<2x128xbf16>, vector<128x4096xbf16>, vector<2x4096xf32> -> vector<2x4096xf32>
    %cst_3 = arith.constant 0.000000e+00 : f32
    %3 = vector.broadcast %cst_3 : f32 to vector<1x256xf32>
    %cst_4 = arith.constant 0.000000e+00 : f32
    %4 = vector.broadcast %cst_4 : f32 to vector<1x256xf32>
    %5 = vector.extract_strided_slice %2 {offsets = [0, 0], sizes = [2, 256], strides = [1, 1]} : vector<2x4096xf32> to vector<2x256xf32>
    %cst_5 = arith.constant dense<0.000000e+00> : vector<256xf32>
    %6 = vector.multi_reduction <add>, %5, %cst_5 [0] : vector<2x256xf32> to vector<256xf32>
    %7 = vector.shape_cast %6 : vector<256xf32> to vector<1x256xf32>
    %8 = arith.addf %3, %7 : vector<1x256xf32>
    %9 = arith.mulf %5, %5 : vector<2x256xf32>
    %cst_6 = arith.constant dense<0.000000e+00> : vector<256xf32>
    %10 = vector.multi_reduction <add>, %9, %cst_6 [0] : vector<2x256xf32> to vector<256xf32>
    %11 = vector.shape_cast %10 : vector<256xf32> to vector<1x256xf32>
    %12 = arith.addf %4, %11 : vector<1x256xf32>
    %13 = vector.extract_strided_slice %2 {offsets = [0, 256], sizes = [2, 256], strides = [1, 1]} : vector<2x4096xf32> to vector<2x256xf32>
    %cst_7 = arith.constant dense<0.000000e+00> : vector<256xf32>
    %14 = vector.multi_reduction <add>, %13, %cst_7 [0] : vector<2x256xf32> to vector<256xf32>
    %15 = vector.shape_cast %14 : vector<256xf32> to vector<1x256xf32>
    %16 = arith.addf %8, %15 : vector<1x256xf32>
    %17 = arith.mulf %13, %13 : vector<2x256xf32>
    %cst_8 = arith.constant dense<0.000000e+00> : vector<256xf32>
    %18 = vector.multi_reduction <add>, %17, %cst_8 [0] : vector<2x256xf32> to vector<256xf32>
    %19 = vector.shape_cast %18 : vector<256xf32> to vector<1x256xf32>
    %20 = arith.addf %12, %19 : vector<1x256xf32>
    %21 = vector.extract_strided_slice %2 {offsets = [0, 512], sizes = [2, 256], strides = [1, 1]} : vector<2x4096xf32> to vector<2x256xf32>
    %cst_9 = arith.constant dense<0.000000e+00> : vector<256xf32>
    %22 = vector.multi_reduction <add>, %21, %cst_9 [0] : vector<2x256xf32> to vector<256xf32>
    %23 = vector.shape_cast %22 : vector<256xf32> to vector<1x256xf32>
    %24 = arith.addf %16, %23 : vector<1x256xf32>
    %25 = arith.mulf %21, %21 : vector<2x256xf32>
    %cst_10 = arith.constant dense<0.000000e+00> : vector<256xf32>
    %26 = vector.multi_reduction <add>, %25, %cst_10 [0] : vector<2x256xf32> to vector<256xf32>
    %27 = vector.shape_cast %26 : vector<256xf32> to vector<1x256xf32>
    %28 = arith.addf %20, %27 : vector<1x256xf32>
    %29 = vector.extract_strided_slice %2 {offsets = [0, 768], sizes = [2, 256], strides = [1, 1]} : vector<2x4096xf32> to vector<2x256xf32>
    %cst_11 = arith.constant dense<0.000000e+00> : vector<256xf32>
    %30 = vector.multi_reduction <add>, %29, %cst_11 [0] : vector<2x256xf32> to vector<256xf32>
    %31 = vector.shape_cast %30 : vector<256xf32> to vector<1x256xf32>
    %32 = arith.addf %24, %31 : vector<1x256xf32>
    %33 = arith.mulf %29, %29 : vector<2x256xf32>
    %cst_12 = arith.constant dense<0.000000e+00> : vector<256xf32>
    %34 = vector.multi_reduction <add>, %33, %cst_12 [0] : vector<2x256xf32> to vector<256xf32>
    %35 = vector.shape_cast %34 : vector<256xf32> to vector<1x256xf32>
    %36 = arith.addf %28, %35 : vector<1x256xf32>
    %37 = vector.extract_strided_slice %2 {offsets = [0, 1024], sizes = [2, 256], strides = [1, 1]} : vector<2x4096xf32> to vector<2x256xf32>
    %cst_13 = arith.constant dense<0.000000e+00> : vector<256xf32>
    %38 = vector.multi_reduction <add>, %37, %cst_13 [0] : vector<2x256xf32> to vector<256xf32>
    %39 = vector.shape_cast %38 : vector<256xf32> to vector<1x256xf32>
    %40 = arith.addf %32, %39 : vector<1x256xf32>
    %41 = arith.mulf %37, %37 : vector<2x256xf32>
    %cst_14 = arith.constant dense<0.000000e+00> : vector<256xf32>
    %42 = vector.multi_reduction <add>, %41, %cst_14 [0] : vector<2x256xf32> to vector<256xf32>
    %43 = vector.shape_cast %42 : vector<256xf32> to vector<1x256xf32>
    %44 = arith.addf %36, %43 : vector<1x256xf32>
    %45 = vector.extract_strided_slice %2 {offsets = [0, 1280], sizes = [2, 256], strides = [1, 1]} : vector<2x4096xf32> to vector<2x256xf32>
    %cst_15 = arith.constant dense<0.000000e+00> : vector<256xf32>
    %46 = vector.multi_reduction <add>, %45, %cst_15 [0] : vector<2x256xf32> to vector<256xf32>
    %47 = vector.shape_cast %46 : vector<256xf32> to vector<1x256xf32>
    %48 = arith.addf %40, %47 : vector<1x256xf32>
    %49 = arith.mulf %45, %45 : vector<2x256xf32>
    %cst_16 = arith.constant dense<0.000000e+00> : vector<256xf32>
    %50 = vector.multi_reduction <add>, %49, %cst_16 [0] : vector<2x256xf32> to vector<256xf32>
    %51 = vector.shape_cast %50 : vector<256xf32> to vector<1x256xf32>
    %52 = arith.addf %44, %51 : vector<1x256xf32>
    %53 = vector.extract_strided_slice %2 {offsets = [0, 1536], sizes = [2, 256], strides = [1, 1]} : vector<2x4096xf32> to vector<2x256xf32>
    %cst_17 = arith.constant dense<0.000000e+00> : vector<256xf32>
    %54 = vector.multi_reduction <add>, %53, %cst_17 [0] : vector<2x256xf32> to vector<256xf32>
    %55 = vector.shape_cast %54 : vector<256xf32> to vector<1x256xf32>
    %56 = arith.addf %48, %55 : vector<1x256xf32>
    %57 = arith.mulf %53, %53 : vector<2x256xf32>
    %cst_18 = arith.constant dense<0.000000e+00> : vector<256xf32>
    %58 = vector.multi_reduction <add>, %57, %cst_18 [0] : vector<2x256xf32> to vector<256xf32>
    %59 = vector.shape_cast %58 : vector<256xf32> to vector<1x256xf32>
    %60 = arith.addf %52, %59 : vector<1x256xf32>
    %61 = vector.extract_strided_slice %2 {offsets = [0, 1792], sizes = [2, 256], strides = [1, 1]} : vector<2x4096xf32> to vector<2x256xf32>
    %cst_19 = arith.constant dense<0.000000e+00> : vector<256xf32>
    %62 = vector.multi_reduction <add>, %61, %cst_19 [0] : vector<2x256xf32> to vector<256xf32>
    %63 = vector.shape_cast %62 : vector<256xf32> to vector<1x256xf32>
    %64 = arith.addf %56, %63 : vector<1x256xf32>
    %65 = arith.mulf %61, %61 : vector<2x256xf32>
    %cst_20 = arith.constant dense<0.000000e+00> : vector<256xf32>
    %66 = vector.multi_reduction <add>, %65, %cst_20 [0] : vector<2x256xf32> to vector<256xf32>
    %67 = vector.shape_cast %66 : vector<256xf32> to vector<1x256xf32>
    %68 = arith.addf %60, %67 : vector<1x256xf32>
    %69 = vector.extract_strided_slice %2 {offsets = [0, 2048], sizes = [2, 256], strides = [1, 1]} : vector<2x4096xf32> to vector<2x256xf32>
    %cst_21 = arith.constant dense<0.000000e+00> : vector<256xf32>
    %70 = vector.multi_reduction <add>, %69, %cst_21 [0] : vector<2x256xf32> to vector<256xf32>
    %71 = vector.shape_cast %70 : vector<256xf32> to vector<1x256xf32>
    %72 = arith.addf %64, %71 : vector<1x256xf32>
    %73 = arith.mulf %69, %69 : vector<2x256xf32>
    %cst_22 = arith.constant dense<0.000000e+00> : vector<256xf32>
    %74 = vector.multi_reduction <add>, %73, %cst_22 [0] : vector<2x256xf32> to vector<256xf32>
    %75 = vector.shape_cast %74 : vector<256xf32> to vector<1x256xf32>
    %76 = arith.addf %68, %75 : vector<1x256xf32>
    %77 = vector.extract_strided_slice %2 {offsets = [0, 2304], sizes = [2, 256], strides = [1, 1]} : vector<2x4096xf32> to vector<2x256xf32>
    %cst_23 = arith.constant dense<0.000000e+00> : vector<256xf32>
    %78 = vector.multi_reduction <add>, %77, %cst_23 [0] : vector<2x256xf32> to vector<256xf32>
    %79 = vector.shape_cast %78 : vector<256xf32> to vector<1x256xf32>
    %80 = arith.addf %72, %79 : vector<1x256xf32>
    %81 = arith.mulf %77, %77 : vector<2x256xf32>
    %cst_24 = arith.constant dense<0.000000e+00> : vector<256xf32>
    %82 = vector.multi_reduction <add>, %81, %cst_24 [0] : vector<2x256xf32> to vector<256xf32>
    %83 = vector.shape_cast %82 : vector<256xf32> to vector<1x256xf32>
    %84 = arith.addf %76, %83 : vector<1x256xf32>
    %85 = vector.extract_strided_slice %2 {offsets = [0, 2560], sizes = [2, 256], strides = [1, 1]} : vector<2x4096xf32> to vector<2x256xf32>
    %cst_25 = arith.constant dense<0.000000e+00> : vector<256xf32>
    %86 = vector.multi_reduction <add>, %85, %cst_25 [0] : vector<2x256xf32> to vector<256xf32>
    %87 = vector.shape_cast %86 : vector<256xf32> to vector<1x256xf32>
    %88 = arith.addf %80, %87 : vector<1x256xf32>
    %89 = arith.mulf %85, %85 : vector<2x256xf32>
    %cst_26 = arith.constant dense<0.000000e+00> : vector<256xf32>
    %90 = vector.multi_reduction <add>, %89, %cst_26 [0] : vector<2x256xf32> to vector<256xf32>
    %91 = vector.shape_cast %90 : vector<256xf32> to vector<1x256xf32>
    %92 = arith.addf %84, %91 : vector<1x256xf32>
    %93 = vector.extract_strided_slice %2 {offsets = [0, 2816], sizes = [2, 256], strides = [1, 1]} : vector<2x4096xf32> to vector<2x256xf32>
    %cst_27 = arith.constant dense<0.000000e+00> : vector<256xf32>
    %94 = vector.multi_reduction <add>, %93, %cst_27 [0] : vector<2x256xf32> to vector<256xf32>
    %95 = vector.shape_cast %94 : vector<256xf32> to vector<1x256xf32>
    %96 = arith.addf %88, %95 : vector<1x256xf32>
    %97 = arith.mulf %93, %93 : vector<2x256xf32>
    %cst_28 = arith.constant dense<0.000000e+00> : vector<256xf32>
    %98 = vector.multi_reduction <add>, %97, %cst_28 [0] : vector<2x256xf32> to vector<256xf32>
    %99 = vector.shape_cast %98 : vector<256xf32> to vector<1x256xf32>
    %100 = arith.addf %92, %99 : vector<1x256xf32>
    %101 = vector.extract_strided_slice %2 {offsets = [0, 3072], sizes = [2, 256], strides = [1, 1]} : vector<2x4096xf32> to vector<2x256xf32>
    %cst_29 = arith.constant dense<0.000000e+00> : vector<256xf32>
    %102 = vector.multi_reduction <add>, %101, %cst_29 [0] : vector<2x256xf32> to vector<256xf32>
    %103 = vector.shape_cast %102 : vector<256xf32> to vector<1x256xf32>
    %104 = arith.addf %96, %103 : vector<1x256xf32>
    %105 = arith.mulf %101, %101 : vector<2x256xf32>
    %cst_30 = arith.constant dense<0.000000e+00> : vector<256xf32>
    %106 = vector.multi_reduction <add>, %105, %cst_30 [0] : vector<2x256xf32> to vector<256xf32>
    %107 = vector.shape_cast %106 : vector<256xf32> to vector<1x256xf32>
    %108 = arith.addf %100, %107 : vector<1x256xf32>
    %109 = vector.extract_strided_slice %2 {offsets = [0, 3328], sizes = [2, 256], strides = [1, 1]} : vector<2x4096xf32> to vector<2x256xf32>
    %cst_31 = arith.constant dense<0.000000e+00> : vector<256xf32>
    %110 = vector.multi_reduction <add>, %109, %cst_31 [0] : vector<2x256xf32> to vector<256xf32>
    %111 = vector.shape_cast %110 : vector<256xf32> to vector<1x256xf32>
    %112 = arith.addf %104, %111 : vector<1x256xf32>
    %113 = arith.mulf %109, %109 : vector<2x256xf32>
    %cst_32 = arith.constant dense<0.000000e+00> : vector<256xf32>
    %114 = vector.multi_reduction <add>, %113, %cst_32 [0] : vector<2x256xf32> to vector<256xf32>
    %115 = vector.shape_cast %114 : vector<256xf32> to vector<1x256xf32>
    %116 = arith.addf %108, %115 : vector<1x256xf32>
    %117 = vector.extract_strided_slice %2 {offsets = [0, 3584], sizes = [2, 256], strides = [1, 1]} : vector<2x4096xf32> to vector<2x256xf32>
    %cst_33 = arith.constant dense<0.000000e+00> : vector<256xf32>
    %118 = vector.multi_reduction <add>, %117, %cst_33 [0] : vector<2x256xf32> to vector<256xf32>
    %119 = vector.shape_cast %118 : vector<256xf32> to vector<1x256xf32>
    %120 = arith.addf %112, %119 : vector<1x256xf32>
    %121 = arith.mulf %117, %117 : vector<2x256xf32>
    %cst_34 = arith.constant dense<0.000000e+00> : vector<256xf32>
    %122 = vector.multi_reduction <add>, %121, %cst_34 [0] : vector<2x256xf32> to vector<256xf32>
    %123 = vector.shape_cast %122 : vector<256xf32> to vector<1x256xf32>
    %124 = arith.addf %116, %123 : vector<1x256xf32>
    %125 = vector.extract_strided_slice %2 {offsets = [0, 3840], sizes = [2, 256], strides = [1, 1]} : vector<2x4096xf32> to vector<2x256xf32>
    %cst_35 = arith.constant dense<0.000000e+00> : vector<256xf32>
    %126 = vector.multi_reduction <add>, %125, %cst_35 [0] : vector<2x256xf32> to vector<256xf32>
    %127 = vector.shape_cast %126 : vector<256xf32> to vector<1x256xf32>
    %128 = arith.addf %120, %127 : vector<1x256xf32>
    %129 = arith.mulf %125, %125 : vector<2x256xf32>
    %cst_36 = arith.constant dense<0.000000e+00> : vector<256xf32>
    %130 = vector.multi_reduction <add>, %129, %cst_36 [0] : vector<2x256xf32> to vector<256xf32>
    %131 = vector.shape_cast %130 : vector<256xf32> to vector<1x256xf32>
    %132 = arith.addf %124, %131 : vector<1x256xf32>
    %cst_37 = arith.constant 3.125000e-02 : f32
    %133 = vector.broadcast %cst_37 : f32 to vector<1x256xf32>
    %134 = arith.mulf %128, %133 : vector<1x256xf32>
    %cst_38 = arith.constant 3.125000e-02 : f32
    %135 = vector.broadcast %cst_38 : f32 to vector<1x256xf32>
    %136 = arith.mulf %132, %135 : vector<1x256xf32>
    %137 = arith.mulf %134, %134 : vector<1x256xf32>
    %138 = arith.subf %136, %137 : vector<1x256xf32>
    %c0_39 = arith.constant 0 : index
    %c0_40 = arith.constant 0 : index
    %139 = vector.load %arg2[%c0_39, %c0_40] : memref<1x256xf32, #tpu.memory_space<vmem>>, vector<1x256xf32>
    %cst_41 = arith.constant 9.99999974E-6 : f32
    %140 = vector.broadcast %cst_41 : f32 to vector<1x256xf32>
    %141 = arith.addf %138, %140 : vector<1x256xf32>
    %142 = math.rsqrt %141 : vector<1x256xf32>
    %143 = arith.mulf %139, %142 : vector<1x256xf32>
    %c0_42 = arith.constant 0 : index
    %c0_43 = arith.constant 0 : index
    %144 = vector.load %arg3[%c0_42, %c0_43] : memref<1x256xf32, #tpu.memory_space<vmem>>, vector<1x256xf32>
    %145 = arith.mulf %134, %143 : vector<1x256xf32>
    %146 = arith.subf %144, %145 : vector<1x256xf32>
    %147 = vector.extract_strided_slice %2 {offsets = [0, 0], sizes = [2, 256], strides = [1, 1]} : vector<2x4096xf32> to vector<2x256xf32>
    %148 = vector.broadcast %143 : vector<1x256xf32> to vector<2x256xf32>
    %149 = arith.mulf %147, %148 : vector<2x256xf32>
    %150 = vector.broadcast %146 : vector<1x256xf32> to vector<2x256xf32>
    %151 = arith.addf %149, %150 : vector<2x256xf32>
    %cst_44 = arith.constant 0.000000e+00 : f32
    %152 = vector.broadcast %cst_44 : f32 to vector<2x256xf32>
    %153 = arith.maximumf %151, %152 : vector<2x256xf32>
    %154 = arith.truncf %153 : vector<2x256xf32> to vector<2x256xbf16>
    %c0_45 = arith.constant 0 : index
    %c0_46 = arith.constant 0 : index
    %155 = vector.load %arg4[%c0_45, %c0_46] : memref<2x4096xbf16, #tpu.memory_space<vmem>>, vector<2x256xbf16>
    tpu.vector_store %arg4[%c0_45, %c0_46], %154 {strides = array<i32>} : memref<2x4096xbf16, #tpu.memory_space<vmem>>, vector<2x256xbf16>,
    %156 = vector.extract_strided_slice %2 {offsets = [0, 256], sizes = [2, 256], strides = [1, 1]} : vector<2x4096xf32> to vector<2x256xf32>
    %157 = vector.broadcast %143 : vector<1x256xf32> to vector<2x256xf32>
    %158 = arith.mulf %156, %157 : vector<2x256xf32>
    %159 = vector.broadcast %146 : vector<1x256xf32> to vector<2x256xf32>
    %160 = arith.addf %158, %159 : vector<2x256xf32>
    %cst_47 = arith.constant 0.000000e+00 : f32
    %161 = vector.broadcast %cst_47 : f32 to vector<2x256xf32>
    %162 = arith.maximumf %160, %161 : vector<2x256xf32>
    %163 = arith.truncf %162 : vector<2x256xf32> to vector<2x256xbf16>
    %c0_48 = arith.constant 0 : index
    %c256 = arith.constant 256 : index
    %164 = vector.load %arg4[%c0_48, %c256] : memref<2x4096xbf16, #tpu.memory_space<vmem>>, vector<2x256xbf16>
    tpu.vector_store %arg4[%c0_48, %c256], %163 {strides = array<i32>} : memref<2x4096xbf16, #tpu.memory_space<vmem>>, vector<2x256xbf16>,
    %165 = vector.extract_strided_slice %2 {offsets = [0, 512], sizes = [2, 256], strides = [1, 1]} : vector<2x4096xf32> to vector<2x256xf32>
    %166 = vector.broadcast %143 : vector<1x256xf32> to vector<2x256xf32>
    %167 = arith.mulf %165, %166 : vector<2x256xf32>
    %168 = vector.broadcast %146 : vector<1x256xf32> to vector<2x256xf32>
    %169 = arith.addf %167, %168 : vector<2x256xf32>
    %cst_49 = arith.constant 0.000000e+00 : f32
    %170 = vector.broadcast %cst_49 : f32 to vector<2x256xf32>
    %171 = arith.maximumf %169, %170 : vector<2x256xf32>
    %172 = arith.truncf %171 : vector<2x256xf32> to vector<2x256xbf16>
    %c0_50 = arith.constant 0 : index
    %c512 = arith.constant 512 : index
    %173 = vector.load %arg4[%c0_50, %c512] : memref<2x4096xbf16, #tpu.memory_space<vmem>>, vector<2x256xbf16>
    tpu.vector_store %arg4[%c0_50, %c512], %172 {strides = array<i32>} : memref<2x4096xbf16, #tpu.memory_space<vmem>>, vector<2x256xbf16>,
    %174 = vector.extract_strided_slice %2 {offsets = [0, 768], sizes = [2, 256], strides = [1, 1]} : vector<2x4096xf32> to vector<2x256xf32>
    %175 = vector.broadcast %143 : vector<1x256xf32> to vector<2x256xf32>
    %176 = arith.mulf %174, %175 : vector<2x256xf32>
    %177 = vector.broadcast %146 : vector<1x256xf32> to vector<2x256xf32>
    %178 = arith.addf %176, %177 : vector<2x256xf32>
    %cst_51 = arith.constant 0.000000e+00 : f32
    %179 = vector.broadcast %cst_51 : f32 to vector<2x256xf32>
    %180 = arith.maximumf %178, %179 : vector<2x256xf32>
    %181 = arith.truncf %180 : vector<2x256xf32> to vector<2x256xbf16>
    %c0_52 = arith.constant 0 : index
    %c768 = arith.constant 768 : index
    %182 = vector.load %arg4[%c0_52, %c768] : memref<2x4096xbf16, #tpu.memory_space<vmem>>, vector<2x256xbf16>
    tpu.vector_store %arg4[%c0_52, %c768], %181 {strides = array<i32>} : memref<2x4096xbf16, #tpu.memory_space<vmem>>, vector<2x256xbf16>,
    %183 = vector.extract_strided_slice %2 {offsets = [0, 1024], sizes = [2, 256], strides = [1, 1]} : vector<2x4096xf32> to vector<2x256xf32>
    %184 = vector.broadcast %143 : vector<1x256xf32> to vector<2x256xf32>
    %185 = arith.mulf %183, %184 : vector<2x256xf32>
    %186 = vector.broadcast %146 : vector<1x256xf32> to vector<2x256xf32>
    %187 = arith.addf %185, %186 : vector<2x256xf32>
    %cst_53 = arith.constant 0.000000e+00 : f32
    %188 = vector.broadcast %cst_53 : f32 to vector<2x256xf32>
    %189 = arith.maximumf %187, %188 : vector<2x256xf32>
    %190 = arith.truncf %189 : vector<2x256xf32> to vector<2x256xbf16>
    %c0_54 = arith.constant 0 : index
    %c1024 = arith.constant 1024 : index
    %191 = vector.load %arg4[%c0_54, %c1024] : memref<2x4096xbf16, #tpu.memory_space<vmem>>, vector<2x256xbf16>
    tpu.vector_store %arg4[%c0_54, %c1024], %190 {strides = array<i32>} : memref<2x4096xbf16, #tpu.memory_space<vmem>>, vector<2x256xbf16>,
    %192 = vector.extract_strided_slice %2 {offsets = [0, 1280], sizes = [2, 256], strides = [1, 1]} : vector<2x4096xf32> to vector<2x256xf32>
    %193 = vector.broadcast %143 : vector<1x256xf32> to vector<2x256xf32>
    %194 = arith.mulf %192, %193 : vector<2x256xf32>
    %195 = vector.broadcast %146 : vector<1x256xf32> to vector<2x256xf32>
    %196 = arith.addf %194, %195 : vector<2x256xf32>
    %cst_55 = arith.constant 0.000000e+00 : f32
    %197 = vector.broadcast %cst_55 : f32 to vector<2x256xf32>
    %198 = arith.maximumf %196, %197 : vector<2x256xf32>
    %199 = arith.truncf %198 : vector<2x256xf32> to vector<2x256xbf16>
    %c0_56 = arith.constant 0 : index
    %c1280 = arith.constant 1280 : index
    %200 = vector.load %arg4[%c0_56, %c1280] : memref<2x4096xbf16, #tpu.memory_space<vmem>>, vector<2x256xbf16>
    tpu.vector_store %arg4[%c0_56, %c1280], %199 {strides = array<i32>} : memref<2x4096xbf16, #tpu.memory_space<vmem>>, vector<2x256xbf16>,
    %201 = vector.extract_strided_slice %2 {offsets = [0, 1536], sizes = [2, 256], strides = [1, 1]} : vector<2x4096xf32> to vector<2x256xf32>
    %202 = vector.broadcast %143 : vector<1x256xf32> to vector<2x256xf32>
    %203 = arith.mulf %201, %202 : vector<2x256xf32>
    %204 = vector.broadcast %146 : vector<1x256xf32> to vector<2x256xf32>
    %205 = arith.addf %203, %204 : vector<2x256xf32>
    %cst_57 = arith.constant 0.000000e+00 : f32
    %206 = vector.broadcast %cst_57 : f32 to vector<2x256xf32>
    %207 = arith.maximumf %205, %206 : vector<2x256xf32>
    %208 = arith.truncf %207 : vector<2x256xf32> to vector<2x256xbf16>
    %c0_58 = arith.constant 0 : index
    %c1536 = arith.constant 1536 : index
    %209 = vector.load %arg4[%c0_58, %c1536] : memref<2x4096xbf16, #tpu.memory_space<vmem>>, vector<2x256xbf16>
    tpu.vector_store %arg4[%c0_58, %c1536], %208 {strides = array<i32>} : memref<2x4096xbf16, #tpu.memory_space<vmem>>, vector<2x256xbf16>,
    %210 = vector.extract_strided_slice %2 {offsets = [0, 1792], sizes = [2, 256], strides = [1, 1]} : vector<2x4096xf32> to vector<2x256xf32>
    %211 = vector.broadcast %143 : vector<1x256xf32> to vector<2x256xf32>
    %212 = arith.mulf %210, %211 : vector<2x256xf32>
    %213 = vector.broadcast %146 : vector<1x256xf32> to vector<2x256xf32>
    %214 = arith.addf %212, %213 : vector<2x256xf32>
    %cst_59 = arith.constant 0.000000e+00 : f32
    %215 = vector.broadcast %cst_59 : f32 to vector<2x256xf32>
    %216 = arith.maximumf %214, %215 : vector<2x256xf32>
    %217 = arith.truncf %216 : vector<2x256xf32> to vector<2x256xbf16>
    %c0_60 = arith.constant 0 : index
    %c1792 = arith.constant 1792 : index
    %218 = vector.load %arg4[%c0_60, %c1792] : memref<2x4096xbf16, #tpu.memory_space<vmem>>, vector<2x256xbf16>
    tpu.vector_store %arg4[%c0_60, %c1792], %217 {strides = array<i32>} : memref<2x4096xbf16, #tpu.memory_space<vmem>>, vector<2x256xbf16>,
    %219 = vector.extract_strided_slice %2 {offsets = [0, 2048], sizes = [2, 256], strides = [1, 1]} : vector<2x4096xf32> to vector<2x256xf32>
    %220 = vector.broadcast %143 : vector<1x256xf32> to vector<2x256xf32>
    %221 = arith.mulf %219, %220 : vector<2x256xf32>
    %222 = vector.broadcast %146 : vector<1x256xf32> to vector<2x256xf32>
    %223 = arith.addf %221, %222 : vector<2x256xf32>
    %cst_61 = arith.constant 0.000000e+00 : f32
    %224 = vector.broadcast %cst_61 : f32 to vector<2x256xf32>
    %225 = arith.maximumf %223, %224 : vector<2x256xf32>
    %226 = arith.truncf %225 : vector<2x256xf32> to vector<2x256xbf16>
    %c0_62 = arith.constant 0 : index
    %c2048 = arith.constant 2048 : index
    %227 = vector.load %arg4[%c0_62, %c2048] : memref<2x4096xbf16, #tpu.memory_space<vmem>>, vector<2x256xbf16>
    tpu.vector_store %arg4[%c0_62, %c2048], %226 {strides = array<i32>} : memref<2x4096xbf16, #tpu.memory_space<vmem>>, vector<2x256xbf16>,
    %228 = vector.extract_strided_slice %2 {offsets = [0, 2304], sizes = [2, 256], strides = [1, 1]} : vector<2x4096xf32> to vector<2x256xf32>
    %229 = vector.broadcast %143 : vector<1x256xf32> to vector<2x256xf32>
    %230 = arith.mulf %228, %229 : vector<2x256xf32>
    %231 = vector.broadcast %146 : vector<1x256xf32> to vector<2x256xf32>
    %232 = arith.addf %230, %231 : vector<2x256xf32>
    %cst_63 = arith.constant 0.000000e+00 : f32
    %233 = vector.broadcast %cst_63 : f32 to vector<2x256xf32>
    %234 = arith.maximumf %232, %233 : vector<2x256xf32>
    %235 = arith.truncf %234 : vector<2x256xf32> to vector<2x256xbf16>
    %c0_64 = arith.constant 0 : index
    %c2304 = arith.constant 2304 : index
    %236 = vector.load %arg4[%c0_64, %c2304] : memref<2x4096xbf16, #tpu.memory_space<vmem>>, vector<2x256xbf16>
    tpu.vector_store %arg4[%c0_64, %c2304], %235 {strides = array<i32>} : memref<2x4096xbf16, #tpu.memory_space<vmem>>, vector<2x256xbf16>,
    %237 = vector.extract_strided_slice %2 {offsets = [0, 2560], sizes = [2, 256], strides = [1, 1]} : vector<2x4096xf32> to vector<2x256xf32>
    %238 = vector.broadcast %143 : vector<1x256xf32> to vector<2x256xf32>
    %239 = arith.mulf %237, %238 : vector<2x256xf32>
    %240 = vector.broadcast %146 : vector<1x256xf32> to vector<2x256xf32>
    %241 = arith.addf %239, %240 : vector<2x256xf32>
    %cst_65 = arith.constant 0.000000e+00 : f32
    %242 = vector.broadcast %cst_65 : f32 to vector<2x256xf32>
    %243 = arith.maximumf %241, %242 : vector<2x256xf32>
    %244 = arith.truncf %243 : vector<2x256xf32> to vector<2x256xbf16>
    %c0_66 = arith.constant 0 : index
    %c2560 = arith.constant 2560 : index
    %245 = vector.load %arg4[%c0_66, %c2560] : memref<2x4096xbf16, #tpu.memory_space<vmem>>, vector<2x256xbf16>
    tpu.vector_store %arg4[%c0_66, %c2560], %244 {strides = array<i32>} : memref<2x4096xbf16, #tpu.memory_space<vmem>>, vector<2x256xbf16>,
    %246 = vector.extract_strided_slice %2 {offsets = [0, 2816], sizes = [2, 256], strides = [1, 1]} : vector<2x4096xf32> to vector<2x256xf32>
    %247 = vector.broadcast %143 : vector<1x256xf32> to vector<2x256xf32>
    %248 = arith.mulf %246, %247 : vector<2x256xf32>
    %249 = vector.broadcast %146 : vector<1x256xf32> to vector<2x256xf32>
    %250 = arith.addf %248, %249 : vector<2x256xf32>
    %cst_67 = arith.constant 0.000000e+00 : f32
    %251 = vector.broadcast %cst_67 : f32 to vector<2x256xf32>
    %252 = arith.maximumf %250, %251 : vector<2x256xf32>
    %253 = arith.truncf %252 : vector<2x256xf32> to vector<2x256xbf16>
    %c0_68 = arith.constant 0 : index
    %c2816 = arith.constant 2816 : index
    %254 = vector.load %arg4[%c0_68, %c2816] : memref<2x4096xbf16, #tpu.memory_space<vmem>>, vector<2x256xbf16>
    tpu.vector_store %arg4[%c0_68, %c2816], %253 {strides = array<i32>} : memref<2x4096xbf16, #tpu.memory_space<vmem>>, vector<2x256xbf16>,
    %255 = vector.extract_strided_slice %2 {offsets = [0, 3072], sizes = [2, 256], strides = [1, 1]} : vector<2x4096xf32> to vector<2x256xf32>
    %256 = vector.broadcast %143 : vector<1x256xf32> to vector<2x256xf32>
    %257 = arith.mulf %255, %256 : vector<2x256xf32>
    %258 = vector.broadcast %146 : vector<1x256xf32> to vector<2x256xf32>
    %259 = arith.addf %257, %258 : vector<2x256xf32>
    %cst_69 = arith.constant 0.000000e+00 : f32
    %260 = vector.broadcast %cst_69 : f32 to vector<2x256xf32>
    %261 = arith.maximumf %259, %260 : vector<2x256xf32>
    %262 = arith.truncf %261 : vector<2x256xf32> to vector<2x256xbf16>
    %c0_70 = arith.constant 0 : index
    %c3072 = arith.constant 3072 : index
    %263 = vector.load %arg4[%c0_70, %c3072] : memref<2x4096xbf16, #tpu.memory_space<vmem>>, vector<2x256xbf16>
    tpu.vector_store %arg4[%c0_70, %c3072], %262 {strides = array<i32>} : memref<2x4096xbf16, #tpu.memory_space<vmem>>, vector<2x256xbf16>,
    %264 = vector.extract_strided_slice %2 {offsets = [0, 3328], sizes = [2, 256], strides = [1, 1]} : vector<2x4096xf32> to vector<2x256xf32>
    %265 = vector.broadcast %143 : vector<1x256xf32> to vector<2x256xf32>
    %266 = arith.mulf %264, %265 : vector<2x256xf32>
    %267 = vector.broadcast %146 : vector<1x256xf32> to vector<2x256xf32>
    %268 = arith.addf %266, %267 : vector<2x256xf32>
    %cst_71 = arith.constant 0.000000e+00 : f32
    %269 = vector.broadcast %cst_71 : f32 to vector<2x256xf32>
    %270 = arith.maximumf %268, %269 : vector<2x256xf32>
    %271 = arith.truncf %270 : vector<2x256xf32> to vector<2x256xbf16>
    %c0_72 = arith.constant 0 : index
    %c3328 = arith.constant 3328 : index
    %272 = vector.load %arg4[%c0_72, %c3328] : memref<2x4096xbf16, #tpu.memory_space<vmem>>, vector<2x256xbf16>
    tpu.vector_store %arg4[%c0_72, %c3328], %271 {strides = array<i32>} : memref<2x4096xbf16, #tpu.memory_space<vmem>>, vector<2x256xbf16>,
    %273 = vector.extract_strided_slice %2 {offsets = [0, 3584], sizes = [2, 256], strides = [1, 1]} : vector<2x4096xf32> to vector<2x256xf32>
    %274 = vector.broadcast %143 : vector<1x256xf32> to vector<2x256xf32>
    %275 = arith.mulf %273, %274 : vector<2x256xf32>
    %276 = vector.broadcast %146 : vector<1x256xf32> to vector<2x256xf32>
    %277 = arith.addf %275, %276 : vector<2x256xf32>
    %cst_73 = arith.constant 0.000000e+00 : f32
    %278 = vector.broadcast %cst_73 : f32 to vector<2x256xf32>
    %279 = arith.maximumf %277, %278 : vector<2x256xf32>
    %280 = arith.truncf %279 : vector<2x256xf32> to vector<2x256xbf16>
    %c0_74 = arith.constant 0 : index
    %c3584 = arith.constant 3584 : index
    %281 = vector.load %arg4[%c0_74, %c3584] : memref<2x4096xbf16, #tpu.memory_space<vmem>>, vector<2x256xbf16>
    tpu.vector_store %arg4[%c0_74, %c3584], %280 {strides = array<i32>} : memref<2x4096xbf16, #tpu.memory_space<vmem>>, vector<2x256xbf16>,
    %282 = vector.extract_strided_slice %2 {offsets = [0, 3840], sizes = [2, 256], strides = [1, 1]} : vector<2x4096xf32> to vector<2x256xf32>
    %283 = vector.broadcast %143 : vector<1x256xf32> to vector<2x256xf32>
    %284 = arith.mulf %282, %283 : vector<2x256xf32>
    %285 = vector.broadcast %146 : vector<1x256xf32> to vector<2x256xf32>
    %286 = arith.addf %284, %285 : vector<2x256xf32>
    %cst_75 = arith.constant 0.000000e+00 : f32
    %287 = vector.broadcast %cst_75 : f32 to vector<2x256xf32>
    %288 = arith.maximumf %286, %287 : vector<2x256xf32>
    %289 = arith.truncf %288 : vector<2x256xf32> to vector<2x256xbf16>
    %c0_76 = arith.constant 0 : index
    %c3840 = arith.constant 3840 : index
    %290 = vector.load %arg4[%c0_76, %c3840] : memref<2x4096xbf16, #tpu.memory_space<vmem>>, vector<2x256xbf16>
    tpu.vector_store %arg4[%c0_76, %c3840], %289 {strides = array<i32>} : memref<2x4096xbf16, #tpu.memory_space<vmem>>, vector<2x256xbf16>,
    return
  }
}

module attributes {stable_mosaic.version = 11 : i64} {
  func.func @_phase_deconv_kernel(%arg0: i32, %arg1: i32, %arg2: memref<6x8x512xbf16, #tpu.memory_space<vmem>>, %arg3: memref<6x8x512xbf16, #tpu.memory_space<vmem>>, %arg4: memref<8x512x128xbf16, #tpu.memory_space<vmem>>, %arg5: memref<1x128xf32, #tpu.memory_space<vmem>>, %arg6: memref<1x128xf32, #tpu.memory_space<vmem>>, %arg7: memref<4x4x8x128xbf16, #tpu.memory_space<vmem>>) attributes {dimension_semantics = [#tpu.dimension_semantics<parallel>, #tpu.dimension_semantics<parallel>], iteration_bounds = array<i64: 1, 1>, scalar_prefetch = 0 : i64, scratch_operands = 0 : i64, tpu.core_type = #tpu.core_type<tc>, window_params = [{transform_indices = @transform_0, window_bounds = array<i64: 6, 8, 512>}, {transform_indices = @transform_1, window_bounds = array<i64: 6, 8, 512>}, {transform_indices = @transform_2, window_bounds = array<i64: 8, 512, 128>}, {transform_indices = @transform_3, window_bounds = array<i64: 1, 128>}, {transform_indices = @transform_4, window_bounds = array<i64: 1, 128>}, {transform_indices = @transform_5, window_bounds = array<i64: 4, 4, 8, 128>}]} {
    %cst = arith.constant 0.000000e+00 : f32
    %0 = vector.broadcast %cst : f32 to vector<1x128xf32>
    %cst_0 = arith.constant 0.000000e+00 : f32
    %1 = vector.broadcast %cst_0 : f32 to vector<1x128xf32>
    %cst_1 = arith.constant 0.000000e+00 : f32
    %2 = vector.broadcast %cst_1 : f32 to vector<32x128xf32>
    %c0 = arith.constant 0 : index
    %c0_2 = arith.constant 0 : index
    %c0_3 = arith.constant 0 : index
    %3 = vector.load %arg2[%c0, %c0_2, %c0_3] : memref<6x8x512xbf16, #tpu.memory_space<vmem>>, vector<4x8x512xbf16>
    %4 = vector.shape_cast %3 : vector<4x8x512xbf16> to vector<32x512xbf16>
    %c0_4 = arith.constant 0 : index
    %c0_5 = arith.constant 0 : index
    %c0_6 = arith.constant 0 : index
    %5 = vector.load %arg4[%c0_4, %c0_5, %c0_6] : memref<8x512x128xbf16, #tpu.memory_space<vmem>>, vector<1x512x128xbf16>
    %6 = vector.shape_cast %5 : vector<1x512x128xbf16> to vector<512x128xbf16>
    %cst_7 = arith.constant dense<0.000000e+00> : vector<32x128xf32>
    %7 = tpu.matmul %4, %6, %cst_7 {dimension_numbers = #tpu.dot_dimension_numbers<[1], [0], [0], [1], [0, 0, 1, 1], [], []>} : vector<32x512xbf16>, vector<512x128xbf16>, vector<32x128xf32> -> vector<32x128xf32>
    %8 = arith.addf %2, %7 : vector<32x128xf32>
    %c1 = arith.constant 1 : index
    %c0_8 = arith.constant 0 : index
    %c0_9 = arith.constant 0 : index
    %9 = vector.load %arg2[%c1, %c0_8, %c0_9] : memref<6x8x512xbf16, #tpu.memory_space<vmem>>, vector<4x8x512xbf16>
    %10 = vector.shape_cast %9 : vector<4x8x512xbf16> to vector<32x512xbf16>
    %c1_10 = arith.constant 1 : index
    %c0_11 = arith.constant 0 : index
    %c0_12 = arith.constant 0 : index
    %11 = vector.load %arg4[%c1_10, %c0_11, %c0_12] : memref<8x512x128xbf16, #tpu.memory_space<vmem>>, vector<1x512x128xbf16>
    %12 = vector.shape_cast %11 : vector<1x512x128xbf16> to vector<512x128xbf16>
    %cst_13 = arith.constant dense<0.000000e+00> : vector<32x128xf32>
    %13 = tpu.matmul %10, %12, %cst_13 {dimension_numbers = #tpu.dot_dimension_numbers<[1], [0], [0], [1], [0, 0, 1, 1], [], []>} : vector<32x512xbf16>, vector<512x128xbf16>, vector<32x128xf32> -> vector<32x128xf32>
    %14 = arith.addf %8, %13 : vector<32x128xf32>
    %cst_14 = arith.constant dense<0.000000e+00> : vector<128xf32>
    %15 = vector.multi_reduction <add>, %14, %cst_14 [0] : vector<32x128xf32> to vector<128xf32>
    %16 = vector.shape_cast %15 : vector<128xf32> to vector<1x128xf32>
    %17 = arith.addf %0, %16 : vector<1x128xf32>
    %18 = arith.mulf %14, %14 : vector<32x128xf32>
    %cst_15 = arith.constant dense<0.000000e+00> : vector<128xf32>
    %19 = vector.multi_reduction <add>, %18, %cst_15 [0] : vector<32x128xf32> to vector<128xf32>
    %20 = vector.shape_cast %19 : vector<128xf32> to vector<1x128xf32>
    %21 = arith.addf %1, %20 : vector<1x128xf32>
    %22 = vector.shape_cast %14 : vector<32x128xf32> to vector<4x8x128xf32>
    %23 = arith.truncf %22 : vector<4x8x128xf32> to vector<4x8x128xbf16>
    %c0_16 = arith.constant 0 : index
    %c0_17 = arith.constant 0 : index
    %c0_18 = arith.constant 0 : index
    %c0_19 = arith.constant 0 : index
    %24 = vector.load %arg7[%c0_16, %c0_17, %c0_18, %c0_19] : memref<4x4x8x128xbf16, #tpu.memory_space<vmem>>, vector<1x4x8x128xbf16>
    %25 = vector.shape_cast %24 : vector<1x4x8x128xbf16> to vector<4x8x128xbf16>
    %26 = vector.shape_cast %23 : vector<4x8x128xbf16> to vector<1x4x8x128xbf16>
    tpu.vector_store %arg7[%c0_16, %c0_17, %c0_18, %c0_19], %26 {strides = array<i32>} : memref<4x4x8x128xbf16, #tpu.memory_space<vmem>>, vector<1x4x8x128xbf16>,
    %cst_20 = arith.constant 0.000000e+00 : f32
    %27 = vector.broadcast %cst_20 : f32 to vector<32x128xf32>
    %c0_21 = arith.constant 0 : index
    %c0_22 = arith.constant 0 : index
    %c0_23 = arith.constant 0 : index
    %28 = vector.load %arg3[%c0_21, %c0_22, %c0_23] : memref<6x8x512xbf16, #tpu.memory_space<vmem>>, vector<4x8x512xbf16>
    %29 = vector.shape_cast %28 : vector<4x8x512xbf16> to vector<32x512xbf16>
    %c2 = arith.constant 2 : index
    %c0_24 = arith.constant 0 : index
    %c0_25 = arith.constant 0 : index
    %30 = vector.load %arg4[%c2, %c0_24, %c0_25] : memref<8x512x128xbf16, #tpu.memory_space<vmem>>, vector<1x512x128xbf16>
    %31 = vector.shape_cast %30 : vector<1x512x128xbf16> to vector<512x128xbf16>
    %cst_26 = arith.constant dense<0.000000e+00> : vector<32x128xf32>
    %32 = tpu.matmul %29, %31, %cst_26 {dimension_numbers = #tpu.dot_dimension_numbers<[1], [0], [0], [1], [0, 0, 1, 1], [], []>} : vector<32x512xbf16>, vector<512x128xbf16>, vector<32x128xf32> -> vector<32x128xf32>
    %33 = arith.addf %27, %32 : vector<32x128xf32>
    %c1_27 = arith.constant 1 : index
    %c0_28 = arith.constant 0 : index
    %c0_29 = arith.constant 0 : index
    %34 = vector.load %arg3[%c1_27, %c0_28, %c0_29] : memref<6x8x512xbf16, #tpu.memory_space<vmem>>, vector<4x8x512xbf16>
    %35 = vector.shape_cast %34 : vector<4x8x512xbf16> to vector<32x512xbf16>
    %c3 = arith.constant 3 : index
    %c0_30 = arith.constant 0 : index
    %c0_31 = arith.constant 0 : index
    %36 = vector.load %arg4[%c3, %c0_30, %c0_31] : memref<8x512x128xbf16, #tpu.memory_space<vmem>>, vector<1x512x128xbf16>
    %37 = vector.shape_cast %36 : vector<1x512x128xbf16> to vector<512x128xbf16>
    %cst_32 = arith.constant dense<0.000000e+00> : vector<32x128xf32>
    %38 = tpu.matmul %35, %37, %cst_32 {dimension_numbers = #tpu.dot_dimension_numbers<[1], [0], [0], [1], [0, 0, 1, 1], [], []>} : vector<32x512xbf16>, vector<512x128xbf16>, vector<32x128xf32> -> vector<32x128xf32>
    %39 = arith.addf %33, %38 : vector<32x128xf32>
    %cst_33 = arith.constant dense<0.000000e+00> : vector<128xf32>
    %40 = vector.multi_reduction <add>, %39, %cst_33 [0] : vector<32x128xf32> to vector<128xf32>
    %41 = vector.shape_cast %40 : vector<128xf32> to vector<1x128xf32>
    %42 = arith.addf %17, %41 : vector<1x128xf32>
    %43 = arith.mulf %39, %39 : vector<32x128xf32>
    %cst_34 = arith.constant dense<0.000000e+00> : vector<128xf32>
    %44 = vector.multi_reduction <add>, %43, %cst_34 [0] : vector<32x128xf32> to vector<128xf32>
    %45 = vector.shape_cast %44 : vector<128xf32> to vector<1x128xf32>
    %46 = arith.addf %21, %45 : vector<1x128xf32>
    %47 = vector.shape_cast %39 : vector<32x128xf32> to vector<4x8x128xf32>
    %48 = arith.truncf %47 : vector<4x8x128xf32> to vector<4x8x128xbf16>
    %c1_35 = arith.constant 1 : index
    %c0_36 = arith.constant 0 : index
    %c0_37 = arith.constant 0 : index
    %c0_38 = arith.constant 0 : index
    %49 = vector.load %arg7[%c1_35, %c0_36, %c0_37, %c0_38] : memref<4x4x8x128xbf16, #tpu.memory_space<vmem>>, vector<1x4x8x128xbf16>
    %50 = vector.shape_cast %49 : vector<1x4x8x128xbf16> to vector<4x8x128xbf16>
    %51 = vector.shape_cast %48 : vector<4x8x128xbf16> to vector<1x4x8x128xbf16>
    tpu.vector_store %arg7[%c1_35, %c0_36, %c0_37, %c0_38], %51 {strides = array<i32>} : memref<4x4x8x128xbf16, #tpu.memory_space<vmem>>, vector<1x4x8x128xbf16>,
    %cst_39 = arith.constant 0.000000e+00 : f32
    %52 = vector.broadcast %cst_39 : f32 to vector<32x128xf32>
    %c1_40 = arith.constant 1 : index
    %c0_41 = arith.constant 0 : index
    %c0_42 = arith.constant 0 : index
    %53 = vector.load %arg2[%c1_40, %c0_41, %c0_42] : memref<6x8x512xbf16, #tpu.memory_space<vmem>>, vector<4x8x512xbf16>
    %54 = vector.shape_cast %53 : vector<4x8x512xbf16> to vector<32x512xbf16>
    %c4 = arith.constant 4 : index
    %c0_43 = arith.constant 0 : index
    %c0_44 = arith.constant 0 : index
    %55 = vector.load %arg4[%c4, %c0_43, %c0_44] : memref<8x512x128xbf16, #tpu.memory_space<vmem>>, vector<1x512x128xbf16>
    %56 = vector.shape_cast %55 : vector<1x512x128xbf16> to vector<512x128xbf16>
    %cst_45 = arith.constant dense<0.000000e+00> : vector<32x128xf32>
    %57 = tpu.matmul %54, %56, %cst_45 {dimension_numbers = #tpu.dot_dimension_numbers<[1], [0], [0], [1], [0, 0, 1, 1], [], []>} : vector<32x512xbf16>, vector<512x128xbf16>, vector<32x128xf32> -> vector<32x128xf32>
    %58 = arith.addf %52, %57 : vector<32x128xf32>
    %c2_46 = arith.constant 2 : index
    %c0_47 = arith.constant 0 : index
    %c0_48 = arith.constant 0 : index
    %59 = vector.load %arg2[%c2_46, %c0_47, %c0_48] : memref<6x8x512xbf16, #tpu.memory_space<vmem>>, vector<4x8x512xbf16>
    %60 = vector.shape_cast %59 : vector<4x8x512xbf16> to vector<32x512xbf16>
    %c5 = arith.constant 5 : index
    %c0_49 = arith.constant 0 : index
    %c0_50 = arith.constant 0 : index
    %61 = vector.load %arg4[%c5, %c0_49, %c0_50] : memref<8x512x128xbf16, #tpu.memory_space<vmem>>, vector<1x512x128xbf16>
    %62 = vector.shape_cast %61 : vector<1x512x128xbf16> to vector<512x128xbf16>
    %cst_51 = arith.constant dense<0.000000e+00> : vector<32x128xf32>
    %63 = tpu.matmul %60, %62, %cst_51 {dimension_numbers = #tpu.dot_dimension_numbers<[1], [0], [0], [1], [0, 0, 1, 1], [], []>} : vector<32x512xbf16>, vector<512x128xbf16>, vector<32x128xf32> -> vector<32x128xf32>
    %64 = arith.addf %58, %63 : vector<32x128xf32>
    %cst_52 = arith.constant dense<0.000000e+00> : vector<128xf32>
    %65 = vector.multi_reduction <add>, %64, %cst_52 [0] : vector<32x128xf32> to vector<128xf32>
    %66 = vector.shape_cast %65 : vector<128xf32> to vector<1x128xf32>
    %67 = arith.addf %42, %66 : vector<1x128xf32>
    %68 = arith.mulf %64, %64 : vector<32x128xf32>
    %cst_53 = arith.constant dense<0.000000e+00> : vector<128xf32>
    %69 = vector.multi_reduction <add>, %68, %cst_53 [0] : vector<32x128xf32> to vector<128xf32>
    %70 = vector.shape_cast %69 : vector<128xf32> to vector<1x128xf32>
    %71 = arith.addf %46, %70 : vector<1x128xf32>
    %72 = vector.shape_cast %64 : vector<32x128xf32> to vector<4x8x128xf32>
    %73 = arith.truncf %72 : vector<4x8x128xf32> to vector<4x8x128xbf16>
    %c2_54 = arith.constant 2 : index
    %c0_55 = arith.constant 0 : index
    %c0_56 = arith.constant 0 : index
    %c0_57 = arith.constant 0 : index
    %74 = vector.load %arg7[%c2_54, %c0_55, %c0_56, %c0_57] : memref<4x4x8x128xbf16, #tpu.memory_space<vmem>>, vector<1x4x8x128xbf16>
    %75 = vector.shape_cast %74 : vector<1x4x8x128xbf16> to vector<4x8x128xbf16>
    %76 = vector.shape_cast %73 : vector<4x8x128xbf16> to vector<1x4x8x128xbf16>
    tpu.vector_store %arg7[%c2_54, %c0_55, %c0_56, %c0_57], %76 {strides = array<i32>} : memref<4x4x8x128xbf16, #tpu.memory_space<vmem>>, vector<1x4x8x128xbf16>,
    %cst_58 = arith.constant 0.000000e+00 : f32
    %77 = vector.broadcast %cst_58 : f32 to vector<32x128xf32>
    %c1_59 = arith.constant 1 : index
    %c0_60 = arith.constant 0 : index
    %c0_61 = arith.constant 0 : index
    %78 = vector.load %arg3[%c1_59, %c0_60, %c0_61] : memref<6x8x512xbf16, #tpu.memory_space<vmem>>, vector<4x8x512xbf16>
    %79 = vector.shape_cast %78 : vector<4x8x512xbf16> to vector<32x512xbf16>
    %c6 = arith.constant 6 : index
    %c0_62 = arith.constant 0 : index
    %c0_63 = arith.constant 0 : index
    %80 = vector.load %arg4[%c6, %c0_62, %c0_63] : memref<8x512x128xbf16, #tpu.memory_space<vmem>>, vector<1x512x128xbf16>
    %81 = vector.shape_cast %80 : vector<1x512x128xbf16> to vector<512x128xbf16>
    %cst_64 = arith.constant dense<0.000000e+00> : vector<32x128xf32>
    %82 = tpu.matmul %79, %81, %cst_64 {dimension_numbers = #tpu.dot_dimension_numbers<[1], [0], [0], [1], [0, 0, 1, 1], [], []>} : vector<32x512xbf16>, vector<512x128xbf16>, vector<32x128xf32> -> vector<32x128xf32>
    %83 = arith.addf %77, %82 : vector<32x128xf32>
    %c2_65 = arith.constant 2 : index
    %c0_66 = arith.constant 0 : index
    %c0_67 = arith.constant 0 : index
    %84 = vector.load %arg3[%c2_65, %c0_66, %c0_67] : memref<6x8x512xbf16, #tpu.memory_space<vmem>>, vector<4x8x512xbf16>
    %85 = vector.shape_cast %84 : vector<4x8x512xbf16> to vector<32x512xbf16>
    %c7 = arith.constant 7 : index
    %c0_68 = arith.constant 0 : index
    %c0_69 = arith.constant 0 : index
    %86 = vector.load %arg4[%c7, %c0_68, %c0_69] : memref<8x512x128xbf16, #tpu.memory_space<vmem>>, vector<1x512x128xbf16>
    %87 = vector.shape_cast %86 : vector<1x512x128xbf16> to vector<512x128xbf16>
    %cst_70 = arith.constant dense<0.000000e+00> : vector<32x128xf32>
    %88 = tpu.matmul %85, %87, %cst_70 {dimension_numbers = #tpu.dot_dimension_numbers<[1], [0], [0], [1], [0, 0, 1, 1], [], []>} : vector<32x512xbf16>, vector<512x128xbf16>, vector<32x128xf32> -> vector<32x128xf32>
    %89 = arith.addf %83, %88 : vector<32x128xf32>
    %cst_71 = arith.constant dense<0.000000e+00> : vector<128xf32>
    %90 = vector.multi_reduction <add>, %89, %cst_71 [0] : vector<32x128xf32> to vector<128xf32>
    %91 = vector.shape_cast %90 : vector<128xf32> to vector<1x128xf32>
    %92 = arith.addf %67, %91 : vector<1x128xf32>
    %93 = arith.mulf %89, %89 : vector<32x128xf32>
    %cst_72 = arith.constant dense<0.000000e+00> : vector<128xf32>
    %94 = vector.multi_reduction <add>, %93, %cst_72 [0] : vector<32x128xf32> to vector<128xf32>
    %95 = vector.shape_cast %94 : vector<128xf32> to vector<1x128xf32>
    %96 = arith.addf %71, %95 : vector<1x128xf32>
    %97 = vector.shape_cast %89 : vector<32x128xf32> to vector<4x8x128xf32>
    %98 = arith.truncf %97 : vector<4x8x128xf32> to vector<4x8x128xbf16>
    %c3_73 = arith.constant 3 : index
    %c0_74 = arith.constant 0 : index
    %c0_75 = arith.constant 0 : index
    %c0_76 = arith.constant 0 : index
    %99 = vector.load %arg7[%c3_73, %c0_74, %c0_75, %c0_76] : memref<4x4x8x128xbf16, #tpu.memory_space<vmem>>, vector<1x4x8x128xbf16>
    %100 = vector.shape_cast %99 : vector<1x4x8x128xbf16> to vector<4x8x128xbf16>
    %101 = vector.shape_cast %98 : vector<4x8x128xbf16> to vector<1x4x8x128xbf16>
    tpu.vector_store %arg7[%c3_73, %c0_74, %c0_75, %c0_76], %101 {strides = array<i32>} : memref<4x4x8x128xbf16, #tpu.memory_space<vmem>>, vector<1x4x8x128xbf16>,
    %cst_77 = arith.constant 7.812500e-03 : f32
    %102 = vector.broadcast %cst_77 : f32 to vector<1x128xf32>
    %103 = arith.mulf %92, %102 : vector<1x128xf32>
    %cst_78 = arith.constant 7.812500e-03 : f32
    %104 = vector.broadcast %cst_78 : f32 to vector<1x128xf32>
    %105 = arith.mulf %96, %104 : vector<1x128xf32>
    %106 = arith.mulf %103, %103 : vector<1x128xf32>
    %107 = arith.subf %105, %106 : vector<1x128xf32>
    %c0_79 = arith.constant 0 : index
    %c0_80 = arith.constant 0 : index
    %108 = vector.load %arg5[%c0_79, %c0_80] : memref<1x128xf32, #tpu.memory_space<vmem>>, vector<1x128xf32>
    %cst_81 = arith.constant 9.99999974E-6 : f32
    %109 = vector.broadcast %cst_81 : f32 to vector<1x128xf32>
    %110 = arith.addf %107, %109 : vector<1x128xf32>
    %111 = math.rsqrt %110 : vector<1x128xf32>
    %112 = arith.mulf %108, %111 : vector<1x128xf32>
    %c0_82 = arith.constant 0 : index
    %c0_83 = arith.constant 0 : index
    %113 = vector.load %arg6[%c0_82, %c0_83] : memref<1x128xf32, #tpu.memory_space<vmem>>, vector<1x128xf32>
    %114 = arith.mulf %103, %112 : vector<1x128xf32>
    %115 = arith.subf %113, %114 : vector<1x128xf32>
    %c0_84 = arith.constant 0 : index
    %c0_85 = arith.constant 0 : index
    %c0_86 = arith.constant 0 : index
    %c0_87 = arith.constant 0 : index
    %116 = vector.load %arg7[%c0_84, %c0_85, %c0_86, %c0_87] : memref<4x4x8x128xbf16, #tpu.memory_space<vmem>>, vector<1x4x8x128xbf16>
    %117 = vector.shape_cast %116 : vector<1x4x8x128xbf16> to vector<4x8x128xbf16>
    %118 = arith.extf %117 : vector<4x8x128xbf16> to vector<4x8x128xf32>
    %119 = vector.shape_cast %112 : vector<1x128xf32> to vector<1x1x128xf32>
    %120 = vector.broadcast %119 : vector<1x1x128xf32> to vector<4x8x128xf32>
    %121 = arith.mulf %118, %120 : vector<4x8x128xf32>
    %122 = vector.shape_cast %115 : vector<1x128xf32> to vector<1x1x128xf32>
    %123 = vector.broadcast %122 : vector<1x1x128xf32> to vector<4x8x128xf32>
    %124 = arith.addf %121, %123 : vector<4x8x128xf32>
    %cst_88 = arith.constant 0.000000e+00 : f32
    %125 = vector.broadcast %cst_88 : f32 to vector<4x8x128xf32>
    %126 = arith.maximumf %124, %125 : vector<4x8x128xf32>
    %127 = arith.truncf %126 : vector<4x8x128xf32> to vector<4x8x128xbf16>
    %c0_89 = arith.constant 0 : index
    %c0_90 = arith.constant 0 : index
    %c0_91 = arith.constant 0 : index
    %c0_92 = arith.constant 0 : index
    %128 = vector.load %arg7[%c0_89, %c0_90, %c0_91, %c0_92] : memref<4x4x8x128xbf16, #tpu.memory_space<vmem>>, vector<1x4x8x128xbf16>
    %129 = vector.shape_cast %128 : vector<1x4x8x128xbf16> to vector<4x8x128xbf16>
    %130 = vector.shape_cast %127 : vector<4x8x128xbf16> to vector<1x4x8x128xbf16>
    tpu.vector_store %arg7[%c0_89, %c0_90, %c0_91, %c0_92], %130 {strides = array<i32>} : memref<4x4x8x128xbf16, #tpu.memory_space<vmem>>, vector<1x4x8x128xbf16>,
    %c1_93 = arith.constant 1 : index
    %c0_94 = arith.constant 0 : index
    %c0_95 = arith.constant 0 : index
    %c0_96 = arith.constant 0 : index
    %131 = vector.load %arg7[%c1_93, %c0_94, %c0_95, %c0_96] : memref<4x4x8x128xbf16, #tpu.memory_space<vmem>>, vector<1x4x8x128xbf16>
    %132 = vector.shape_cast %131 : vector<1x4x8x128xbf16> to vector<4x8x128xbf16>
    %133 = arith.extf %132 : vector<4x8x128xbf16> to vector<4x8x128xf32>
    %134 = vector.shape_cast %112 : vector<1x128xf32> to vector<1x1x128xf32>
    %135 = vector.broadcast %134 : vector<1x1x128xf32> to vector<4x8x128xf32>
    %136 = arith.mulf %133, %135 : vector<4x8x128xf32>
    %137 = vector.shape_cast %115 : vector<1x128xf32> to vector<1x1x128xf32>
    %138 = vector.broadcast %137 : vector<1x1x128xf32> to vector<4x8x128xf32>
    %139 = arith.addf %136, %138 : vector<4x8x128xf32>
    %cst_97 = arith.constant 0.000000e+00 : f32
    %140 = vector.broadcast %cst_97 : f32 to vector<4x8x128xf32>
    %141 = arith.maximumf %139, %140 : vector<4x8x128xf32>
    %142 = arith.truncf %141 : vector<4x8x128xf32> to vector<4x8x128xbf16>
    %c1_98 = arith.constant 1 : index
    %c0_99 = arith.constant 0 : index
    %c0_100 = arith.constant 0 : index
    %c0_101 = arith.constant 0 : index
    %143 = vector.load %arg7[%c1_98, %c0_99, %c0_100, %c0_101] : memref<4x4x8x128xbf16, #tpu.memory_space<vmem>>, vector<1x4x8x128xbf16>
    %144 = vector.shape_cast %143 : vector<1x4x8x128xbf16> to vector<4x8x128xbf16>
    %145 = vector.shape_cast %142 : vector<4x8x128xbf16> to vector<1x4x8x128xbf16>
    tpu.vector_store %arg7[%c1_98, %c0_99, %c0_100, %c0_101], %145 {strides = array<i32>} : memref<4x4x8x128xbf16, #tpu.memory_space<vmem>>, vector<1x4x8x128xbf16>,
    %c2_102 = arith.constant 2 : index
    %c0_103 = arith.constant 0 : index
    %c0_104 = arith.constant 0 : index
    %c0_105 = arith.constant 0 : index
    %146 = vector.load %arg7[%c2_102, %c0_103, %c0_104, %c0_105] : memref<4x4x8x128xbf16, #tpu.memory_space<vmem>>, vector<1x4x8x128xbf16>
    %147 = vector.shape_cast %146 : vector<1x4x8x128xbf16> to vector<4x8x128xbf16>
    %148 = arith.extf %147 : vector<4x8x128xbf16> to vector<4x8x128xf32>
    %149 = vector.shape_cast %112 : vector<1x128xf32> to vector<1x1x128xf32>
    %150 = vector.broadcast %149 : vector<1x1x128xf32> to vector<4x8x128xf32>
    %151 = arith.mulf %148, %150 : vector<4x8x128xf32>
    %152 = vector.shape_cast %115 : vector<1x128xf32> to vector<1x1x128xf32>
    %153 = vector.broadcast %152 : vector<1x1x128xf32> to vector<4x8x128xf32>
    %154 = arith.addf %151, %153 : vector<4x8x128xf32>
    %cst_106 = arith.constant 0.000000e+00 : f32
    %155 = vector.broadcast %cst_106 : f32 to vector<4x8x128xf32>
    %156 = arith.maximumf %154, %155 : vector<4x8x128xf32>
    %157 = arith.truncf %156 : vector<4x8x128xf32> to vector<4x8x128xbf16>
    %c2_107 = arith.constant 2 : index
    %c0_108 = arith.constant 0 : index
    %c0_109 = arith.constant 0 : index
    %c0_110 = arith.constant 0 : index
    %158 = vector.load %arg7[%c2_107, %c0_108, %c0_109, %c0_110] : memref<4x4x8x128xbf16, #tpu.memory_space<vmem>>, vector<1x4x8x128xbf16>
    %159 = vector.shape_cast %158 : vector<1x4x8x128xbf16> to vector<4x8x128xbf16>
    %160 = vector.shape_cast %157 : vector<4x8x128xbf16> to vector<1x4x8x128xbf16>
    tpu.vector_store %arg7[%c2_107, %c0_108, %c0_109, %c0_110], %160 {strides = array<i32>} : memref<4x4x8x128xbf16, #tpu.memory_space<vmem>>, vector<1x4x8x128xbf16>,
    %c3_111 = arith.constant 3 : index
    %c0_112 = arith.constant 0 : index
    %c0_113 = arith.constant 0 : index
    %c0_114 = arith.constant 0 : index
    %161 = vector.load %arg7[%c3_111, %c0_112, %c0_113, %c0_114] : memref<4x4x8x128xbf16, #tpu.memory_space<vmem>>, vector<1x4x8x128xbf16>
    %162 = vector.shape_cast %161 : vector<1x4x8x128xbf16> to vector<4x8x128xbf16>
    %163 = arith.extf %162 : vector<4x8x128xbf16> to vector<4x8x128xf32>
    %164 = vector.shape_cast %112 : vector<1x128xf32> to vector<1x1x128xf32>
    %165 = vector.broadcast %164 : vector<1x1x128xf32> to vector<4x8x128xf32>
    %166 = arith.mulf %163, %165 : vector<4x8x128xf32>
    %167 = vector.shape_cast %115 : vector<1x128xf32> to vector<1x1x128xf32>
    %168 = vector.broadcast %167 : vector<1x1x128xf32> to vector<4x8x128xf32>
    %169 = arith.addf %166, %168 : vector<4x8x128xf32>
    %cst_115 = arith.constant 0.000000e+00 : f32
    %170 = vector.broadcast %cst_115 : f32 to vector<4x8x128xf32>
    %171 = arith.maximumf %169, %170 : vector<4x8x128xf32>
    %172 = arith.truncf %171 : vector<4x8x128xf32> to vector<4x8x128xbf16>
    %c3_116 = arith.constant 3 : index
    %c0_117 = arith.constant 0 : index
    %c0_118 = arith.constant 0 : index
    %c0_119 = arith.constant 0 : index
    %173 = vector.load %arg7[%c3_116, %c0_117, %c0_118, %c0_119] : memref<4x4x8x128xbf16, #tpu.memory_space<vmem>>, vector<1x4x8x128xbf16>
    %174 = vector.shape_cast %173 : vector<1x4x8x128xbf16> to vector<4x8x128xbf16>
    %175 = vector.shape_cast %172 : vector<4x8x128xbf16> to vector<1x4x8x128xbf16>
    tpu.vector_store %arg7[%c3_116, %c0_117, %c0_118, %c0_119], %175 {strides = array<i32>} : memref<4x4x8x128xbf16, #tpu.memory_space<vmem>>, vector<1x4x8x128xbf16>,
    return
  }
  func.func @transform_0(%arg0: i32, %arg1: i32) -> (i32, i32, i32) {
    %c0_i32 = arith.constant 0 : i32
    %c0_i32_0 = arith.constant 0 : i32
    %c0_i32_1 = arith.constant 0 : i32
    return %c0_i32, %arg0, %c0_i32_0 : i32, i32, i32
  }
  func.func @transform_1(%arg0: i32, %arg1: i32) -> (i32, i32, i32) {
    %c0_i32 = arith.constant 0 : i32
    %c0_i32_0 = arith.constant 0 : i32
    %c0_i32_1 = arith.constant 0 : i32
    return %c0_i32, %arg0, %c0_i32_0 : i32, i32, i32
  }
  func.func @transform_2(%arg0: i32, %arg1: i32) -> (i32, i32, i32) {
    %c0_i32 = arith.constant 0 : i32
    %c0_i32_0 = arith.constant 0 : i32
    %c0_i32_1 = arith.constant 0 : i32
    return %c0_i32, %c0_i32_0, %arg1 : i32, i32, i32
  }
  func.func @transform_3(%arg0: i32, %arg1: i32) -> (i32, i32) {
    %c0_i32 = arith.constant 0 : i32
    %c0_i32_0 = arith.constant 0 : i32
    return %c0_i32, %arg1 : i32, i32
  }
  func.func @transform_4(%arg0: i32, %arg1: i32) -> (i32, i32) {
    %c0_i32 = arith.constant 0 : i32
    %c0_i32_0 = arith.constant 0 : i32
    return %c0_i32, %arg1 : i32, i32
  }
  func.func @transform_5(%arg0: i32, %arg1: i32) -> (i32, i32, i32, i32) {
    %c0_i32 = arith.constant 0 : i32
    %c0_i32_0 = arith.constant 0 : i32
    %c0_i32_1 = arith.constant 0 : i32
    return %c0_i32, %c0_i32_0, %arg0, %arg1 : i32, i32, i32, i32
  }
}

module attributes {stable_mosaic.version = 11 : i64} {
  func.func @_phase_deconv_kernel(%arg0: i32, %arg1: i32, %arg2: memref<10x16x256xbf16, #tpu.memory_space<vmem>>, %arg3: memref<10x16x256xbf16, #tpu.memory_space<vmem>>, %arg4: memref<8x256x128xbf16, #tpu.memory_space<vmem>>, %arg5: memref<1x128xf32, #tpu.memory_space<vmem>>, %arg6: memref<1x128xf32, #tpu.memory_space<vmem>>, %arg7: memref<4x8x16x128xbf16, #tpu.memory_space<vmem>>) attributes {dimension_semantics = [#tpu.dimension_semantics<parallel>, #tpu.dimension_semantics<parallel>], iteration_bounds = array<i64: 1, 1>, scalar_prefetch = 0 : i64, scratch_operands = 0 : i64, tpu.core_type = #tpu.core_type<tc>, window_params = [{transform_indices = @transform_0, window_bounds = array<i64: 10, 16, 256>}, {transform_indices = @transform_1, window_bounds = array<i64: 10, 16, 256>}, {transform_indices = @transform_2, window_bounds = array<i64: 8, 256, 128>}, {transform_indices = @transform_3, window_bounds = array<i64: 1, 128>}, {transform_indices = @transform_4, window_bounds = array<i64: 1, 128>}, {transform_indices = @transform_5, window_bounds = array<i64: 4, 8, 16, 128>}]} {
    %cst = arith.constant 0.000000e+00 : f32
    %0 = vector.broadcast %cst : f32 to vector<1x128xf32>
    %cst_0 = arith.constant 0.000000e+00 : f32
    %1 = vector.broadcast %cst_0 : f32 to vector<1x128xf32>
    %cst_1 = arith.constant 0.000000e+00 : f32
    %2 = vector.broadcast %cst_1 : f32 to vector<128x128xf32>
    %c0 = arith.constant 0 : index
    %c0_2 = arith.constant 0 : index
    %c0_3 = arith.constant 0 : index
    %3 = vector.load %arg2[%c0, %c0_2, %c0_3] : memref<10x16x256xbf16, #tpu.memory_space<vmem>>, vector<8x16x256xbf16>
    %4 = vector.shape_cast %3 : vector<8x16x256xbf16> to vector<128x256xbf16>
    %c0_4 = arith.constant 0 : index
    %c0_5 = arith.constant 0 : index
    %c0_6 = arith.constant 0 : index
    %5 = vector.load %arg4[%c0_4, %c0_5, %c0_6] : memref<8x256x128xbf16, #tpu.memory_space<vmem>>, vector<1x256x128xbf16>
    %6 = vector.shape_cast %5 : vector<1x256x128xbf16> to vector<256x128xbf16>
    %cst_7 = arith.constant dense<0.000000e+00> : vector<128x128xf32>
    %7 = tpu.matmul %4, %6, %cst_7 {dimension_numbers = #tpu.dot_dimension_numbers<[1], [0], [0], [1], [0, 0, 1, 1], [], []>} : vector<128x256xbf16>, vector<256x128xbf16>, vector<128x128xf32> -> vector<128x128xf32>
    %8 = arith.addf %2, %7 : vector<128x128xf32>
    %c1 = arith.constant 1 : index
    %c0_8 = arith.constant 0 : index
    %c0_9 = arith.constant 0 : index
    %9 = vector.load %arg2[%c1, %c0_8, %c0_9] : memref<10x16x256xbf16, #tpu.memory_space<vmem>>, vector<8x16x256xbf16>
    %10 = vector.shape_cast %9 : vector<8x16x256xbf16> to vector<128x256xbf16>
    %c1_10 = arith.constant 1 : index
    %c0_11 = arith.constant 0 : index
    %c0_12 = arith.constant 0 : index
    %11 = vector.load %arg4[%c1_10, %c0_11, %c0_12] : memref<8x256x128xbf16, #tpu.memory_space<vmem>>, vector<1x256x128xbf16>
    %12 = vector.shape_cast %11 : vector<1x256x128xbf16> to vector<256x128xbf16>
    %cst_13 = arith.constant dense<0.000000e+00> : vector<128x128xf32>
    %13 = tpu.matmul %10, %12, %cst_13 {dimension_numbers = #tpu.dot_dimension_numbers<[1], [0], [0], [1], [0, 0, 1, 1], [], []>} : vector<128x256xbf16>, vector<256x128xbf16>, vector<128x128xf32> -> vector<128x128xf32>
    %14 = arith.addf %8, %13 : vector<128x128xf32>
    %cst_14 = arith.constant dense<0.000000e+00> : vector<128xf32>
    %15 = vector.multi_reduction <add>, %14, %cst_14 [0] : vector<128x128xf32> to vector<128xf32>
    %16 = vector.shape_cast %15 : vector<128xf32> to vector<1x128xf32>
    %17 = arith.addf %0, %16 : vector<1x128xf32>
    %18 = arith.mulf %14, %14 : vector<128x128xf32>
    %cst_15 = arith.constant dense<0.000000e+00> : vector<128xf32>
    %19 = vector.multi_reduction <add>, %18, %cst_15 [0] : vector<128x128xf32> to vector<128xf32>
    %20 = vector.shape_cast %19 : vector<128xf32> to vector<1x128xf32>
    %21 = arith.addf %1, %20 : vector<1x128xf32>
    %22 = vector.shape_cast %14 : vector<128x128xf32> to vector<8x16x128xf32>
    %23 = arith.truncf %22 : vector<8x16x128xf32> to vector<8x16x128xbf16>
    %c0_16 = arith.constant 0 : index
    %c0_17 = arith.constant 0 : index
    %c0_18 = arith.constant 0 : index
    %c0_19 = arith.constant 0 : index
    %24 = vector.load %arg7[%c0_16, %c0_17, %c0_18, %c0_19] : memref<4x8x16x128xbf16, #tpu.memory_space<vmem>>, vector<1x8x16x128xbf16>
    %25 = vector.shape_cast %24 : vector<1x8x16x128xbf16> to vector<8x16x128xbf16>
    %26 = vector.shape_cast %23 : vector<8x16x128xbf16> to vector<1x8x16x128xbf16>
    tpu.vector_store %arg7[%c0_16, %c0_17, %c0_18, %c0_19], %26 {strides = array<i32>} : memref<4x8x16x128xbf16, #tpu.memory_space<vmem>>, vector<1x8x16x128xbf16>,
    %cst_20 = arith.constant 0.000000e+00 : f32
    %27 = vector.broadcast %cst_20 : f32 to vector<128x128xf32>
    %c0_21 = arith.constant 0 : index
    %c0_22 = arith.constant 0 : index
    %c0_23 = arith.constant 0 : index
    %28 = vector.load %arg3[%c0_21, %c0_22, %c0_23] : memref<10x16x256xbf16, #tpu.memory_space<vmem>>, vector<8x16x256xbf16>
    %29 = vector.shape_cast %28 : vector<8x16x256xbf16> to vector<128x256xbf16>
    %c2 = arith.constant 2 : index
    %c0_24 = arith.constant 0 : index
    %c0_25 = arith.constant 0 : index
    %30 = vector.load %arg4[%c2, %c0_24, %c0_25] : memref<8x256x128xbf16, #tpu.memory_space<vmem>>, vector<1x256x128xbf16>
    %31 = vector.shape_cast %30 : vector<1x256x128xbf16> to vector<256x128xbf16>
    %cst_26 = arith.constant dense<0.000000e+00> : vector<128x128xf32>
    %32 = tpu.matmul %29, %31, %cst_26 {dimension_numbers = #tpu.dot_dimension_numbers<[1], [0], [0], [1], [0, 0, 1, 1], [], []>} : vector<128x256xbf16>, vector<256x128xbf16>, vector<128x128xf32> -> vector<128x128xf32>
    %33 = arith.addf %27, %32 : vector<128x128xf32>
    %c1_27 = arith.constant 1 : index
    %c0_28 = arith.constant 0 : index
    %c0_29 = arith.constant 0 : index
    %34 = vector.load %arg3[%c1_27, %c0_28, %c0_29] : memref<10x16x256xbf16, #tpu.memory_space<vmem>>, vector<8x16x256xbf16>
    %35 = vector.shape_cast %34 : vector<8x16x256xbf16> to vector<128x256xbf16>
    %c3 = arith.constant 3 : index
    %c0_30 = arith.constant 0 : index
    %c0_31 = arith.constant 0 : index
    %36 = vector.load %arg4[%c3, %c0_30, %c0_31] : memref<8x256x128xbf16, #tpu.memory_space<vmem>>, vector<1x256x128xbf16>
    %37 = vector.shape_cast %36 : vector<1x256x128xbf16> to vector<256x128xbf16>
    %cst_32 = arith.constant dense<0.000000e+00> : vector<128x128xf32>
    %38 = tpu.matmul %35, %37, %cst_32 {dimension_numbers = #tpu.dot_dimension_numbers<[1], [0], [0], [1], [0, 0, 1, 1], [], []>} : vector<128x256xbf16>, vector<256x128xbf16>, vector<128x128xf32> -> vector<128x128xf32>
    %39 = arith.addf %33, %38 : vector<128x128xf32>
    %cst_33 = arith.constant dense<0.000000e+00> : vector<128xf32>
    %40 = vector.multi_reduction <add>, %39, %cst_33 [0] : vector<128x128xf32> to vector<128xf32>
    %41 = vector.shape_cast %40 : vector<128xf32> to vector<1x128xf32>
    %42 = arith.addf %17, %41 : vector<1x128xf32>
    %43 = arith.mulf %39, %39 : vector<128x128xf32>
    %cst_34 = arith.constant dense<0.000000e+00> : vector<128xf32>
    %44 = vector.multi_reduction <add>, %43, %cst_34 [0] : vector<128x128xf32> to vector<128xf32>
    %45 = vector.shape_cast %44 : vector<128xf32> to vector<1x128xf32>
    %46 = arith.addf %21, %45 : vector<1x128xf32>
    %47 = vector.shape_cast %39 : vector<128x128xf32> to vector<8x16x128xf32>
    %48 = arith.truncf %47 : vector<8x16x128xf32> to vector<8x16x128xbf16>
    %c1_35 = arith.constant 1 : index
    %c0_36 = arith.constant 0 : index
    %c0_37 = arith.constant 0 : index
    %c0_38 = arith.constant 0 : index
    %49 = vector.load %arg7[%c1_35, %c0_36, %c0_37, %c0_38] : memref<4x8x16x128xbf16, #tpu.memory_space<vmem>>, vector<1x8x16x128xbf16>
    %50 = vector.shape_cast %49 : vector<1x8x16x128xbf16> to vector<8x16x128xbf16>
    %51 = vector.shape_cast %48 : vector<8x16x128xbf16> to vector<1x8x16x128xbf16>
    tpu.vector_store %arg7[%c1_35, %c0_36, %c0_37, %c0_38], %51 {strides = array<i32>} : memref<4x8x16x128xbf16, #tpu.memory_space<vmem>>, vector<1x8x16x128xbf16>,
    %cst_39 = arith.constant 0.000000e+00 : f32
    %52 = vector.broadcast %cst_39 : f32 to vector<128x128xf32>
    %c1_40 = arith.constant 1 : index
    %c0_41 = arith.constant 0 : index
    %c0_42 = arith.constant 0 : index
    %53 = vector.load %arg2[%c1_40, %c0_41, %c0_42] : memref<10x16x256xbf16, #tpu.memory_space<vmem>>, vector<8x16x256xbf16>
    %54 = vector.shape_cast %53 : vector<8x16x256xbf16> to vector<128x256xbf16>
    %c4 = arith.constant 4 : index
    %c0_43 = arith.constant 0 : index
    %c0_44 = arith.constant 0 : index
    %55 = vector.load %arg4[%c4, %c0_43, %c0_44] : memref<8x256x128xbf16, #tpu.memory_space<vmem>>, vector<1x256x128xbf16>
    %56 = vector.shape_cast %55 : vector<1x256x128xbf16> to vector<256x128xbf16>
    %cst_45 = arith.constant dense<0.000000e+00> : vector<128x128xf32>
    %57 = tpu.matmul %54, %56, %cst_45 {dimension_numbers = #tpu.dot_dimension_numbers<[1], [0], [0], [1], [0, 0, 1, 1], [], []>} : vector<128x256xbf16>, vector<256x128xbf16>, vector<128x128xf32> -> vector<128x128xf32>
    %58 = arith.addf %52, %57 : vector<128x128xf32>
    %c2_46 = arith.constant 2 : index
    %c0_47 = arith.constant 0 : index
    %c0_48 = arith.constant 0 : index
    %59 = vector.load %arg2[%c2_46, %c0_47, %c0_48] : memref<10x16x256xbf16, #tpu.memory_space<vmem>>, vector<8x16x256xbf16>
    %60 = vector.shape_cast %59 : vector<8x16x256xbf16> to vector<128x256xbf16>
    %c5 = arith.constant 5 : index
    %c0_49 = arith.constant 0 : index
    %c0_50 = arith.constant 0 : index
    %61 = vector.load %arg4[%c5, %c0_49, %c0_50] : memref<8x256x128xbf16, #tpu.memory_space<vmem>>, vector<1x256x128xbf16>
    %62 = vector.shape_cast %61 : vector<1x256x128xbf16> to vector<256x128xbf16>
    %cst_51 = arith.constant dense<0.000000e+00> : vector<128x128xf32>
    %63 = tpu.matmul %60, %62, %cst_51 {dimension_numbers = #tpu.dot_dimension_numbers<[1], [0], [0], [1], [0, 0, 1, 1], [], []>} : vector<128x256xbf16>, vector<256x128xbf16>, vector<128x128xf32> -> vector<128x128xf32>
    %64 = arith.addf %58, %63 : vector<128x128xf32>
    %cst_52 = arith.constant dense<0.000000e+00> : vector<128xf32>
    %65 = vector.multi_reduction <add>, %64, %cst_52 [0] : vector<128x128xf32> to vector<128xf32>
    %66 = vector.shape_cast %65 : vector<128xf32> to vector<1x128xf32>
    %67 = arith.addf %42, %66 : vector<1x128xf32>
    %68 = arith.mulf %64, %64 : vector<128x128xf32>
    %cst_53 = arith.constant dense<0.000000e+00> : vector<128xf32>
    %69 = vector.multi_reduction <add>, %68, %cst_53 [0] : vector<128x128xf32> to vector<128xf32>
    %70 = vector.shape_cast %69 : vector<128xf32> to vector<1x128xf32>
    %71 = arith.addf %46, %70 : vector<1x128xf32>
    %72 = vector.shape_cast %64 : vector<128x128xf32> to vector<8x16x128xf32>
    %73 = arith.truncf %72 : vector<8x16x128xf32> to vector<8x16x128xbf16>
    %c2_54 = arith.constant 2 : index
    %c0_55 = arith.constant 0 : index
    %c0_56 = arith.constant 0 : index
    %c0_57 = arith.constant 0 : index
    %74 = vector.load %arg7[%c2_54, %c0_55, %c0_56, %c0_57] : memref<4x8x16x128xbf16, #tpu.memory_space<vmem>>, vector<1x8x16x128xbf16>
    %75 = vector.shape_cast %74 : vector<1x8x16x128xbf16> to vector<8x16x128xbf16>
    %76 = vector.shape_cast %73 : vector<8x16x128xbf16> to vector<1x8x16x128xbf16>
    tpu.vector_store %arg7[%c2_54, %c0_55, %c0_56, %c0_57], %76 {strides = array<i32>} : memref<4x8x16x128xbf16, #tpu.memory_space<vmem>>, vector<1x8x16x128xbf16>,
    %cst_58 = arith.constant 0.000000e+00 : f32
    %77 = vector.broadcast %cst_58 : f32 to vector<128x128xf32>
    %c1_59 = arith.constant 1 : index
    %c0_60 = arith.constant 0 : index
    %c0_61 = arith.constant 0 : index
    %78 = vector.load %arg3[%c1_59, %c0_60, %c0_61] : memref<10x16x256xbf16, #tpu.memory_space<vmem>>, vector<8x16x256xbf16>
    %79 = vector.shape_cast %78 : vector<8x16x256xbf16> to vector<128x256xbf16>
    %c6 = arith.constant 6 : index
    %c0_62 = arith.constant 0 : index
    %c0_63 = arith.constant 0 : index
    %80 = vector.load %arg4[%c6, %c0_62, %c0_63] : memref<8x256x128xbf16, #tpu.memory_space<vmem>>, vector<1x256x128xbf16>
    %81 = vector.shape_cast %80 : vector<1x256x128xbf16> to vector<256x128xbf16>
    %cst_64 = arith.constant dense<0.000000e+00> : vector<128x128xf32>
    %82 = tpu.matmul %79, %81, %cst_64 {dimension_numbers = #tpu.dot_dimension_numbers<[1], [0], [0], [1], [0, 0, 1, 1], [], []>} : vector<128x256xbf16>, vector<256x128xbf16>, vector<128x128xf32> -> vector<128x128xf32>
    %83 = arith.addf %77, %82 : vector<128x128xf32>
    %c2_65 = arith.constant 2 : index
    %c0_66 = arith.constant 0 : index
    %c0_67 = arith.constant 0 : index
    %84 = vector.load %arg3[%c2_65, %c0_66, %c0_67] : memref<10x16x256xbf16, #tpu.memory_space<vmem>>, vector<8x16x256xbf16>
    %85 = vector.shape_cast %84 : vector<8x16x256xbf16> to vector<128x256xbf16>
    %c7 = arith.constant 7 : index
    %c0_68 = arith.constant 0 : index
    %c0_69 = arith.constant 0 : index
    %86 = vector.load %arg4[%c7, %c0_68, %c0_69] : memref<8x256x128xbf16, #tpu.memory_space<vmem>>, vector<1x256x128xbf16>
    %87 = vector.shape_cast %86 : vector<1x256x128xbf16> to vector<256x128xbf16>
    %cst_70 = arith.constant dense<0.000000e+00> : vector<128x128xf32>
    %88 = tpu.matmul %85, %87, %cst_70 {dimension_numbers = #tpu.dot_dimension_numbers<[1], [0], [0], [1], [0, 0, 1, 1], [], []>} : vector<128x256xbf16>, vector<256x128xbf16>, vector<128x128xf32> -> vector<128x128xf32>
    %89 = arith.addf %83, %88 : vector<128x128xf32>
    %cst_71 = arith.constant dense<0.000000e+00> : vector<128xf32>
    %90 = vector.multi_reduction <add>, %89, %cst_71 [0] : vector<128x128xf32> to vector<128xf32>
    %91 = vector.shape_cast %90 : vector<128xf32> to vector<1x128xf32>
    %92 = arith.addf %67, %91 : vector<1x128xf32>
    %93 = arith.mulf %89, %89 : vector<128x128xf32>
    %cst_72 = arith.constant dense<0.000000e+00> : vector<128xf32>
    %94 = vector.multi_reduction <add>, %93, %cst_72 [0] : vector<128x128xf32> to vector<128xf32>
    %95 = vector.shape_cast %94 : vector<128xf32> to vector<1x128xf32>
    %96 = arith.addf %71, %95 : vector<1x128xf32>
    %97 = vector.shape_cast %89 : vector<128x128xf32> to vector<8x16x128xf32>
    %98 = arith.truncf %97 : vector<8x16x128xf32> to vector<8x16x128xbf16>
    %c3_73 = arith.constant 3 : index
    %c0_74 = arith.constant 0 : index
    %c0_75 = arith.constant 0 : index
    %c0_76 = arith.constant 0 : index
    %99 = vector.load %arg7[%c3_73, %c0_74, %c0_75, %c0_76] : memref<4x8x16x128xbf16, #tpu.memory_space<vmem>>, vector<1x8x16x128xbf16>
    %100 = vector.shape_cast %99 : vector<1x8x16x128xbf16> to vector<8x16x128xbf16>
    %101 = vector.shape_cast %98 : vector<8x16x128xbf16> to vector<1x8x16x128xbf16>
    tpu.vector_store %arg7[%c3_73, %c0_74, %c0_75, %c0_76], %101 {strides = array<i32>} : memref<4x8x16x128xbf16, #tpu.memory_space<vmem>>, vector<1x8x16x128xbf16>,
    %cst_77 = arith.constant 0.001953125 : f32
    %102 = vector.broadcast %cst_77 : f32 to vector<1x128xf32>
    %103 = arith.mulf %92, %102 : vector<1x128xf32>
    %cst_78 = arith.constant 0.001953125 : f32
    %104 = vector.broadcast %cst_78 : f32 to vector<1x128xf32>
    %105 = arith.mulf %96, %104 : vector<1x128xf32>
    %106 = arith.mulf %103, %103 : vector<1x128xf32>
    %107 = arith.subf %105, %106 : vector<1x128xf32>
    %c0_79 = arith.constant 0 : index
    %c0_80 = arith.constant 0 : index
    %108 = vector.load %arg5[%c0_79, %c0_80] : memref<1x128xf32, #tpu.memory_space<vmem>>, vector<1x128xf32>
    %cst_81 = arith.constant 9.99999974E-6 : f32
    %109 = vector.broadcast %cst_81 : f32 to vector<1x128xf32>
    %110 = arith.addf %107, %109 : vector<1x128xf32>
    %111 = math.rsqrt %110 : vector<1x128xf32>
    %112 = arith.mulf %108, %111 : vector<1x128xf32>
    %c0_82 = arith.constant 0 : index
    %c0_83 = arith.constant 0 : index
    %113 = vector.load %arg6[%c0_82, %c0_83] : memref<1x128xf32, #tpu.memory_space<vmem>>, vector<1x128xf32>
    %114 = arith.mulf %103, %112 : vector<1x128xf32>
    %115 = arith.subf %113, %114 : vector<1x128xf32>
    %c0_84 = arith.constant 0 : index
    %c0_85 = arith.constant 0 : index
    %c0_86 = arith.constant 0 : index
    %c0_87 = arith.constant 0 : index
    %116 = vector.load %arg7[%c0_84, %c0_85, %c0_86, %c0_87] : memref<4x8x16x128xbf16, #tpu.memory_space<vmem>>, vector<1x8x16x128xbf16>
    %117 = vector.shape_cast %116 : vector<1x8x16x128xbf16> to vector<8x16x128xbf16>
    %118 = arith.extf %117 : vector<8x16x128xbf16> to vector<8x16x128xf32>
    %119 = vector.shape_cast %112 : vector<1x128xf32> to vector<1x1x128xf32>
    %120 = vector.broadcast %119 : vector<1x1x128xf32> to vector<8x16x128xf32>
    %121 = arith.mulf %118, %120 : vector<8x16x128xf32>
    %122 = vector.shape_cast %115 : vector<1x128xf32> to vector<1x1x128xf32>
    %123 = vector.broadcast %122 : vector<1x1x128xf32> to vector<8x16x128xf32>
    %124 = arith.addf %121, %123 : vector<8x16x128xf32>
    %cst_88 = arith.constant 0.000000e+00 : f32
    %125 = vector.broadcast %cst_88 : f32 to vector<8x16x128xf32>
    %126 = arith.maximumf %124, %125 : vector<8x16x128xf32>
    %127 = arith.truncf %126 : vector<8x16x128xf32> to vector<8x16x128xbf16>
    %c0_89 = arith.constant 0 : index
    %c0_90 = arith.constant 0 : index
    %c0_91 = arith.constant 0 : index
    %c0_92 = arith.constant 0 : index
    %128 = vector.load %arg7[%c0_89, %c0_90, %c0_91, %c0_92] : memref<4x8x16x128xbf16, #tpu.memory_space<vmem>>, vector<1x8x16x128xbf16>
    %129 = vector.shape_cast %128 : vector<1x8x16x128xbf16> to vector<8x16x128xbf16>
    %130 = vector.shape_cast %127 : vector<8x16x128xbf16> to vector<1x8x16x128xbf16>
    tpu.vector_store %arg7[%c0_89, %c0_90, %c0_91, %c0_92], %130 {strides = array<i32>} : memref<4x8x16x128xbf16, #tpu.memory_space<vmem>>, vector<1x8x16x128xbf16>,
    %c1_93 = arith.constant 1 : index
    %c0_94 = arith.constant 0 : index
    %c0_95 = arith.constant 0 : index
    %c0_96 = arith.constant 0 : index
    %131 = vector.load %arg7[%c1_93, %c0_94, %c0_95, %c0_96] : memref<4x8x16x128xbf16, #tpu.memory_space<vmem>>, vector<1x8x16x128xbf16>
    %132 = vector.shape_cast %131 : vector<1x8x16x128xbf16> to vector<8x16x128xbf16>
    %133 = arith.extf %132 : vector<8x16x128xbf16> to vector<8x16x128xf32>
    %134 = vector.shape_cast %112 : vector<1x128xf32> to vector<1x1x128xf32>
    %135 = vector.broadcast %134 : vector<1x1x128xf32> to vector<8x16x128xf32>
    %136 = arith.mulf %133, %135 : vector<8x16x128xf32>
    %137 = vector.shape_cast %115 : vector<1x128xf32> to vector<1x1x128xf32>
    %138 = vector.broadcast %137 : vector<1x1x128xf32> to vector<8x16x128xf32>
    %139 = arith.addf %136, %138 : vector<8x16x128xf32>
    %cst_97 = arith.constant 0.000000e+00 : f32
    %140 = vector.broadcast %cst_97 : f32 to vector<8x16x128xf32>
    %141 = arith.maximumf %139, %140 : vector<8x16x128xf32>
    %142 = arith.truncf %141 : vector<8x16x128xf32> to vector<8x16x128xbf16>
    %c1_98 = arith.constant 1 : index
    %c0_99 = arith.constant 0 : index
    %c0_100 = arith.constant 0 : index
    %c0_101 = arith.constant 0 : index
    %143 = vector.load %arg7[%c1_98, %c0_99, %c0_100, %c0_101] : memref<4x8x16x128xbf16, #tpu.memory_space<vmem>>, vector<1x8x16x128xbf16>
    %144 = vector.shape_cast %143 : vector<1x8x16x128xbf16> to vector<8x16x128xbf16>
    %145 = vector.shape_cast %142 : vector<8x16x128xbf16> to vector<1x8x16x128xbf16>
    tpu.vector_store %arg7[%c1_98, %c0_99, %c0_100, %c0_101], %145 {strides = array<i32>} : memref<4x8x16x128xbf16, #tpu.memory_space<vmem>>, vector<1x8x16x128xbf16>,
    %c2_102 = arith.constant 2 : index
    %c0_103 = arith.constant 0 : index
    %c0_104 = arith.constant 0 : index
    %c0_105 = arith.constant 0 : index
    %146 = vector.load %arg7[%c2_102, %c0_103, %c0_104, %c0_105] : memref<4x8x16x128xbf16, #tpu.memory_space<vmem>>, vector<1x8x16x128xbf16>
    %147 = vector.shape_cast %146 : vector<1x8x16x128xbf16> to vector<8x16x128xbf16>
    %148 = arith.extf %147 : vector<8x16x128xbf16> to vector<8x16x128xf32>
    %149 = vector.shape_cast %112 : vector<1x128xf32> to vector<1x1x128xf32>
    %150 = vector.broadcast %149 : vector<1x1x128xf32> to vector<8x16x128xf32>
    %151 = arith.mulf %148, %150 : vector<8x16x128xf32>
    %152 = vector.shape_cast %115 : vector<1x128xf32> to vector<1x1x128xf32>
    %153 = vector.broadcast %152 : vector<1x1x128xf32> to vector<8x16x128xf32>
    %154 = arith.addf %151, %153 : vector<8x16x128xf32>
    %cst_106 = arith.constant 0.000000e+00 : f32
    %155 = vector.broadcast %cst_106 : f32 to vector<8x16x128xf32>
    %156 = arith.maximumf %154, %155 : vector<8x16x128xf32>
    %157 = arith.truncf %156 : vector<8x16x128xf32> to vector<8x16x128xbf16>
    %c2_107 = arith.constant 2 : index
    %c0_108 = arith.constant 0 : index
    %c0_109 = arith.constant 0 : index
    %c0_110 = arith.constant 0 : index
    %158 = vector.load %arg7[%c2_107, %c0_108, %c0_109, %c0_110] : memref<4x8x16x128xbf16, #tpu.memory_space<vmem>>, vector<1x8x16x128xbf16>
    %159 = vector.shape_cast %158 : vector<1x8x16x128xbf16> to vector<8x16x128xbf16>
    %160 = vector.shape_cast %157 : vector<8x16x128xbf16> to vector<1x8x16x128xbf16>
    tpu.vector_store %arg7[%c2_107, %c0_108, %c0_109, %c0_110], %160 {strides = array<i32>} : memref<4x8x16x128xbf16, #tpu.memory_space<vmem>>, vector<1x8x16x128xbf16>,
    %c3_111 = arith.constant 3 : index
    %c0_112 = arith.constant 0 : index
    %c0_113 = arith.constant 0 : index
    %c0_114 = arith.constant 0 : index
    %161 = vector.load %arg7[%c3_111, %c0_112, %c0_113, %c0_114] : memref<4x8x16x128xbf16, #tpu.memory_space<vmem>>, vector<1x8x16x128xbf16>
    %162 = vector.shape_cast %161 : vector<1x8x16x128xbf16> to vector<8x16x128xbf16>
    %163 = arith.extf %162 : vector<8x16x128xbf16> to vector<8x16x128xf32>
    %164 = vector.shape_cast %112 : vector<1x128xf32> to vector<1x1x128xf32>
    %165 = vector.broadcast %164 : vector<1x1x128xf32> to vector<8x16x128xf32>
    %166 = arith.mulf %163, %165 : vector<8x16x128xf32>
    %167 = vector.shape_cast %115 : vector<1x128xf32> to vector<1x1x128xf32>
    %168 = vector.broadcast %167 : vector<1x1x128xf32> to vector<8x16x128xf32>
    %169 = arith.addf %166, %168 : vector<8x16x128xf32>
    %cst_115 = arith.constant 0.000000e+00 : f32
    %170 = vector.broadcast %cst_115 : f32 to vector<8x16x128xf32>
    %171 = arith.maximumf %169, %170 : vector<8x16x128xf32>
    %172 = arith.truncf %171 : vector<8x16x128xf32> to vector<8x16x128xbf16>
    %c3_116 = arith.constant 3 : index
    %c0_117 = arith.constant 0 : index
    %c0_118 = arith.constant 0 : index
    %c0_119 = arith.constant 0 : index
    %173 = vector.load %arg7[%c3_116, %c0_117, %c0_118, %c0_119] : memref<4x8x16x128xbf16, #tpu.memory_space<vmem>>, vector<1x8x16x128xbf16>
    %174 = vector.shape_cast %173 : vector<1x8x16x128xbf16> to vector<8x16x128xbf16>
    %175 = vector.shape_cast %172 : vector<8x16x128xbf16> to vector<1x8x16x128xbf16>
    tpu.vector_store %arg7[%c3_116, %c0_117, %c0_118, %c0_119], %175 {strides = array<i32>} : memref<4x8x16x128xbf16, #tpu.memory_space<vmem>>, vector<1x8x16x128xbf16>,
    return
  }
  func.func @transform_0(%arg0: i32, %arg1: i32) -> (i32, i32, i32) {
    %c0_i32 = arith.constant 0 : i32
    %c0_i32_0 = arith.constant 0 : i32
    %c0_i32_1 = arith.constant 0 : i32
    return %c0_i32, %arg0, %c0_i32_0 : i32, i32, i32
  }
  func.func @transform_1(%arg0: i32, %arg1: i32) -> (i32, i32, i32) {
    %c0_i32 = arith.constant 0 : i32
    %c0_i32_0 = arith.constant 0 : i32
    %c0_i32_1 = arith.constant 0 : i32
    return %c0_i32, %arg0, %c0_i32_0 : i32, i32, i32
  }
  func.func @transform_2(%arg0: i32, %arg1: i32) -> (i32, i32, i32) {
    %c0_i32 = arith.constant 0 : i32
    %c0_i32_0 = arith.constant 0 : i32
    %c0_i32_1 = arith.constant 0 : i32
    return %c0_i32, %c0_i32_0, %arg1 : i32, i32, i32
  }
  func.func @transform_3(%arg0: i32, %arg1: i32) -> (i32, i32) {
    %c0_i32 = arith.constant 0 : i32
    %c0_i32_0 = arith.constant 0 : i32
    return %c0_i32, %arg1 : i32, i32
  }
  func.func @transform_4(%arg0: i32, %arg1: i32) -> (i32, i32) {
    %c0_i32 = arith.constant 0 : i32
    %c0_i32_0 = arith.constant 0 : i32
    return %c0_i32, %arg1 : i32, i32
  }
  func.func @transform_5(%arg0: i32, %arg1: i32) -> (i32, i32, i32, i32) {
    %c0_i32 = arith.constant 0 : i32
    %c0_i32_0 = arith.constant 0 : i32
    %c0_i32_1 = arith.constant 0 : i32
    return %c0_i32, %c0_i32_0, %arg0, %arg1 : i32, i32, i32, i32
  }
}

module attributes {stable_mosaic.version = 11 : i64} {
  func.func @_phase_deconv_kernel(%arg0: i32, %arg1: i32, %arg2: memref<18x16x128xbf16, #tpu.memory_space<vmem>>, %arg3: memref<18x16x128xbf16, #tpu.memory_space<vmem>>, %arg4: memref<8x128x128xbf16, #tpu.memory_space<vmem>>, %arg5: memref<4x16x16x128xf32, #tpu.memory_space<vmem>>) attributes {dimension_semantics = [#tpu.dimension_semantics<parallel>, #tpu.dimension_semantics<parallel>], iteration_bounds = array<i64: 2, 1>, scalar_prefetch = 0 : i64, scratch_operands = 0 : i64, tpu.core_type = #tpu.core_type<tc>, window_params = [{transform_indices = @transform_0, window_bounds = array<i64: 18, 16, 128>}, {transform_indices = @transform_1, window_bounds = array<i64: 18, 16, 128>}, {transform_indices = @transform_2, window_bounds = array<i64: 8, 128, 128>}, {transform_indices = @transform_3, window_bounds = array<i64: 4, 16, 16, 128>}]} {
    %cst = arith.constant 0.000000e+00 : f32
    %0 = vector.broadcast %cst : f32 to vector<256x128xf32>
    %c0 = arith.constant 0 : index
    %c0_0 = arith.constant 0 : index
    %c0_1 = arith.constant 0 : index
    %1 = vector.load %arg2[%c0, %c0_0, %c0_1] : memref<18x16x128xbf16, #tpu.memory_space<vmem>>, vector<16x16x128xbf16>
    %2 = vector.shape_cast %1 : vector<16x16x128xbf16> to vector<256x128xbf16>
    %c0_2 = arith.constant 0 : index
    %c0_3 = arith.constant 0 : index
    %c0_4 = arith.constant 0 : index
    %3 = vector.load %arg4[%c0_2, %c0_3, %c0_4] : memref<8x128x128xbf16, #tpu.memory_space<vmem>>, vector<1x128x128xbf16>
    %4 = vector.shape_cast %3 : vector<1x128x128xbf16> to vector<128x128xbf16>
    %cst_5 = arith.constant dense<0.000000e+00> : vector<256x128xf32>
    %5 = tpu.matmul %2, %4, %cst_5 {dimension_numbers = #tpu.dot_dimension_numbers<[1], [0], [0], [1], [0, 0, 1, 1], [], []>} : vector<256x128xbf16>, vector<128x128xbf16>, vector<256x128xf32> -> vector<256x128xf32>
    %6 = arith.addf %0, %5 : vector<256x128xf32>
    %c1 = arith.constant 1 : index
    %c0_6 = arith.constant 0 : index
    %c0_7 = arith.constant 0 : index
    %7 = vector.load %arg2[%c1, %c0_6, %c0_7] : memref<18x16x128xbf16, #tpu.memory_space<vmem>>, vector<16x16x128xbf16>
    %8 = vector.shape_cast %7 : vector<16x16x128xbf16> to vector<256x128xbf16>
    %c1_8 = arith.constant 1 : index
    %c0_9 = arith.constant 0 : index
    %c0_10 = arith.constant 0 : index
    %9 = vector.load %arg4[%c1_8, %c0_9, %c0_10] : memref<8x128x128xbf16, #tpu.memory_space<vmem>>, vector<1x128x128xbf16>
    %10 = vector.shape_cast %9 : vector<1x128x128xbf16> to vector<128x128xbf16>
    %cst_11 = arith.constant dense<0.000000e+00> : vector<256x128xf32>
    %11 = tpu.matmul %8, %10, %cst_11 {dimension_numbers = #tpu.dot_dimension_numbers<[1], [0], [0], [1], [0, 0, 1, 1], [], []>} : vector<256x128xbf16>, vector<128x128xbf16>, vector<256x128xf32> -> vector<256x128xf32>
    %12 = arith.addf %6, %11 : vector<256x128xf32>
    %13 = vector.shape_cast %12 : vector<256x128xf32> to vector<16x16x128xf32>
    %c0_12 = arith.constant 0 : index
    %c0_13 = arith.constant 0 : index
    %c0_14 = arith.constant 0 : index
    %c0_15 = arith.constant 0 : index
    %14 = vector.load %arg5[%c0_12, %c0_13, %c0_14, %c0_15] : memref<4x16x16x128xf32, #tpu.memory_space<vmem>>, vector<1x16x16x128xf32>
    %15 = vector.shape_cast %14 : vector<1x16x16x128xf32> to vector<16x16x128xf32>
    %16 = vector.shape_cast %13 : vector<16x16x128xf32> to vector<1x16x16x128xf32>
    tpu.vector_store %arg5[%c0_12, %c0_13, %c0_14, %c0_15], %16 {strides = array<i32>} : memref<4x16x16x128xf32, #tpu.memory_space<vmem>>, vector<1x16x16x128xf32>,
    %cst_16 = arith.constant 0.000000e+00 : f32
    %17 = vector.broadcast %cst_16 : f32 to vector<256x128xf32>
    %c0_17 = arith.constant 0 : index
    %c0_18 = arith.constant 0 : index
    %c0_19 = arith.constant 0 : index
    %18 = vector.load %arg3[%c0_17, %c0_18, %c0_19] : memref<18x16x128xbf16, #tpu.memory_space<vmem>>, vector<16x16x128xbf16>
    %19 = vector.shape_cast %18 : vector<16x16x128xbf16> to vector<256x128xbf16>
    %c2 = arith.constant 2 : index
    %c0_20 = arith.constant 0 : index
    %c0_21 = arith.constant 0 : index
    %20 = vector.load %arg4[%c2, %c0_20, %c0_21] : memref<8x128x128xbf16, #tpu.memory_space<vmem>>, vector<1x128x128xbf16>
    %21 = vector.shape_cast %20 : vector<1x128x128xbf16> to vector<128x128xbf16>
    %cst_22 = arith.constant dense<0.000000e+00> : vector<256x128xf32>
    %22 = tpu.matmul %19, %21, %cst_22 {dimension_numbers = #tpu.dot_dimension_numbers<[1], [0], [0], [1], [0, 0, 1, 1], [], []>} : vector<256x128xbf16>, vector<128x128xbf16>, vector<256x128xf32> -> vector<256x128xf32>
    %23 = arith.addf %17, %22 : vector<256x128xf32>
    %c1_23 = arith.constant 1 : index
    %c0_24 = arith.constant 0 : index
    %c0_25 = arith.constant 0 : index
    %24 = vector.load %arg3[%c1_23, %c0_24, %c0_25] : memref<18x16x128xbf16, #tpu.memory_space<vmem>>, vector<16x16x128xbf16>
    %25 = vector.shape_cast %24 : vector<16x16x128xbf16> to vector<256x128xbf16>
    %c3 = arith.constant 3 : index
    %c0_26 = arith.constant 0 : index
    %c0_27 = arith.constant 0 : index
    %26 = vector.load %arg4[%c3, %c0_26, %c0_27] : memref<8x128x128xbf16, #tpu.memory_space<vmem>>, vector<1x128x128xbf16>
    %27 = vector.shape_cast %26 : vector<1x128x128xbf16> to vector<128x128xbf16>
    %cst_28 = arith.constant dense<0.000000e+00> : vector<256x128xf32>
    %28 = tpu.matmul %25, %27, %cst_28 {dimension_numbers = #tpu.dot_dimension_numbers<[1], [0], [0], [1], [0, 0, 1, 1], [], []>} : vector<256x128xbf16>, vector<128x128xbf16>, vector<256x128xf32> -> vector<256x128xf32>
    %29 = arith.addf %23, %28 : vector<256x128xf32>
    %30 = vector.shape_cast %29 : vector<256x128xf32> to vector<16x16x128xf32>
    %c1_29 = arith.constant 1 : index
    %c0_30 = arith.constant 0 : index
    %c0_31 = arith.constant 0 : index
    %c0_32 = arith.constant 0 : index
    %31 = vector.load %arg5[%c1_29, %c0_30, %c0_31, %c0_32] : memref<4x16x16x128xf32, #tpu.memory_space<vmem>>, vector<1x16x16x128xf32>
    %32 = vector.shape_cast %31 : vector<1x16x16x128xf32> to vector<16x16x128xf32>
    %33 = vector.shape_cast %30 : vector<16x16x128xf32> to vector<1x16x16x128xf32>
    tpu.vector_store %arg5[%c1_29, %c0_30, %c0_31, %c0_32], %33 {strides = array<i32>} : memref<4x16x16x128xf32, #tpu.memory_space<vmem>>, vector<1x16x16x128xf32>,
    %cst_33 = arith.constant 0.000000e+00 : f32
    %34 = vector.broadcast %cst_33 : f32 to vector<256x128xf32>
    %c1_34 = arith.constant 1 : index
    %c0_35 = arith.constant 0 : index
    %c0_36 = arith.constant 0 : index
    %35 = vector.load %arg2[%c1_34, %c0_35, %c0_36] : memref<18x16x128xbf16, #tpu.memory_space<vmem>>, vector<16x16x128xbf16>
    %36 = vector.shape_cast %35 : vector<16x16x128xbf16> to vector<256x128xbf16>
    %c4 = arith.constant 4 : index
    %c0_37 = arith.constant 0 : index
    %c0_38 = arith.constant 0 : index
    %37 = vector.load %arg4[%c4, %c0_37, %c0_38] : memref<8x128x128xbf16, #tpu.memory_space<vmem>>, vector<1x128x128xbf16>
    %38 = vector.shape_cast %37 : vector<1x128x128xbf16> to vector<128x128xbf16>
    %cst_39 = arith.constant dense<0.000000e+00> : vector<256x128xf32>
    %39 = tpu.matmul %36, %38, %cst_39 {dimension_numbers = #tpu.dot_dimension_numbers<[1], [0], [0], [1], [0, 0, 1, 1], [], []>} : vector<256x128xbf16>, vector<128x128xbf16>, vector<256x128xf32> -> vector<256x128xf32>
    %40 = arith.addf %34, %39 : vector<256x128xf32>
    %c2_40 = arith.constant 2 : index
    %c0_41 = arith.constant 0 : index
    %c0_42 = arith.constant 0 : index
    %41 = vector.load %arg2[%c2_40, %c0_41, %c0_42] : memref<18x16x128xbf16, #tpu.memory_space<vmem>>, vector<16x16x128xbf16>
    %42 = vector.shape_cast %41 : vector<16x16x128xbf16> to vector<256x128xbf16>
    %c5 = arith.constant 5 : index
    %c0_43 = arith.constant 0 : index
    %c0_44 = arith.constant 0 : index
    %43 = vector.load %arg4[%c5, %c0_43, %c0_44] : memref<8x128x128xbf16, #tpu.memory_space<vmem>>, vector<1x128x128xbf16>
    %44 = vector.shape_cast %43 : vector<1x128x128xbf16> to vector<128x128xbf16>
    %cst_45 = arith.constant dense<0.000000e+00> : vector<256x128xf32>
    %45 = tpu.matmul %42, %44, %cst_45 {dimension_numbers = #tpu.dot_dimension_numbers<[1], [0], [0], [1], [0, 0, 1, 1], [], []>} : vector<256x128xbf16>, vector<128x128xbf16>, vector<256x128xf32> -> vector<256x128xf32>
    %46 = arith.addf %40, %45 : vector<256x128xf32>
    %47 = vector.shape_cast %46 : vector<256x128xf32> to vector<16x16x128xf32>
    %c2_46 = arith.constant 2 : index
    %c0_47 = arith.constant 0 : index
    %c0_48 = arith.constant 0 : index
    %c0_49 = arith.constant 0 : index
    %48 = vector.load %arg5[%c2_46, %c0_47, %c0_48, %c0_49] : memref<4x16x16x128xf32, #tpu.memory_space<vmem>>, vector<1x16x16x128xf32>
    %49 = vector.shape_cast %48 : vector<1x16x16x128xf32> to vector<16x16x128xf32>
    %50 = vector.shape_cast %47 : vector<16x16x128xf32> to vector<1x16x16x128xf32>
    tpu.vector_store %arg5[%c2_46, %c0_47, %c0_48, %c0_49], %50 {strides = array<i32>} : memref<4x16x16x128xf32, #tpu.memory_space<vmem>>, vector<1x16x16x128xf32>,
    %cst_50 = arith.constant 0.000000e+00 : f32
    %51 = vector.broadcast %cst_50 : f32 to vector<256x128xf32>
    %c1_51 = arith.constant 1 : index
    %c0_52 = arith.constant 0 : index
    %c0_53 = arith.constant 0 : index
    %52 = vector.load %arg3[%c1_51, %c0_52, %c0_53] : memref<18x16x128xbf16, #tpu.memory_space<vmem>>, vector<16x16x128xbf16>
    %53 = vector.shape_cast %52 : vector<16x16x128xbf16> to vector<256x128xbf16>
    %c6 = arith.constant 6 : index
    %c0_54 = arith.constant 0 : index
    %c0_55 = arith.constant 0 : index
    %54 = vector.load %arg4[%c6, %c0_54, %c0_55] : memref<8x128x128xbf16, #tpu.memory_space<vmem>>, vector<1x128x128xbf16>
    %55 = vector.shape_cast %54 : vector<1x128x128xbf16> to vector<128x128xbf16>
    %cst_56 = arith.constant dense<0.000000e+00> : vector<256x128xf32>
    %56 = tpu.matmul %53, %55, %cst_56 {dimension_numbers = #tpu.dot_dimension_numbers<[1], [0], [0], [1], [0, 0, 1, 1], [], []>} : vector<256x128xbf16>, vector<128x128xbf16>, vector<256x128xf32> -> vector<256x128xf32>
    %57 = arith.addf %51, %56 : vector<256x128xf32>
    %c2_57 = arith.constant 2 : index
    %c0_58 = arith.constant 0 : index
    %c0_59 = arith.constant 0 : index
    %58 = vector.load %arg3[%c2_57, %c0_58, %c0_59] : memref<18x16x128xbf16, #tpu.memory_space<vmem>>, vector<16x16x128xbf16>
    %59 = vector.shape_cast %58 : vector<16x16x128xbf16> to vector<256x128xbf16>
    %c7 = arith.constant 7 : index
    %c0_60 = arith.constant 0 : index
    %c0_61 = arith.constant 0 : index
    %60 = vector.load %arg4[%c7, %c0_60, %c0_61] : memref<8x128x128xbf16, #tpu.memory_space<vmem>>, vector<1x128x128xbf16>
    %61 = vector.shape_cast %60 : vector<1x128x128xbf16> to vector<128x128xbf16>
    %cst_62 = arith.constant dense<0.000000e+00> : vector<256x128xf32>
    %62 = tpu.matmul %59, %61, %cst_62 {dimension_numbers = #tpu.dot_dimension_numbers<[1], [0], [0], [1], [0, 0, 1, 1], [], []>} : vector<256x128xbf16>, vector<128x128xbf16>, vector<256x128xf32> -> vector<256x128xf32>
    %63 = arith.addf %57, %62 : vector<256x128xf32>
    %64 = vector.shape_cast %63 : vector<256x128xf32> to vector<16x16x128xf32>
    %c3_63 = arith.constant 3 : index
    %c0_64 = arith.constant 0 : index
    %c0_65 = arith.constant 0 : index
    %c0_66 = arith.constant 0 : index
    %65 = vector.load %arg5[%c3_63, %c0_64, %c0_65, %c0_66] : memref<4x16x16x128xf32, #tpu.memory_space<vmem>>, vector<1x16x16x128xf32>
    %66 = vector.shape_cast %65 : vector<1x16x16x128xf32> to vector<16x16x128xf32>
    %67 = vector.shape_cast %64 : vector<16x16x128xf32> to vector<1x16x16x128xf32>
    tpu.vector_store %arg5[%c3_63, %c0_64, %c0_65, %c0_66], %67 {strides = array<i32>} : memref<4x16x16x128xf32, #tpu.memory_space<vmem>>, vector<1x16x16x128xf32>,
    return
  }
  func.func @transform_0(%arg0: i32, %arg1: i32) -> (i32, i32, i32) {
    %c0_i32 = arith.constant 0 : i32
    %c0_i32_0 = arith.constant 0 : i32
    %c0_i32_1 = arith.constant 0 : i32
    return %c0_i32, %arg0, %c0_i32_0 : i32, i32, i32
  }
  func.func @transform_1(%arg0: i32, %arg1: i32) -> (i32, i32, i32) {
    %c0_i32 = arith.constant 0 : i32
    %c0_i32_0 = arith.constant 0 : i32
    %c0_i32_1 = arith.constant 0 : i32
    return %c0_i32, %arg0, %c0_i32_0 : i32, i32, i32
  }
  func.func @transform_2(%arg0: i32, %arg1: i32) -> (i32, i32, i32) {
    %c0_i32 = arith.constant 0 : i32
    %c0_i32_0 = arith.constant 0 : i32
    %c0_i32_1 = arith.constant 0 : i32
    return %c0_i32, %c0_i32_0, %arg1 : i32, i32, i32
  }
  func.func @transform_3(%arg0: i32, %arg1: i32) -> (i32, i32, i32, i32) {
    %c0_i32 = arith.constant 0 : i32
    %c0_i32_0 = arith.constant 0 : i32
    %c0_i32_1 = arith.constant 0 : i32
    return %c0_i32, %c0_i32_0, %arg0, %arg1 : i32, i32, i32, i32
  }
}

</mosaic_0001>

<bundles_post_ra>
// kernel: generator_forward.4
= control target key start
LH: loop header
LB: loop body
LE: loop exit
PB: predicated region body
PF: predicated region fallthrough
CT: control target
= control target key end

     0   :  { %9 = vsyncpa [#allocation3], 0  ;;  %s3603_s15 = smov [#allocation2]   ;;  %s4140_s0 = inlined_call_operand.vmem [shape: bf16[2,128], index: 0, kind: input, shape index: {}]   ;;  %s4141_s1 = inlined_call_operand.hbm [shape: bf16[128,4096], index: 1, kind: input, shape index: {}]   ;;  %s4142_s2 = inlined_call_operand.vmem [shape: f32[1,256], index: 2, kind: input, shape index: {}]   ;;  %s4143_s3 = inlined_call_operand.vmem [shape: f32[1,256], index: 3, kind: input, shape index: {}]   ;;  %s4144_s4 = inlined_call_operand.vmem [shape: bf16[2,4096], index: 4, kind: output, shape index: {}]  }
   0x1   :  { %s17_s16 = sshll.u32 %s3603_s15, 4  ;;  %s18_s16 = int_to_ptr.vmem [resolvable:$true] %s17_s16 }
   0x2   :  { %s3589_s17 = scalar_lea.vmem %s18_s16, 32768  ;;  %p3594_p1 = scmp.lt.s32.totalorder %s18_s16, %s18_s16 }
   0x3   :  { %p3590_p0 = scmp.ne.s32.totalorder %s18_s16, %s3589_s17  ;;  %p3595_p2 = scmp.lt.s32.totalorder %s3589_s17, %s3589_s17 }
   0x5   :  { %p3596_p3 = por %p3595_p2, %p3594_p1 }
   0x7   :  { %p3597_p4 = pnand %p3596_p3, %p3590_p0 }
   0x9   :  { %3600 = shalt.err (!%p3597_p4)
}
   0xa   :  { %s3604_s18 = smov 2048   ;;  %s3605_s19 = smov 128  }
   0xb   :  { %23 = dma.hbm_to_vmem [thread:$0]  %s4141_s1, 32768, %s18_s16, [#allocation3], %s3604_s18, %s3604_s18, %s3605_s19  }
   0xc   :  { %3601 = dma.done.wait [#allocation3], 32768  }
   0xd   :  { %3602 = vsyncadd [#allocation3], 4294934528  ;;  %v3606_v0 = vmov 0   ;;  %v257_v1 = vld [vmem:[#allocation2 + $0x700] sm:$0xff]  ;;  %v258_v3 = vld [vmem:[#allocation2 + $0x708] sm:$0xff]  ;;  %vm2225_vm0 = vcmask 1041408  }
   0xe   :  { %1601 = vmatprep.mubr.bf16.mxu0 %v3606_v0  ;;  %1642 = vmatprep.mubr.bf16.mxu1 %v3606_v0  ;;  %v273_v2 = vld [vmem:[#allocation2 + $0x780] sm:$0xff]  ;;  %v274_v5 = vld [vmem:[#allocation2 + $0x788] sm:$0xff]  ;;  %v259_v63 = vld [vmem:[#allocation2 + $0x710] sm:$0xff] }
   0xf   :  { %v3508_v4 = vcombine.high %v257_v1, %v273_v2  ;;  %v3507_v6 = vcombine.low %v257_v1, %v273_v2  ;;  %v225_v7 = vld [vmem:[#allocation2 + $0x600] sm:$0xff]  ;;  %v3510_v9 = vcombine.high %v258_v3, %v274_v5  ;;  %v3509_v10 = vcombine.low %v258_v3, %v274_v5  ;;  %v226_v12 = vld [vmem:[#allocation2 + $0x608] sm:$0xff]  ;;  %v275_v1 = vld [vmem:[#allocation2 + $0x790] sm:$0xff] }
  0x10   :  { %v241_v8 = vld [vmem:[#allocation2 + $0x680] sm:$0xff]  ;;  %v242_v13 = vld [vmem:[#allocation2 + $0x688] sm:$0xff]  ;;  %v260_v2 = vld [vmem:[#allocation2 + $0x718] sm:$0xff] }
  0x11   :  { %v3476_v11 = vcombine.high %v225_v7, %v241_v8  ;;  %v193_v14 = vld [vmem:[#allocation2 + $0x500] sm:$0xff]  ;;  %1569 = vmatprep.subr.bf16.mxu0 %v3508_v4  ;;  %v3478_v15 = vcombine.high %v226_v12, %v242_v13  ;;  %v194_v17 = vld [vmem:[#allocation2 + $0x508] sm:$0xff]  ;;  %1610 = vmatprep.subr.bf16.mxu1 %v3510_v9  ;;  %v3475_v19 = vcombine.low %v225_v7, %v241_v8  ;;  %v276_v3 = vld [vmem:[#allocation2 + $0x798] sm:$0xff] }
  0x12   :  { %v209_v16 = vld [vmem:[#allocation2 + $0x580] sm:$0xff]  ;;  %v210_v18 = vld [vmem:[#allocation2 + $0x588] sm:$0xff]  ;;  %1570 = vmatpush1.bf16.msra.mxu0 %v3507_v6  ;;  %1611 = vmatpush1.bf16.msra.mxu1 %v3509_v10  ;;  %v3477_v20 = vcombine.low %v226_v12, %v242_v13  ;;  %v3512_v6 = vcombine.high %v259_v63, %v275_v1  ;;  %v3514_v7 = vcombine.high %v260_v2, %v276_v3  ;;  %v227_v8 = vld [vmem:[#allocation2 + $0x610] sm:$0xff] }
  0x13   :  { %1571 = vmatprep.subr.bf16.mxu0 %v3476_v11  ;;  %v3444_v21 = vcombine.high %v193_v14, %v209_v16  ;;  %1612 = vmatprep.subr.bf16.mxu1 %v3478_v15  ;;  %v3446_v22 = vcombine.high %v194_v17, %v210_v18  ;;  %v161_v23 = vld [vmem:[#allocation2 + $0x400] sm:$0xff]  ;;  %v162_v25 = vld [vmem:[#allocation2 + $0x408] sm:$0xff]  ;;  %v3443_v27 = vcombine.low %v193_v14, %v209_v16  ;;  %v243_v9 = vld [vmem:[#allocation2 + $0x690] sm:$0xff] }
  0x14   :  { %v177_v24 = vld [vmem:[#allocation2 + $0x480] sm:$0xff]  ;;  %v178_v26 = vld [vmem:[#allocation2 + $0x488] sm:$0xff]  ;;  %v3445_v28 = vcombine.low %v194_v17, %v210_v18  ;;  %v228_v10 = vld [vmem:[#allocation2 + $0x618] sm:$0xff]  ;;  %v3511_v13 = vcombine.low %v259_v63, %v275_v1  ;;  %v3513_v14 = vcombine.low %v260_v2, %v276_v3  ;;  %v3480_v15 = vcombine.high %v227_v8, %v243_v9 }
  0x15   :  { %v3412_v29 = vcombine.high %v161_v23, %v177_v24  ;;  %v3414_v30 = vcombine.high %v162_v25, %v178_v26  ;;  %v129_v31 = vld [vmem:[#allocation2 + $0x300] sm:$0xff]  ;;  %v130_v33 = vld [vmem:[#allocation2 + $0x308] sm:$0xff]  ;;  %v3411_v35 = vcombine.low %v161_v23, %v177_v24  ;;  %v3413_v36 = vcombine.low %v162_v25, %v178_v26  ;;  %v244_v11 = vld [vmem:[#allocation2 + $0x698] sm:$0xff] }
  0x16   :  { %1572 = vmatpush1.bf16.msra.mxu0 %v3475_v19  ;;  %1613 = vmatpush1.bf16.msra.mxu1 %v3477_v20  ;;  %v145_v32 = vld [vmem:[#allocation2 + $0x380] sm:$0xff]  ;;  %v146_v34 = vld [vmem:[#allocation2 + $0x388] sm:$0xff]  ;;  %v3482_v16 = vcombine.high %v228_v10, %v244_v11  ;;  %v195_v17 = vld [vmem:[#allocation2 + $0x510] sm:$0xff] }
  0x17   :  { %1573 = vmatprep.subr.bf16.mxu0 %v3444_v21  ;;  %1614 = vmatprep.subr.bf16.mxu1 %v3446_v22  ;;  %v3380_v37 = vcombine.high %v129_v31, %v145_v32  ;;  %v3382_v38 = vcombine.high %v130_v33, %v146_v34  ;;  %v97_v39 = vld [vmem:[#allocation2 + $0x200] sm:$0xff]  ;;  %v98_v41 = vld [vmem:[#allocation2 + $0x208] sm:$0xff]  ;;  %v3379_v43 = vcombine.low %v129_v31, %v145_v32  ;;  %v211_v18 = vld [vmem:[#allocation2 + $0x590] sm:$0xff] }
  0x18   :  { %v113_v40 = vld [vmem:[#allocation2 + $0x280] sm:$0xff]  ;;  %v114_v42 = vld [vmem:[#allocation2 + $0x288] sm:$0xff]  ;;  %v3381_v44 = vcombine.low %v130_v33, %v146_v34  ;;  %v196_v19 = vld [vmem:[#allocation2 + $0x518] sm:$0xff]  ;;  %v3479_v21 = vcombine.low %v227_v8, %v243_v9  ;;  %v3481_v22 = vcombine.low %v228_v10, %v244_v11  ;;  %v3448_v23 = vcombine.high %v195_v17, %v211_v18 }
  0x19   :  { %v3348_v45 = vcombine.high %v97_v39, %v113_v40  ;;  %v3350_v46 = vcombine.high %v98_v41, %v114_v42  ;;  %v65_v47 = vld [vmem:[#allocation2 + $0x100] sm:$0xff]  ;;  %v66_v49 = vld [vmem:[#allocation2 + $0x108] sm:$0xff]  ;;  %v3347_v51 = vcombine.low %v97_v39, %v113_v40  ;;  %v3349_v52 = vcombine.low %v98_v41, %v114_v42  ;;  %v212_v20 = vld [vmem:[#allocation2 + $0x598] sm:$0xff] }
  0x1a   :  { %1574 = vmatpush1.bf16.msra.mxu0 %v3443_v27  ;;  %1615 = vmatpush1.bf16.msra.mxu1 %v3445_v28  ;;  %v81_v48 = vld [vmem:[#allocation2 + $0x180] sm:$0xff]  ;;  %v82_v50 = vld [vmem:[#allocation2 + $0x188] sm:$0xff]  ;;  %v3450_v24 = vcombine.high %v196_v19, %v212_v20  ;;  %v163_v25 = vld [vmem:[#allocation2 + $0x410] sm:$0xff] }
  0x1b   :  { %1575 = vmatprep.subr.bf16.mxu0 %v3412_v29  ;;  %1616 = vmatprep.subr.bf16.mxu1 %v3414_v30  ;;  %v3316_v53 = vcombine.high %v65_v47, %v81_v48  ;;  %v3318_v54 = vcombine.high %v66_v49, %v82_v50  ;;  %v33_v55 = vld [vmem:[#allocation2] sm:$0xff]  ;;  %v34_v57 = vld [vmem:[#allocation2 + $0x8] sm:$0xff]  ;;  %v3315_v59 = vcombine.low %v65_v47, %v81_v48  ;;  %v179_v26 = vld [vmem:[#allocation2 + $0x490] sm:$0xff] }
  0x1c   :  { %v49_v56 = vld [vmem:[#allocation2 + $0x80] sm:$0xff]  ;;  %v50_v58 = vld [vmem:[#allocation2 + $0x88] sm:$0xff]  ;;  %v3317_v60 = vcombine.low %v66_v49, %v82_v50  ;;  %v164_v27 = vld [vmem:[#allocation2 + $0x418] sm:$0xff]  ;;  %v3447_v29 = vcombine.low %v195_v17, %v211_v18  ;;  %v3449_v30 = vcombine.low %v196_v19, %v212_v20  ;;  %v3416_v31 = vcombine.high %v163_v25, %v179_v26 }
  0x1d   :  { %v3284_v61 = vcombine.high %v33_v55, %v49_v56  ;;  %v3286_v62 = vcombine.high %v34_v57, %v50_v58  ;;  %v3283_v4 = vcombine.low %v33_v55, %v49_v56  ;;  %v3285_v5 = vcombine.low %v34_v57, %v50_v58  ;;  %v3641_v12 = vld [vmem:[%s4140_s0] sm:$0x1]  ;;  %v180_v28 = vld [vmem:[#allocation2 + $0x498] sm:$0xff]  ;;  %v131_v33 = vld [vmem:[#allocation2 + $0x310] sm:$0xff] }
  0x1e   :  { %1576 = vmatpush1.bf16.msra.mxu0 %v3411_v35  ;;  %1617 = vmatpush1.bf16.msra.mxu1 %v3413_v36  ;;  %v3418_v32 = vcombine.high %v164_v27, %v180_v28  ;;  %v147_v34 = vld [vmem:[#allocation2 + $0x390] sm:$0xff]  ;;  %v132_v35 = vld [vmem:[#allocation2 + $0x318] sm:$0xff]  ;;  %v261_v2 = vld [vmem:[#allocation2 + $0x720] sm:$0xff] }
  0x1f   :  { %1577 = vmatprep.subr.bf16.mxu0 %v3380_v37  ;;  %1618 = vmatprep.subr.bf16.mxu1 %v3382_v38  ;;  %v148_v36 = vld [vmem:[#allocation2 + $0x398] sm:$0xff]  ;;  %v3415_v37 = vcombine.low %v163_v25, %v179_v26  ;;  %v3417_v38 = vcombine.low %v164_v27, %v180_v28  ;;  %v3384_v39 = vcombine.high %v131_v33, %v147_v34  ;;  %v99_v41 = vld [vmem:[#allocation2 + $0x210] sm:$0xff]  ;;  %v277_v3 = vld [vmem:[#allocation2 + $0x7a0] sm:$0xff] }
  0x20   :  { %v3386_v40 = vcombine.high %v132_v35, %v148_v36  ;;  %v115_v42 = vld [vmem:[#allocation2 + $0x290] sm:$0xff]  ;;  %v3516_v8 = vcombine.high %v261_v2, %v277_v3  ;;  %v229_v10 = vld [vmem:[#allocation2 + $0x620] sm:$0xff] }
  0x21   :  { %v3352_v47 = vcombine.high %v99_v41, %v115_v42  ;;  %v67_v49 = vld [vmem:[#allocation2 + $0x110] sm:$0xff]  ;;  %v245_v11 = vld [vmem:[#allocation2 + $0x6a0] sm:$0xff] }
  0x22   :  { %1578 = vmatpush1.bf16.msra.mxu0 %v3379_v43  ;;  %1619 = vmatpush1.bf16.msra.mxu1 %v3381_v44  ;;  %v100_v43 = vld [vmem:[#allocation2 + $0x218] sm:$0xff]  ;;  %v83_v50 = vld [vmem:[#allocation2 + $0x190] sm:$0xff]  ;;  %v3484_v17 = vcombine.high %v229_v10, %v245_v11  ;;  %v197_v19 = vld [vmem:[#allocation2 + $0x520] sm:$0xff] }
  0x23   :  { %1579 = vmatprep.subr.bf16.mxu0 %v3348_v45  ;;  %1620 = vmatprep.subr.bf16.mxu1 %v3350_v46  ;;  %v116_v44 = vld [vmem:[#allocation2 + $0x298] sm:$0xff]  ;;  %v3383_v45 = vcombine.low %v131_v33, %v147_v34  ;;  %v3385_v46 = vcombine.low %v132_v35, %v148_v36  ;;  %v3320_v55 = vcombine.high %v67_v49, %v83_v50  ;;  %v35_v57 = vld [vmem:[#allocation2 + $0x10] sm:$0xff]  ;;  %v213_v20 = vld [vmem:[#allocation2 + $0x5a0] sm:$0xff] }
  0x24   :  { %v3354_v48 = vcombine.high %v100_v43, %v116_v44  ;;  %v51_v58 = vld [vmem:[#allocation2 + $0x90] sm:$0xff]  ;;  %v3452_v25 = vcombine.high %v197_v19, %v213_v20  ;;  %v165_v27 = vld [vmem:[#allocation2 + $0x420] sm:$0xff] }
  0x25   :  { %v3288_v63 = vcombine.high %v35_v57, %v51_v58  ;;  %v181_v28 = vld [vmem:[#allocation2 + $0x4a0] sm:$0xff] }
  0x26   :  { %1580 = vmatpush1.bf16.msra.mxu0 %v3347_v51  ;;  %1621 = vmatpush1.bf16.msra.mxu1 %v3349_v52  ;;  %v68_v51 = vld [vmem:[#allocation2 + $0x118] sm:$0xff]  ;;  %v3420_v33 = vcombine.high %v165_v27, %v181_v28  ;;  %v133_v35 = vld [vmem:[#allocation2 + $0x320] sm:$0xff] }
  0x27   :  { %1581 = vmatprep.subr.bf16.mxu0 %v3316_v53  ;;  %1622 = vmatprep.subr.bf16.mxu1 %v3318_v54  ;;  %v84_v52 = vld [vmem:[#allocation2 + $0x198] sm:$0xff]  ;;  %v3351_v53 = vcombine.low %v99_v41, %v115_v42  ;;  %v3353_v54 = vcombine.low %v100_v43, %v116_v44  ;;  %v149_v36 = vld [vmem:[#allocation2 + $0x3a0] sm:$0xff] }
  0x28   :  { %v3322_v56 = vcombine.high %v68_v51, %v84_v52  ;;  %v3388_v41 = vcombine.high %v133_v35, %v149_v36  ;;  %v101_v43 = vld [vmem:[#allocation2 + $0x220] sm:$0xff] }
  0x29   :  { %v117_v44 = vld [vmem:[#allocation2 + $0x2a0] sm:$0xff] }
  0x2a   :  { %1582 = vmatpush1.bf16.msra.mxu0 %v3315_v59  ;;  %1623 = vmatpush1.bf16.msra.mxu1 %v3317_v60  ;;  %v36_v59 = vld [vmem:[#allocation2 + $0x18] sm:$0xff] }
  0x2b   :  { %1583 = vmatprep.subr.bf16.mxu0 %v3284_v61  ;;  %1624 = vmatprep.subr.bf16.mxu1 %v3286_v62  ;;  %v52_v60 = vld [vmem:[#allocation2 + $0x98] sm:$0xff]  ;;  %v3319_v61 = vcombine.low %v67_v49, %v83_v50  ;;  %v3321_v62 = vcombine.low %v68_v51, %v84_v52  ;;  %v3356_v49 = vcombine.high %v101_v43, %v117_v44  ;;  %v69_v51 = vld [vmem:[#allocation2 + $0x120] sm:$0xff] }
  0x2c   :  { %v3290_v1 = vcombine.high %v36_v59, %v52_v60  ;;  %v85_v52 = vld [vmem:[#allocation2 + $0x1a0] sm:$0xff] }
  0x2e   :  { %1584 = vmatpush1.bf16.msra.mxu0 %v3283_v4  ;;  %1625 = vmatpush1.bf16.msra.mxu1 %v3285_v5  ;;  %v262_v4 = vld [vmem:[#allocation2 + $0x728] sm:$0xff] }
  0x2f   :  { %1651 = vmatprep.subr.bf16.mxu0 %v3512_v6  ;;  %1692 = vmatprep.subr.bf16.mxu1 %v3514_v7  ;;  %v278_v5 = vld [vmem:[#allocation2 + $0x7a8] sm:$0xff]  ;;  %v3287_v6 = vcombine.low %v35_v57, %v51_v58  ;;  %v3289_v7 = vcombine.low %v36_v59, %v52_v60  ;;  %v3324_v57 = vcombine.high %v69_v51, %v85_v52  ;;  %v37_v59 = vld [vmem:[#allocation2 + $0x20] sm:$0xff] }
  0x30   :  { %v3518_v9 = vcombine.high %v262_v4, %v278_v5  ;;  %v53_v60 = vld [vmem:[#allocation2 + $0xa0] sm:$0xff] }
  0x31   :  { %1602 = vmatmul.mubr.bf16.vlgmr.msra.gmra.mxu0 %v3641_v12  ;;  %1643 = vmatmul.mubr.bf16.vlgmr.msra.gmra.mxu1 %v3641_v12 }
  0x32   :  { %1652 = vmatpush1.bf16.msra.mxu0 %v3511_v13  ;;  %1693 = vmatpush1.bf16.msra.mxu1 %v3513_v14  ;;  %v230_v13 = vld [vmem:[#allocation2 + $0x628] sm:$0xff] }
  0x33   :  { %1653 = vmatprep.subr.bf16.mxu0 %v3480_v15  ;;  %1694 = vmatprep.subr.bf16.mxu1 %v3482_v16  ;;  %v246_v14 = vld [vmem:[#allocation2 + $0x6a8] sm:$0xff]  ;;  %v3515_v15 = vcombine.low %v261_v2, %v277_v3  ;;  %v3517_v16 = vcombine.low %v262_v4, %v278_v5  ;;  %v3292_v2 = vcombine.high %v37_v59, %v53_v60  ;;  %v263_v4 = vld [vmem:[#allocation2 + $0x730] sm:$0xff] }
  0x34   :  { %1683 = vmatprep.mubr.bf16.mxu0 %v3606_v0  ;;  %1724 = vmatprep.mubr.bf16.mxu1 %v3606_v0  ;;  %v3486_v18 = vcombine.high %v230_v13, %v246_v14  ;;  %v279_v5 = vld [vmem:[#allocation2 + $0x7b0] sm:$0xff] }
  0x36   :  { %1654 = vmatpush1.bf16.msra.mxu0 %v3479_v21  ;;  %1695 = vmatpush1.bf16.msra.mxu1 %v3481_v22  ;;  %v198_v21 = vld [vmem:[#allocation2 + $0x528] sm:$0xff] }
  0x37   :  { %1655 = vmatprep.subr.bf16.mxu0 %v3448_v23  ;;  %1696 = vmatprep.subr.bf16.mxu1 %v3450_v24  ;;  %v214_v22 = vld [vmem:[#allocation2 + $0x5a8] sm:$0xff]  ;;  %v3483_v23 = vcombine.low %v229_v10, %v245_v11  ;;  %v3485_v24 = vcombine.low %v230_v13, %v246_v14  ;;  %v3520_v10 = vcombine.high %v263_v4, %v279_v5  ;;  %v231_v13 = vld [vmem:[#allocation2 + $0x630] sm:$0xff] }
  0x38   :  { %v3454_v26 = vcombine.high %v198_v21, %v214_v22  ;;  %v247_v14 = vld [vmem:[#allocation2 + $0x6b0] sm:$0xff] }
  0x3a   :  { %1656 = vmatpush1.bf16.msra.mxu0 %v3447_v29  ;;  %1697 = vmatpush1.bf16.msra.mxu1 %v3449_v30  ;;  %v166_v29 = vld [vmem:[#allocation2 + $0x428] sm:$0xff] }
  0x3b   :  { %1657 = vmatprep.subr.bf16.mxu0 %v3416_v31  ;;  %1698 = vmatprep.subr.bf16.mxu1 %v3418_v32  ;;  %v182_v30 = vld [vmem:[#allocation2 + $0x4a8] sm:$0xff]  ;;  %v3451_v31 = vcombine.low %v197_v19, %v213_v20  ;;  %v3453_v32 = vcombine.low %v198_v21, %v214_v22  ;;  %v3488_v19 = vcombine.high %v231_v13, %v247_v14  ;;  %v199_v21 = vld [vmem:[#allocation2 + $0x530] sm:$0xff] }
  0x3c   :  { %v3422_v34 = vcombine.high %v166_v29, %v182_v30  ;;  %v215_v22 = vld [vmem:[#allocation2 + $0x5b0] sm:$0xff] }
  0x3e   :  { %1658 = vmatpush1.bf16.msra.mxu0 %v3415_v37  ;;  %1699 = vmatpush1.bf16.msra.mxu1 %v3417_v38  ;;  %v134_v37 = vld [vmem:[#allocation2 + $0x328] sm:$0xff] }
  0x3f   :  { %1659 = vmatprep.subr.bf16.mxu0 %v3384_v39  ;;  %1700 = vmatprep.subr.bf16.mxu1 %v3386_v40  ;;  %v150_v38 = vld [vmem:[#allocation2 + $0x3a8] sm:$0xff]  ;;  %v3419_v39 = vcombine.low %v165_v27, %v181_v28  ;;  %v3421_v40 = vcombine.low %v166_v29, %v182_v30  ;;  %v3456_v27 = vcombine.high %v199_v21, %v215_v22  ;;  %v167_v29 = vld [vmem:[#allocation2 + $0x430] sm:$0xff] }
  0x40   :  { %v3390_v42 = vcombine.high %v134_v37, %v150_v38  ;;  %v183_v30 = vld [vmem:[#allocation2 + $0x4b0] sm:$0xff] }
  0x42   :  { %1660 = vmatpush1.bf16.msra.mxu0 %v3383_v45  ;;  %1701 = vmatpush1.bf16.msra.mxu1 %v3385_v46  ;;  %v102_v45 = vld [vmem:[#allocation2 + $0x228] sm:$0xff] }
  0x43   :  { %1661 = vmatprep.subr.bf16.mxu0 %v3352_v47  ;;  %1702 = vmatprep.subr.bf16.mxu1 %v3354_v48  ;;  %v118_v46 = vld [vmem:[#allocation2 + $0x2a8] sm:$0xff]  ;;  %v3387_v47 = vcombine.low %v133_v35, %v149_v36  ;;  %v3389_v48 = vcombine.low %v134_v37, %v150_v38  ;;  %v3424_v35 = vcombine.high %v167_v29, %v183_v30  ;;  %v135_v37 = vld [vmem:[#allocation2 + $0x330] sm:$0xff] }
  0x44   :  { %v3358_v50 = vcombine.high %v102_v45, %v118_v46  ;;  %v151_v38 = vld [vmem:[#allocation2 + $0x3b0] sm:$0xff] }
  0x46   :  { %1662 = vmatpush1.bf16.msra.mxu0 %v3351_v53  ;;  %1703 = vmatpush1.bf16.msra.mxu1 %v3353_v54  ;;  %v70_v53 = vld [vmem:[#allocation2 + $0x128] sm:$0xff] }
  0x47   :  { %1663 = vmatprep.subr.bf16.mxu0 %v3320_v55  ;;  %1704 = vmatprep.subr.bf16.mxu1 %v3322_v56  ;;  %v86_v54 = vld [vmem:[#allocation2 + $0x1a8] sm:$0xff]  ;;  %v3355_v55 = vcombine.low %v101_v43, %v117_v44  ;;  %v3357_v56 = vcombine.low %v102_v45, %v118_v46  ;;  %v3392_v43 = vcombine.high %v135_v37, %v151_v38  ;;  %v103_v45 = vld [vmem:[#allocation2 + $0x230] sm:$0xff] }
  0x48   :  { %v3326_v58 = vcombine.high %v70_v53, %v86_v54  ;;  %v119_v46 = vld [vmem:[#allocation2 + $0x2b0] sm:$0xff] }
  0x4a   :  { %1664 = vmatpush1.bf16.msra.mxu0 %v3319_v61  ;;  %1705 = vmatpush1.bf16.msra.mxu1 %v3321_v62  ;;  %v38_v61 = vld [vmem:[#allocation2 + $0x28] sm:$0xff] }
  0x4b   :  { %1665 = vmatprep.subr.bf16.mxu0 %v3288_v63  ;;  %1706 = vmatprep.subr.bf16.mxu1 %v3290_v1  ;;  %v54_v62 = vld [vmem:[#allocation2 + $0xa8] sm:$0xff]  ;;  %v3323_v63 = vcombine.low %v69_v51, %v85_v52  ;;  %v3325_v1 = vcombine.low %v70_v53, %v86_v54  ;;  %v3360_v51 = vcombine.high %v103_v45, %v119_v46  ;;  %v71_v53 = vld [vmem:[#allocation2 + $0x130] sm:$0xff] }
  0x4c   :  { %v3294_v3 = vcombine.high %v38_v61, %v54_v62  ;;  %v87_v54 = vld [vmem:[#allocation2 + $0x1b0] sm:$0xff] }
  0x4e   :  { %1666 = vmatpush1.bf16.msra.mxu0 %v3287_v6  ;;  %1707 = vmatpush1.bf16.msra.mxu1 %v3289_v7  ;;  %v264_v6 = vld [vmem:[#allocation2 + $0x738] sm:$0xff] }
  0x4f   :  { %1733 = vmatprep.subr.bf16.mxu0 %v3516_v8  ;;  %1774 = vmatprep.subr.bf16.mxu1 %v3518_v9  ;;  %v280_v7 = vld [vmem:[#allocation2 + $0x7b8] sm:$0xff]  ;;  %v3291_v8 = vcombine.low %v37_v59, %v53_v60  ;;  %v3293_v9 = vcombine.low %v38_v61, %v54_v62  ;;  %v3328_v59 = vcombine.high %v71_v53, %v87_v54  ;;  %v39_v61 = vld [vmem:[#allocation2 + $0x30] sm:$0xff] }
  0x50   :  { %v3522_v11 = vcombine.high %v264_v6, %v280_v7  ;;  %v55_v62 = vld [vmem:[#allocation2 + $0xb0] sm:$0xff] }
  0x51   :  { %1684 = vmatmul.mubr.bf16.vlgmr.msra.gmra.mxu0 %v3641_v12  ;;  %1725 = vmatmul.mubr.bf16.vlgmr.msra.gmra.mxu1 %v3641_v12 }
  0x52   :  { %1734 = vmatpush1.bf16.msra.mxu0 %v3515_v15  ;;  %1775 = vmatpush1.bf16.msra.mxu1 %v3517_v16  ;;  %v232_v15 = vld [vmem:[#allocation2 + $0x638] sm:$0xff] }
  0x53   :  { %1735 = vmatprep.subr.bf16.mxu0 %v3484_v17  ;;  %1776 = vmatprep.subr.bf16.mxu1 %v3486_v18  ;;  %v248_v16 = vld [vmem:[#allocation2 + $0x6b8] sm:$0xff]  ;;  %v3519_v17 = vcombine.low %v263_v4, %v279_v5  ;;  %v3521_v18 = vcombine.low %v264_v6, %v280_v7  ;;  %v3296_v4 = vcombine.high %v39_v61, %v55_v62  ;;  %v265_v6 = vld [vmem:[#allocation2 + $0x740] sm:$0xff] }
  0x54   :  { %1765 = vmatprep.mubr.bf16.mxu0 %v3606_v0  ;;  %1806 = vmatprep.mubr.bf16.mxu1 %v3606_v0  ;;  %v3490_v20 = vcombine.high %v232_v15, %v248_v16  ;;  %v281_v7 = vld [vmem:[#allocation2 + $0x7c0] sm:$0xff] }
  0x56   :  { %1736 = vmatpush1.bf16.msra.mxu0 %v3483_v23  ;;  %1777 = vmatpush1.bf16.msra.mxu1 %v3485_v24  ;;  %v200_v23 = vld [vmem:[#allocation2 + $0x538] sm:$0xff] }
  0x57   :  { %1737 = vmatprep.subr.bf16.mxu0 %v3452_v25  ;;  %1778 = vmatprep.subr.bf16.mxu1 %v3454_v26  ;;  %v216_v24 = vld [vmem:[#allocation2 + $0x5b8] sm:$0xff]  ;;  %v3487_v25 = vcombine.low %v231_v13, %v247_v14  ;;  %v3489_v26 = vcombine.low %v232_v15, %v248_v16  ;;  %v3524_v13 = vcombine.high %v265_v6, %v281_v7  ;;  %v233_v15 = vld [vmem:[#allocation2 + $0x640] sm:$0xff] }
  0x58   :  { %v3458_v28 = vcombine.high %v200_v23, %v216_v24  ;;  %v249_v16 = vld [vmem:[#allocation2 + $0x6c0] sm:$0xff] }
  0x5a   :  { %1738 = vmatpush1.bf16.msra.mxu0 %v3451_v31  ;;  %1779 = vmatpush1.bf16.msra.mxu1 %v3453_v32  ;;  %v168_v31 = vld [vmem:[#allocation2 + $0x438] sm:$0xff] }
  0x5b   :  { %1739 = vmatprep.subr.bf16.mxu0 %v3420_v33  ;;  %1780 = vmatprep.subr.bf16.mxu1 %v3422_v34  ;;  %v184_v32 = vld [vmem:[#allocation2 + $0x4b8] sm:$0xff]  ;;  %v3455_v33 = vcombine.low %v199_v21, %v215_v22  ;;  %v3457_v34 = vcombine.low %v200_v23, %v216_v24  ;;  %v3492_v21 = vcombine.high %v233_v15, %v249_v16  ;;  %v201_v23 = vld [vmem:[#allocation2 + $0x540] sm:$0xff] }
  0x5c   :  { %v3426_v36 = vcombine.high %v168_v31, %v184_v32  ;;  %v217_v24 = vld [vmem:[#allocation2 + $0x5c0] sm:$0xff] }
  0x5e   :  { %1740 = vmatpush1.bf16.msra.mxu0 %v3419_v39  ;;  %1781 = vmatpush1.bf16.msra.mxu1 %v3421_v40  ;;  %v136_v39 = vld [vmem:[#allocation2 + $0x338] sm:$0xff] }
  0x5f   :  { %1741 = vmatprep.subr.bf16.mxu0 %v3388_v41  ;;  %1782 = vmatprep.subr.bf16.mxu1 %v3390_v42  ;;  %v152_v40 = vld [vmem:[#allocation2 + $0x3b8] sm:$0xff]  ;;  %v3423_v41 = vcombine.low %v167_v29, %v183_v30  ;;  %v3425_v42 = vcombine.low %v168_v31, %v184_v32  ;;  %v3460_v29 = vcombine.high %v201_v23, %v217_v24  ;;  %v169_v31 = vld [vmem:[#allocation2 + $0x440] sm:$0xff] }
  0x60   :  { %v3394_v44 = vcombine.high %v136_v39, %v152_v40  ;;  %v185_v32 = vld [vmem:[#allocation2 + $0x4c0] sm:$0xff] }
  0x62   :  { %1742 = vmatpush1.bf16.msra.mxu0 %v3387_v47  ;;  %1783 = vmatpush1.bf16.msra.mxu1 %v3389_v48  ;;  %v104_v47 = vld [vmem:[#allocation2 + $0x238] sm:$0xff] }
  0x63   :  { %1743 = vmatprep.subr.bf16.mxu0 %v3356_v49  ;;  %1784 = vmatprep.subr.bf16.mxu1 %v3358_v50  ;;  %v120_v48 = vld [vmem:[#allocation2 + $0x2b8] sm:$0xff]  ;;  %v3391_v49 = vcombine.low %v135_v37, %v151_v38  ;;  %v3393_v50 = vcombine.low %v136_v39, %v152_v40  ;;  %v3428_v37 = vcombine.high %v169_v31, %v185_v32  ;;  %v137_v39 = vld [vmem:[#allocation2 + $0x340] sm:$0xff] }
  0x64   :  { %v3362_v52 = vcombine.high %v104_v47, %v120_v48  ;;  %v153_v40 = vld [vmem:[#allocation2 + $0x3c0] sm:$0xff] }
  0x66   :  { %1744 = vmatpush1.bf16.msra.mxu0 %v3355_v55  ;;  %1785 = vmatpush1.bf16.msra.mxu1 %v3357_v56  ;;  %v72_v55 = vld [vmem:[#allocation2 + $0x138] sm:$0xff] }
  0x67   :  { %1745 = vmatprep.subr.bf16.mxu0 %v3324_v57  ;;  %1786 = vmatprep.subr.bf16.mxu1 %v3326_v58  ;;  %v88_v56 = vld [vmem:[#allocation2 + $0x1b8] sm:$0xff]  ;;  %v3359_v57 = vcombine.low %v103_v45, %v119_v46  ;;  %v3361_v58 = vcombine.low %v104_v47, %v120_v48  ;;  %v3396_v45 = vcombine.high %v137_v39, %v153_v40  ;;  %v105_v47 = vld [vmem:[#allocation2 + $0x240] sm:$0xff] }
  0x68   :  { %v3330_v60 = vcombine.high %v72_v55, %v88_v56  ;;  %v121_v48 = vld [vmem:[#allocation2 + $0x2c0] sm:$0xff] }
  0x6a   :  { %1746 = vmatpush1.bf16.msra.mxu0 %v3323_v63  ;;  %1787 = vmatpush1.bf16.msra.mxu1 %v3325_v1  ;;  %v40_v63 = vld [vmem:[#allocation2 + $0x38] sm:$0xff] }
  0x6b   :  { %1747 = vmatprep.subr.bf16.mxu0 %v3292_v2  ;;  %1788 = vmatprep.subr.bf16.mxu1 %v3294_v3  ;;  %v56_v1 = vld [vmem:[#allocation2 + $0xb8] sm:$0xff]  ;;  %v3327_v2 = vcombine.low %v71_v53, %v87_v54  ;;  %v3329_v3 = vcombine.low %v72_v55, %v88_v56  ;;  %v3364_v53 = vcombine.high %v105_v47, %v121_v48  ;;  %v73_v55 = vld [vmem:[#allocation2 + $0x140] sm:$0xff] }
  0x6c   :  { %v3298_v5 = vcombine.high %v40_v63, %v56_v1  ;;  %v89_v56 = vld [vmem:[#allocation2 + $0x1c0] sm:$0xff] }
  0x6e   :  { %1748 = vmatpush1.bf16.msra.mxu0 %v3291_v8  ;;  %1789 = vmatpush1.bf16.msra.mxu1 %v3293_v9  ;;  %v266_v8 = vld [vmem:[#allocation2 + $0x748] sm:$0xff] }
  0x6f   :  { %1815 = vmatprep.subr.bf16.mxu0 %v3520_v10  ;;  %1856 = vmatprep.subr.bf16.mxu1 %v3522_v11  ;;  %v282_v9 = vld [vmem:[#allocation2 + $0x7c8] sm:$0xff]  ;;  %v3295_v10 = vcombine.low %v39_v61, %v55_v62  ;;  %v3297_v11 = vcombine.low %v40_v63, %v56_v1  ;;  %v3332_v61 = vcombine.high %v73_v55, %v89_v56  ;;  %v41_v63 = vld [vmem:[#allocation2 + $0x40] sm:$0xff] }
  0x70   :  { %v3526_v14 = vcombine.high %v266_v8, %v282_v9  ;;  %v57_v1 = vld [vmem:[#allocation2 + $0xc0] sm:$0xff] }
  0x71   :  { %1766 = vmatmul.mubr.bf16.vlgmr.msra.gmra.mxu0 %v3641_v12  ;;  %1807 = vmatmul.mubr.bf16.vlgmr.msra.gmra.mxu1 %v3641_v12 }
  0x72   :  { %1816 = vmatpush1.bf16.msra.mxu0 %v3519_v17  ;;  %1857 = vmatpush1.bf16.msra.mxu1 %v3521_v18  ;;  %v234_v17 = vld [vmem:[#allocation2 + $0x648] sm:$0xff] }
  0x73   :  { %1817 = vmatprep.subr.bf16.mxu0 %v3488_v19  ;;  %1858 = vmatprep.subr.bf16.mxu1 %v3490_v20  ;;  %v250_v18 = vld [vmem:[#allocation2 + $0x6c8] sm:$0xff]  ;;  %v3523_v19 = vcombine.low %v265_v6, %v281_v7  ;;  %v3525_v20 = vcombine.low %v266_v8, %v282_v9  ;;  %v3300_v6 = vcombine.high %v41_v63, %v57_v1  ;;  %v267_v8 = vld [vmem:[#allocation2 + $0x750] sm:$0xff] }
  0x74   :  { %1847 = vmatprep.mubr.bf16.mxu0 %v3606_v0  ;;  %1888 = vmatprep.mubr.bf16.mxu1 %v3606_v0  ;;  %v3494_v22 = vcombine.high %v234_v17, %v250_v18  ;;  %v283_v9 = vld [vmem:[#allocation2 + $0x7d0] sm:$0xff] }
  0x76   :  { %1818 = vmatpush1.bf16.msra.mxu0 %v3487_v25  ;;  %1859 = vmatpush1.bf16.msra.mxu1 %v3489_v26  ;;  %v202_v25 = vld [vmem:[#allocation2 + $0x548] sm:$0xff] }
  0x77   :  { %1819 = vmatprep.subr.bf16.mxu0 %v3456_v27  ;;  %1860 = vmatprep.subr.bf16.mxu1 %v3458_v28  ;;  %v218_v26 = vld [vmem:[#allocation2 + $0x5c8] sm:$0xff]  ;;  %v3491_v27 = vcombine.low %v233_v15, %v249_v16  ;;  %v3493_v28 = vcombine.low %v234_v17, %v250_v18  ;;  %v3528_v15 = vcombine.high %v267_v8, %v283_v9  ;;  %v235_v17 = vld [vmem:[#allocation2 + $0x650] sm:$0xff] }
  0x78   :  { %v3462_v30 = vcombine.high %v202_v25, %v218_v26  ;;  %v251_v18 = vld [vmem:[#allocation2 + $0x6d0] sm:$0xff] }
  0x7a   :  { %1820 = vmatpush1.bf16.msra.mxu0 %v3455_v33  ;;  %1861 = vmatpush1.bf16.msra.mxu1 %v3457_v34  ;;  %v170_v33 = vld [vmem:[#allocation2 + $0x448] sm:$0xff] }
  0x7b   :  { %1821 = vmatprep.subr.bf16.mxu0 %v3424_v35  ;;  %1862 = vmatprep.subr.bf16.mxu1 %v3426_v36  ;;  %v186_v34 = vld [vmem:[#allocation2 + $0x4c8] sm:$0xff]  ;;  %v3459_v35 = vcombine.low %v201_v23, %v217_v24  ;;  %v3461_v36 = vcombine.low %v202_v25, %v218_v26  ;;  %v3496_v23 = vcombine.high %v235_v17, %v251_v18  ;;  %v203_v25 = vld [vmem:[#allocation2 + $0x550] sm:$0xff] }
  0x7c   :  { %v3430_v38 = vcombine.high %v170_v33, %v186_v34  ;;  %v219_v26 = vld [vmem:[#allocation2 + $0x5d0] sm:$0xff] }
  0x7e   :  { %1822 = vmatpush1.bf16.msra.mxu0 %v3423_v41  ;;  %1863 = vmatpush1.bf16.msra.mxu1 %v3425_v42  ;;  %v138_v41 = vld [vmem:[#allocation2 + $0x348] sm:$0xff] }
  0x7f   :  { %1823 = vmatprep.subr.bf16.mxu0 %v3392_v43  ;;  %1864 = vmatprep.subr.bf16.mxu1 %v3394_v44  ;;  %v154_v42 = vld [vmem:[#allocation2 + $0x3c8] sm:$0xff]  ;;  %v3427_v43 = vcombine.low %v169_v31, %v185_v32  ;;  %v3429_v44 = vcombine.low %v170_v33, %v186_v34  ;;  %v3464_v31 = vcombine.high %v203_v25, %v219_v26  ;;  %v171_v33 = vld [vmem:[#allocation2 + $0x450] sm:$0xff] }
  0x80   :  { %v3398_v46 = vcombine.high %v138_v41, %v154_v42  ;;  %v187_v34 = vld [vmem:[#allocation2 + $0x4d0] sm:$0xff] }
  0x82   :  { %1824 = vmatpush1.bf16.msra.mxu0 %v3391_v49  ;;  %1865 = vmatpush1.bf16.msra.mxu1 %v3393_v50  ;;  %v106_v49 = vld [vmem:[#allocation2 + $0x248] sm:$0xff] }
  0x83   :  { %1825 = vmatprep.subr.bf16.mxu0 %v3360_v51  ;;  %1866 = vmatprep.subr.bf16.mxu1 %v3362_v52  ;;  %v122_v50 = vld [vmem:[#allocation2 + $0x2c8] sm:$0xff]  ;;  %v3395_v51 = vcombine.low %v137_v39, %v153_v40  ;;  %v3397_v52 = vcombine.low %v138_v41, %v154_v42  ;;  %v3432_v39 = vcombine.high %v171_v33, %v187_v34  ;;  %v139_v41 = vld [vmem:[#allocation2 + $0x350] sm:$0xff] }
  0x84   :  { %v3366_v54 = vcombine.high %v106_v49, %v122_v50  ;;  %v155_v42 = vld [vmem:[#allocation2 + $0x3d0] sm:$0xff] }
  0x86   :  { %1826 = vmatpush1.bf16.msra.mxu0 %v3359_v57  ;;  %1867 = vmatpush1.bf16.msra.mxu1 %v3361_v58  ;;  %v74_v57 = vld [vmem:[#allocation2 + $0x148] sm:$0xff] }
  0x87   :  { %1827 = vmatprep.subr.bf16.mxu0 %v3328_v59  ;;  %1868 = vmatprep.subr.bf16.mxu1 %v3330_v60  ;;  %v90_v58 = vld [vmem:[#allocation2 + $0x1c8] sm:$0xff]  ;;  %v3363_v59 = vcombine.low %v105_v47, %v121_v48  ;;  %v3365_v60 = vcombine.low %v106_v49, %v122_v50  ;;  %v3400_v47 = vcombine.high %v139_v41, %v155_v42  ;;  %v107_v49 = vld [vmem:[#allocation2 + $0x250] sm:$0xff] }
  0x88   :  { %v3334_v62 = vcombine.high %v74_v57, %v90_v58  ;;  %v123_v50 = vld [vmem:[#allocation2 + $0x2d0] sm:$0xff] }
  0x8a   :  { %1828 = vmatpush1.bf16.msra.mxu0 %v3327_v2  ;;  %1869 = vmatpush1.bf16.msra.mxu1 %v3329_v3  ;;  %v42_v2 = vld [vmem:[#allocation2 + $0x48] sm:$0xff] }
  0x8b   :  { %1829 = vmatprep.subr.bf16.mxu0 %v3296_v4  ;;  %1870 = vmatprep.subr.bf16.mxu1 %v3298_v5  ;;  %v58_v3 = vld [vmem:[#allocation2 + $0xc8] sm:$0xff]  ;;  %v3331_v4 = vcombine.low %v73_v55, %v89_v56  ;;  %v3333_v5 = vcombine.low %v74_v57, %v90_v58  ;;  %v3368_v55 = vcombine.high %v107_v49, %v123_v50  ;;  %v75_v57 = vld [vmem:[#allocation2 + $0x150] sm:$0xff] }
  0x8c   :  { %v3302_v7 = vcombine.high %v42_v2, %v58_v3  ;;  %v91_v58 = vld [vmem:[#allocation2 + $0x1d0] sm:$0xff] }
  0x8e   :  { %1830 = vmatpush1.bf16.msra.mxu0 %v3295_v10  ;;  %1871 = vmatpush1.bf16.msra.mxu1 %v3297_v11  ;;  %v268_v10 = vld [vmem:[#allocation2 + $0x758] sm:$0xff] }
  0x8f   :  { %1897 = vmatprep.subr.bf16.mxu0 %v3524_v13  ;;  %1938 = vmatprep.subr.bf16.mxu1 %v3526_v14  ;;  %v284_v11 = vld [vmem:[#allocation2 + $0x7d8] sm:$0xff]  ;;  %v3299_v13 = vcombine.low %v41_v63, %v57_v1  ;;  %v3301_v14 = vcombine.low %v42_v2, %v58_v3  ;;  %v3336_v63 = vcombine.high %v75_v57, %v91_v58  ;;  %v43_v2 = vld [vmem:[#allocation2 + $0x50] sm:$0xff] }
  0x90   :  { %v3530_v16 = vcombine.high %v268_v10, %v284_v11  ;;  %v59_v3 = vld [vmem:[#allocation2 + $0xd0] sm:$0xff] }
  0x91   :  { %1848 = vmatmul.mubr.bf16.vlgmr.msra.gmra.mxu0 %v3641_v12  ;;  %1889 = vmatmul.mubr.bf16.vlgmr.msra.gmra.mxu1 %v3641_v12 }
  0x92   :  { %1898 = vmatpush1.bf16.msra.mxu0 %v3523_v19  ;;  %1939 = vmatpush1.bf16.msra.mxu1 %v3525_v20  ;;  %v236_v19 = vld [vmem:[#allocation2 + $0x658] sm:$0xff] }
  0x93   :  { %1899 = vmatprep.subr.bf16.mxu0 %v3492_v21  ;;  %1940 = vmatprep.subr.bf16.mxu1 %v3494_v22  ;;  %v252_v20 = vld [vmem:[#allocation2 + $0x6d8] sm:$0xff]  ;;  %v3527_v21 = vcombine.low %v267_v8, %v283_v9  ;;  %v3529_v22 = vcombine.low %v268_v10, %v284_v11  ;;  %v3304_v8 = vcombine.high %v43_v2, %v59_v3  ;;  %v269_v10 = vld [vmem:[#allocation2 + $0x760] sm:$0xff] }
  0x94   :  { %1929 = vmatprep.mubr.bf16.mxu0 %v3606_v0  ;;  %1970 = vmatprep.mubr.bf16.mxu1 %v3606_v0  ;;  %v3498_v24 = vcombine.high %v236_v19, %v252_v20  ;;  %v285_v11 = vld [vmem:[#allocation2 + $0x7e0] sm:$0xff] }
  0x96   :  { %1900 = vmatpush1.bf16.msra.mxu0 %v3491_v27  ;;  %1941 = vmatpush1.bf16.msra.mxu1 %v3493_v28  ;;  %v204_v27 = vld [vmem:[#allocation2 + $0x558] sm:$0xff] }
  0x97   :  { %1901 = vmatprep.subr.bf16.mxu0 %v3460_v29  ;;  %1942 = vmatprep.subr.bf16.mxu1 %v3462_v30  ;;  %v220_v28 = vld [vmem:[#allocation2 + $0x5d8] sm:$0xff]  ;;  %v3495_v29 = vcombine.low %v235_v17, %v251_v18  ;;  %v3497_v30 = vcombine.low %v236_v19, %v252_v20  ;;  %v3532_v17 = vcombine.high %v269_v10, %v285_v11  ;;  %v237_v19 = vld [vmem:[#allocation2 + $0x660] sm:$0xff] }
  0x98   :  { %v3466_v32 = vcombine.high %v204_v27, %v220_v28  ;;  %v253_v20 = vld [vmem:[#allocation2 + $0x6e0] sm:$0xff] }
  0x9a   :  { %1902 = vmatpush1.bf16.msra.mxu0 %v3459_v35  ;;  %1943 = vmatpush1.bf16.msra.mxu1 %v3461_v36  ;;  %v172_v35 = vld [vmem:[#allocation2 + $0x458] sm:$0xff] }
  0x9b   :  { %1903 = vmatprep.subr.bf16.mxu0 %v3428_v37  ;;  %1944 = vmatprep.subr.bf16.mxu1 %v3430_v38  ;;  %v188_v36 = vld [vmem:[#allocation2 + $0x4d8] sm:$0xff]  ;;  %v3463_v37 = vcombine.low %v203_v25, %v219_v26  ;;  %v3465_v38 = vcombine.low %v204_v27, %v220_v28  ;;  %v3500_v25 = vcombine.high %v237_v19, %v253_v20  ;;  %v205_v27 = vld [vmem:[#allocation2 + $0x560] sm:$0xff] }
  0x9c   :  { %v3434_v40 = vcombine.high %v172_v35, %v188_v36  ;;  %v221_v28 = vld [vmem:[#allocation2 + $0x5e0] sm:$0xff] }
  0x9e   :  { %1904 = vmatpush1.bf16.msra.mxu0 %v3427_v43  ;;  %1945 = vmatpush1.bf16.msra.mxu1 %v3429_v44  ;;  %v140_v43 = vld [vmem:[#allocation2 + $0x358] sm:$0xff] }
  0x9f   :  { %1905 = vmatprep.subr.bf16.mxu0 %v3396_v45  ;;  %1946 = vmatprep.subr.bf16.mxu1 %v3398_v46  ;;  %v156_v44 = vld [vmem:[#allocation2 + $0x3d8] sm:$0xff]  ;;  %v3431_v45 = vcombine.low %v171_v33, %v187_v34  ;;  %v3433_v46 = vcombine.low %v172_v35, %v188_v36  ;;  %v3468_v34 = vcombine.high %v205_v27, %v221_v28  ;;  %v173_v36 = vld [vmem:[#allocation2 + $0x460] sm:$0xff] }
  0xa0   :  { %v3402_v48 = vcombine.high %v140_v43, %v156_v44 }
  0xa2   :  { %1906 = vmatpush1.bf16.msra.mxu0 %v3395_v51  ;;  %1947 = vmatpush1.bf16.msra.mxu1 %v3397_v52  ;;  %v108_v51 = vld [vmem:[#allocation2 + $0x258] sm:$0xff] }
  0xa3   :  { %1907 = vmatprep.subr.bf16.mxu0 %v3364_v53  ;;  %1948 = vmatprep.subr.bf16.mxu1 %v3366_v54  ;;  %v124_v52 = vld [vmem:[#allocation2 + $0x2d8] sm:$0xff]  ;;  %v3399_v53 = vcombine.low %v139_v41, %v155_v42  ;;  %v3401_v54 = vcombine.low %v140_v43, %v156_v44  ;;  %v141_v43 = vld [vmem:[#allocation2 + $0x360] sm:$0xff] }
  0xa4   :  { %v3370_v56 = vcombine.high %v108_v51, %v124_v52  ;;  %v157_v44 = vld [vmem:[#allocation2 + $0x3e0] sm:$0xff] }
  0xa6   :  { %1908 = vmatpush1.bf16.msra.mxu0 %v3363_v59  ;;  %1949 = vmatpush1.bf16.msra.mxu1 %v3365_v60  ;;  %v76_v59 = vld [vmem:[#allocation2 + $0x158] sm:$0xff] }
  0xa7   :  { %1909 = vmatprep.subr.bf16.mxu0 %v3332_v61  ;;  %1950 = vmatprep.subr.bf16.mxu1 %v3334_v62  ;;  %v92_v60 = vld [vmem:[#allocation2 + $0x1d8] sm:$0xff]  ;;  %v3367_v61 = vcombine.low %v107_v49, %v123_v50  ;;  %v3369_v62 = vcombine.low %v108_v51, %v124_v52  ;;  %v3404_v49 = vcombine.high %v141_v43, %v157_v44  ;;  %v109_v51 = vld [vmem:[#allocation2 + $0x260] sm:$0xff] }
  0xa8   :  { %v3338_v1 = vcombine.high %v76_v59, %v92_v60  ;;  %v125_v52 = vld [vmem:[#allocation2 + $0x2e0] sm:$0xff] }
  0xaa   :  { %1910 = vmatpush1.bf16.msra.mxu0 %v3331_v4  ;;  %1951 = vmatpush1.bf16.msra.mxu1 %v3333_v5  ;;  %v44_v4 = vld [vmem:[#allocation2 + $0x58] sm:$0xff] }
  0xab   :  { %1911 = vmatprep.subr.bf16.mxu0 %v3300_v6  ;;  %1952 = vmatprep.subr.bf16.mxu1 %v3302_v7  ;;  %v60_v5 = vld [vmem:[#allocation2 + $0xd8] sm:$0xff]  ;;  %v3335_v6 = vcombine.low %v75_v57, %v91_v58  ;;  %v3337_v7 = vcombine.low %v76_v59, %v92_v60  ;;  %v3372_v57 = vcombine.high %v109_v51, %v125_v52  ;;  %v77_v59 = vld [vmem:[#allocation2 + $0x160] sm:$0xff] }
  0xac   :  { %v3306_v9 = vcombine.high %v44_v4, %v60_v5  ;;  %v93_v60 = vld [vmem:[#allocation2 + $0x1e0] sm:$0xff] }
  0xae   :  { %1912 = vmatpush1.bf16.msra.mxu0 %v3299_v13  ;;  %1953 = vmatpush1.bf16.msra.mxu1 %v3301_v14  ;;  %v270_v13 = vld [vmem:[#allocation2 + $0x768] sm:$0xff] }
  0xaf   :  { %1979 = vmatprep.subr.bf16.mxu0 %v3528_v15  ;;  %2020 = vmatprep.subr.bf16.mxu1 %v3530_v16  ;;  %v286_v14 = vld [vmem:[#allocation2 + $0x7e8] sm:$0xff]  ;;  %v3303_v15 = vcombine.low %v43_v2, %v59_v3  ;;  %v3305_v16 = vcombine.low %v44_v4, %v60_v5  ;;  %v3340_v2 = vcombine.high %v77_v59, %v93_v60  ;;  %v45_v4 = vld [vmem:[#allocation2 + $0x60] sm:$0xff] }
  0xb0   :  { %v3534_v18 = vcombine.high %v270_v13, %v286_v14  ;;  %v61_v5 = vld [vmem:[#allocation2 + $0xe0] sm:$0xff] }
  0xb1   :  { %1930 = vmatmul.mubr.bf16.vlgmr.msra.gmra.mxu0 %v3641_v12  ;;  %1971 = vmatmul.mubr.bf16.vlgmr.msra.gmra.mxu1 %v3641_v12 }
  0xb2   :  { %1980 = vmatpush1.bf16.msra.mxu0 %v3527_v21  ;;  %2021 = vmatpush1.bf16.msra.mxu1 %v3529_v22  ;;  %v238_v21 = vld [vmem:[#allocation2 + $0x668] sm:$0xff] }
  0xb3   :  { %1981 = vmatprep.subr.bf16.mxu0 %v3496_v23  ;;  %2022 = vmatprep.subr.bf16.mxu1 %v3498_v24  ;;  %v254_v22 = vld [vmem:[#allocation2 + $0x6e8] sm:$0xff]  ;;  %v3531_v23 = vcombine.low %v269_v10, %v285_v11  ;;  %v3533_v24 = vcombine.low %v270_v13, %v286_v14  ;;  %v3308_v10 = vcombine.high %v45_v4, %v61_v5  ;;  %v271_v13 = vld [vmem:[#allocation2 + $0x770] sm:$0xff] }
  0xb4   :  { %2011 = vmatprep.mubr.bf16.mxu0 %v3606_v0  ;;  %2052 = vmatprep.mubr.bf16.mxu1 %v3606_v0  ;;  %v3502_v26 = vcombine.high %v238_v21, %v254_v22  ;;  %v3501_v33 = vcombine.low %v238_v21, %v254_v22  ;;  %v287_v14 = vld [vmem:[#allocation2 + $0x7f0] sm:$0xff] }
  0xb5   :  { %v239_v21 = vld [vmem:[#allocation2 + $0x670] sm:$0xff] }
  0xb6   :  { %1982 = vmatpush1.bf16.msra.mxu0 %v3495_v29  ;;  %2023 = vmatpush1.bf16.msra.mxu1 %v3497_v30  ;;  %v206_v29 = vld [vmem:[#allocation2 + $0x568] sm:$0xff]  ;;  %v255_v22 = vld [vmem:[#allocation2 + $0x6f0] sm:$0xff] }
  0xb7   :  { %1983 = vmatprep.subr.bf16.mxu0 %v3464_v31  ;;  %2024 = vmatprep.subr.bf16.mxu1 %v3466_v32  ;;  %v222_v30 = vld [vmem:[#allocation2 + $0x5e8] sm:$0xff]  ;;  %v3667_v31 = vld [vmem:[%s4140_s0] sm:$0x1]  ;;  %v3499_v32 = vcombine.low %v237_v19, %v253_v20  ;;  %v3536_v19 = vcombine.high %v271_v13, %v287_v14 }
  0xb8   :  { %v3470_v35 = vcombine.high %v206_v29, %v222_v30 }
  0xba   :  { %1984 = vmatpush1.bf16.msra.mxu0 %v3463_v37  ;;  %2025 = vmatpush1.bf16.msra.mxu1 %v3465_v38  ;;  %v189_v37 = vld [vmem:[#allocation2 + $0x4e0] sm:$0xff]  ;;  %v190_v38 = vld [vmem:[#allocation2 + $0x4e8] sm:$0xff] }
  0xbb   :  { %1985 = vmatprep.subr.bf16.mxu0 %v3432_v39  ;;  %2026 = vmatprep.subr.bf16.mxu1 %v3434_v40  ;;  %v3467_v39 = vcombine.low %v205_v27, %v221_v28  ;;  %v3469_v40 = vcombine.low %v206_v29, %v222_v30  ;;  %v3436_v41 = vcombine.high %v173_v36, %v189_v37  ;;  %v207_v29 = vld [vmem:[#allocation2 + $0x570] sm:$0xff] }
  0xbc   :  { %v3504_v27 = vcombine.high %v239_v21, %v255_v22  ;;  %v223_v30 = vld [vmem:[#allocation2 + $0x5f0] sm:$0xff] }
  0xbe   :  { %1986 = vmatpush1.bf16.msra.mxu0 %v3431_v45  ;;  %2027 = vmatpush1.bf16.msra.mxu1 %v3433_v46  ;;  %v142_v45 = vld [vmem:[#allocation2 + $0x368] sm:$0xff] }
  0xbf   :  { %1987 = vmatprep.subr.bf16.mxu0 %v3400_v47  ;;  %2028 = vmatprep.subr.bf16.mxu1 %v3402_v48  ;;  %v158_v46 = vld [vmem:[#allocation2 + $0x3e8] sm:$0xff]  ;;  %v3435_v47 = vcombine.low %v173_v36, %v189_v37  ;;  %v3503_v36 = vcombine.low %v239_v21, %v255_v22 }
  0xc0   :  { %v3406_v50 = vcombine.high %v142_v45, %v158_v46 }
  0xc2   :  { %1988 = vmatpush1.bf16.msra.mxu0 %v3399_v53  ;;  %2029 = vmatpush1.bf16.msra.mxu1 %v3401_v54  ;;  %v110_v53 = vld [vmem:[#allocation2 + $0x268] sm:$0xff] }
  0xc3   :  { %1989 = vmatprep.subr.bf16.mxu0 %v3368_v55  ;;  %2030 = vmatprep.subr.bf16.mxu1 %v3370_v56  ;;  %v126_v54 = vld [vmem:[#allocation2 + $0x2e8] sm:$0xff]  ;;  %v3403_v55 = vcombine.low %v141_v43, %v157_v44  ;;  %v3405_v56 = vcombine.low %v142_v45, %v158_v46  ;;  %v176_v44 = vld [vmem:[#allocation2 + $0x478] sm:$0xff] }
  0xc4   :  { %v3374_v58 = vcombine.high %v110_v53, %v126_v54  ;;  %v192_v45 = vld [vmem:[#allocation2 + $0x4f8] sm:$0xff] }
  0xc6   :  { %1990 = vmatpush1.bf16.msra.mxu0 %v3367_v61  ;;  %2031 = vmatpush1.bf16.msra.mxu1 %v3369_v62  ;;  %v78_v61 = vld [vmem:[#allocation2 + $0x168] sm:$0xff] }
  0xc7   :  { %1991 = vmatprep.subr.bf16.mxu0 %v3336_v63  ;;  %2032 = vmatprep.subr.bf16.mxu1 %v3338_v1  ;;  %v94_v62 = vld [vmem:[#allocation2 + $0x1e8] sm:$0xff]  ;;  %v3371_v63 = vcombine.low %v109_v51, %v125_v52  ;;  %v3373_v1 = vcombine.low %v110_v53, %v126_v54  ;;  %v3442_v52 = vcombine.high %v176_v44, %v192_v45  ;;  %v143_v53 = vld [vmem:[#allocation2 + $0x370] sm:$0xff] }
  0xc8   :  { %v3342_v3 = vcombine.high %v78_v61, %v94_v62  ;;  %v159_v54 = vld [vmem:[#allocation2 + $0x3f0] sm:$0xff] }
  0xca   :  { %1992 = vmatpush1.bf16.msra.mxu0 %v3335_v6  ;;  %2033 = vmatpush1.bf16.msra.mxu1 %v3337_v7  ;;  %v46_v6 = vld [vmem:[#allocation2 + $0x68] sm:$0xff] }
  0xcb   :  { %1993 = vmatprep.subr.bf16.mxu0 %v3304_v8  ;;  %2034 = vmatprep.subr.bf16.mxu1 %v3306_v9  ;;  %v62_v7 = vld [vmem:[#allocation2 + $0xe8] sm:$0xff]  ;;  %v3339_v8 = vcombine.low %v77_v59, %v93_v60  ;;  %v3341_v9 = vcombine.low %v78_v61, %v94_v62  ;;  %v111_v60 = vld [vmem:[#allocation2 + $0x270] sm:$0xff]  ;;  %v112_v62 = vld [vmem:[#allocation2 + $0x278] sm:$0xff] }
  0xcc   :  { %v3310_v11 = vcombine.high %v46_v6, %v62_v7  ;;  %v127_v61 = vld [vmem:[#allocation2 + $0x2f0] sm:$0xff] }
  0xce   :  { %1994 = vmatpush1.bf16.msra.mxu0 %v3303_v15  ;;  %2035 = vmatpush1.bf16.msra.mxu1 %v3305_v16  ;;  %v272_v15 = vld [vmem:[#allocation2 + $0x778] sm:$0xff] }
  0xcf   :  { %2061 = vmatprep.subr.bf16.mxu0 %v3532_v17  ;;  %2102 = vmatprep.subr.bf16.mxu1 %v3534_v18  ;;  %v288_v16 = vld [vmem:[#allocation2 + $0x7f8] sm:$0xff]  ;;  %v3307_v17 = vcombine.low %v45_v4, %v61_v5  ;;  %v3309_v18 = vcombine.low %v46_v6, %v62_v7  ;;  %v79_v5 = vld [vmem:[#allocation2 + $0x170] sm:$0xff] }
  0xd0   :  { %v3538_v20 = vcombine.high %v272_v15, %v288_v16  ;;  %v95_v6 = vld [vmem:[#allocation2 + $0x1f0] sm:$0xff]  ;;  %v80_v7 = vld [vmem:[#allocation2 + $0x178] sm:$0xff] }
  0xd1   :  { %2012 = vmatmul.mubr.bf16.vlgmr.msra.gmra.mxu0 %v3641_v12  ;;  %2053 = vmatmul.mubr.bf16.vlgmr.msra.gmra.mxu1 %v3667_v31  ;;  %v174_v12 = vld [vmem:[#allocation2 + $0x468] sm:$0xff] }
  0xd2   :  { %2062 = vmatpush1.bf16.msra.mxu0 %v3531_v23  ;;  %2103 = vmatpush1.bf16.msra.mxu1 %v3533_v24  ;;  %v3438_v42 = vcombine.high %v174_v12, %v190_v38  ;;  %v3437_v48 = vcombine.low %v174_v12, %v190_v38  ;;  %v240_v23 = vld [vmem:[#allocation2 + $0x678] sm:$0xff]  ;;  %v3472_v38 = vcombine.high %v207_v29, %v223_v30 }
  0xd3   :  { %2063 = vmatprep.subr.bf16.mxu0 %v3500_v25  ;;  %2104 = vmatprep.subr.bf16.mxu1 %v3502_v26  ;;  %v256_v24 = vld [vmem:[#allocation2 + $0x6f8] sm:$0xff]  ;;  %v3535_v25 = vcombine.low %v271_v13, %v287_v14  ;;  %v3537_v26 = vcombine.low %v272_v15, %v288_v16  ;;  %v47_v14 = vld [vmem:[#allocation2 + $0x70] sm:$0xff] }
  0xd4   :  { %2093 = vmatprep.mubr.bf16.mxu0 %v3606_v0  ;;  %2134 = vmatprep.mubr.bf16.mxu1 %v3606_v0  ;;  %v3506_v28 = vcombine.high %v240_v23, %v256_v24  ;;  %v3505_v12 = vcombine.low %v240_v23, %v256_v24  ;;  %v63_v15 = vld [vmem:[#allocation2 + $0xf0] sm:$0xff]  ;;  %v48_v16 = vld [vmem:[#allocation2 + $0x78] sm:$0xff] }
  0xd5   :  { %v3311_v22 = vcombine.low %v47_v14, %v63_v15 }
  0xd6   :  { %2064 = vmatpush1.bf16.msra.mxu0 %v3499_v32  ;;  %2105 = vmatpush1.bf16.msra.mxu1 %v3501_v33  ;;  %v208_v33 = vld [vmem:[#allocation2 + $0x578] sm:$0xff] }
  0xd7   :  { %2065 = vmatprep.subr.bf16.mxu0 %v3468_v34  ;;  %2106 = vmatprep.subr.bf16.mxu1 %v3470_v35  ;;  %v224_v34 = vld [vmem:[#allocation2 + $0x5f8] sm:$0xff] }
  0xda   :  { %2066 = vmatpush1.bf16.msra.mxu0 %v3467_v39  ;;  %2107 = vmatpush1.bf16.msra.mxu1 %v3469_v40  ;;  %v3474_v40 = vcombine.high %v208_v33, %v224_v34 }
  0xdb   :  { %2067 = vmatprep.subr.bf16.mxu0 %v3436_v41  ;;  %2108 = vmatprep.subr.bf16.mxu1 %v3438_v42  ;;  %v175_v41 = vld [vmem:[#allocation2 + $0x470] sm:$0xff] }
  0xdc   :  { %v191_v42 = vld [vmem:[#allocation2 + $0x4f0] sm:$0xff] }
  0xde   :  { %2068 = vmatpush1.bf16.msra.mxu0 %v3435_v47  ;;  %2109 = vmatpush1.bf16.msra.mxu1 %v3437_v48  ;;  %v3471_v47 = vcombine.low %v207_v29, %v223_v30 }
  0xdf   :  { %2069 = vmatprep.subr.bf16.mxu0 %v3404_v49  ;;  %2110 = vmatprep.subr.bf16.mxu1 %v3406_v50  ;;  %v3473_v49 = vcombine.low %v208_v33, %v224_v34  ;;  %v3440_v50 = vcombine.high %v175_v41, %v191_v42 }
  0xe2   :  { %2070 = vmatpush1.bf16.msra.mxu0 %v3403_v55  ;;  %2111 = vmatpush1.bf16.msra.mxu1 %v3405_v56  ;;  %v144_v55 = vld [vmem:[#allocation2 + $0x378] sm:$0xff] }
  0xe3   :  { %2071 = vmatprep.subr.bf16.mxu0 %v3372_v57  ;;  %2112 = vmatprep.subr.bf16.mxu1 %v3374_v58  ;;  %v160_v56 = vld [vmem:[#allocation2 + $0x3f8] sm:$0xff]  ;;  %v3439_v57 = vcombine.low %v175_v41, %v191_v42  ;;  %v3408_v58 = vcombine.high %v143_v53, %v159_v54 }
  0xe4   :  { %v3410_v59 = vcombine.high %v144_v55, %v160_v56 }
  0xe6   :  { %2072 = vmatpush1.bf16.msra.mxu0 %v3371_v63  ;;  %2113 = vmatpush1.bf16.msra.mxu1 %v3373_v1  ;;  %v128_v63 = vld [vmem:[#allocation2 + $0x2f8] sm:$0xff]  ;;  %v3407_v1 = vcombine.low %v143_v53, %v159_v54 }
  0xe7   :  { %2073 = vmatprep.subr.bf16.mxu0 %v3340_v2  ;;  %2114 = vmatprep.subr.bf16.mxu1 %v3342_v3  ;;  %v3409_v2 = vcombine.low %v144_v55, %v160_v56  ;;  %v3376_v3 = vcombine.high %v111_v60, %v127_v61  ;;  %v3378_v4 = vcombine.high %v112_v62, %v128_v63 }
  0xea   :  { %2074 = vmatpush1.bf16.msra.mxu0 %v3339_v8  ;;  %2115 = vmatpush1.bf16.msra.mxu1 %v3341_v9  ;;  %v96_v8 = vld [vmem:[#allocation2 + $0x1f8] sm:$0xff]  ;;  %v3375_v9 = vcombine.low %v111_v60, %v127_v61 }
  0xeb   :  { %2075 = vmatprep.subr.bf16.mxu0 %v3308_v10  ;;  %2116 = vmatprep.subr.bf16.mxu1 %v3310_v11  ;;  %v3377_v10 = vcombine.low %v112_v62, %v128_v63  ;;  %v3344_v11 = vcombine.high %v79_v5, %v95_v6  ;;  %v3346_v13 = vcombine.high %v80_v7, %v96_v8 }
  0xee   :  { %2076 = vmatpush1.bf16.msra.mxu0 %v3307_v17  ;;  %2117 = vmatpush1.bf16.msra.mxu1 %v3309_v18  ;;  %v64_v17 = vld [vmem:[#allocation2 + $0xf8] sm:$0xff]  ;;  %v3343_v18 = vcombine.low %v79_v5, %v95_v6 }
  0xef   :  { %2143 = vmatprep.subr.bf16.mxu0 %v3536_v19  ;;  %2184 = vmatprep.subr.bf16.mxu1 %v3538_v20  ;;  %v3345_v19 = vcombine.low %v80_v7, %v96_v8  ;;  %v3312_v20 = vcombine.high %v47_v14, %v63_v15  ;;  %v3314_v21 = vcombine.high %v48_v16, %v64_v17 }
  0xf0   :  { %v3313_v23 = vcombine.low %v48_v16, %v64_v17 }
  0xf1   :  { %v3672_v32 = vpop.f32.mrf.mxu0  ;;  %2094 = vmatmul.mubr.bf16.vlgmr.msra.gmra.mxu0 %v3667_v31  ;;  %v3675_v35 = vpop.f32.mrf.mxu1  ;;  %2135 = vmatmul.mubr.bf16.vlgmr.msra.gmra.mxu1 %v3667_v31 }
  0xf2   :  { %2144 = vmatpush1.bf16.msra.mxu0 %v3535_v25  ;;  %2185 = vmatpush1.bf16.msra.mxu1 %v3537_v26 }
  0xf3   :  { %v3678_v37 = vpop.f32.mrf.mxu0  ;;  %2145 = vmatprep.subr.bf16.mxu0 %v3504_v27  ;;  %v3680_v39 = vpop.f32.mrf.mxu1  ;;  %2186 = vmatprep.subr.bf16.mxu1 %v3506_v28 }
  0xf4   :  { %2175 = vmatprep.mubr.bf16.mxu0 %v3606_v0  ;;  %2216 = vmatprep.mubr.bf16.mxu1 %v3606_v0  ;;  %v3441_v0 = vcombine.low %v176_v44, %v192_v45  ;;  %v2276_v44 = vmul.f32 %v3675_v35, %v3675_v35  ;;  %v2226_v45 = vsel %vm2225_vm0, %v3672_v32, 0.0  ;;  %v2233_v56 = vsel %vm2225_vm0, %v3678_v37, 0.0 }
  0xf5   :  { %v1607_v43 = vpop.f32.mrf.mxu0  ;;  %v1648_v46 = vpop.f32.mrf.mxu1  ;;  %v2227_v54 = vrot.slane %v2226_v45, 4  ;;  %v2234_v63 = vrot.slane %v2233_v56, 4 }
  0xf6   :  { %2146 = vmatpush1.bf16.msra.mxu0 %v3503_v36  ;;  %2187 = vmatpush1.bf16.msra.mxu1 %v3505_v12  ;;  %v2242_v43 = vmul.f32 %v3672_v32, %v3672_v32  ;;  %v2260_v46 = vsel %vm2225_vm0, %v3675_v35, 0.0 }
  0xf7   :  { %v1608_v48 = vpop.f32.mrf.mxu0  ;;  %2147 = vmatprep.subr.bf16.mxu0 %v3472_v38  ;;  %v1649_v51 = vpop.f32.mrf.mxu1  ;;  %2188 = vmatprep.subr.bf16.mxu1 %v3474_v40  ;;  %v2261_v55 = vrot.slane %v2260_v46, 4 }
  0xf8   :  { %v2244_v48 = vsel %vm2225_vm0, %v2242_v43, 0.0  ;;  %v2278_v51 = vsel %vm2225_vm0, %v2276_v44, 0.0 }
  0xf9   :  { %v2279_v60 = vrot.slane %v2278_v51, 4  ;;  %v2262_v5 = vadd.f32 %v2261_v55, %v2260_v46 }
  0xfa   :  { %2148 = vmatpush1.bf16.msra.mxu0 %v3471_v47  ;;  %2189 = vmatpush1.bf16.msra.mxu1 %v3473_v49  ;;  %v2243_v49 = vmul.f32 %v3678_v37, %v3678_v37 }
  0xfb   :  { %2149 = vmatprep.subr.bf16.mxu0 %v3440_v50  ;;  %2190 = vmatprep.subr.bf16.mxu1 %v3442_v52  ;;  %v2277_v52 = vmul.f32 %v3680_v39, %v3680_v39  ;;  %v2263_v15 = vrot.slane %v2262_v5, 2 }
  0xfc   :  { %v2251_v61 = vsel %vm2225_vm0, %v2243_v49, 0.0 }
  0xfd   :  { %v2252_v8 = vrot.slane %v2251_v61, 4 }
  0xfe   :  { %2150 = vmatpush1.bf16.msra.mxu0 %v3439_v57  ;;  %2191 = vmatpush1.bf16.msra.mxu1 %v3441_v0  ;;  %v2267_v57 = vsel %vm2225_vm0, %v3680_v39, 0.0 }
  0xff   :  { %2151 = vmatprep.subr.bf16.mxu0 %v3408_v58  ;;  %2192 = vmatprep.subr.bf16.mxu1 %v3410_v59  ;;  %v2245_v58 = vrot.slane %v2244_v48, 4  ;;  %v2253_v17 = vadd.f32 %v2252_v8, %v2251_v61 }
 0x101   :  { %v2246_v7 = vadd.f32 %v2245_v58, %v2244_v48 }
 0x102   :  { %2152 = vmatpush1.bf16.msra.mxu0 %v3407_v1  ;;  %2193 = vmatpush1.bf16.msra.mxu1 %v3409_v2  ;;  %v2268_v1 = vrot.slane %v2267_v57, 4  ;;  %v2285_v2 = vsel %vm2225_vm0, %v2277_v52, 0.0 }
 0x103   :  { %2153 = vmatprep.subr.bf16.mxu0 %v3376_v3  ;;  %2194 = vmatprep.subr.bf16.mxu1 %v3378_v4  ;;  %v2228_v4 = vadd.f32 %v2227_v54, %v2226_v45  ;;  %v2247_v16 = vrot.slane %v2246_v7, 2 }
 0x105   :  { %v2229_v14 = vrot.slane %v2228_v4, 2 }
 0x106   :  { %2154 = vmatpush1.bf16.msra.mxu0 %v3375_v9  ;;  %2195 = vmatpush1.bf16.msra.mxu1 %v3377_v10  ;;  %v2280_v9 = vadd.f32 %v2279_v60, %v2278_v51  ;;  %v2286_v10 = vrot.slane %v2285_v2, 4 }
 0x107   :  { %2155 = vmatprep.subr.bf16.mxu0 %v3344_v11  ;;  %2196 = vmatprep.subr.bf16.mxu1 %v3346_v13  ;;  %v2235_v11 = vadd.f32 %v2234_v63, %v2233_v56  ;;  %v2269_v13 = vadd.f32 %v2268_v1, %v2267_v57 }
 0x10a   :  { %2156 = vmatpush1.bf16.msra.mxu0 %v3343_v18  ;;  %2197 = vmatpush1.bf16.msra.mxu1 %v3345_v19  ;;  %v2281_v18 = vrot.slane %v2280_v9, 2  ;;  %v2287_v19 = vadd.f32 %v2286_v10, %v2285_v2 }
 0x10b   :  { %2157 = vmatprep.subr.bf16.mxu0 %v3312_v20  ;;  %2198 = vmatprep.subr.bf16.mxu1 %v3314_v21  ;;  %v2236_v20 = vrot.slane %v2235_v11, 2  ;;  %v2270_v21 = vrot.slane %v2269_v13, 2 }
 0x10e   :  { %2158 = vmatpush1.bf16.msra.mxu0 %v3311_v22  ;;  %2199 = vmatpush1.bf16.msra.mxu1 %v3313_v23  ;;  %v2230_v22 = vadd.f32 %v2229_v14, %v2228_v4  ;;  %v2264_v23 = vadd.f32 %v2263_v15, %v2262_v5 }
 0x111   :  { %v3684_v24 = vpop.f32.mrf.mxu0  ;;  %2176 = vmatmul.mubr.bf16.vlgmr.msra.gmra.mxu0 %v3667_v31  ;;  %v3687_v25 = vpop.f32.mrf.mxu1  ;;  %2217 = vmatmul.mubr.bf16.vlgmr.msra.gmra.mxu1 %v3667_v31 }
 0x112   :  { %4161 = vst [vmem:[#allocation5_spill] sm:$0xff] %v3684_v24  ;;  %4162 = vst [vmem:[#allocation6_spill] sm:$0xff] %v3687_v25  ;;  %v2310_v43 = vmul.f32 %v3684_v24, %v3684_v24  ;;  %v2294_v49 = vsel %vm2225_vm0, %v3684_v24, 0.0  ;;  %v2328_v55 = vsel %vm2225_vm0, %v3687_v25, 0.0 }
 0x113   :  { %v3690_v26 = vpop.f32.mrf.mxu0  ;;  %v3692_v27 = vpop.f32.mrf.mxu1 }
 0x114   :  { %4163 = vst [vmem:[#allocation7_spill] sm:$0xff] %v3690_v26  ;;  %4164 = vst [vmem:[#allocation8_spill] sm:$0xff] %v3692_v27  ;;  %v2311_v51 = vmul.f32 %v3690_v26, %v3690_v26  ;;  %v2312_v58 = vsel %vm2225_vm0, %v2310_v43, 0.0  ;;  %v2301_v63 = vsel %vm2225_vm0, %v3690_v26, 0.0  ;;  %v2345_v8 = vmul.f32 %v3692_v27, %v3692_v27 }
 0x115   :  { %v1689_v28 = vpop.f32.mrf.mxu0  ;;  %v1730_v29 = vpop.f32.mrf.mxu1  ;;  %v2302_v10 = vrot.slane %v2301_v63, 4 }
 0x116   :  { %v2248_v28 = vadd.f32 %v2247_v16, %v2246_v7  ;;  %v2254_v29 = vrot.slane %v2253_v17, 2  ;;  %v2319_v4 = vsel %vm2225_vm0, %v2311_v51, 0.0  ;;  %v2313_v7 = vrot.slane %v2312_v58, 4 }
 0x117   :  { %v1690_v30 = vpop.f32.mrf.mxu0  ;;  %v1731_v33 = vpop.f32.mrf.mxu1  ;;  %v2320_v16 = vrot.slane %v2319_v4, 4 }
 0x118   :  { %v2282_v30 = vadd.f32 %v2281_v18, %v2280_v9  ;;  %v2288_v33 = vrot.slane %v2287_v19, 2  ;;  %v2249_v44 = vrot.slane %v2248_v28, 1  ;;  %v2255_v45 = vadd.f32 %v2254_v29, %v2253_v17 }
 0x119   :  { %v2303_v29 = vadd.f32 %v2302_v10, %v2301_v63 }
 0x11a   :  { %v2283_v46 = vrot.slane %v2282_v30, 1  ;;  %v2289_v48 = vadd.f32 %v2288_v33, %v2287_v19  ;;  %v2250_v60 = vadd.f32 %v2249_v44, %v2248_v28  ;;  %v2256_v61 = vrot.slane %v2255_v45, 1 }
 0x11b   :  { %v2353_v28 = vsel %vm2225_vm0, %v2345_v8, 0.0 }
 0x11c   :  { %v2284_v1 = vadd.f32 %v2283_v46, %v2282_v30  ;;  %v2290_v2 = vrot.slane %v2289_v48, 1  ;;  %v2257_v14 = vadd.f32 %v2256_v61, %v2255_v45 }
 0x11e   :  { %v3751_v17 = vadd.f32 %v2284_v1, %v2250_v60  ;;  %v2291_v18 = vadd.f32 %v2290_v2, %v2289_v48  ;;  %v2354_v48 = vrot.slane %v2353_v28, 4 }
 0x120   :  { %v3767_v45 = vadd.f32 %v2291_v18, %v2257_v14 }
 0x131   :  { %v3694_v34 = vpop.f32.mrf.mxu0  ;;  %v3696_v36 = vpop.f32.mrf.mxu1 }
 0x132   :  { %4165 = vst [vmem:[#allocation9_spill] sm:$0xff] %v3694_v34  ;;  %4166 = vst [vmem:[#allocation10_spill] sm:$0xff] %v3696_v36  ;;  %v2362_v30 = vsel %vm2225_vm0, %v3694_v34, 0.0 }
 0x133   :  { %v3698_v12 = vpop.f32.mrf.mxu0  ;;  %v3700_v38 = vpop.f32.mrf.mxu1 }
 0x134   :  { %4167 = vst [vmem:[#allocation11_spill] sm:$0xff] %v3698_v12  ;;  %4168 = vst [vmem:[#allocation12_spill] sm:$0xff] %v3700_v38  ;;  %v2369_v43 = vsel %vm2225_vm0, %v3698_v12, 0.0  ;;  %v2403_v8 = vsel %vm2225_vm0, %v3700_v38, 0.0 }
 0x135   :  { %v1771_v40 = vpop.f32.mrf.mxu0  ;;  %v1812_v41 = vpop.f32.mrf.mxu1  ;;  %v2370_v60 = vrot.slane %v2369_v43, 4 }
 0x136   :  { %v2237_v40 = vadd.f32 %v2236_v20, %v2235_v11  ;;  %v2271_v41 = vadd.f32 %v2270_v21, %v2269_v13  ;;  %v2378_v11 = vmul.f32 %v3694_v34, %v3694_v34  ;;  %v2335_v20 = vsel %vm2225_vm0, %v3692_v27, 0.0 }
 0x137   :  { %v1772_v42 = vpop.f32.mrf.mxu0  ;;  %v1813_v31 = vpop.f32.mrf.mxu1 }
 0x138   :  { %v2231_v42 = vrot.slane %v2230_v22, 1  ;;  %v2265_v31 = vrot.slane %v2264_v23, 1  ;;  %v2238_v52 = vrot.slane %v2237_v40, 1  ;;  %v2272_v54 = vrot.slane %v2271_v41, 1 }
 0x139   :  { %v2380_v33 = vsel %vm2225_vm0, %v2378_v11, 0.0 }
 0x13a   :  { %v2232_v56 = vadd.f32 %v2231_v42, %v2230_v22  ;;  %v2266_v57 = vadd.f32 %v2265_v31, %v2264_v23  ;;  %v2239_v5 = vadd.f32 %v2238_v52, %v2237_v40  ;;  %v2314_v22 = vadd.f32 %v2313_v7, %v2312_v58 }
 0x13b   :  { %v2379_v40 = vmul.f32 %v3698_v12, %v3698_v12  ;;  %v2321_v42 = vadd.f32 %v2320_v16, %v2319_v4  ;;  %v2336_v31 = vrot.slane %v2335_v20, 4 }
 0x13c   :  { %v3749_v13 = vadd.f32 %v2266_v57, %v2232_v56  ;;  %v2396_v56 = vsel %vm2225_vm0, %v3696_v36, 0.0  ;;  %v2315_v58 = vrot.slane %v2314_v22, 2 }
 0x13d   :  { %v2387_v61 = vsel %vm2225_vm0, %v2379_v40, 0.0  ;;  %v2322_v1 = vrot.slane %v2321_v42, 2  ;;  %v2337_v2 = vadd.f32 %v2336_v31, %v2335_v20  ;;  %v2371_v40 = vadd.f32 %v2370_v60, %v2369_v43 }
 0x13e   :  { %v2388_v16 = vrot.slane %v2387_v61, 4 }
 0x13f   :  { %v2323_v31 = vadd.f32 %v2322_v1, %v2321_v42 }
 0x141   :  { %v2324_v43 = vrot.slane %v2323_v31, 1 }
 0x143   :  { %v2325_v27 = vadd.f32 %v2324_v43, %v2323_v31 }
 0x151   :  { %v3710_v47 = vpop.f32.mrf.mxu0  ;;  %v3715_v50 = vpop.f32.mrf.mxu1 }
 0x153   :  { %v3720_v53 = vpop.f32.mrf.mxu0  ;;  %v3726_v0 = vpop.f32.mrf.mxu1 }
 0x155   :  { %v1853_v59 = vpop.f32.mrf.mxu0  ;;  %v1894_v62 = vpop.f32.mrf.mxu1 }
 0x156   :  { %v2344_v59 = vmul.f32 %v3687_v25, %v3687_v25  ;;  %v2295_v62 = vrot.slane %v2294_v49, 4 }
 0x157   :  { %v1854_v3 = vpop.f32.mrf.mxu0  ;;  %v1895_v6 = vpop.f32.mrf.mxu1 }
 0x158   :  { %v2329_v3 = vrot.slane %v2328_v55, 4  ;;  %v2273_v6 = vadd.f32 %v2272_v54, %v2271_v41  ;;  %v2346_v9 = vsel %vm2225_vm0, %v2344_v59, 0.0  ;;  %v2296_v15 = vadd.f32 %v2295_v62, %v2294_v49 }
 0x159   :  { %v2347_v23 = vrot.slane %v2346_v9, 4  ;;  %v2412_v49 = vmul.f32 %v3696_v36, %v3696_v36  ;;  %v2363_v54 = vrot.slane %v2362_v30, 4  ;;  %v2304_v59 = vrot.slane %v2303_v29, 2 }
 0x15a   :  { %v2330_v19 = vadd.f32 %v2329_v3, %v2328_v55  ;;  %v3755_v21 = vadd.f32 %v2273_v6, %v2239_v5  ;;  %v2297_v41 = vrot.slane %v2296_v15, 2  ;;  %v2381_v55 = vrot.slane %v2380_v33, 4 }
 0x15b   :  { %v2348_v52 = vadd.f32 %v2347_v23, %v2346_v9  ;;  %v2413_v3 = vmul.f32 %v3700_v38, %v3700_v38  ;;  %v2355_v5 = vadd.f32 %v2354_v48, %v2353_v28  ;;  %v2397_v6 = vrot.slane %v2396_v56, 4 }
 0x15c   :  { %v2331_v46 = vrot.slane %v2330_v19, 2  ;;  %v2298_v63 = vadd.f32 %v2297_v41, %v2296_v15  ;;  %v2414_v7 = vsel %vm2225_vm0, %v2412_v49, 0.0  ;;  %v2364_v11 = vadd.f32 %v2363_v54, %v2362_v30 }
 0x15d   :  { %v2349_v10 = vrot.slane %v2348_v52, 2  ;;  %v2382_v14 = vadd.f32 %v2381_v55, %v2380_v33  ;;  %v2316_v15 = vadd.f32 %v2315_v58, %v2314_v22  ;;  %v2305_v20 = vadd.f32 %v2304_v59, %v2303_v29 }
 0x15e   :  { %v2332_v23 = vadd.f32 %v2331_v46, %v2330_v19  ;;  %v2404_v28 = vrot.slane %v2403_v8, 4  ;;  %v2421_v48 = vsel %vm2225_vm0, %v2413_v3, 0.0  ;;  %v2299_v49 = vrot.slane %v2298_v63, 1 }
 0x15f   :  { %v2338_v36 = vrot.slane %v2337_v2, 2  ;;  %v2356_v12 = vrot.slane %v2355_v5, 2  ;;  %v2398_v38 = vadd.f32 %v2397_v6, %v2396_v56  ;;  %v2365_v34 = vrot.slane %v2364_v11, 2 }
 0x160   :  { %v2383_v30 = vrot.slane %v2382_v14, 2  ;;  %v2389_v33 = vadd.f32 %v2388_v16, %v2387_v61  ;;  %v2317_v54 = vrot.slane %v2316_v15, 1  ;;  %v2306_v55 = vrot.slane %v2305_v20, 1 }
 0x161   :  { %v2372_v22 = vrot.slane %v2371_v40, 2  ;;  %v2422_v19 = vrot.slane %v2421_v48, 4  ;;  %v2333_v29 = vrot.slane %v2332_v23, 1  ;;  %v2405_v42 = vadd.f32 %v2404_v28, %v2403_v8 }
 0x162   :  { %v2300_v58 = vadd.f32 %v2299_v49, %v2298_v63  ;;  %v2339_v59 = vadd.f32 %v2338_v36, %v2337_v2  ;;  %v2357_v60 = vadd.f32 %v2356_v12, %v2355_v5  ;;  %v2399_v1 = vrot.slane %v2398_v38, 2 }
 0x163   :  { %v2390_v56 = vrot.slane %v2389_v33, 2  ;;  %v2307_v6 = vadd.f32 %v2306_v55, %v2305_v20  ;;  %v2423_v61 = vadd.f32 %v2422_v19, %v2421_v48  ;;  %v2334_v16 = vadd.f32 %v2333_v29, %v2332_v23 }
 0x164   :  { %v2406_v26 = vrot.slane %v2405_v42, 2  ;;  %v2308_v24 = vadd.f32 %v2300_v58, %v3749_v13  ;;  %v2358_v8 = vrot.slane %v2357_v60, 1  ;;  %v2400_v63 = vadd.f32 %v2399_v1, %v2398_v38 }
 0x165   :  { %v2391_v5 = vadd.f32 %v2390_v56, %v2389_v33  ;;  %v2327_v23 = vadd.f32 %v2325_v27, %v3767_v45  ;;  %v2446_v13 = vmul.f32 %v3710_v47, %v3710_v47  ;;  %v2447_v19 = vmul.f32 %v3720_v53, %v3720_v53 }
 0x166   :  { %v2342_v31 = vadd.f32 %v2334_v16, %v2308_v24  ;;  %v2359_v38 = vadd.f32 %v2358_v8, %v2357_v60  ;;  %v2401_v28 = vrot.slane %v2400_v63, 1  ;;  %v2464_v24 = vsel %vm2225_vm0, %v3715_v50, 0.0 }
 0x167   :  { %v2448_v45 = vsel %vm2225_vm0, %v2446_v13, 0.0  ;;  %v2437_v1 = vsel %vm2225_vm0, %v3720_v53, 0.0 }
 0x168   :  { %v2361_v27 = vadd.f32 %v2359_v38, %v2327_v23  ;;  %v2449_v60 = vrot.slane %v2448_v45, 4 }
 0x171   :  { %v3765_v44 = vpop.f32.mrf.mxu0  ;;  %v3771_v51 = vpop.f32.mrf.mxu1 }
 0x172   :  { %v2514_v56 = vmul.f32 %v3765_v44, %v3765_v44 }
 0x173   :  { %v3775_v57 = vpop.f32.mrf.mxu0  ;;  %v3778_v62 = vpop.f32.mrf.mxu1 }
 0x174   :  { %4169 = vst [vmem:[#allocation13_spill] sm:$0xff] %v3778_v62 }
 0x175   :  { %v1935_v4 = vpop.f32.mrf.mxu0  ;;  %v1976_v9 = vpop.f32.mrf.mxu1 }
 0x176   :  { %v2415_v4 = vrot.slane %v2414_v7, 4  ;;  %v2350_v9 = vadd.f32 %v2349_v10, %v2348_v52  ;;  %v2318_v52 = vadd.f32 %v2317_v54, %v2316_v15  ;;  %v2373_v10 = vadd.f32 %v2372_v22, %v2371_v40 }
 0x177   :  { %v1936_v18 = vpop.f32.mrf.mxu0  ;;  %v1977_v41 = vpop.f32.mrf.mxu1  ;;  %v2424_v15 = vrot.slane %v2423_v61, 2  ;;  %v2407_v40 = vadd.f32 %v2406_v26, %v2405_v42  ;;  %v2480_v22 = vmul.f32 %v3715_v50, %v3715_v50 }
 0x178   :  { %v2416_v46 = vadd.f32 %v2415_v4, %v2414_v7  ;;  %v2351_v3 = vrot.slane %v2350_v9, 1  ;;  %v2366_v18 = vadd.f32 %v2365_v34, %v2364_v11  ;;  %v2384_v41 = vadd.f32 %v2383_v30, %v2382_v14 }
 0x179   :  { %v2340_v7 = vrot.slane %v2339_v59, 1  ;;  %v2326_v34 = vadd.f32 %v2318_v52, %v3751_v17  ;;  %v2309_v11 = vadd.f32 %v2307_v6, %v3755_v21  ;;  %v2374_v14 = vrot.slane %v2373_v10, 1 }
 0x17a   :  { %v2417_v25 = vrot.slane %v2416_v46, 2  ;;  %v2352_v36 = vadd.f32 %v2351_v3, %v2350_v9  ;;  %v2367_v12 = vrot.slane %v2366_v18, 1  ;;  %v2385_v2 = vrot.slane %v2384_v41, 1 }
 0x17b   :  { %v2341_v4 = vadd.f32 %v2340_v7, %v2339_v59  ;;  %v2392_v9 = vrot.slane %v2391_v5, 1  ;;  %v2430_v17 = vsel %vm2225_vm0, %v3710_v47, 0.0  ;;  %v2375_v33 = vadd.f32 %v2374_v14, %v2373_v10 }
 0x17c   :  { %v2418_v20 = vadd.f32 %v2417_v25, %v2416_v46  ;;  %v2368_v48 = vadd.f32 %v2367_v12, %v2366_v18  ;;  %v2386_v49 = vadd.f32 %v2385_v2, %v2384_v41  ;;  %v2360_v21 = vadd.f32 %v2352_v36, %v2326_v34 }
 0x17d   :  { %v2343_v30 = vadd.f32 %v2341_v4, %v2309_v11  ;;  %v2425_v54 = vadd.f32 %v2424_v15, %v2423_v61  ;;  %v2408_v26 = vrot.slane %v2407_v40, 1  ;;  %v2431_v55 = vrot.slane %v2430_v17, 4 }
 0x17e   :  { %v2419_v25 = vrot.slane %v2418_v20, 1  ;;  %v2376_v29 = vadd.f32 %v2368_v48, %v2342_v31  ;;  %v2394_v43 = vadd.f32 %v2386_v49, %v2360_v21  ;;  %v2402_v46 = vadd.f32 %v2401_v28, %v2400_v63 }
 0x17f   :  { %v2393_v42 = vadd.f32 %v2392_v9, %v2391_v5  ;;  %v2377_v58 = vadd.f32 %v2375_v33, %v2343_v30  ;;  %v2426_v59 = vrot.slane %v2425_v54, 1  ;;  %v2409_v18 = vadd.f32 %v2408_v26, %v2407_v40 }
 0x180   :  { %v2420_v3 = vadd.f32 %v2419_v25, %v2418_v20  ;;  %v2465_v41 = vrot.slane %v2464_v24, 4  ;;  %v2432_v52 = vadd.f32 %v2431_v55, %v2430_v17  ;;  %v2482_v6 = vsel %vm2225_vm0, %v2480_v22, 0.0 }
 0x181   :  { %v2455_v10 = vsel %vm2225_vm0, %v2447_v19, 0.0  ;;  %v2481_v61 = vmul.f32 %v3726_v0, %v3726_v0  ;;  %v3809_v16 = vadd.f32 %v2402_v46, %v2376_v29  ;;  %v2395_v8 = vadd.f32 %v2393_v42, %v2361_v27 }
 0x182   :  { %v3811_v7 = vadd.f32 %v2420_v3, %v2394_v43  ;;  %v2438_v63 = vrot.slane %v2437_v1, 4  ;;  %v3813_v36 = vadd.f32 %v2409_v18, %v2377_v58  ;;  %v2427_v12 = vadd.f32 %v2426_v59, %v2425_v54 }
 0x183   :  { %v2450_v2 = vadd.f32 %v2449_v60, %v2448_v45  ;;  %v2498_v5 = vsel %vm2225_vm0, %v3765_v44, 0.0  ;;  %v2483_v34 = vrot.slane %v2482_v6, 4  ;;  %v2456_v11 = vrot.slane %v2455_v10, 4 }
 0x184   :  { %v2471_v14 = vsel %vm2225_vm0, %v3726_v0, 0.0  ;;  %v2516_v15 = vsel %vm2225_vm0, %v2514_v56, 0.0  ;;  %v2433_v20 = vrot.slane %v2432_v52, 2  ;;  %v2466_v40 = vadd.f32 %v2465_v41, %v2464_v24 }
 0x185   :  { %v2489_v13 = vsel %vm2225_vm0, %v2481_v61, 0.0  ;;  %v2515_v31 = vmul.f32 %v3775_v57, %v3775_v57  ;;  %v2439_v38 = vadd.f32 %v2438_v63, %v2437_v1  ;;  %v2499_v28 = vrot.slane %v2498_v5, 4 }
 0x186   :  { %v2532_v48 = vsel %vm2225_vm0, %v3771_v51, 0.0  ;;  %v2548_v49 = vmul.f32 %v3771_v51, %v3771_v51  ;;  %v2451_v17 = vrot.slane %v2450_v2, 2  ;;  %v2472_v21 = vrot.slane %v2471_v14, 4 }
 0x187   :  { %v2517_v30 = vrot.slane %v2516_v15, 4  ;;  %v2505_v33 = vsel %vm2225_vm0, %v3775_v57, 0.0  ;;  %v3837_v27 = vadd.f32 %v2427_v12, %v2395_v8  ;;  %v2484_v25 = vadd.f32 %v2483_v34, %v2482_v6 }
 0x188   :  { %v2457_v26 = vadd.f32 %v2456_v11, %v2455_v10  ;;  %v2490_v45 = vrot.slane %v2489_v13, 4  ;;  %v2434_v24 = vadd.f32 %v2433_v20, %v2432_v52  ;;  %v2467_v22 = vrot.slane %v2466_v40, 2 }
 0x189   :  { %v2533_v19 = vrot.slane %v2532_v48, 4  ;;  %v2523_v29 = vsel %vm2225_vm0, %v2515_v31, 0.0  ;;  %v2440_v46 = vrot.slane %v2439_v38, 2  ;;  %v2500_v42 = vadd.f32 %v2499_v28, %v2498_v5 }
 0x18a   :  { %v2550_v58 = vsel %vm2225_vm0, %v2548_v49, 0.0  ;;  %v2506_v59 = vrot.slane %v2505_v33, 4  ;;  %v2452_v1 = vadd.f32 %v2451_v17, %v2450_v2  ;;  %v2473_v3 = vadd.f32 %v2472_v21, %v2471_v14 }
 0x18b   :  { %v2518_v18 = vadd.f32 %v2517_v30, %v2516_v15  ;;  %v2539_v41 = vsel %vm2225_vm0, %v3778_v62, 0.0  ;;  %v2485_v6 = vrot.slane %v2484_v25, 2  ;;  %v2458_v52 = vrot.slane %v2457_v26, 2 }
 0x18c   :  { %v2491_v10 = vadd.f32 %v2490_v45, %v2489_v13  ;;  %v2524_v61 = vrot.slane %v2523_v29, 4  ;;  %v2435_v8 = vrot.slane %v2434_v24, 1  ;;  %v2534_v63 = vadd.f32 %v2533_v19, %v2532_v48 }
 0x18d   :  { %v2551_v12 = vrot.slane %v2550_v58, 4  ;;  %v2549_v5 = vmul.f32 %v3778_v62, %v3778_v62  ;;  %v2441_v34 = vadd.f32 %v2440_v46, %v2439_v38  ;;  %v2501_v11 = vrot.slane %v2500_v42, 2 }
 0x18e   :  { %v2507_v20 = vadd.f32 %v2506_v59, %v2505_v33  ;;  %v2540_v2 = vrot.slane %v2539_v41, 4  ;;  %v2453_v14 = vrot.slane %v2452_v1, 1  ;;  %v2468_v15 = vadd.f32 %v2467_v22, %v2466_v40 }
 0x18f   :  { %v2474_v31 = vrot.slane %v2473_v3, 2  ;;  %v2519_v28 = vrot.slane %v2518_v18, 2  ;;  %v2486_v49 = vadd.f32 %v2485_v6, %v2484_v25  ;;  %v2459_v17 = vadd.f32 %v2458_v52, %v2457_v26 }
 0x190   :  { %v2492_v21 = vrot.slane %v2491_v10, 2  ;;  %v2525_v30 = vadd.f32 %v2524_v61, %v2523_v29  ;;  %v2436_v13 = vadd.f32 %v2435_v8, %v2434_v24  ;;  %v2535_v45 = vrot.slane %v2534_v63, 2 }
 0x191   :  { %v3820_v23 = vpop.f32.mrf.mxu0  ;;  %v3825_v4 = vpop.f32.mrf.mxu1  ;;  %v2557_v48 = vsel %vm2225_vm0, %v2549_v5, 0.0  ;;  %v2442_v19 = vrot.slane %v2441_v34, 1  ;;  %v2541_v38 = vadd.f32 %v2540_v2, %v2539_v41  ;;  %v2454_v46 = vadd.f32 %v2453_v14, %v2452_v1 }
 0x192   :  { %4170 = vst [vmem:[#allocation14_spill] sm:$0xff] %v3825_v4  ;;  %v2469_v33 = vrot.slane %v2468_v15, 1  ;;  %v2475_v59 = vadd.f32 %v2474_v31, %v2473_v3  ;;  %v2460_v40 = vrot.slane %v2459_v17, 1  ;;  %v2493_v22 = vadd.f32 %v2492_v21, %v2491_v10 }
 0x193   :  { %v3831_v9 = vpop.f32.mrf.mxu0  ;;  %v3835_v54 = vpop.f32.mrf.mxu1  ;;  %v2526_v62 = vrot.slane %v2525_v30, 2  ;;  %v2558_v25 = vrot.slane %v2557_v48, 4  ;;  %v2444_v26 = vadd.f32 %v2436_v13, %v3809_v16  ;;  %v2487_v29 = vrot.slane %v2486_v49, 1 }
 0x194   :  { %4171 = vst [vmem:[#allocation15_spill] sm:$0xff] %v3831_v9  ;;  %4172 = vst [vmem:[#allocation16_spill] sm:$0xff] %v3835_v54  ;;  %v2536_v24 = vadd.f32 %v2535_v45, %v2534_v63  ;;  %v2542_v8 = vrot.slane %v2541_v38, 2  ;;  %v2470_v41 = vadd.f32 %v2469_v33, %v2468_v15  ;;  %v2476_v1 = vrot.slane %v2475_v59, 1 }
 0x195   :  { %v2017_v55 = vpop.f32.mrf.mxu0  ;;  %v2058_v43 = vpop.f32.mrf.mxu1  ;;  %v2461_v3 = vadd.f32 %v2460_v40, %v2459_v17  ;;  %v2527_v5 = vadd.f32 %v2526_v62, %v2525_v30  ;;  %v2559_v10 = vadd.f32 %v2558_v25, %v2557_v48  ;;  %v2488_v2 = vadd.f32 %v2487_v29, %v2486_v49 }
 0x196   :  { %v2552_v55 = vadd.f32 %v2551_v12, %v2550_v58  ;;  %v2502_v43 = vadd.f32 %v2501_v11, %v2500_v42  ;;  %v2443_v58 = vadd.f32 %v2442_v19, %v2441_v34  ;;  %v2462_v42 = vadd.f32 %v2454_v46, %v3811_v7 }
 0x197   :  { %v2018_v60 = vpop.f32.mrf.mxu0  ;;  %v2059_v56 = vpop.f32.mrf.mxu1  ;;  %v2478_v11 = vadd.f32 %v2470_v41, %v2444_v26  ;;  %v2537_v14 = vrot.slane %v2536_v24, 1  ;;  %v2477_v21 = vadd.f32 %v2476_v1, %v2475_v59  ;;  %v2582_v7 = vmul.f32 %v3820_v23, %v3820_v23 }
 0x198   :  { %v2508_v60 = vrot.slane %v2507_v20, 2  ;;  %v2520_v56 = vadd.f32 %v2519_v28, %v2518_v18  ;;  %v2553_v6 = vrot.slane %v2552_v55, 2  ;;  %v2503_v52 = vrot.slane %v2502_v43, 1 }
 0x199   :  { %v2494_v18 = vrot.slane %v2493_v22, 1  ;;  %v2445_v63 = vadd.f32 %v2443_v58, %v3813_v36  ;;  %v2543_v28 = vadd.f32 %v2542_v8, %v2541_v38  ;;  %v2463_v15 = vadd.f32 %v2461_v3, %v3837_v27 }
 0x19a   :  { %v2509_v61 = vadd.f32 %v2508_v60, %v2507_v20  ;;  %v2521_v12 = vrot.slane %v2520_v56, 1  ;;  %v2554_v16 = vadd.f32 %v2553_v6, %v2552_v55  ;;  %v2504_v31 = vadd.f32 %v2503_v52, %v2502_v43 }
 0x19b   :  { %v2496_v20 = vadd.f32 %v2488_v2, %v2462_v42  ;;  %v2495_v17 = vadd.f32 %v2494_v18, %v2493_v22  ;;  %v2528_v62 = vrot.slane %v2527_v5, 1  ;;  %v2560_v30 = vrot.slane %v2559_v10, 2 }
 0x19c   :  { %v2510_v34 = vrot.slane %v2509_v61, 1  ;;  %v2522_v13 = vadd.f32 %v2521_v12, %v2520_v56  ;;  %v2538_v45 = vadd.f32 %v2537_v14, %v2536_v24  ;;  %v2555_v49 = vrot.slane %v2554_v16, 1 }
 0x19d   :  { %v2566_v55 = vsel %vm2225_vm0, %v3820_v23, 0.0  ;;  %v2600_v36 = vsel %vm2225_vm0, %v3825_v4, 0.0  ;;  %v2512_v48 = vadd.f32 %v2504_v31, %v2478_v11  ;;  %v2544_v43 = vrot.slane %v2543_v28, 1 }
 0x19e   :  { %v2511_v19 = vadd.f32 %v2510_v34, %v2509_v61  ;;  %v2616_v60 = vmul.f32 %v3825_v4, %v3825_v4  ;;  %v2530_v38 = vadd.f32 %v2522_v13, %v2496_v20  ;;  %v2584_v27 = vsel %vm2225_vm0, %v2582_v7, 0.0 }
 0x19f   :  { %v2573_v46 = vsel %vm2225_vm0, %v3831_v9, 0.0  ;;  %v2583_v33 = vmul.f32 %v3831_v9, %v3831_v9  ;;  %v2529_v59 = vadd.f32 %v2528_v62, %v2527_v5  ;;  %v2561_v56 = vadd.f32 %v2560_v30, %v2559_v10 }
 0x1a0   :  { %v2567_v40 = vrot.slane %v2566_v55, 4  ;;  %v2601_v22 = vrot.slane %v2600_v36, 4  ;;  %v2479_v25 = vadd.f32 %v2477_v21, %v2445_v63  ;;  %v2497_v26 = vadd.f32 %v2495_v17, %v2463_v15 }
 0x1a1   :  { %v2556_v29 = vadd.f32 %v2555_v49, %v2554_v16  ;;  %v3863_v24 = vadd.f32 %v2538_v45, %v2512_v48  ;;  %v2585_v6 = vrot.slane %v2584_v27, 4  ;;  %v2618_v58 = vsel %vm2225_vm0, %v2616_v60, 0.0 }
 0x1a2   :  { %v2574_v52 = vrot.slane %v2573_v46, 4  ;;  %v2513_v8 = vadd.f32 %v2511_v19, %v2479_v25  ;;  %v2545_v42 = vadd.f32 %v2544_v43, %v2543_v28  ;;  %v2591_v41 = vsel %vm2225_vm0, %v2583_v33, 0.0 }
 0x1a3   :  { %v3866_v61 = vadd.f32 %v2556_v29, %v2530_v38  ;;  %v3869_v1 = vadd.f32 %v2529_v59, %v2497_v26  ;;  %v2562_v12 = vrot.slane %v2561_v56, 1  ;;  %v2568_v3 = vadd.f32 %v2567_v40, %v2566_v55 }
 0x1a4   :  { %v2602_v18 = vadd.f32 %v2601_v22, %v2600_v36  ;;  %v2619_v10 = vrot.slane %v2618_v58, 4  ;;  %v2607_v11 = vsel %vm2225_vm0, %v3835_v54, 0.0  ;;  %v2586_v63 = vadd.f32 %v2585_v6, %v2584_v27 }
 0x1a5   :  { %v2575_v31 = vadd.f32 %v2574_v52, %v2573_v46  ;;  %v2592_v34 = vrot.slane %v2591_v41, 4  ;;  %v2617_v28 = vmul.f32 %v3835_v54, %v3835_v54  ;;  %v3894_v62 = vadd.f32 %v2545_v42, %v2513_v8 }
 0x1a6   :  { %v2569_v30 = vrot.slane %v2568_v3, 2  ;;  %v3896_v36 = vadd.f32 %v2562_v12, %v2561_v56  ;;  %v2603_v48 = vrot.slane %v2602_v18, 2  ;;  %v2608_v19 = vrot.slane %v2607_v11, 4 }
 0x1a7   :  { %v2587_v38 = vrot.slane %v2586_v63, 2  ;;  %v2620_v27 = vadd.f32 %v2619_v10, %v2618_v58  ;;  %v2625_v46 = vsel %vm2225_vm0, %v2617_v28, 0.0  ;;  %v2576_v40 = vrot.slane %v2575_v31, 2 }
 0x1a8   :  { %v2593_v22 = vadd.f32 %v2592_v34, %v2591_v41  ;;  %v2570_v29 = vadd.f32 %v2569_v30, %v2568_v3  ;;  %v2609_v58 = vadd.f32 %v2608_v19, %v2607_v11  ;;  %v2626_v42 = vrot.slane %v2625_v46, 4 }
 0x1a9   :  { %v2604_v28 = vadd.f32 %v2603_v48, %v2602_v18  ;;  %v2577_v34 = vadd.f32 %v2576_v40, %v2575_v31 }
 0x1aa   :  { %v2571_v3 = vrot.slane %v2570_v29, 1 }
 0x1ab   :  { %v2578_v48 = vrot.slane %v2577_v34, 1 }
 0x1ac   :  { %v2572_v40 = vadd.f32 %v2571_v3, %v2570_v29 }
 0x1b1   :  { %v3871_v5 = vpop.f32.mrf.mxu0  ;;  %v3879_v16 = vpop.f32.mrf.mxu1 }
 0x1b2   :  { %4173 = vst [vmem:[#allocation17_spill] sm:$0xff] %v3871_v5  ;;  %v2634_v2 = vsel %vm2225_vm0, %v3871_v5, 0.0  ;;  %v2650_v14 = vmul.f32 %v3871_v5, %v3871_v5  ;;  %4174 = vst [vmem:[#allocation18_spill] sm:$0xff] %v3879_v16  ;;  %v2684_v13 = vmul.f32 %v3879_v16, %v3879_v16  ;;  %v2668_v25 = vsel %vm2225_vm0, %v3879_v16, 0.0 }
 0x1b3   :  { %v3883_v20 = vpop.f32.mrf.mxu0  ;;  %v3892_v17 = vpop.f32.mrf.mxu1  ;;  %v2635_v45 = vrot.slane %v2634_v2, 4 }
 0x1b4   :  { %4175 = vst [vmem:[#allocation19_spill] sm:$0xff] %v3883_v20  ;;  %v2652_v21 = vsel %vm2225_vm0, %v2650_v14, 0.0  ;;  %v2641_v7 = vsel %vm2225_vm0, %v3883_v20, 0.0  ;;  %v2651_v15 = vmul.f32 %v3883_v20, %v3883_v20  ;;  %4176 = vst [vmem:[#allocation20_spill] sm:$0xff] %v3892_v17  ;;  %v2686_v26 = vsel %vm2225_vm0, %v2684_v13, 0.0 }
 0x1b5   :  { %v2653_v49 = vrot.slane %v2652_v21, 4  ;;  %v2099_v55 = vpop.f32.mrf.mxu0  ;;  %v2642_v43 = vrot.slane %v2641_v7, 4  ;;  %v2140_v60 = vpop.f32.mrf.mxu1  ;;  %v2636_v6 = vadd.f32 %v2635_v45, %v2634_v2  ;;  %v2675_v8 = vsel %vm2225_vm0, %v3892_v17, 0.0 }
 0x1b6   :  { %v2659_v33 = vsel %vm2225_vm0, %v2651_v15, 0.0  ;;  %v2588_v14 = vadd.f32 %v2587_v38, %v2586_v63  ;;  %v2669_v15 = vrot.slane %v2668_v25, 4  ;;  %v2687_v41 = vrot.slane %v2686_v26, 4 }
 0x1b7   :  { %v2100_v59 = vpop.f32.mrf.mxu0  ;;  %v2141_v56 = vpop.f32.mrf.mxu1  ;;  %v2654_v52 = vadd.f32 %v2653_v49, %v2652_v21  ;;  %v2643_v12 = vadd.f32 %v2642_v43, %v2641_v7  ;;  %v2660_v10 = vrot.slane %v2659_v33, 4  ;;  %v2594_v55 = vrot.slane %v2593_v22, 2 }
 0x1b8   :  { %v2676_v60 = vrot.slane %v2675_v8, 4  ;;  %v2685_v13 = vmul.f32 %v3892_v17, %v3892_v17  ;;  %v2621_v2 = vrot.slane %v2620_v27, 2  ;;  %v2637_v21 = vrot.slane %v2636_v6, 2 }
 0x1b9   :  { %v2655_v30 = vrot.slane %v2654_v52, 2  ;;  %v2610_v45 = vrot.slane %v2609_v58, 2  ;;  %v2627_v49 = vadd.f32 %v2626_v42, %v2625_v46  ;;  %v2644_v11 = vrot.slane %v2643_v12, 2 }
 0x1ba   :  { %v2661_v19 = vadd.f32 %v2660_v10, %v2659_v33  ;;  %v2589_v7 = vrot.slane %v2588_v14, 1  ;;  %v2605_v43 = vrot.slane %v2604_v28, 1  ;;  %v2670_v63 = vadd.f32 %v2669_v15, %v2668_v25 }
 0x1bb   :  { %v2688_v18 = vadd.f32 %v2687_v41, %v2686_v26  ;;  %v2595_v38 = vadd.f32 %v2594_v55, %v2593_v22  ;;  %v2677_v31 = vadd.f32 %v2676_v60, %v2675_v8  ;;  %v2693_v59 = vsel %vm2225_vm0, %v2685_v13, 0.0 }
 0x1bc   :  { %v2622_v56 = vadd.f32 %v2621_v2, %v2620_v27  ;;  %v2638_v17 = vadd.f32 %v2637_v21, %v2636_v6  ;;  %v2656_v16 = vadd.f32 %v2655_v30, %v2654_v52  ;;  %v2611_v20 = vadd.f32 %v2610_v45, %v2609_v58 }
 0x1bd   :  { %v2628_v5 = vrot.slane %v2627_v49, 2  ;;  %v2645_v54 = vadd.f32 %v2644_v11, %v2643_v12  ;;  %v2662_v4 = vrot.slane %v2661_v19, 2  ;;  %v2590_v46 = vadd.f32 %v2589_v7, %v2588_v14 }
 0x1be   :  { %v2671_v42 = vrot.slane %v2670_v63, 2  ;;  %v2689_v33 = vrot.slane %v2688_v18, 2  ;;  %v2694_v10 = vrot.slane %v2693_v59, 4  ;;  %v2606_v9 = vadd.f32 %v2605_v43, %v2604_v28 }
 0x1bf   :  { %v2579_v25 = vadd.f32 %v2578_v48, %v2577_v34  ;;  %v2596_v26 = vrot.slane %v2595_v38, 1  ;;  %v2678_v15 = vrot.slane %v2677_v31, 2  ;;  %v2580_v22 = vadd.f32 %v2572_v40, %v3863_v24 }
 0x1c0   :  { %v2623_v8 = vrot.slane %v2622_v56, 1  ;;  %v2639_v41 = vrot.slane %v2638_v17, 1  ;;  %v2657_v29 = vrot.slane %v2656_v16, 1  ;;  %v2612_v27 = vrot.slane %v2611_v20, 1 }
 0x1c1   :  { %v2629_v6 = vadd.f32 %v2628_v5, %v2627_v49  ;;  %v2646_v52 = vrot.slane %v2645_v54, 1  ;;  %v2663_v58 = vadd.f32 %v2662_v4, %v2661_v19  ;;  %v2598_v12 = vadd.f32 %v2590_v46, %v3866_v61 }
 0x1c2   :  { %v2672_v55 = vadd.f32 %v2671_v42, %v2670_v63  ;;  %v2690_v14 = vadd.f32 %v2689_v33, %v2688_v18  ;;  %v2695_v60 = vadd.f32 %v2694_v10, %v2693_v59  ;;  %v2565_v28 = vadd.f32 %v3896_v36, %v3869_v1 }
 0x1c3   :  { %v2581_v34 = vadd.f32 %v2579_v25, %v3894_v62  ;;  %v2597_v13 = vadd.f32 %v2596_v26, %v2595_v38  ;;  %v2679_v3 = vadd.f32 %v2678_v15, %v2677_v31  ;;  %v2614_v24 = vadd.f32 %v2606_v9, %v2580_v22 }
 0x1c4   :  { %v2624_v2 = vadd.f32 %v2623_v8, %v2622_v56  ;;  %v2640_v21 = vadd.f32 %v2639_v41, %v2638_v17  ;;  %v2658_v30 = vadd.f32 %v2657_v29, %v2656_v16  ;;  %v2613_v45 = vadd.f32 %v2612_v27, %v2611_v20 }
 0x1c5   :  { %v2630_v5 = vrot.slane %v2629_v6, 1  ;;  %v2647_v49 = vadd.f32 %v2646_v52, %v2645_v54  ;;  %v2664_v4 = vrot.slane %v2663_v58, 1  ;;  %v2673_v61 = vrot.slane %v2672_v55, 1 }
 0x1c6   :  { %v2632_v11 = vadd.f32 %v2624_v2, %v2598_v12  ;;  %v2691_v19 = vrot.slane %v2690_v14, 1  ;;  %v2696_v7 = vrot.slane %v2695_v60, 2  ;;  %v2599_v43 = vadd.f32 %v2597_v13, %v2565_v28 }
 0x1c7   :  { %v2615_v63 = vadd.f32 %v2613_v45, %v2581_v34  ;;  %v2680_v18 = vrot.slane %v2679_v3, 1  ;;  %v2648_v1 = vadd.f32 %v2640_v21, %v2614_v24  ;;  %v2631_v62 = vadd.f32 %v2630_v5, %v2629_v6 }
 0x1c8   :  { %v2666_v36 = vadd.f32 %v2658_v30, %v2632_v11  ;;  %v2665_v38 = vadd.f32 %v2664_v4, %v2663_v58  ;;  %v2674_v9 = vadd.f32 %v2673_v61, %v2672_v55  ;;  %v2692_v31 = vadd.f32 %v2691_v19, %v2690_v14 }
 0x1c9   :  { %v2649_v48 = vadd.f32 %v2647_v49, %v2615_v63  ;;  %v3913_v17 = vadd.f32 %v2696_v7, %v2695_v60  ;;  %v2633_v16 = vadd.f32 %v2631_v62, %v2599_v43  ;;  %v2681_v20 = vadd.f32 %v2680_v18, %v2679_v3 }
 0x1ca   :  { %v2682_v54 = vadd.f32 %v2674_v9, %v2648_v1  ;;  %v3915_v59 = vadd.f32 %v2692_v31, %v2666_v36 }
 0x1cb   :  { %v3919_v56 = vadd.f32 %v2665_v38, %v2633_v16  ;;  %v3921_v46 = vadd.f32 %v2681_v20, %v2649_v48  ;;  %v2698_v25 = vrot.slane %v3913_v17, 1 }
 0x1d1   :  { %v3917_v40 = vpop.f32.mrf.mxu0  ;;  %v3927_v10 = vpop.f32.mrf.mxu1 }
 0x1d2   :  { %v2702_v42 = vsel %vm2225_vm0, %v3917_v40, 0.0  ;;  %v2718_v33 = vmul.f32 %v3917_v40, %v3917_v40  ;;  %v2736_v15 = vsel %vm2225_vm0, %v3927_v10, 0.0  ;;  %v2752_v22 = vmul.f32 %v3927_v10, %v3927_v10 }
 0x1d3   :  { %v2703_v26 = vrot.slane %v2702_v42, 4  ;;  %v3934_v8 = vpop.f32.mrf.mxu0  ;;  %v2737_v29 = vrot.slane %v2736_v15, 4  ;;  %v3941_v52 = vpop.f32.mrf.mxu1 }
 0x1d4   :  { %v2720_v41 = vsel %vm2225_vm0, %v2718_v33, 0.0  ;;  %v2709_v27 = vsel %vm2225_vm0, %v3934_v8, 0.0  ;;  %v2719_v6 = vmul.f32 %v3934_v8, %v3934_v8  ;;  %v2754_v55 = vsel %vm2225_vm0, %v2752_v22, 0.0 }
 0x1d5   :  { %v2704_v58 = vadd.f32 %v2703_v26, %v2702_v42  ;;  %v2721_v12 = vrot.slane %v2720_v41, 4  ;;  %v2710_v14 = vrot.slane %v2709_v27, 4  ;;  %v2181_v60 = vpop.f32.mrf.mxu0  ;;  %v2738_v28 = vadd.f32 %v2737_v29, %v2736_v15  ;;  %v2222_v24 = vpop.f32.mrf.mxu1 }
 0x1d6   :  { %v2755_v34 = vrot.slane %v2754_v55, 4  ;;  %v2727_v13 = vsel %vm2225_vm0, %v2719_v6, 0.0  ;;  %v2743_v3 = vsel %vm2225_vm0, %v3941_v52, 0.0  ;;  %v2753_v61 = vmul.f32 %v3941_v52, %v3941_v52 }
 0x1d7   :  { %v2705_v2 = vrot.slane %v2704_v58, 2  ;;  %v2722_v21 = vadd.f32 %v2721_v12, %v2720_v41  ;;  %v2711_v30 = vadd.f32 %v2710_v14, %v2709_v27  ;;  %v2728_v45 = vrot.slane %v2727_v13, 4  ;;  %v2182_v5 = vpop.f32.mrf.mxu0  ;;  %v2223_v19 = vpop.f32.mrf.mxu1 }
 0x1d8   :  { %v2739_v49 = vrot.slane %v2738_v28, 2  ;;  %v2756_v4 = vadd.f32 %v2755_v34, %v2754_v55  ;;  %v2744_v11 = vrot.slane %v2743_v3, 4  ;;  %v2761_v48 = vsel %vm2225_vm0, %v2753_v61, 0.0 }
 0x1d9   :  { %v2706_v7 = vadd.f32 %v2705_v2, %v2704_v58  ;;  %v2723_v43 = vrot.slane %v2722_v21, 2  ;;  %v2712_v63 = vrot.slane %v2711_v30, 2  ;;  %v2729_v18 = vadd.f32 %v2728_v45, %v2727_v13 }
 0x1da   :  { %v2740_v1 = vadd.f32 %v2739_v49, %v2738_v28  ;;  %v2757_v36 = vrot.slane %v2756_v4, 2  ;;  %v2745_v62 = vadd.f32 %v2744_v11, %v2743_v3  ;;  %v2762_v26 = vrot.slane %v2761_v48, 4 }
 0x1db   :  { %v2707_v38 = vrot.slane %v2706_v7, 1  ;;  %v2724_v9 = vadd.f32 %v2723_v43, %v2722_v21  ;;  %v2713_v31 = vadd.f32 %v2712_v63, %v2711_v30  ;;  %v2730_v16 = vrot.slane %v2729_v18, 2 }
 0x1dc   :  { %v2741_v20 = vrot.slane %v2740_v1, 1  ;;  %v2758_v42 = vadd.f32 %v2757_v36, %v2756_v4  ;;  %v2746_v33 = vrot.slane %v2745_v62, 2  ;;  %v2763_v12 = vadd.f32 %v2762_v26, %v2761_v48 }
 0x1dd   :  { %v2708_v15 = vadd.f32 %v2707_v38, %v2706_v7  ;;  %v2725_v22 = vrot.slane %v2724_v9, 1  ;;  %v2714_v41 = vrot.slane %v2713_v31, 1  ;;  %v2731_v29 = vadd.f32 %v2730_v16, %v2729_v18 }
 0x1de   :  { %v2742_v27 = vadd.f32 %v2741_v20, %v2740_v1  ;;  %v2759_v6 = vrot.slane %v2758_v42, 1  ;;  %v2747_v58 = vadd.f32 %v2746_v33, %v2745_v62  ;;  %v2699_v34 = vadd.f32 %v2698_v25, %v3913_v17 }
 0x1df   :  { %v2716_v55 = vadd.f32 %v2708_v15, %v2682_v54  ;;  %v2726_v14 = vadd.f32 %v2725_v22, %v2724_v9  ;;  %v2715_v60 = vadd.f32 %v2714_v41, %v2713_v31  ;;  %v2732_v28 = vrot.slane %v2731_v29, 1  ;;  %v2778_v22 = vld [vmem:[%s4142_s2] sm:$0x3] }
 0x1e0   :  { %v2760_v13 = vadd.f32 %v2759_v6, %v2758_v42  ;;  %v2748_v3 = vrot.slane %v2747_v58, 1  ;;  %v2764_v24 = vrot.slane %v2763_v12, 2  ;;  %v2701_v5 = vadd.f32 %v2699_v34, %v3919_v56 }
 0x1e1   :  { %v2734_v2 = vadd.f32 %v2726_v14, %v3915_v59  ;;  %v2750_v21 = vadd.f32 %v2742_v27, %v2716_v55  ;;  %v2717_v30 = vadd.f32 %v2715_v60, %v3921_v46  ;;  %v2733_v45 = vadd.f32 %v2732_v28, %v2731_v29 }
 0x1e2   :  { %v2749_v49 = vadd.f32 %v2748_v3, %v2747_v58  ;;  %v2765_v4 = vadd.f32 %v2764_v24, %v2763_v12  ;;  %v3607_v56 = vmov 1966171168   ;;  %v2789_v9 = vlaneseq  ;;  %v4177_v24 = vld [vmem:[#allocation5_spill] sm:$0xff] }
 0x1e3   :  { %v2768_v11 = vadd.f32 %v2760_v13, %v2734_v2  ;;  %v2770_v54 = vmul.f32 0.03125, %v2750_v21  ;;  %v2735_v61 = vadd.f32 %v2733_v45, %v2701_v5  ;;  %v2787_v38 = vunpack.c.l.s4 %v3607_v56  ;;  %v4179_v5 = vld [vmem:[#allocation6_spill] sm:$0xff] }
 0x1e4   :  { %v2751_v19 = vadd.f32 %v2749_v49, %v2717_v30  ;;  %v2766_v7 = vrot.slane %v2765_v4, 1  ;;  %v2790_v16 = vshrl.u32 %v2789_v9, 7  ;;  %v4178_v30 = vld [vmem:[#allocation7_spill] sm:$0xff] }
 0x1e5   :  { %v2772_v43 = vmul.f32 0.03125, %v2768_v11  ;;  %v2774_v17 = vmul.f32 %v2770_v54, %v2770_v54  ;;  %v2788_v31 = vunpack.c.0.s8 %v2787_v38 }
 0x1e6   :  { %v2767_v25 = vadd.f32 %v2766_v7, %v2765_v4  ;;  %v2771_v63 = vmul.f32 0.03125, %v2751_v19  ;;  %v2806_v29 = vsub.s32 0, %v2790_v16  ;;  %v2810_v27 = vsub.s32 1, %v2790_v16  ;;  %v4180_v4 = vld [vmem:[#allocation8_spill] sm:$0xff]  ;;  %v4183_v19 = vld [vmem:[#allocation10_spill] sm:$0xff] }
 0x1e7   :  { %v2776_v18 = vsub.f32 %v2772_v43, %v2774_v17  ;;  %v3954_v42 = vsub.s32 %v2788_v31, %v2790_v16  ;;  %v4184_v7 = vld [vmem:[#allocation12_spill] sm:$0xff] }
 0x1e8   :  { %v2769_v1 = vadd.f32 %v2767_v25, %v2735_v61  ;;  %v2775_v59 = vmul.f32 %v2771_v63, %v2771_v63  ;;  %v4182_v61 = vld [vmem:[#allocation11_spill] sm:$0xff] }
 0x1e9   :  { %v2779_v62 = vadd.f32 1e-05, %v2776_v18 }
 0x1ea   :  { %v2773_v36 = vmul.f32 0.03125, %v2769_v1 }
 0x1eb   :  { %3576 = vrsqrt.f32 %v2779_v62 }
 0x1ec   :  { %v2777_v46 = vsub.f32 %v2773_v36, %v2775_v59 }
 0x1ee   :  { %v2780_v48 = vadd.f32 1e-05, %v2777_v46 }
 0x1f0   :  { %3578 = vrsqrt.f32 %v2780_v48  ;;  %v4185_v48 = vld [vmem:[#allocation13_spill] sm:$0xff] }
 0x1f8   :  { %v3577_v20 = vpop.eup %3576 }
 0x1fd   :  { %v3579_v33 = vpop.eup %3578 }
 0x1fe   :  { %v2785_v26 = vcombine.low %v3577_v20, %v3579_v33 }
 0x200   :  { %v2792_v15 = vrot.slane %v2785_v26, %v3954_v42 }
 0x202   :  { %v2799_v41 = vrot.slane %v2792_v15, %v3954_v42  ;;  %v4192_v15 = vld [vmem:[#allocation20_spill] sm:$0xff] }
 0x204   :  { %v2801_v6 = vmul.f32 %v2799_v41, %v2778_v22 }
 0x206   :  { %v2807_v58 = vrot.slane %v2801_v6, %v2806_v29  ;;  %v2811_v12 = vrot.slane %v2801_v6, %v2810_v27 }
 0x208   :  { %v2814_v55 = vmul.f32 %v2807_v58, %v2770_v54  ;;  %v2815_v14 = vmul.f32 %v2811_v12, %v2771_v63  ;;  %v2835_v28 = vmul.f32 %v2807_v58, %v3672_v32  ;;  %v2836_v34 = vmul.f32 %v2811_v12, %v3678_v37  ;;  %v2802_v32 = vld [vmem:[%s4143_s3] sm:$0x3] }
 0x209   :  { %v2873_v13 = vmul.f32 %v2807_v58, %v3675_v35  ;;  %v2874_v3 = vmul.f32 %v2811_v12, %v3680_v39  ;;  %v2900_v2 = vmul.f32 %v2807_v58, %v4177_v24  ;;  %v2901_v45 = vmul.f32 %v2811_v12, %v4178_v30  ;;  %v4181_v54 = vld [vmem:[#allocation9_spill] sm:$0xff] }
 0x20a   :  { %v2818_v60 = vcombine.low %v2814_v55, %v2815_v14  ;;  %v2927_v49 = vmul.f32 %v2807_v58, %v4179_v5  ;;  %v2928_v11 = vmul.f32 %v2811_v12, %v4180_v4  ;;  %v2954_v37 = vmul.f32 %v2807_v58, %v4181_v54 }
 0x20b   :  { %v2955_v35 = vmul.f32 %v2811_v12, %v4182_v61  ;;  %v2981_v39 = vmul.f32 %v2807_v58, %v4183_v19  ;;  %v2982_v43 = vmul.f32 %v2811_v12, %v4184_v7  ;;  %v3008_v25 = vmul.f32 %v2807_v58, %v3710_v47  ;;  %v4186_v47 = vld [vmem:[#allocation15_spill] sm:$0xff] }
 0x20c   :  { %v2825_v21 = vrot.slane %v2818_v60, %v3954_v42  ;;  %v3009_v63 = vmul.f32 %v2811_v12, %v3720_v53  ;;  %v3035_v18 = vmul.f32 %v2807_v58, %v3715_v50  ;;  %v3036_v1 = vmul.f32 %v2811_v12, %v3726_v0  ;;  %v4187_v50 = vld [vmem:[#allocation14_spill] sm:$0xff]  ;;  %v4188_v0 = vld [vmem:[#allocation16_spill] sm:$0xff] }
 0x20d   :  { %v3062_v59 = vmul.f32 %v2807_v58, %v3765_v44  ;;  %v3063_v36 = vmul.f32 %v2811_v12, %v3775_v57  ;;  %v3985_v62 = vmul.f32 %v2807_v58, %v3771_v51  ;;  %v3988_v56 = vmul.f32 %v2811_v12, %v4185_v48  ;;  %v4189_v57 = vld [vmem:[#allocation17_spill] sm:$0xff]  ;;  %v4190_v51 = vld [vmem:[#allocation19_spill] sm:$0xff] }
 0x20e   :  { %v2832_v17 = vrot.slane %v2825_v21, %v3954_v42  ;;  %v3991_v38 = vmul.f32 %v2807_v58, %v3820_v23  ;;  %v3994_v53 = vmul.f32 %v2811_v12, %v4186_v47  ;;  %v3997_v9 = vmul.f32 %v2807_v58, %v4187_v50  ;;  %v4191_v23 = vld [vmem:[#allocation18_spill] sm:$0xff] }
 0x20f   :  { %v4000_v44 = vmul.f32 %v2811_v12, %v4188_v0  ;;  %v4003_v31 = vmul.f32 %v2807_v58, %v4189_v57  ;;  %v4006_v16 = vmul.f32 %v2811_v12, %v4190_v51  ;;  %v4013_v26 = vmul.f32 %v2807_v58, %v4191_v23 }
 0x210   :  { %v2834_v46 = vsub.f32 %v2802_v32, %v2832_v17  ;;  %v4016_v22 = vmul.f32 %v2811_v12, %v4192_v15  ;;  %v4019_v41 = vmul.f32 %v2807_v58, %v3917_v40  ;;  %v4022_v6 = vmul.f32 %v2811_v12, %v3934_v8 }
 0x211   :  { %v4025_v55 = vmul.f32 %v2807_v58, %v3927_v10 }
 0x212   :  { %v4008_v20 = vrot.slane %v2834_v46, %v2806_v29  ;;  %v4010_v33 = vrot.slane %v2834_v46, %v2810_v27  ;;  %v4028_v29 = vmul.f32 %v2811_v12, %v3941_v52 }
 0x214   :  { %v2848_v27 = vadd.f32 %v4008_v20, %v2835_v28  ;;  %v2849_v14 = vadd.f32 %v4010_v33, %v2836_v34  ;;  %v2875_v60 = vadd.f32 %v2873_v13, %v4008_v20  ;;  %v2876_v24 = vadd.f32 %v2874_v3, %v4010_v33 }
 0x215   :  { %v2902_v40 = vadd.f32 %v2900_v2, %v4008_v20  ;;  %v2903_v21 = vadd.f32 %v2901_v45, %v4010_v33  ;;  %v2929_v8 = vadd.f32 %v2927_v49, %v4008_v20  ;;  %v2930_v10 = vadd.f32 %v2928_v11, %v4010_v33 }
 0x216   :  { %v2850_v58 = vmax.f32 %v2848_v27, 0.0  ;;  %v2851_v30 = vmax.f32 %v2849_v14, 0.0  ;;  %v2877_v52 = vmax.f32 %v2875_v60, 0.0  ;;  %v2878_v12 = vmax.f32 %v2876_v24, 0.0 }
 0x217   :  { %v2904_v5 = vmax.f32 %v2902_v40, 0.0  ;;  %v2905_v28 = vmax.f32 %v2903_v21, 0.0  ;;  %v2931_v4 = vmax.f32 %v2929_v8, 0.0  ;;  %v2932_v34 = vmax.f32 %v2930_v10, 0.0 }
 0x218   :  { %v3539_v32 = vpack.c.bf16 %v2851_v30, %v2850_v58  ;;  %v3541_v13 = vpack.c.bf16 %v2878_v12, %v2877_v52  ;;  %v2956_v3 = vadd.f32 %v2954_v37, %v4008_v20  ;;  %v2957_v2 = vadd.f32 %v2955_v35, %v4010_v33 }
 0x219   :  { %v3543_v54 = vpack.c.bf16 %v2905_v28, %v2904_v5  ;;  %v3545_v45 = vpack.c.bf16 %v2932_v34, %v2931_v4  ;;  %v2983_v49 = vadd.f32 %v2981_v39, %v4008_v20  ;;  %v2984_v11 = vadd.f32 %v2982_v43, %v4010_v33 }
 0x21a   :  { %v2863_v61 = vrot.slane %v3539_v32, %v3954_v42  ;;  %v2890_v19 = vrot.slane %v3541_v13, %v3954_v42  ;;  %v2958_v7 = vmax.f32 %v2956_v3, 0.0  ;;  %v2959_v17 = vmax.f32 %v2957_v2, 0.0 }
 0x21b   :  { %v2917_v46 = vrot.slane %v3543_v54, %v3954_v42  ;;  %v2944_v48 = vrot.slane %v3545_v45, %v3954_v42  ;;  %v2985_v47 = vmax.f32 %v2983_v49, 0.0  ;;  %v2986_v37 = vmax.f32 %v2984_v11, 0.0 }
 0x21c   :  { %3540 = vst.sshfl [vmem:[%s4144_s4] sm:$0x5 pattern:$0x73625140] %v2863_v61  ;;  %v3547_v35 = vpack.c.bf16 %v2959_v17, %v2958_v7  ;;  %v3010_v39 = vadd.f32 %v3008_v25, %v4008_v20  ;;  %v3011_v43 = vadd.f32 %v3009_v63, %v4010_v33  ;;  %v3037_v50 = vadd.f32 %v3035_v18, %v4008_v20 }
 0x21d   :  { %3542 = vst.sshfl [vmem:[%s4144_s4 + $0x2] sm:$0x5 pattern:$0x73625140] %v2890_v19  ;;  %v3549_v0 = vpack.c.bf16 %v2986_v37, %v2985_v47  ;;  %v3038_v57 = vadd.f32 %v3036_v1, %v4010_v33  ;;  %v3064_v51 = vadd.f32 %v3062_v59, %v4008_v20  ;;  %v3065_v23 = vadd.f32 %v3063_v36, %v4010_v33 }
 0x21e   :  { %3544 = vst.sshfl [vmem:[%s4144_s4 + $0x4] sm:$0x5 pattern:$0x73625140] %v2917_v46  ;;  %v2971_v25 = vrot.slane %v3547_v35, %v3954_v42  ;;  %v3012_v63 = vmax.f32 %v3010_v39, 0.0  ;;  %v3013_v15 = vmax.f32 %v3011_v43, 0.0  ;;  %v3091_v1 = vadd.f32 %v3985_v62, %v4008_v20 }
 0x21f   :  { %3546 = vst.sshfl [vmem:[%s4144_s4 + $0x6] sm:$0x5 pattern:$0x73625140] %v2944_v48  ;;  %v3039_v18 = vmax.f32 %v3037_v50, 0.0  ;;  %v2998_v27 = vrot.slane %v3549_v0, %v3954_v42  ;;  %v3040_v14 = vmax.f32 %v3038_v57, 0.0  ;;  %v3092_v59 = vadd.f32 %v3988_v56, %v4010_v33 }
 0x220   :  { %v3066_v60 = vmax.f32 %v3064_v51, 0.0  ;;  %v3067_v24 = vmax.f32 %v3065_v23, 0.0  ;;  %3548 = vst.sshfl [vmem:[%s4144_s4 + $0x8] sm:$0x5 pattern:$0x73625140] %v2971_v25  ;;  %v3551_v40 = vpack.c.bf16 %v3013_v15, %v3012_v63  ;;  %v3118_v36 = vadd.f32 %v3991_v38, %v4008_v20 }
 0x221   :  { %3550 = vst.sshfl [vmem:[%s4144_s4 + $0xa] sm:$0x5 pattern:$0x73625140] %v2998_v27  ;;  %v3553_v21 = vpack.c.bf16 %v3040_v14, %v3039_v18  ;;  %v3119_v10 = vadd.f32 %v3994_v53, %v4010_v33  ;;  %v3145_v58 = vadd.f32 %v3997_v9, %v4008_v20  ;;  %v3093_v30 = vmax.f32 %v3091_v1, 0.0 }
 0x222   :  { %v3555_v8 = vpack.c.bf16 %v3067_v24, %v3066_v60  ;;  %v3025_v62 = vrot.slane %v3551_v40, %v3954_v42  ;;  %v3094_v52 = vmax.f32 %v3092_v59, 0.0  ;;  %v3120_v56 = vmax.f32 %v3118_v36, 0.0 }
 0x223   :  { %v3052_v12 = vrot.slane %v3553_v21, %v3954_v42  ;;  %v3121_v5 = vmax.f32 %v3119_v10, 0.0  ;;  %v3146_v28 = vadd.f32 %v4000_v44, %v4010_v33  ;;  %v3147_v4 = vmax.f32 %v3145_v58, 0.0 }
 0x224   :  { %v3079_v38 = vrot.slane %v3555_v8, %v3954_v42  ;;  %3552 = vst.sshfl [vmem:[%s4144_s4 + $0xc] sm:$0x5 pattern:$0x73625140] %v3025_v62  ;;  %v3557_v53 = vpack.c.bf16 %v3094_v52, %v3093_v30  ;;  %v3172_v9 = vadd.f32 %v4003_v31, %v4008_v20  ;;  %v3173_v34 = vadd.f32 %v4006_v16, %v4010_v33 }
 0x225   :  { %3554 = vst.sshfl [vmem:[%s4144_s4 + $0xe] sm:$0x5 pattern:$0x73625140] %v3052_v12  ;;  %v3559_v44 = vpack.c.bf16 %v3121_v5, %v3120_v56  ;;  %v3148_v32 = vmax.f32 %v3146_v28, 0.0  ;;  %v3199_v13 = vadd.f32 %v4013_v26, %v4008_v20  ;;  %v3200_v3 = vadd.f32 %v4016_v22, %v4010_v33 }
 0x226   :  { %3556 = vst.sshfl [vmem:[%s4144_s4 + $0x10] sm:$0x5 pattern:$0x73625140] %v3079_v38  ;;  %v3106_v31 = vrot.slane %v3557_v53, %v3954_v42  ;;  %v3174_v2 = vmax.f32 %v3172_v9, 0.0  ;;  %v3175_v16 = vmax.f32 %v3173_v34, 0.0  ;;  %v3226_v54 = vadd.f32 %v4019_v41, %v4008_v20 }
 0x227   :  { %v3133_v45 = vrot.slane %v3559_v44, %v3954_v42  ;;  %v3561_v49 = vpack.c.bf16 %v3148_v32, %v3147_v4  ;;  %v3201_v11 = vmax.f32 %v3199_v13, 0.0  ;;  %v3202_v61 = vmax.f32 %v3200_v3, 0.0 }
 0x228   :  { %3558 = vst.sshfl [vmem:[%s4144_s4 + $0x12] sm:$0x5 pattern:$0x73625140] %v3106_v31  ;;  %v3563_v26 = vpack.c.bf16 %v3175_v16, %v3174_v2  ;;  %v3227_v22 = vadd.f32 %v4022_v6, %v4010_v33  ;;  %v3228_v19 = vmax.f32 %v3226_v54, 0.0  ;;  %v3253_v7 = vadd.f32 %v4025_v55, %v4008_v20 }
 0x229   :  { %3560 = vst.sshfl [vmem:[%s4144_s4 + $0x14] sm:$0x5 pattern:$0x73625140] %v3133_v45  ;;  %v3160_v41 = vrot.slane %v3561_v49, %v3954_v42  ;;  %v3565_v17 = vpack.c.bf16 %v3202_v61, %v3201_v11  ;;  %v3254_v46 = vadd.f32 %v4028_v29, %v4010_v33 }
 0x22a   :  { %v3187_v48 = vrot.slane %v3563_v26, %v3954_v42  ;;  %v3229_v47 = vmax.f32 %v3227_v22, 0.0  ;;  %v3255_v37 = vmax.f32 %v3253_v7, 0.0 }
 0x22b   :  { %3562 = vst.sshfl [vmem:[%s4144_s4 + $0x16] sm:$0x5 pattern:$0x73625140] %v3160_v41  ;;  %v3214_v20 = vrot.slane %v3565_v17, %v3954_v42  ;;  %v3256_v6 = vmax.f32 %v3254_v46, 0.0 }
 0x22c   :  { %3564 = vst.sshfl [vmem:[%s4144_s4 + $0x18] sm:$0x5 pattern:$0x73625140] %v3187_v48  ;;  %v3567_v55 = vpack.c.bf16 %v3229_v47, %v3228_v19 }
 0x22d   :  { %3566 = vst.sshfl [vmem:[%s4144_s4 + $0x1a] sm:$0x5 pattern:$0x73625140] %v3214_v20  ;;  %v3569_v33 = vpack.c.bf16 %v3256_v6, %v3255_v37 }
 0x22e   :  { %v3241_v29 = vrot.slane %v3567_v55, %v3954_v42 }
 0x22f   :  { %v3268_v35 = vrot.slane %v3569_v33, %v3954_v42 }
 0x230   :  { %3568 = vst.sshfl [vmem:[%s4144_s4 + $0x1c] sm:$0x5 pattern:$0x73625140] %v3241_v29 }
 0x231   :  { %3570 = vst.sshfl [vmem:[%s4144_s4 + $0x1e] sm:$0x5 pattern:$0x73625140] %v3268_v35 }
 0x232   :  { %3282 = vsyncpa [#allocation3], 1 }

// kernel: generator_forward.5
= control target key start
LH: loop header
LB: loop body
LE: loop exit
PB: predicated region body
PF: predicated region fallthrough
CT: control target
= control target key end

     0   :  { %s6447_s2 = inlined_call_operand.vmem [shape: bf16[8,512,128], index: 2, kind: input, shape index: {}]   ;;  %s6448_s0 = inlined_call_operand.vmem [shape: bf16[6,8,512], index: 0, kind: input, shape index: {}]   ;;  %s6449_s1 = inlined_call_operand.vmem [shape: bf16[6,8,512], index: 1, kind: input, shape index: {}]   ;;  %s6450_s3 = inlined_call_operand.vmem [shape: f32[1,128], index: 3, kind: input, shape index: {}]   ;;  %s6451_s4 = inlined_call_operand.vmem [shape: f32[1,128], index: 4, kind: input, shape index: {}]   ;;  %s6452_s5 = inlined_call_operand.vmem [shape: bf16[4,4,8,128], index: 5, kind: output, shape index: {}]  }
   0x1   :  { %v4951_v0 = vld [vmem:[%s6447_s2 + $0x178] sm:$0xff]   ;;  %v4955_v4 = vld [vmem:[%s6447_s2 + $0x170] sm:$0xff]   ;;  %v4959_v8 = vld [vmem:[%s6447_s2 + $0x168] sm:$0xff]  }
   0x2   :  { %v4952_v1 = vld [vmem:[%s6447_s2 + $0x1f8] sm:$0xff]   ;;  %4503 = vmatprep.subr.bf16.mxu0 %v4951_v0  ;;  %v4956_v5 = vld [vmem:[%s6447_s2 + $0x1f0] sm:$0xff]   ;;  %v4960_v9 = vld [vmem:[%s6447_s2 + $0x1e8] sm:$0xff]  }
   0x3   :  { %v4953_v2 = vld [vmem:[%s6447_s2 + $0x138] sm:$0xff]   ;;  %4531 = vmatprep.subr.bf16.mxu1 %v4952_v1  ;;  %v4957_v6 = vld [vmem:[%s6447_s2 + $0x130] sm:$0xff]   ;;  %v4961_v10 = vld [vmem:[%s6447_s2 + $0x128] sm:$0xff]  }
   0x4   :  { %v4954_v3 = vld [vmem:[%s6447_s2 + $0x1b8] sm:$0xff]   ;;  %4504 = vmatpush3.bf16.msra.mxu0 %v4953_v2  ;;  %v4958_v7 = vld [vmem:[%s6447_s2 + $0x1b0] sm:$0xff]   ;;  %v4962_v11 = vld [vmem:[%s6447_s2 + $0x1a8] sm:$0xff]  }
   0x5   :  { %4532 = vmatpush3.bf16.msra.mxu1 %v4954_v3  ;;  %4505 = vmatprep.subr.bf16.mxu0 %v4955_v4  ;;  %v4963_v12 = vld [vmem:[%s6447_s2 + $0x160] sm:$0xff]   ;;  %v4967_v16 = vld [vmem:[%s6447_s2 + $0x158] sm:$0xff]   ;;  %v4971_v20 = vld [vmem:[%s6447_s2 + $0x150] sm:$0xff]  }
   0x6   :  { %4533 = vmatprep.subr.bf16.mxu1 %v4956_v5  ;;  %v4964_v13 = vld [vmem:[%s6447_s2 + $0x1e0] sm:$0xff]   ;;  %v4968_v17 = vld [vmem:[%s6447_s2 + $0x1d8] sm:$0xff]   ;;  %v4972_v21 = vld [vmem:[%s6447_s2 + $0x1d0] sm:$0xff]  }
   0x7   :  { %v4965_v14 = vld [vmem:[%s6447_s2 + $0x120] sm:$0xff]   ;;  %v4969_v18 = vld [vmem:[%s6447_s2 + $0x118] sm:$0xff]   ;;  %v4973_v22 = vld [vmem:[%s6447_s2 + $0x110] sm:$0xff]  }
   0x8   :  { %4506 = vmatpush3.bf16.msra.mxu0 %v4957_v6  ;;  %v4966_v15 = vld [vmem:[%s6447_s2 + $0x1a0] sm:$0xff]   ;;  %v4970_v19 = vld [vmem:[%s6447_s2 + $0x198] sm:$0xff]   ;;  %v4974_v23 = vld [vmem:[%s6447_s2 + $0x190] sm:$0xff]  }
   0x9   :  { %4534 = vmatpush3.bf16.msra.mxu1 %v4958_v7  ;;  %4507 = vmatprep.subr.bf16.mxu0 %v4959_v8  ;;  %v4975_v24 = vld [vmem:[%s6447_s2 + $0x148] sm:$0xff]   ;;  %v4979_v28 = vld [vmem:[%s6447_s2 + $0x140] sm:$0xff]   ;;  %v5402_v32 = vld [vmem:[%s6448_s0 + $0x10] sm:$0xff] }
   0xa   :  { %4535 = vmatprep.subr.bf16.mxu1 %v4960_v9  ;;  %v4976_v25 = vld [vmem:[%s6447_s2 + $0x1c8] sm:$0xff]   ;;  %v4980_v29 = vld [vmem:[%s6447_s2 + $0x1c0] sm:$0xff]   ;;  %v5412_v34 = vld [vmem:[%s6448_s0 + $0x18] sm:$0xff] }
   0xb   :  { %v4977_v26 = vld [vmem:[%s6447_s2 + $0x108] sm:$0xff]   ;;  %v4981_v30 = vld [vmem:[%s6447_s2 + $0x100] sm:$0xff]   ;;  %v4987_v40 = vld [vmem:[%s6447_s2 + $0x78] sm:$0xff]  }
   0xc   :  { %4508 = vmatpush3.bf16.msra.mxu0 %v4961_v10  ;;  %v4978_v27 = vld [vmem:[%s6447_s2 + $0x188] sm:$0xff]   ;;  %v4982_v31 = vld [vmem:[%s6447_s2 + $0x180] sm:$0xff]   ;;  %v4988_v41 = vld [vmem:[%s6447_s2 + $0xf8] sm:$0xff]  }
   0xd   :  { %4536 = vmatpush3.bf16.msra.mxu1 %v4962_v11  ;;  %4509 = vmatprep.subr.bf16.mxu0 %v4963_v12  ;;  %v5407_v33 = vld [vmem:[%s6448_s0 + $0x20] sm:$0xff]  ;;  %v5421_v37 = vld [vmem:[%s6448_s0 + $0x28] sm:$0xff]  ;;  %v4989_v42 = vld [vmem:[%s6447_s2 + $0x38] sm:$0xff]  }
   0xe   :  { %4537 = vmatprep.subr.bf16.mxu1 %v4964_v13  ;;  %v3590_v35 = vcombine.low %v5402_v32, %v5407_v33  ;;  %v3591_v36 = vcombine.high %v5402_v32, %v5407_v33  ;;  %v3592_v38 = vcombine.low %v5412_v34, %v5421_v37  ;;  %v3593_v39 = vcombine.high %v5412_v34, %v5421_v37  ;;  %v4990_v43 = vld [vmem:[%s6447_s2 + $0xb8] sm:$0xff]   ;;  %v4991_v44 = vld [vmem:[%s6447_s2 + $0x70] sm:$0xff]   ;;  %v4995_v48 = vld [vmem:[%s6447_s2 + $0x68] sm:$0xff]  }
   0xf   :  { %v4992_v45 = vld [vmem:[%s6447_s2 + $0xf0] sm:$0xff]   ;;  %v4996_v49 = vld [vmem:[%s6447_s2 + $0xe8] sm:$0xff]   ;;  %v4999_v52 = vld [vmem:[%s6447_s2 + $0x60] sm:$0xff]  }
  0x10   :  { %4510 = vmatpush3.bf16.msra.mxu0 %v4965_v14  ;;  %431 = vmatprep.mubr.bf16.mxu0 %v3591_v36  ;;  %v4993_v46 = vld [vmem:[%s6447_s2 + $0x30] sm:$0xff]   ;;  %v4997_v50 = vld [vmem:[%s6447_s2 + $0x28] sm:$0xff]   ;;  %v5000_v53 = vld [vmem:[%s6447_s2 + $0xe0] sm:$0xff]  }
  0x11   :  { %4538 = vmatpush3.bf16.msra.mxu1 %v4966_v15  ;;  %4511 = vmatprep.subr.bf16.mxu0 %v4967_v16  ;;  %v4994_v47 = vld [vmem:[%s6447_s2 + $0xb0] sm:$0xff]   ;;  %v4998_v51 = vld [vmem:[%s6447_s2 + $0xa8] sm:$0xff]   ;;  %v5001_v54 = vld [vmem:[%s6447_s2 + $0x20] sm:$0xff]  }
  0x12   :  { %4539 = vmatprep.subr.bf16.mxu1 %v4968_v17  ;;  %480 = vmatprep.mubr.bf16.mxu1 %v3593_v39  ;;  %v5002_v55 = vld [vmem:[%s6447_s2 + $0xa0] sm:$0xff]   ;;  %v5003_v56 = vld [vmem:[%s6447_s2 + $0x58] sm:$0xff]   ;;  %v5490_v60 = vld [vmem:[%s6448_s0 + $0x30] sm:$0xff] }
  0x13   :  { %v5004_v57 = vld [vmem:[%s6447_s2 + $0xd8] sm:$0xff]   ;;  %v3524_v61 = vld [vmem:[%s6448_s0 + $0x40] sm:$0xff]  ;;  %v3525_v0 = vld [vmem:[%s6448_s0 + $0x48] sm:$0xff] }
  0x14   :  { %4512 = vmatpush3.bf16.msra.mxu0 %v4969_v18  ;;  %v5005_v58 = vld [vmem:[%s6447_s2 + $0x18] sm:$0xff]   ;;  %v3595_v62 = vcombine.high %v5490_v60, %v3524_v61  ;;  %v3594_v1 = vcombine.low %v5490_v60, %v3524_v61  ;;  %v5011_v4 = vld [vmem:[%s6447_s2 + $0x50] sm:$0xff]   ;;  %v5015_v8 = vld [vmem:[%s6447_s2 + $0x48] sm:$0xff]  }
  0x15   :  { %4540 = vmatpush3.bf16.msra.mxu1 %v4970_v19  ;;  %4513 = vmatprep.subr.bf16.mxu0 %v4971_v20  ;;  %v5006_v59 = vld [vmem:[%s6447_s2 + $0x98] sm:$0xff]   ;;  %v5012_v5 = vld [vmem:[%s6447_s2 + $0xd0] sm:$0xff]   ;;  %v5016_v9 = vld [vmem:[%s6447_s2 + $0xc8] sm:$0xff]  }
  0x16   :  { %4541 = vmatprep.subr.bf16.mxu1 %v4972_v21  ;;  %v5499_v63 = vld [vmem:[%s6448_s0 + $0x38] sm:$0xff]  ;;  %v5013_v6 = vld [vmem:[%s6447_s2 + $0x10] sm:$0xff]   ;;  %v5017_v10 = vld [vmem:[%s6447_s2 + $0x8] sm:$0xff]  }
  0x17   :  { %v3597_v2 = vcombine.high %v5499_v63, %v3525_v0  ;;  %v3596_v3 = vcombine.low %v5499_v63, %v3525_v0  ;;  %v5014_v7 = vld [vmem:[%s6447_s2 + $0x90] sm:$0xff]   ;;  %v5018_v11 = vld [vmem:[%s6447_s2 + $0x88] sm:$0xff]   ;;  %v5019_v12 = vld [vmem:[%s6447_s2 + $0x40] sm:$0xff]  }
  0x18   :  { %4514 = vmatpush3.bf16.msra.mxu0 %v4973_v22  ;;  %v5020_v13 = vld [vmem:[%s6447_s2 + $0xc0] sm:$0xff]   ;;  %v22_v19 = vld [vmem:[%s6448_s0 + $0x8] sm:$0xff]  ;;  %v5027_v22 = vld [vmem:[%s6447_s2 + $0x378] sm:$0xff]  }
  0x19   :  { %4542 = vmatpush3.bf16.msra.mxu1 %v4974_v23  ;;  %4515 = vmatprep.subr.bf16.mxu0 %v4975_v24  ;;  %v5021_v14 = vld [vmem:[%s6447_s2] sm:$0xff]   ;;  %v3632_v20 = vcombine.low %v22_v19, %v5412_v34  ;;  %v3633_v21 = vcombine.high %v22_v19, %v5412_v34  ;;  %v5028_v23 = vld [vmem:[%s6447_s2 + $0x3f8] sm:$0xff]   ;;  %v3635_v24 = vcombine.high %v5407_v33, %v5490_v60  ;;  %v5038_v36 = vld [vmem:[%s6447_s2 + $0x3e8] sm:$0xff]  }
  0x1a   :  { %4543 = vmatprep.subr.bf16.mxu1 %v4976_v25  ;;  %v5022_v15 = vld [vmem:[%s6447_s2 + $0x80] sm:$0xff]   ;;  %v5029_v25 = vld [vmem:[%s6447_s2 + $0x338] sm:$0xff]   ;;  %v3636_v34 = vcombine.low %v5421_v37, %v5499_v63 }
  0x1b   :  { %v21_v16 = vld [vmem:[%s6448_s0] sm:$0xff]  ;;  %v5084_v19 = vld [vmem:[%s6447_s2 + $0x2d8] sm:$0xff]  }
  0x1c   :  { %4516 = vmatpush3.bf16.msra.mxu0 %v4977_v26  ;;  %v3630_v17 = vcombine.low %v21_v16, %v5402_v32  ;;  %v3631_v18 = vcombine.high %v21_v16, %v5402_v32  ;;  %v3637_v26 = vcombine.high %v5421_v37, %v5499_v63  ;;  %v5034_v32 = vld [vmem:[%s6447_s2 + $0x3b0] sm:$0xff]   ;;  %v5041_v37 = vld [vmem:[%s6447_s2 + $0x3a8] sm:$0xff]   ;;  %v5044_v39 = vld [vmem:[%s6447_s2 + $0x3e0] sm:$0xff]  }
  0x1d   :  { %4544 = vmatpush3.bf16.msra.mxu1 %v4978_v27  ;;  %4517 = vmatprep.subr.bf16.mxu0 %v4979_v28  ;;  %v5030_v27 = vld [vmem:[%s6447_s2 + $0x3b8] sm:$0xff]   ;;  %v5031_v28 = vld [vmem:[%s6447_s2 + $0x370] sm:$0xff]   ;;  %v5679_v63 = vld [vmem:[%s6449_s1 + $0x28] sm:$0xff] }
  0x1e   :  { %4545 = vmatprep.subr.bf16.mxu1 %v4980_v29  ;;  %v5032_v29 = vld [vmem:[%s6447_s2 + $0x3f0] sm:$0xff]   ;;  %v5081_v16 = vld [vmem:[%s6447_s2 + $0x220] sm:$0xff]  }
  0x20   :  { %4518 = vmatpush3.bf16.msra.mxu0 %v4981_v30  ;;  %v5033_v30 = vld [vmem:[%s6447_s2 + $0x330] sm:$0xff]  }
  0x21   :  { %4546 = vmatpush3.bf16.msra.mxu1 %v4982_v31  ;;  %4559 = vmatprep.subr.bf16.mxu0 %v4987_v40  ;;  %v3634_v31 = vcombine.low %v5407_v33, %v5490_v60  ;;  %v5040_v33 = vld [vmem:[%s6447_s2 + $0x328] sm:$0xff]   ;;  %v5045_v40 = vld [vmem:[%s6447_s2 + $0x320] sm:$0xff]  }
  0x22   :  { %4587 = vmatprep.subr.bf16.mxu1 %v4988_v41  ;;  %v5046_v41 = vld [vmem:[%s6447_s2 + $0x3a0] sm:$0xff]  }
  0x23   :  { %432 = vmatmul.mubr.bf16.vlgmr.msra.gmra.mxu0 %v3590_v35  ;;  %v5037_v35 = vld [vmem:[%s6447_s2 + $0x368] sm:$0xff]  }
  0x24   :  { %481 = vmatmul.mubr.bf16.vlgmr.msra.gmra.mxu1 %v3592_v38  ;;  %4560 = vmatpush3.bf16.msra.mxu0 %v4989_v42  ;;  %v5043_v38 = vld [vmem:[%s6447_s2 + $0x360] sm:$0xff]   ;;  %v5047_v42 = vld [vmem:[%s6447_s2 + $0x358] sm:$0xff]  }
  0x25   :  { %4588 = vmatpush3.bf16.msra.mxu1 %v4990_v43  ;;  %4561 = vmatprep.subr.bf16.mxu0 %v4991_v44  ;;  %v5048_v43 = vld [vmem:[%s6447_s2 + $0x3d8] sm:$0xff]  }
  0x26   :  { %4589 = vmatprep.subr.bf16.mxu1 %v4992_v45  ;;  %439 = vmatprep.mubr.bf16.mxu0 %v3595_v62  ;;  %v5049_v44 = vld [vmem:[%s6447_s2 + $0x318] sm:$0xff]  }
  0x27   :  { %488 = vmatprep.mubr.bf16.mxu1 %v3597_v2  ;;  %v5050_v45 = vld [vmem:[%s6447_s2 + $0x398] sm:$0xff]  }
  0x28   :  { %4562 = vmatpush3.bf16.msra.mxu0 %v4993_v46  ;;  %v5051_v46 = vld [vmem:[%s6447_s2 + $0x350] sm:$0xff]   ;;  %v5674_v62 = vld [vmem:[%s6449_s1 + $0x18] sm:$0xff] }
  0x29   :  { %4590 = vmatpush3.bf16.msra.mxu1 %v4994_v47  ;;  %4563 = vmatprep.subr.bf16.mxu0 %v4995_v48  ;;  %v5052_v47 = vld [vmem:[%s6447_s2 + $0x3d0] sm:$0xff]   ;;  %v3808_v0 = vcombine.low %v5674_v62, %v5679_v63  ;;  %v5067_v2 = vld [vmem:[%s6447_s2 + $0x278] sm:$0xff]  }
  0x2a   :  { %4591 = vmatprep.subr.bf16.mxu1 %v4996_v49  ;;  %v5053_v48 = vld [vmem:[%s6447_s2 + $0x310] sm:$0xff]  }
  0x2b   :  { %440 = vmatmul.mubr.bf16.gmra.mxu0 %v3594_v1  ;;  %v5054_v49 = vld [vmem:[%s6447_s2 + $0x390] sm:$0xff]   ;;  %v3809_v1 = vcombine.high %v5674_v62, %v5679_v63 }
  0x2c   :  { %4564 = vmatpush3.bf16.msra.mxu0 %v4997_v50  ;;  %489 = vmatmul.mubr.bf16.gmra.mxu1 %v3596_v3  ;;  %v5055_v50 = vld [vmem:[%s6447_s2 + $0x348] sm:$0xff]   ;;  %v5068_v3 = vld [vmem:[%s6447_s2 + $0x2f8] sm:$0xff]  }
  0x2d   :  { %4592 = vmatpush3.bf16.msra.mxu1 %v4998_v51  ;;  %4565 = vmatprep.subr.bf16.mxu0 %v4999_v52  ;;  %v5056_v51 = vld [vmem:[%s6447_s2 + $0x3c8] sm:$0xff]  }
  0x2e   :  { %4593 = vmatprep.subr.bf16.mxu1 %v5000_v53  ;;  %761 = vmatprep.mubr.bf16.mxu0 %v3631_v18  ;;  %v5057_v52 = vld [vmem:[%s6447_s2 + $0x308] sm:$0xff]   ;;  %v5083_v18 = vld [vmem:[%s6447_s2 + $0x258] sm:$0xff]  }
  0x2f   :  { %810 = vmatprep.mubr.bf16.mxu1 %v3633_v21  ;;  %v5058_v53 = vld [vmem:[%s6447_s2 + $0x388] sm:$0xff]   ;;  %v5086_v21 = vld [vmem:[%s6447_s2 + $0x298] sm:$0xff]  }
  0x30   :  { %4566 = vmatpush3.bf16.msra.mxu0 %v5001_v54  ;;  %v5059_v54 = vld [vmem:[%s6447_s2 + $0x340] sm:$0xff]  }
  0x31   :  { %4594 = vmatpush3.bf16.msra.mxu1 %v5002_v55  ;;  %4567 = vmatprep.subr.bf16.mxu0 %v5003_v56  ;;  %v5060_v55 = vld [vmem:[%s6447_s2 + $0x3c0] sm:$0xff]  }
  0x32   :  { %4595 = vmatprep.subr.bf16.mxu1 %v5004_v57  ;;  %v5061_v56 = vld [vmem:[%s6447_s2 + $0x300] sm:$0xff]  }
  0x33   :  { %v5062_v57 = vld [vmem:[%s6447_s2 + $0x380] sm:$0xff]  }
  0x34   :  { %4568 = vmatpush3.bf16.msra.mxu0 %v5005_v58  ;;  %v5660_v58 = vld [vmem:[%s6449_s1 + $0x10] sm:$0xff] }
  0x35   :  { %4596 = vmatpush3.bf16.msra.mxu1 %v5006_v59  ;;  %4569 = vmatprep.subr.bf16.mxu0 %v5011_v4  ;;  %v5665_v59 = vld [vmem:[%s6449_s1 + $0x20] sm:$0xff]  ;;  %v5069_v4 = vld [vmem:[%s6447_s2 + $0x238] sm:$0xff]  }
  0x36   :  { %4597 = vmatprep.subr.bf16.mxu1 %v5012_v5  ;;  %v3806_v60 = vcombine.low %v5660_v58, %v5665_v59  ;;  %v3807_v61 = vcombine.high %v5660_v58, %v5665_v59  ;;  %v5070_v5 = vld [vmem:[%s6447_s2 + $0x2b8] sm:$0xff]  }
  0x38   :  { %4570 = vmatpush3.bf16.msra.mxu0 %v5013_v6  ;;  %v5071_v6 = vld [vmem:[%s6447_s2 + $0x270] sm:$0xff]  }
  0x39   :  { %4598 = vmatpush3.bf16.msra.mxu1 %v5014_v7  ;;  %4571 = vmatprep.subr.bf16.mxu0 %v5015_v8  ;;  %v5072_v7 = vld [vmem:[%s6447_s2 + $0x2f0] sm:$0xff]  }
  0x3a   :  { %4599 = vmatprep.subr.bf16.mxu1 %v5016_v9  ;;  %v5073_v8 = vld [vmem:[%s6447_s2 + $0x230] sm:$0xff]  }
  0x3b   :  { %v5074_v9 = vld [vmem:[%s6447_s2 + $0x2b0] sm:$0xff]  }
  0x3c   :  { %4572 = vmatpush3.bf16.msra.mxu0 %v5017_v10  ;;  %v5075_v10 = vld [vmem:[%s6447_s2 + $0x268] sm:$0xff]  }
  0x3d   :  { %4600 = vmatpush3.bf16.msra.mxu1 %v5018_v11  ;;  %4573 = vmatprep.subr.bf16.mxu0 %v5019_v12  ;;  %v5076_v11 = vld [vmem:[%s6447_s2 + $0x2e8] sm:$0xff]  }
  0x3e   :  { %4601 = vmatprep.subr.bf16.mxu1 %v5020_v13  ;;  %v5077_v12 = vld [vmem:[%s6447_s2 + $0x228] sm:$0xff]  }
  0x3f   :  { %v5078_v13 = vld [vmem:[%s6447_s2 + $0x2a8] sm:$0xff]  }
  0x40   :  { %4574 = vmatpush3.bf16.msra.mxu0 %v5021_v14  ;;  %v5079_v14 = vld [vmem:[%s6447_s2 + $0x260] sm:$0xff]  }
  0x41   :  { %4602 = vmatpush3.bf16.msra.mxu1 %v5022_v15  ;;  %4615 = vmatprep.subr.bf16.mxu0 %v5027_v22  ;;  %v5080_v15 = vld [vmem:[%s6447_s2 + $0x2e0] sm:$0xff]   ;;  %v5748_v22 = vld [vmem:[%s6449_s1 + $0x30] sm:$0xff] }
  0x42   :  { %4643 = vmatprep.subr.bf16.mxu1 %v5028_v23  ;;  %v3740_v23 = vld [vmem:[%s6449_s1 + $0x40] sm:$0xff] }
  0x43   :  { %762 = vmatmul.mubr.bf16.vlgmr.msra.gmra.mxu0 %v3630_v17  ;;  %v5082_v17 = vld [vmem:[%s6447_s2 + $0x2a0] sm:$0xff]  }
  0x44   :  { %811 = vmatmul.mubr.bf16.vlgmr.msra.gmra.mxu1 %v3632_v20  ;;  %4616 = vmatpush3.bf16.msra.mxu0 %v5029_v25  ;;  %v5085_v20 = vld [vmem:[%s6447_s2 + $0x218] sm:$0xff]   ;;  %v3741_v25 = vld [vmem:[%s6449_s1 + $0x48] sm:$0xff] }
  0x45   :  { %4644 = vmatpush3.bf16.msra.mxu1 %v5030_v27  ;;  %769 = vmatprep.mubr.bf16.mxu0 %v3635_v24  ;;  %v5756_v24 = vld [vmem:[%s6449_s1 + $0x38] sm:$0xff] }
  0x46   :  { %4617 = vmatprep.subr.bf16.mxu0 %v5031_v28  ;;  %818 = vmatprep.mubr.bf16.mxu1 %v3637_v26  ;;  %v3811_v26 = vcombine.high %v5748_v22, %v3740_v23  ;;  %v3813_v27 = vcombine.high %v5756_v24, %v3741_v25  ;;  %v3810_v28 = vcombine.low %v5748_v22, %v3740_v23  ;;  %v5933_v23 = vld [vmem:[%s6448_s0 + $0x38] sm:$0xff] }
  0x47   :  { %4645 = vmatprep.subr.bf16.mxu1 %v5032_v29  ;;  %v3812_v29 = vcombine.low %v5756_v24, %v3741_v25 }
  0x48   :  { %4618 = vmatpush3.bf16.msra.mxu0 %v5033_v30  ;;  %v5091_v30 = vld [vmem:[%s6447_s2 + $0x250] sm:$0xff]  }
  0x49   :  { %4646 = vmatpush3.bf16.msra.mxu1 %v5034_v32  ;;  %4619 = vmatprep.subr.bf16.mxu0 %v5037_v35  ;;  %v5093_v32 = vld [vmem:[%s6447_s2 + $0x210] sm:$0xff]   ;;  %v5095_v35 = vld [vmem:[%s6447_s2 + $0x248] sm:$0xff]  }
  0x4a   :  { %4647 = vmatprep.subr.bf16.mxu1 %v5038_v36  ;;  %v5096_v36 = vld [vmem:[%s6447_s2 + $0x2c8] sm:$0xff]  }
  0x4b   :  { %770 = vmatmul.mubr.bf16.gmra.mxu0 %v3634_v31  ;;  %v5092_v31 = vld [vmem:[%s6447_s2 + $0x2d0] sm:$0xff]  }
  0x4c   :  { %819 = vmatmul.mubr.bf16.gmra.mxu1 %v3636_v34  ;;  %4620 = vmatpush3.bf16.msra.mxu0 %v5040_v33  ;;  %v5094_v34 = vld [vmem:[%s6447_s2 + $0x290] sm:$0xff]   ;;  %v5097_v33 = vld [vmem:[%s6447_s2 + $0x208] sm:$0xff]  }
  0x4d   :  { %4648 = vmatpush3.bf16.msra.mxu1 %v5041_v37  ;;  %4621 = vmatprep.subr.bf16.mxu0 %v5043_v38  ;;  %v5098_v37 = vld [vmem:[%s6447_s2 + $0x288] sm:$0xff]   ;;  %v5099_v38 = vld [vmem:[%s6447_s2 + $0x240] sm:$0xff]  }
  0x4e   :  { %4649 = vmatprep.subr.bf16.mxu1 %v5044_v39  ;;  %1270 = vmatprep.mubr.bf16.mxu0 %v3807_v61  ;;  %v5100_v39 = vld [vmem:[%s6447_s2 + $0x2c0] sm:$0xff]   ;;  %v3852_v61 = vcombine.low %v5679_v63, %v5756_v24 }
  0x4f   :  { %1319 = vmatprep.mubr.bf16.mxu1 %v3809_v1  ;;  %v5124_v1 = vld [vmem:[%s6447_s2 + $0x5e0] sm:$0xff]  }
  0x50   :  { %4622 = vmatpush3.bf16.msra.mxu0 %v5045_v40  ;;  %v5101_v40 = vld [vmem:[%s6447_s2 + $0x200] sm:$0xff]  }
  0x51   :  { %4650 = vmatpush3.bf16.msra.mxu1 %v5046_v41  ;;  %4623 = vmatprep.subr.bf16.mxu0 %v5047_v42  ;;  %v5102_v41 = vld [vmem:[%s6447_s2 + $0x280] sm:$0xff]  }
  0x52   :  { %4651 = vmatprep.subr.bf16.mxu1 %v5048_v43  ;;  %v859_v42 = vld [vmem:[%s6449_s1] sm:$0xff]  ;;  %v860_v43 = vld [vmem:[%s6449_s1 + $0x8] sm:$0xff] }
  0x54   :  { %4624 = vmatpush3.bf16.msra.mxu0 %v5049_v44  ;;  %v3846_v44 = vcombine.low %v859_v42, %v5660_v58 }
  0x55   :  { %4652 = vmatpush3.bf16.msra.mxu1 %v5050_v45  ;;  %4625 = vmatprep.subr.bf16.mxu0 %v5051_v46  ;;  %v3847_v45 = vcombine.high %v859_v42, %v5660_v58  ;;  %v3848_v46 = vcombine.low %v860_v43, %v5674_v62  ;;  %v3850_v58 = vcombine.low %v5665_v59, %v5748_v22  ;;  %v5161_v42 = vld [vmem:[%s6447_s2 + $0x420] sm:$0xff]  }
  0x56   :  { %4653 = vmatprep.subr.bf16.mxu1 %v5052_v47  ;;  %v5107_v47 = vld [vmem:[%s6447_s2 + $0x578] sm:$0xff]  }
  0x58   :  { %4626 = vmatpush3.bf16.msra.mxu0 %v5053_v48  ;;  %v3849_v48 = vcombine.high %v860_v43, %v5674_v62  ;;  %v5118_v62 = vld [vmem:[%s6447_s2 + $0x5e8] sm:$0xff]   ;;  %v5162_v43 = vld [vmem:[%s6447_s2 + $0x4a0] sm:$0xff]  }
  0x59   :  { %4654 = vmatpush3.bf16.msra.mxu1 %v5054_v49  ;;  %4627 = vmatprep.subr.bf16.mxu0 %v5055_v50  ;;  %v5108_v49 = vld [vmem:[%s6447_s2 + $0x5f8] sm:$0xff]  }
  0x5a   :  { %4655 = vmatprep.subr.bf16.mxu1 %v5056_v51  ;;  %v5109_v50 = vld [vmem:[%s6447_s2 + $0x538] sm:$0xff]   ;;  %v3851_v51 = vcombine.high %v5665_v59, %v5748_v22  ;;  %v5121_v59 = vld [vmem:[%s6447_s2 + $0x5a8] sm:$0xff]  }
  0x5b   :  { %v5928_v22 = vld [vmem:[%s6448_s0 + $0x28] sm:$0xff] }
  0x5c   :  { %4628 = vmatpush3.bf16.msra.mxu0 %v5057_v52  ;;  %v5110_v52 = vld [vmem:[%s6447_s2 + $0x5b8] sm:$0xff]  }
  0x5d   :  { %4656 = vmatpush3.bf16.msra.mxu1 %v5058_v53  ;;  %4629 = vmatprep.subr.bf16.mxu0 %v5059_v54  ;;  %v3853_v53 = vcombine.high %v5679_v63, %v5756_v24  ;;  %v5111_v54 = vld [vmem:[%s6447_s2 + $0x570] sm:$0xff]   ;;  %v5123_v63 = vld [vmem:[%s6447_s2 + $0x560] sm:$0xff]  }
  0x5e   :  { %4657 = vmatprep.subr.bf16.mxu1 %v5060_v55  ;;  %v5112_v55 = vld [vmem:[%s6447_s2 + $0x5f0] sm:$0xff]  }
  0x60   :  { %4630 = vmatpush3.bf16.msra.mxu0 %v5061_v56  ;;  %v5113_v56 = vld [vmem:[%s6447_s2 + $0x530] sm:$0xff]  }
  0x61   :  { %4658 = vmatpush3.bf16.msra.mxu1 %v5062_v57  ;;  %4671 = vmatprep.subr.bf16.mxu0 %v5067_v2  ;;  %v5114_v57 = vld [vmem:[%s6447_s2 + $0x5b0] sm:$0xff]   ;;  %v5125_v2 = vld [vmem:[%s6447_s2 + $0x520] sm:$0xff]  }
  0x62   :  { %4699 = vmatprep.subr.bf16.mxu1 %v5068_v3  ;;  %v5126_v3 = vld [vmem:[%s6447_s2 + $0x5a0] sm:$0xff]  }
  0x63   :  { %1271 = vmatmul.mubr.bf16.vlgmr.msra.gmra.mxu0 %v3806_v60  ;;  %v5117_v60 = vld [vmem:[%s6447_s2 + $0x568] sm:$0xff]  }
  0x64   :  { %1320 = vmatmul.mubr.bf16.vlgmr.msra.gmra.mxu1 %v3808_v0  ;;  %4672 = vmatpush3.bf16.msra.mxu0 %v5069_v4  ;;  %v5120_v0 = vld [vmem:[%s6447_s2 + $0x528] sm:$0xff]   ;;  %v5127_v4 = vld [vmem:[%s6447_s2 + $0x558] sm:$0xff]  }
  0x65   :  { %4700 = vmatpush3.bf16.msra.mxu1 %v5070_v5  ;;  %4673 = vmatprep.subr.bf16.mxu0 %v5071_v6  ;;  %v5128_v5 = vld [vmem:[%s6447_s2 + $0x5d8] sm:$0xff]  }
  0x66   :  { %4701 = vmatprep.subr.bf16.mxu1 %v5072_v7  ;;  %1278 = vmatprep.mubr.bf16.mxu0 %v3811_v26  ;;  %v5129_v6 = vld [vmem:[%s6447_s2 + $0x518] sm:$0xff]   ;;  %v4036_v26 = vcombine.low %v5928_v22, %v5933_v23 }
  0x67   :  { %1327 = vmatprep.mubr.bf16.mxu1 %v3813_v27  ;;  %v5130_v7 = vld [vmem:[%s6447_s2 + $0x598] sm:$0xff]  }
  0x68   :  { %4674 = vmatpush3.bf16.msra.mxu0 %v5073_v8  ;;  %v5131_v8 = vld [vmem:[%s6447_s2 + $0x550] sm:$0xff]   ;;  %v5147_v27 = vld [vmem:[%s6447_s2 + $0x478] sm:$0xff]  }
  0x69   :  { %4702 = vmatpush3.bf16.msra.mxu1 %v5074_v9  ;;  %4675 = vmatprep.subr.bf16.mxu0 %v5075_v10  ;;  %v5132_v9 = vld [vmem:[%s6447_s2 + $0x5d0] sm:$0xff]  }
  0x6a   :  { %4703 = vmatprep.subr.bf16.mxu1 %v5076_v11  ;;  %v5133_v10 = vld [vmem:[%s6447_s2 + $0x510] sm:$0xff]  }
  0x6b   :  { %1279 = vmatmul.mubr.bf16.gmra.mxu0 %v3810_v28  ;;  %v5134_v11 = vld [vmem:[%s6447_s2 + $0x590] sm:$0xff]   ;;  %v4037_v28 = vcombine.high %v5928_v22, %v5933_v23 }
  0x6c   :  { %4676 = vmatpush3.bf16.msra.mxu0 %v5077_v12  ;;  %1328 = vmatmul.mubr.bf16.gmra.mxu1 %v3812_v29  ;;  %v5135_v12 = vld [vmem:[%s6447_s2 + $0x548] sm:$0xff]   ;;  %v5148_v29 = vld [vmem:[%s6447_s2 + $0x4f8] sm:$0xff]  }
  0x6d   :  { %4704 = vmatpush3.bf16.msra.mxu1 %v5078_v13  ;;  %4677 = vmatprep.subr.bf16.mxu0 %v5079_v14  ;;  %v5136_v13 = vld [vmem:[%s6447_s2 + $0x5c8] sm:$0xff]  }
  0x6e   :  { %4705 = vmatprep.subr.bf16.mxu1 %v5080_v15  ;;  %1600 = vmatprep.mubr.bf16.mxu0 %v3847_v45  ;;  %v5137_v14 = vld [vmem:[%s6447_s2 + $0x508] sm:$0xff]   ;;  %v5164_v45 = vld [vmem:[%s6447_s2 + $0x4d8] sm:$0xff]  }
  0x6f   :  { %1649 = vmatprep.mubr.bf16.mxu1 %v3849_v48  ;;  %v5138_v15 = vld [vmem:[%s6447_s2 + $0x588] sm:$0xff]   ;;  %v6006_v48 = vld [vmem:[%s6448_s0 + $0x40] sm:$0xff] }
  0x70   :  { %4678 = vmatpush3.bf16.msra.mxu0 %v5081_v16  ;;  %v5139_v16 = vld [vmem:[%s6447_s2 + $0x540] sm:$0xff]  }
  0x71   :  { %4706 = vmatpush3.bf16.msra.mxu1 %v5082_v17  ;;  %4679 = vmatprep.subr.bf16.mxu0 %v5083_v18  ;;  %v5140_v17 = vld [vmem:[%s6447_s2 + $0x5c0] sm:$0xff]  }
  0x72   :  { %4707 = vmatprep.subr.bf16.mxu1 %v5084_v19  ;;  %v5141_v18 = vld [vmem:[%s6447_s2 + $0x500] sm:$0xff]  }
  0x73   :  { %v5142_v19 = vld [vmem:[%s6447_s2 + $0x580] sm:$0xff]  }
  0x74   :  { %4680 = vmatpush3.bf16.msra.mxu0 %v5085_v20  ;;  %v5918_v20 = vld [vmem:[%s6448_s0 + $0x20] sm:$0xff] }
  0x75   :  { %4708 = vmatpush3.bf16.msra.mxu1 %v5086_v21  ;;  %4681 = vmatprep.subr.bf16.mxu0 %v5091_v30  ;;  %v5923_v21 = vld [vmem:[%s6448_s0 + $0x30] sm:$0xff]  ;;  %v5149_v30 = vld [vmem:[%s6447_s2 + $0x438] sm:$0xff]  }
  0x76   :  { %4709 = vmatprep.subr.bf16.mxu1 %v5092_v31  ;;  %v4034_v24 = vcombine.low %v5918_v20, %v5923_v21  ;;  %v4035_v25 = vcombine.high %v5918_v20, %v5923_v21  ;;  %v5150_v31 = vld [vmem:[%s6447_s2 + $0x4b8] sm:$0xff]  }
  0x78   :  { %4682 = vmatpush3.bf16.msra.mxu0 %v5093_v32  ;;  %v5151_v32 = vld [vmem:[%s6447_s2 + $0x470] sm:$0xff]  }
  0x79   :  { %4710 = vmatpush3.bf16.msra.mxu1 %v5094_v34  ;;  %4683 = vmatprep.subr.bf16.mxu0 %v5095_v35  ;;  %v5152_v34 = vld [vmem:[%s6447_s2 + $0x4f0] sm:$0xff]  }
  0x7a   :  { %4711 = vmatprep.subr.bf16.mxu1 %v5096_v36  ;;  %v5153_v35 = vld [vmem:[%s6447_s2 + $0x430] sm:$0xff]  }
  0x7b   :  { %v5154_v36 = vld [vmem:[%s6447_s2 + $0x4b0] sm:$0xff]  }
  0x7c   :  { %4684 = vmatpush3.bf16.msra.mxu0 %v5097_v33  ;;  %v5155_v33 = vld [vmem:[%s6447_s2 + $0x468] sm:$0xff]  }
  0x7d   :  { %4712 = vmatpush3.bf16.msra.mxu1 %v5098_v37  ;;  %4685 = vmatprep.subr.bf16.mxu0 %v5099_v38  ;;  %v5156_v37 = vld [vmem:[%s6447_s2 + $0x4e8] sm:$0xff]  }
  0x7e   :  { %4713 = vmatprep.subr.bf16.mxu1 %v5100_v39  ;;  %v5157_v38 = vld [vmem:[%s6447_s2 + $0x428] sm:$0xff]  }
  0x7f   :  { %v5158_v39 = vld [vmem:[%s6447_s2 + $0x4a8] sm:$0xff]  }
  0x80   :  { %4686 = vmatpush3.bf16.msra.mxu0 %v5101_v40  ;;  %v5159_v40 = vld [vmem:[%s6447_s2 + $0x460] sm:$0xff]  }
  0x81   :  { %4714 = vmatpush3.bf16.msra.mxu1 %v5102_v41  ;;  %4727 = vmatprep.subr.bf16.mxu0 %v5107_v47  ;;  %v5160_v41 = vld [vmem:[%s6447_s2 + $0x4e0] sm:$0xff]   ;;  %v5166_v47 = vld [vmem:[%s6447_s2 + $0x498] sm:$0xff]  }
  0x82   :  { %4755 = vmatprep.subr.bf16.mxu1 %v5108_v49  ;;  %v3968_v49 = vld [vmem:[%s6448_s0 + $0x50] sm:$0xff] }
  0x83   :  { %1601 = vmatmul.mubr.bf16.vlgmr.msra.gmra.mxu0 %v3846_v44  ;;  %v5163_v44 = vld [vmem:[%s6447_s2 + $0x458] sm:$0xff]  }
  0x84   :  { %1650 = vmatmul.mubr.bf16.vlgmr.msra.gmra.mxu1 %v3848_v46  ;;  %4728 = vmatpush3.bf16.msra.mxu0 %v5109_v50  ;;  %v5165_v46 = vld [vmem:[%s6447_s2 + $0x418] sm:$0xff]   ;;  %v6014_v50 = vld [vmem:[%s6448_s0 + $0x48] sm:$0xff] }
  0x85   :  { %4756 = vmatpush3.bf16.msra.mxu1 %v5110_v52  ;;  %4729 = vmatprep.subr.bf16.mxu0 %v5111_v54  ;;  %v3969_v52 = vld [vmem:[%s6448_s0 + $0x58] sm:$0xff] }
  0x86   :  { %1608 = vmatprep.mubr.bf16.mxu0 %v3851_v51  ;;  %4757 = vmatprep.subr.bf16.mxu1 %v5112_v55  ;;  %v4039_v51 = vcombine.high %v6006_v48, %v3968_v49  ;;  %v4041_v54 = vcombine.high %v6014_v50, %v3969_v52  ;;  %v4040_v55 = vcombine.low %v6014_v50, %v3969_v52  ;;  %v5222_v52 = vld [vmem:[%s6447_s2 + $0x780] sm:$0xff]  }
  0x87   :  { %1657 = vmatprep.mubr.bf16.mxu1 %v3853_v53  ;;  %v4038_v53 = vcombine.low %v6006_v48, %v3968_v49  ;;  %v5221_v49 = vld [vmem:[%s6447_s2 + $0x700] sm:$0xff]  }
  0x88   :  { %4730 = vmatpush3.bf16.msra.mxu0 %v5113_v56  ;;  %v5171_v56 = vld [vmem:[%s6447_s2 + $0x450] sm:$0xff]  }
  0x89   :  { %4758 = vmatpush3.bf16.msra.mxu1 %v5114_v57  ;;  %4731 = vmatprep.subr.bf16.mxu0 %v5117_v60  ;;  %v5172_v57 = vld [vmem:[%s6447_s2 + $0x4d0] sm:$0xff]  }
  0x8a   :  { %4759 = vmatprep.subr.bf16.mxu1 %v5118_v62  ;;  %v5174_v60 = vld [vmem:[%s6447_s2 + $0x490] sm:$0xff]   ;;  %v5176_v62 = vld [vmem:[%s6447_s2 + $0x4c8] sm:$0xff]  }
  0x8b   :  { %1609 = vmatmul.mubr.bf16.gmra.mxu0 %v3850_v58  ;;  %v5173_v58 = vld [vmem:[%s6447_s2 + $0x410] sm:$0xff]  }
  0x8c   :  { %1658 = vmatmul.mubr.bf16.gmra.mxu1 %v3852_v61  ;;  %4732 = vmatpush3.bf16.msra.mxu0 %v5120_v0  ;;  %v5175_v61 = vld [vmem:[%s6447_s2 + $0x448] sm:$0xff]  }
  0x8d   :  { %4760 = vmatpush3.bf16.msra.mxu1 %v5121_v59  ;;  %4733 = vmatprep.subr.bf16.mxu0 %v5123_v63  ;;  %v5177_v0 = vld [vmem:[%s6447_s2 + $0x408] sm:$0xff]   ;;  %v5179_v63 = vld [vmem:[%s6447_s2 + $0x440] sm:$0xff]  }
  0x8e   :  { %4761 = vmatprep.subr.bf16.mxu1 %v5124_v1  ;;  %2110 = vmatprep.mubr.bf16.mxu0 %v4035_v25  ;;  %v5178_v59 = vld [vmem:[%s6447_s2 + $0x488] sm:$0xff]   ;;  %v5180_v1 = vld [vmem:[%s6447_s2 + $0x4c0] sm:$0xff]  }
  0x8f   :  { %2159 = vmatprep.mubr.bf16.mxu1 %v4037_v28  ;;  %v5198_v25 = vld [vmem:[%s6447_s2 + $0x7e8] sm:$0xff]   ;;  %v5205_v28 = vld [vmem:[%s6447_s2 + $0x720] sm:$0xff]  }
  0x90   :  { %4734 = vmatpush3.bf16.msra.mxu0 %v5125_v2  ;;  %v5181_v2 = vld [vmem:[%s6447_s2 + $0x400] sm:$0xff]  }
  0x91   :  { %4762 = vmatpush3.bf16.msra.mxu1 %v5126_v3  ;;  %4735 = vmatprep.subr.bf16.mxu0 %v5127_v4  ;;  %v5182_v3 = vld [vmem:[%s6447_s2 + $0x480] sm:$0xff]   ;;  %v3890_v4 = vld [vmem:[%s6448_s0 + $0x10] sm:$0xff] }
  0x92   :  { %4763 = vmatprep.subr.bf16.mxu1 %v5128_v5  ;;  %v3891_v5 = vld [vmem:[%s6448_s0 + $0x18] sm:$0xff] }
  0x94   :  { %4736 = vmatpush3.bf16.msra.mxu0 %v5129_v6  ;;  %v4074_v6 = vcombine.low %v3890_v4, %v5918_v20 }
  0x95   :  { %4764 = vmatpush3.bf16.msra.mxu1 %v5130_v7  ;;  %4737 = vmatprep.subr.bf16.mxu0 %v5131_v8  ;;  %v4075_v7 = vcombine.high %v3890_v4, %v5918_v20  ;;  %v4076_v8 = vcombine.low %v3891_v5, %v5928_v22  ;;  %v4078_v20 = vcombine.low %v5923_v21, %v6006_v48  ;;  %v5228_v4 = vld [vmem:[%s6447_s2 + $0x6f8] sm:$0xff]  }
  0x96   :  { %4765 = vmatprep.subr.bf16.mxu1 %v5132_v9  ;;  %v4077_v9 = vcombine.high %v3891_v5, %v5928_v22  ;;  %v5197_v22 = vld [vmem:[%s6447_s2 + $0x768] sm:$0xff]   ;;  %v5229_v5 = vld [vmem:[%s6447_s2 + $0x638] sm:$0xff]  }
  0x98   :  { %4738 = vmatpush3.bf16.msra.mxu0 %v5133_v10  ;;  %v5187_v10 = vld [vmem:[%s6447_s2 + $0x778] sm:$0xff]  }
  0x99   :  { %4766 = vmatpush3.bf16.msra.mxu1 %v5134_v11  ;;  %4739 = vmatprep.subr.bf16.mxu0 %v5135_v12  ;;  %v5188_v11 = vld [vmem:[%s6447_s2 + $0x7f8] sm:$0xff]  }
  0x9a   :  { %4767 = vmatprep.subr.bf16.mxu1 %v5136_v13  ;;  %v5189_v12 = vld [vmem:[%s6447_s2 + $0x738] sm:$0xff]   ;;  %v4079_v13 = vcombine.high %v5923_v21, %v6006_v48  ;;  %v5201_v21 = vld [vmem:[%s6447_s2 + $0x7a8] sm:$0xff]  }
  0x9c   :  { %4740 = vmatpush3.bf16.msra.mxu0 %v5137_v14  ;;  %v5190_v14 = vld [vmem:[%s6447_s2 + $0x7b8] sm:$0xff]  }
  0x9d   :  { %4768 = vmatpush3.bf16.msra.mxu1 %v5138_v15  ;;  %4741 = vmatprep.subr.bf16.mxu0 %v5139_v16  ;;  %v4081_v15 = vcombine.high %v5933_v23, %v6014_v50  ;;  %v5191_v16 = vld [vmem:[%s6447_s2 + $0x770] sm:$0xff]  }
  0x9e   :  { %4769 = vmatprep.subr.bf16.mxu1 %v5140_v17  ;;  %v5192_v17 = vld [vmem:[%s6447_s2 + $0x7f0] sm:$0xff]  }
  0xa0   :  { %4742 = vmatpush3.bf16.msra.mxu0 %v5141_v18  ;;  %v5193_v18 = vld [vmem:[%s6447_s2 + $0x730] sm:$0xff]  }
  0xa1   :  { %4770 = vmatpush3.bf16.msra.mxu1 %v5142_v19  ;;  %4783 = vmatprep.subr.bf16.mxu0 %v5147_v27  ;;  %v5194_v19 = vld [vmem:[%s6447_s2 + $0x7b0] sm:$0xff]   ;;  %v5204_v27 = vld [vmem:[%s6447_s2 + $0x7e0] sm:$0xff]  }
  0xa2   :  { %4811 = vmatprep.subr.bf16.mxu1 %v5148_v29  ;;  %v5206_v29 = vld [vmem:[%s6447_s2 + $0x7a0] sm:$0xff]  }
  0xa3   :  { %2111 = vmatmul.mubr.bf16.vlgmr.msra.gmra.mxu0 %v4034_v24  ;;  %v4080_v24 = vcombine.low %v5933_v23, %v6014_v50  ;;  %v5203_v23 = vld [vmem:[%s6447_s2 + $0x760] sm:$0xff]  }
  0xa4   :  { %2160 = vmatmul.mubr.bf16.vlgmr.msra.gmra.mxu1 %v4036_v26  ;;  %4784 = vmatpush3.bf16.msra.mxu0 %v5149_v30  ;;  %v5200_v26 = vld [vmem:[%s6447_s2 + $0x728] sm:$0xff]   ;;  %v5207_v30 = vld [vmem:[%s6447_s2 + $0x758] sm:$0xff]  }
  0xa5   :  { %4812 = vmatpush3.bf16.msra.mxu1 %v5150_v31  ;;  %4785 = vmatprep.subr.bf16.mxu0 %v5151_v32  ;;  %v5208_v31 = vld [vmem:[%s6447_s2 + $0x7d8] sm:$0xff]  }
  0xa6   :  { %4813 = vmatprep.subr.bf16.mxu1 %v5152_v34  ;;  %2118 = vmatprep.mubr.bf16.mxu0 %v4039_v51  ;;  %v5209_v32 = vld [vmem:[%s6447_s2 + $0x718] sm:$0xff]  }
  0xa7   :  { %2167 = vmatprep.mubr.bf16.mxu1 %v4041_v54  ;;  %v5210_v34 = vld [vmem:[%s6447_s2 + $0x798] sm:$0xff]   ;;  %v6176_v54 = vld [vmem:[%s6449_s1 + $0x20] sm:$0xff] }
  0xa8   :  { %4786 = vmatpush3.bf16.msra.mxu0 %v5153_v35  ;;  %v5211_v35 = vld [vmem:[%s6447_s2 + $0x750] sm:$0xff]  }
  0xa9   :  { %4814 = vmatpush3.bf16.msra.mxu1 %v5154_v36  ;;  %4787 = vmatprep.subr.bf16.mxu0 %v5155_v33  ;;  %v5212_v36 = vld [vmem:[%s6447_s2 + $0x7d0] sm:$0xff]  }
  0xaa   :  { %4815 = vmatprep.subr.bf16.mxu1 %v5156_v37  ;;  %v5213_v33 = vld [vmem:[%s6447_s2 + $0x710] sm:$0xff]  }
  0xab   :  { %2119 = vmatmul.mubr.bf16.gmra.mxu0 %v4038_v53  ;;  %v5214_v37 = vld [vmem:[%s6447_s2 + $0x790] sm:$0xff]  }
  0xac   :  { %4788 = vmatpush3.bf16.msra.mxu0 %v5157_v38  ;;  %2168 = vmatmul.mubr.bf16.gmra.mxu1 %v4040_v55  ;;  %v5215_v38 = vld [vmem:[%s6447_s2 + $0x748] sm:$0xff]   ;;  %v6181_v55 = vld [vmem:[%s6449_s1 + $0x30] sm:$0xff] }
  0xad   :  { %4816 = vmatpush3.bf16.msra.mxu1 %v5158_v39  ;;  %4789 = vmatprep.subr.bf16.mxu0 %v5159_v40  ;;  %v5216_v39 = vld [vmem:[%s6447_s2 + $0x7c8] sm:$0xff]  }
  0xae   :  { %4817 = vmatprep.subr.bf16.mxu1 %v5160_v41  ;;  %2440 = vmatprep.mubr.bf16.mxu0 %v4075_v7  ;;  %v5217_v40 = vld [vmem:[%s6447_s2 + $0x708] sm:$0xff]   ;;  %v5230_v7 = vld [vmem:[%s6447_s2 + $0x6b8] sm:$0xff]  }
  0xaf   :  { %2489 = vmatprep.mubr.bf16.mxu1 %v4077_v9  ;;  %v5232_v9 = vld [vmem:[%s6447_s2 + $0x6f0] sm:$0xff]  }
  0xb0   :  { %4790 = vmatpush3.bf16.msra.mxu0 %v5161_v42  ;;  %v5218_v42 = vld [vmem:[%s6447_s2 + $0x788] sm:$0xff]  }
  0xb1   :  { %4818 = vmatpush3.bf16.msra.mxu1 %v5162_v43  ;;  %4791 = vmatprep.subr.bf16.mxu0 %v5163_v44  ;;  %v5219_v44 = vld [vmem:[%s6447_s2 + $0x740] sm:$0xff]  }
  0xb2   :  { %4819 = vmatprep.subr.bf16.mxu1 %v5164_v45 }
  0xb4   :  { %4792 = vmatpush3.bf16.msra.mxu0 %v5165_v46  ;;  %v5220_v46 = vld [vmem:[%s6447_s2 + $0x7c0] sm:$0xff]  }
  0xb5   :  { %4820 = vmatpush3.bf16.msra.mxu1 %v5166_v47  ;;  %4793 = vmatprep.subr.bf16.mxu0 %v5171_v56  ;;  %v6186_v56 = vld [vmem:[%s6449_s1 + $0x28] sm:$0xff] }
  0xb6   :  { %4821 = vmatprep.subr.bf16.mxu1 %v5172_v57 }
  0xb8   :  { %4794 = vmatpush3.bf16.msra.mxu0 %v5173_v58 }
  0xb9   :  { %4822 = vmatpush3.bf16.msra.mxu1 %v5174_v60  ;;  %4795 = vmatprep.subr.bf16.mxu0 %v5175_v61  ;;  %v4262_v60 = vcombine.low %v6176_v54, %v6181_v55  ;;  %v4263_v61 = vcombine.high %v6176_v54, %v6181_v55 }
  0xba   :  { %4823 = vmatprep.subr.bf16.mxu1 %v5176_v62  ;;  %v6197_v62 = vld [vmem:[%s6449_s1 + $0x38] sm:$0xff] }
  0xbc   :  { %4796 = vmatpush3.bf16.msra.mxu0 %v5177_v0 }
  0xbd   :  { %4824 = vmatpush3.bf16.msra.mxu1 %v5178_v59  ;;  %4797 = vmatprep.subr.bf16.mxu0 %v5179_v63  ;;  %v4264_v63 = vcombine.low %v6186_v56, %v6197_v62 }
  0xbe   :  { %4825 = vmatprep.subr.bf16.mxu1 %v5180_v1  ;;  %v4265_v1 = vcombine.high %v6186_v56, %v6197_v62 }
  0xc0   :  { %4798 = vmatpush3.bf16.msra.mxu0 %v5181_v2  ;;  %v5227_v2 = vld [vmem:[%s6447_s2 + $0x678] sm:$0xff]  }
  0xc1   :  { %4826 = vmatpush3.bf16.msra.mxu1 %v5182_v3  ;;  %4839 = vmatprep.subr.bf16.mxu0 %v5187_v10  ;;  %v5233_v10 = vld [vmem:[%s6447_s2 + $0x630] sm:$0xff]  }
  0xc2   :  { %4867 = vmatprep.subr.bf16.mxu1 %v5188_v11  ;;  %v5234_v11 = vld [vmem:[%s6447_s2 + $0x6b0] sm:$0xff]  }
  0xc3   :  { %2441 = vmatmul.mubr.bf16.vlgmr.msra.gmra.mxu0 %v4074_v6 }
  0xc4   :  { %2490 = vmatmul.mubr.bf16.vlgmr.msra.gmra.mxu1 %v4076_v8  ;;  %4840 = vmatpush3.bf16.msra.mxu0 %v5189_v12  ;;  %v5231_v8 = vld [vmem:[%s6447_s2 + $0x670] sm:$0xff]   ;;  %v5235_v12 = vld [vmem:[%s6447_s2 + $0x668] sm:$0xff]  }
  0xc5   :  { %4868 = vmatpush3.bf16.msra.mxu1 %v5190_v14  ;;  %4841 = vmatprep.subr.bf16.mxu0 %v5191_v16  ;;  %v5237_v14 = vld [vmem:[%s6447_s2 + $0x628] sm:$0xff]   ;;  %v5239_v16 = vld [vmem:[%s6447_s2 + $0x660] sm:$0xff]  }
  0xc6   :  { %2448 = vmatprep.mubr.bf16.mxu0 %v4079_v13  ;;  %4869 = vmatprep.subr.bf16.mxu1 %v5192_v17  ;;  %v5236_v13 = vld [vmem:[%s6447_s2 + $0x6e8] sm:$0xff]   ;;  %v5240_v17 = vld [vmem:[%s6447_s2 + $0x6e0] sm:$0xff]  }
  0xc7   :  { %2497 = vmatprep.mubr.bf16.mxu1 %v4081_v15  ;;  %v5238_v15 = vld [vmem:[%s6447_s2 + $0x6a8] sm:$0xff]  }
  0xc8   :  { %4842 = vmatpush3.bf16.msra.mxu0 %v5193_v18 }
  0xc9   :  { %4870 = vmatpush3.bf16.msra.mxu1 %v5194_v19  ;;  %4843 = vmatprep.subr.bf16.mxu0 %v5197_v22  ;;  %v5241_v19 = vld [vmem:[%s6447_s2 + $0x620] sm:$0xff]  }
  0xca   :  { %4871 = vmatprep.subr.bf16.mxu1 %v5198_v25  ;;  %v5242_v22 = vld [vmem:[%s6447_s2 + $0x6a0] sm:$0xff]   ;;  %v5243_v25 = vld [vmem:[%s6447_s2 + $0x658] sm:$0xff]  }
  0xcb   :  { %2449 = vmatmul.mubr.bf16.gmra.mxu0 %v4078_v20 }
  0xcc   :  { %2498 = vmatmul.mubr.bf16.gmra.mxu1 %v4080_v24  ;;  %4844 = vmatpush3.bf16.msra.mxu0 %v5200_v26 }
  0xcd   :  { %4872 = vmatpush3.bf16.msra.mxu1 %v5201_v21  ;;  %4845 = vmatprep.subr.bf16.mxu0 %v5203_v23  ;;  %v5244_v23 = vld [vmem:[%s6447_s2 + $0x6d8] sm:$0xff]  }
  0xce   :  { %4873 = vmatprep.subr.bf16.mxu1 %v5204_v27  ;;  %2950 = vmatprep.mubr.bf16.mxu0 %v4263_v61  ;;  %v6262_v27 = vld [vmem:[%s6449_s1 + $0x40] sm:$0xff] }
  0xcf   :  { %2999 = vmatprep.mubr.bf16.mxu1 %v4265_v1  ;;  %v5260_v1 = vld [vmem:[%s6447_s2 + $0x6c0] sm:$0xff]  }
  0xd0   :  { %4846 = vmatpush3.bf16.msra.mxu0 %v5205_v28  ;;  %v4196_v28 = vld [vmem:[%s6449_s1 + $0x50] sm:$0xff] }
  0xd1   :  { %4874 = vmatpush3.bf16.msra.mxu1 %v5206_v29  ;;  %4847 = vmatprep.subr.bf16.mxu0 %v5207_v30 }
  0xd2   :  { %4875 = vmatprep.subr.bf16.mxu1 %v5208_v31  ;;  %v4267_v31 = vcombine.high %v6262_v27, %v4196_v28 }
  0xd4   :  { %4848 = vmatpush3.bf16.msra.mxu0 %v5209_v32  ;;  %v6271_v32 = vld [vmem:[%s6449_s1 + $0x48] sm:$0xff] }
  0xd5   :  { %4876 = vmatpush3.bf16.msra.mxu1 %v5210_v34  ;;  %4849 = vmatprep.subr.bf16.mxu0 %v5211_v35  ;;  %v4197_v34 = vld [vmem:[%s6449_s1 + $0x58] sm:$0xff]  ;;  %v4266_v35 = vcombine.low %v6262_v27, %v4196_v28 }
  0xd6   :  { %4877 = vmatprep.subr.bf16.mxu1 %v5212_v36 }
  0xd8   :  { %4850 = vmatpush3.bf16.msra.mxu0 %v5213_v33  ;;  %v4269_v33 = vcombine.high %v6271_v32, %v4197_v34 }
  0xd9   :  { %4878 = vmatpush3.bf16.msra.mxu1 %v5214_v37  ;;  %4851 = vmatprep.subr.bf16.mxu0 %v5215_v38  ;;  %v5247_v37 = vld [vmem:[%s6447_s2 + $0x618] sm:$0xff]   ;;  %v4268_v38 = vcombine.low %v6271_v32, %v4197_v34 }
  0xda   :  { %4879 = vmatprep.subr.bf16.mxu1 %v5216_v39 }
  0xdc   :  { %4852 = vmatpush3.bf16.msra.mxu0 %v5217_v40 }
  0xdd   :  { %4880 = vmatpush3.bf16.msra.mxu1 %v5218_v42  ;;  %4853 = vmatprep.subr.bf16.mxu0 %v5219_v44  ;;  %v5251_v44 = vld [vmem:[%s6447_s2 + $0x650] sm:$0xff]  }
  0xde   :  { %4881 = vmatprep.subr.bf16.mxu1 %v5220_v46  ;;  %v5252_v46 = vld [vmem:[%s6447_s2 + $0x6d0] sm:$0xff]  }
  0xe0   :  { %4854 = vmatpush3.bf16.msra.mxu0 %v5221_v49  ;;  %v5254_v49 = vld [vmem:[%s6447_s2 + $0x690] sm:$0xff]  }
  0xe1   :  { %4882 = vmatpush3.bf16.msra.mxu1 %v5222_v52  ;;  %4895 = vmatprep.subr.bf16.mxu0 %v5227_v2 }
  0xe2   :  { %4923 = vmatprep.subr.bf16.mxu1 %v5228_v4  ;;  %v5261_v4 = vld [vmem:[%s6447_s2 + $0x600] sm:$0xff]  }
  0xe3   :  { %v4519_v41 = vpop.f32.mrf.mxu0  ;;  %2951 = vmatmul.mubr.bf16.vlgmr.msra.gmra.mxu0 %v4262_v60  ;;  %v5258_v60 = vld [vmem:[%s6447_s2 + $0x688] sm:$0xff]  }
  0xe4   :  { %v4547_v43 = vpop.f32.mrf.mxu1  ;;  %3000 = vmatmul.mubr.bf16.vlgmr.msra.gmra.mxu1 %v4264_v63  ;;  %4896 = vmatpush3.bf16.msra.mxu0 %v5229_v5 }
  0xe5   :  { %v4520_v45 = vpop.f32.mrf.mxu0  ;;  %4924 = vmatpush3.bf16.msra.mxu1 %v5230_v7  ;;  %4897 = vmatprep.subr.bf16.mxu0 %v5231_v8  ;;  %v5262_v8 = vld [vmem:[%s6447_s2 + $0x680] sm:$0xff]  }
  0xe6   :  { %v4521_v47 = vadd.f32 %v4520_v45, %v4519_v41  ;;  %v4548_v48 = vpop.f32.mrf.mxu1  ;;  %4925 = vmatprep.subr.bf16.mxu1 %v5232_v9  ;;  %2958 = vmatprep.mubr.bf16.mxu0 %v4267_v31  ;;  %v5248_v41 = vld [vmem:[%s6447_s2 + $0x698] sm:$0xff]   ;;  %v4118_v9 = vld [vmem:[%s6449_s1 + $0x10] sm:$0xff] }
  0xe7   :  { %v4549_v50 = vadd.f32 %v4548_v48, %v4547_v43  ;;  %v4522_v51 = vpop.f32.mrf.mxu0  ;;  %3007 = vmatprep.mubr.bf16.mxu1 %v4269_v33 }
  0xe8   :  { %v4550_v53 = vpop.f32.mrf.mxu1  ;;  %4898 = vmatpush3.bf16.msra.mxu0 %v5233_v10 }
  0xe9   :  { %v6188_v57 = vadd.f32 %v4549_v50, %v4521_v47  ;;  %v4523_v58 = vpop.f32.mrf.mxu0  ;;  %4926 = vmatpush3.bf16.msra.mxu1 %v5234_v11  ;;  %4899 = vmatprep.subr.bf16.mxu0 %v5235_v12  ;;  %v5253_v47 = vld [vmem:[%s6447_s2 + $0x610] sm:$0xff]   ;;  %v5255_v50 = vld [vmem:[%s6447_s2 + $0x648] sm:$0xff]   ;;  %v4307_v11 = vcombine.high %v6181_v55, %v6262_v27  ;;  %v4302_v12 = vcombine.low %v4118_v9, %v6176_v54 }
  0xea   :  { %v4524_v0 = vadd.f32 %v4523_v58, %v4522_v51  ;;  %v4551_v59 = vpop.f32.mrf.mxu1  ;;  %4927 = vmatprep.subr.bf16.mxu1 %v5236_v13  ;;  %v5256_v51 = vld [vmem:[%s6447_s2 + $0x6c8] sm:$0xff]   ;;  %v4303_v13 = vcombine.high %v4118_v9, %v6176_v54 }
  0xeb   :  { %v4552_v3 = vadd.f32 %v4551_v59, %v4550_v53  ;;  %v4525_v18 = vpop.f32.mrf.mxu0  ;;  %2959 = vmatmul.mubr.bf16.gmra.mxu0 %v4266_v35  ;;  %v5257_v53 = vld [vmem:[%s6447_s2 + $0x608] sm:$0xff]  }
  0xec   :  { %4900 = vmatpush3.bf16.msra.mxu0 %v5237_v14  ;;  %v4553_v20 = vpop.f32.mrf.mxu1  ;;  %3008 = vmatmul.mubr.bf16.gmra.mxu1 %v4268_v38  ;;  %v4308_v38 = vcombine.low %v6197_v62, %v6271_v32 }
  0xed   :  { %v6212_v6 = vadd.f32 %v4552_v3, %v4524_v0  ;;  %4928 = vmatpush3.bf16.msra.mxu1 %v5238_v15  ;;  %4901 = vmatprep.subr.bf16.mxu0 %v5239_v16  ;;  %v4526_v24 = vpop.f32.mrf.mxu0  ;;  %v5259_v0 = vld [vmem:[%s6447_s2 + $0x640] sm:$0xff]  }
  0xee   :  { %4929 = vmatprep.subr.bf16.mxu1 %v5240_v17  ;;  %v4527_v26 = vadd.f32 %v4526_v24, %v4525_v18  ;;  %v4554_v21 = vpop.f32.mrf.mxu1  ;;  %3280 = vmatprep.mubr.bf16.mxu0 %v4303_v13 }
  0xef   :  { %v4555_v29 = vadd.f32 %v4554_v21, %v4553_v20  ;;  %v4528_v30 = vpop.f32.mrf.mxu0  ;;  %v4309_v20 = vcombine.high %v6197_v62, %v6271_v32 }
  0xf0   :  { %4902 = vmatpush3.bf16.msra.mxu0 %v5241_v19  ;;  %v4556_v36 = vpop.f32.mrf.mxu1 }
  0xf1   :  { %4930 = vmatpush3.bf16.msra.mxu1 %v5242_v22  ;;  %4903 = vmatprep.subr.bf16.mxu0 %v5243_v25  ;;  %v6282_v39 = vadd.f32 %v4555_v29, %v4527_v26  ;;  %v4529_v40 = vpop.f32.mrf.mxu0 }
  0xf2   :  { %4931 = vmatprep.subr.bf16.mxu1 %v5244_v23  ;;  %v4530_v42 = vadd.f32 %v4529_v40, %v4528_v30  ;;  %v4557_v43 = vpop.f32.mrf.mxu1 }
  0xf3   :  { %v4558_v45 = vadd.f32 %v4557_v43, %v4556_v36  ;;  %v4306_v36 = vcombine.low %v6181_v55, %v6262_v27 }
  0xf4   :  { %4904 = vmatpush3.bf16.msra.mxu0 %v5247_v37 }
  0xf5   :  { %4932 = vmatpush3.bf16.msra.mxu1 %v5248_v41  ;;  %4905 = vmatprep.subr.bf16.mxu0 %v5251_v44  ;;  %v6296_v48 = vadd.f32 %v4558_v45, %v4530_v42 }
  0xf6   :  { %4933 = vmatprep.subr.bf16.mxu1 %v5252_v46 }
  0xf8   :  { %4906 = vmatpush3.bf16.msra.mxu0 %v5253_v47 }
  0xf9   :  { %4934 = vmatpush3.bf16.msra.mxu1 %v5254_v49  ;;  %4907 = vmatprep.subr.bf16.mxu0 %v5255_v50 }
  0xfa   :  { %4935 = vmatprep.subr.bf16.mxu1 %v5256_v51 }
  0xfc   :  { %4908 = vmatpush3.bf16.msra.mxu0 %v5257_v53 }
  0xfd   :  { %4936 = vmatpush3.bf16.msra.mxu1 %v5258_v60  ;;  %4909 = vmatprep.subr.bf16.mxu0 %v5259_v0 }
  0xfe   :  { %4937 = vmatprep.subr.bf16.mxu1 %v5260_v1 }
 0x100   :  { %4910 = vmatpush3.bf16.msra.mxu0 %v5261_v4 }
 0x101   :  { %4938 = vmatpush3.bf16.msra.mxu1 %v5262_v8 }
 0x103   :  { %v4575_v52 = vpop.f32.mrf.mxu0  ;;  %3281 = vmatmul.mubr.bf16.vlgmr.msra.gmra.mxu0 %v4302_v12 }
 0x104   :  { %v4603_v58 = vpop.f32.mrf.mxu1  ;;  %3288 = vmatprep.mubr.bf16.mxu0 %v4307_v11 }
 0x105   :  { %v4576_v61 = vpop.f32.mrf.mxu0 }
 0x106   :  { %v4577_v59 = vadd.f32 %v4576_v61, %v4575_v52  ;;  %v4604_v63 = vpop.f32.mrf.mxu1 }
 0x107   :  { %v4605_v2 = vadd.f32 %v4604_v63, %v4603_v58  ;;  %v4578_v3 = vpop.f32.mrf.mxu0 }
 0x108   :  { %v764_v5 = vadd.f32 %v4577_v59, %v6188_v57  ;;  %v4606_v7 = vpop.f32.mrf.mxu1  ;;  %v4119_v57 = vld [vmem:[%s6449_s1 + $0x18] sm:$0xff] }
 0x109   :  { %v4579_v10 = vpop.f32.mrf.mxu0  ;;  %v4304_v17 = vcombine.low %v4119_v57, %v6186_v56  ;;  %v4305_v18 = vcombine.high %v4119_v57, %v6186_v56 }
 0x10a   :  { %v813_v14 = vadd.f32 %v4605_v2, %v764_v5  ;;  %v4580_v15 = vadd.f32 %v4579_v10, %v4578_v3  ;;  %v4607_v16 = vpop.f32.mrf.mxu1 }
 0x10b   :  { %v4608_v19 = vadd.f32 %v4607_v16, %v4606_v7  ;;  %v4581_v22 = vpop.f32.mrf.mxu0  ;;  %3329 = vmatprep.mubr.bf16.mxu1 %v4305_v18  ;;  %3289 = vmatmul.mubr.bf16.gmra.mxu0 %v4306_v36 }
 0x10c   :  { %v767_v54 = vadd.f32 %v4580_v15, %v6212_v6  ;;  %v4609_v24 = vpop.f32.mrf.mxu1  ;;  %3330 = vmatmul.mubr.bf16.vlgmr.msra.gmra.mxu1 %v4304_v17  ;;  %v837_v28 = vmul.f32 %v813_v14, %v813_v14 }
 0x10d   :  { %v4582_v25 = vpop.f32.mrf.mxu0  ;;  %3337 = vmatprep.mubr.bf16.mxu1 %v4309_v20 }
 0x10e   :  { %v816_v26 = vadd.f32 %v4608_v19, %v767_v54  ;;  %v4583_v21 = vadd.f32 %v4582_v25, %v4581_v22  ;;  %v4610_v23 = vpop.f32.mrf.mxu1 }
 0x10f   :  { %v4584_v56 = vpop.f32.mrf.mxu0  ;;  %v4611_v29 = vadd.f32 %v4610_v23, %v4609_v24 }
 0x110   :  { %v827_v30 = vadd.f32 %v816_v26, %v813_v14  ;;  %v838_v31 = vmul.f32 %v816_v26, %v816_v26  ;;  %v6341_v34 = vpack.c.bf16 %v816_v26, %v813_v14  ;;  %v772_v35 = vadd.f32 %v4583_v21, %v6282_v39  ;;  %v4612_v6 = vpop.f32.mrf.mxu1 }
 0x111   :  { %v4585_v33 = vpop.f32.mrf.mxu0 }
 0x112   :  { %v841_v37 = vadd.f32 %v838_v31, %v837_v28  ;;  %v821_v40 = vadd.f32 %v4611_v29, %v772_v35  ;;  %v4613_v41 = vpop.f32.mrf.mxu1  ;;  %v4586_v42 = vadd.f32 %v4585_v33, %v4584_v56 }
 0x113   :  { %v4614_v43 = vadd.f32 %v4613_v41, %v4612_v6 }
 0x114   :  { %v828_v44 = vadd.f32 %v827_v30, %v821_v40  ;;  %v839_v45 = vmul.f32 %v821_v40, %v821_v40  ;;  %v775_v46 = vadd.f32 %v4586_v42, %v6296_v48  ;;  %3338 = vmatmul.mubr.bf16.gmra.mxu1 %v4308_v38 }
 0x116   :  { %v842_v39 = vadd.f32 %v841_v37, %v839_v45  ;;  %v824_v47 = vadd.f32 %v4614_v43, %v775_v46 }
 0x118   :  { %v6349_v49 = vadd.f32 %v828_v44, %v824_v47  ;;  %v840_v55 = vmul.f32 %v824_v47, %v824_v47  ;;  %v6351_v27 = vpack.c.bf16 %v824_v47, %v821_v40 }
 0x11a   :  { %v6353_v50 = vadd.f32 %v842_v39, %v840_v55  ;;  %v830_v39 = vrot.slane %v6349_v49, 4 }
 0x123   :  { %v4631_v62 = vpop.f32.mrf.mxu0 }
 0x124   :  { %v4659_v32 = vpop.f32.mrf.mxu1 }
 0x125   :  { %v4632_v51 = vpop.f32.mrf.mxu0 }
 0x126   :  { %v4633_v52 = vadd.f32 %v4632_v51, %v4631_v62  ;;  %v4660_v53 = vpop.f32.mrf.mxu1  ;;  %v844_v51 = vrot.slane %v6353_v50, 4 }
 0x127   :  { %v4661_v58 = vadd.f32 %v4660_v53, %v4659_v32  ;;  %v4634_v60 = vpop.f32.mrf.mxu0 }
 0x128   :  { %v4662_v61 = vpop.f32.mrf.mxu1 }
 0x129   :  { %v1322_v0 = vadd.f32 %v4661_v58, %v4633_v52  ;;  %v4635_v48 = vpop.f32.mrf.mxu0 }
 0x12a   :  { %v4636_v59 = vadd.f32 %v4635_v48, %v4634_v60  ;;  %v4663_v63 = vpop.f32.mrf.mxu1 }
 0x12b   :  { %v4664_v1 = vadd.f32 %v4663_v63, %v4662_v61  ;;  %v4637_v3 = vpop.f32.mrf.mxu0  ;;  %v831_v61 = vadd.f32 %v830_v39, %v6349_v49 }
 0x12c   :  { %v4665_v4 = vpop.f32.mrf.mxu1 }
 0x12d   :  { %v1325_v2 = vadd.f32 %v4664_v1, %v4636_v59  ;;  %v4638_v5 = vpop.f32.mrf.mxu0  ;;  %v845_v59 = vadd.f32 %v844_v51, %v6353_v50  ;;  %v832_v1 = vrot.slane %v831_v61, 2 }
 0x12e   :  { %v4666_v7 = vpop.f32.mrf.mxu1  ;;  %v4639_v8 = vadd.f32 %v4638_v5, %v4637_v3 }
 0x12f   :  { %v4667_v9 = vadd.f32 %v4666_v7, %v4665_v4  ;;  %v4640_v10 = vpop.f32.mrf.mxu0  ;;  %v846_v5 = vrot.slane %v845_v59, 2 }
 0x130   :  { %v4668_v11 = vpop.f32.mrf.mxu1 }
 0x131   :  { %v1330_v12 = vadd.f32 %v4667_v9, %v4639_v8  ;;  %v4641_v13 = vpop.f32.mrf.mxu0  ;;  %v833_v9 = vadd.f32 %v832_v1, %v831_v61 }
 0x132   :  { %v4669_v57 = vpop.f32.mrf.mxu1  ;;  %v4642_v14 = vadd.f32 %v4641_v13, %v4640_v10 }
 0x133   :  { %v4670_v15 = vadd.f32 %v4669_v57, %v4668_v11  ;;  %v834_v49 = vrot.slane %v833_v9, 1 }
 0x135   :  { %v1333_v16 = vadd.f32 %v4670_v15, %v4642_v14 }
 0x143   :  { %v4687_v17 = vpop.f32.mrf.mxu0 }
 0x144   :  { %v4715_v18 = vpop.f32.mrf.mxu1 }
 0x145   :  { %v4688_v19 = vpop.f32.mrf.mxu0 }
 0x146   :  { %v4689_v20 = vadd.f32 %v4688_v19, %v4687_v17  ;;  %v4716_v22 = vpop.f32.mrf.mxu1 }
 0x147   :  { %v4717_v54 = vadd.f32 %v4716_v22, %v4715_v18  ;;  %v4690_v24 = vpop.f32.mrf.mxu0  ;;  %v835_v18 = vadd.f32 %v834_v49, %v833_v9 }
 0x148   :  { %v1603_v25 = vadd.f32 %v4689_v20, %v1322_v0  ;;  %v4718_v26 = vpop.f32.mrf.mxu1 }
 0x149   :  { %v4691_v21 = vpop.f32.mrf.mxu0 }
 0x14a   :  { %v1652_v23 = vadd.f32 %v4717_v54, %v1603_v25  ;;  %v4692_v28 = vadd.f32 %v4691_v21, %v4690_v24  ;;  %v4719_v56 = vpop.f32.mrf.mxu1 }
 0x14b   :  { %v4720_v29 = vadd.f32 %v4719_v56, %v4718_v26  ;;  %v4693_v30 = vpop.f32.mrf.mxu0 }
 0x14c   :  { %v1606_v31 = vadd.f32 %v4692_v28, %v1325_v2  ;;  %v4721_v35 = vpop.f32.mrf.mxu1  ;;  %v1676_v38 = vmul.f32 %v1652_v23, %v1652_v23 }
 0x14d   :  { %v4694_v6 = vpop.f32.mrf.mxu0 }
 0x14e   :  { %v1655_v36 = vadd.f32 %v4720_v29, %v1606_v31  ;;  %v4695_v33 = vadd.f32 %v4694_v6, %v4693_v30  ;;  %v4722_v37 = vpop.f32.mrf.mxu1 }
 0x14f   :  { %v4696_v40 = vpop.f32.mrf.mxu0  ;;  %v4723_v41 = vadd.f32 %v4722_v37, %v4721_v35 }
 0x150   :  { %v1666_v42 = vadd.f32 %v1655_v36, %v1652_v23  ;;  %v1677_v43 = vmul.f32 %v1655_v36, %v1655_v36  ;;  %v6355_v44 = vpack.c.bf16 %v1655_v36, %v1652_v23  ;;  %v1611_v45 = vadd.f32 %v4695_v33, %v1330_v12  ;;  %v4724_v46 = vpop.f32.mrf.mxu1 }
 0x151   :  { %v4697_v47 = vpop.f32.mrf.mxu0  ;;  %v847_v12 = vadd.f32 %v846_v5, %v845_v59 }
 0x152   :  { %6455 = vst [vmem:[#allocation2_spill] sm:$0xff] %v6355_v44  ;;  %v1680_v55 = vadd.f32 %v1677_v43, %v1676_v38  ;;  %v1660_v62 = vadd.f32 %v4723_v41, %v1611_v45  ;;  %v4725_v32 = vpop.f32.mrf.mxu1  ;;  %v4698_v52 = vadd.f32 %v4697_v47, %v4696_v40 }
 0x153   :  { %v4726_v53 = vadd.f32 %v4725_v32, %v4724_v46 }
 0x154   :  { %v1667_v58 = vadd.f32 %v1666_v42, %v1660_v62  ;;  %v1678_v60 = vmul.f32 %v1660_v62, %v1660_v62  ;;  %v1614_v0 = vadd.f32 %v4698_v52, %v1333_v16  ;;  %v848_v16 = vrot.slane %v847_v12, 1 }
 0x156   :  { %v1681_v48 = vadd.f32 %v1680_v55, %v1678_v60  ;;  %v1663_v63 = vadd.f32 %v4726_v53, %v1614_v0  ;;  %v849_v22 = vadd.f32 %v848_v16, %v847_v12 }
 0x158   :  { %v1668_v2 = vadd.f32 %v1667_v58, %v1663_v63  ;;  %v1679_v3 = vmul.f32 %v1663_v63, %v1663_v63  ;;  %v6361_v4 = vpack.c.bf16 %v1663_v63, %v1660_v62 }
 0x15a   :  { %6456 = vst [vmem:[#allocation3_spill] sm:$0xff] %v6361_v4  ;;  %v1669_v7 = vrot.slane %v1668_v2, 4  ;;  %v1682_v8 = vadd.f32 %v1681_v48, %v1679_v3 }
 0x15c   :  { %v1670_v10 = vadd.f32 %v1669_v7, %v1668_v2  ;;  %v1683_v11 = vrot.slane %v1682_v8, 4 }
 0x15e   :  { %v1671_v13 = vrot.slane %v1670_v10, 2  ;;  %v1684_v57 = vadd.f32 %v1683_v11, %v1682_v8 }
 0x160   :  { %v1672_v14 = vadd.f32 %v1671_v13, %v1670_v10  ;;  %v1685_v15 = vrot.slane %v1684_v57, 2 }
 0x162   :  { %v1673_v50 = vrot.slane %v1672_v14, 1  ;;  %v1686_v17 = vadd.f32 %v1685_v15, %v1684_v57 }
 0x163   :  { %v4743_v26 = vpop.f32.mrf.mxu0 }
 0x164   :  { %v1674_v19 = vadd.f32 %v1673_v50, %v1672_v14  ;;  %v1687_v20 = vrot.slane %v1686_v17, 1  ;;  %v4771_v21 = vpop.f32.mrf.mxu1 }
 0x165   :  { %v4744_v23 = vpop.f32.mrf.mxu0 }
 0x166   :  { %v6363_v54 = vadd.f32 %v1674_v19, %v835_v18  ;;  %v1688_v24 = vadd.f32 %v1687_v20, %v1686_v17  ;;  %v4772_v28 = vpop.f32.mrf.mxu1  ;;  %v4745_v11 = vadd.f32 %v4744_v23, %v4743_v26 }
 0x167   :  { %v4746_v56 = vpop.f32.mrf.mxu0  ;;  %v4773_v13 = vadd.f32 %v4772_v28, %v4771_v21 }
 0x168   :  { %v6365_v25 = vadd.f32 %v1688_v24, %v849_v22  ;;  %v4774_v29 = vpop.f32.mrf.mxu1 }
 0x169   :  { %v4747_v30 = vpop.f32.mrf.mxu0  ;;  %v2162_v22 = vadd.f32 %v4773_v13, %v4745_v11 }
 0x16a   :  { %v4775_v35 = vpop.f32.mrf.mxu1  ;;  %v4748_v8 = vadd.f32 %v4747_v30, %v4746_v56 }
 0x16b   :  { %v4749_v31 = vpop.f32.mrf.mxu0  ;;  %v4776_v9 = vadd.f32 %v4775_v35, %v4774_v29 }
 0x16c   :  { %v4777_v6 = vpop.f32.mrf.mxu1 }
 0x16d   :  { %v4750_v36 = vpop.f32.mrf.mxu0  ;;  %v2165_v50 = vadd.f32 %v4776_v9, %v4748_v8 }
 0x16e   :  { %v4778_v33 = vpop.f32.mrf.mxu1  ;;  %v4751_v57 = vadd.f32 %v4750_v36, %v4749_v31 }
 0x16f   :  { %v4752_v37 = vpop.f32.mrf.mxu0  ;;  %v4779_v49 = vadd.f32 %v4778_v33, %v4777_v6 }
 0x170   :  { %v4780_v38 = vpop.f32.mrf.mxu1 }
 0x171   :  { %v4753_v40 = vpop.f32.mrf.mxu0  ;;  %v2170_v24 = vadd.f32 %v4779_v49, %v4751_v57 }
 0x172   :  { %v4781_v42 = vpop.f32.mrf.mxu1  ;;  %v4754_v15 = vadd.f32 %v4753_v40, %v4752_v37 }
 0x173   :  { %v4782_v16 = vadd.f32 %v4781_v42, %v4780_v38 }
 0x175   :  { %v2173_v56 = vadd.f32 %v4782_v16, %v4754_v15 }
 0x183   :  { %v4799_v41 = vpop.f32.mrf.mxu0 }
 0x184   :  { %v4827_v43 = vpop.f32.mrf.mxu1 }
 0x185   :  { %v4800_v45 = vpop.f32.mrf.mxu0 }
 0x186   :  { %v4828_v46 = vpop.f32.mrf.mxu1  ;;  %v4801_v17 = vadd.f32 %v4800_v45, %v4799_v41 }
 0x187   :  { %v4802_v39 = vpop.f32.mrf.mxu0  ;;  %v4829_v29 = vadd.f32 %v4828_v46, %v4827_v43 }
 0x188   :  { %v4830_v47 = vpop.f32.mrf.mxu1  ;;  %v2443_v30 = vadd.f32 %v4801_v17, %v2162_v22 }
 0x189   :  { %v4803_v55 = vpop.f32.mrf.mxu0 }
 0x18a   :  { %v4831_v62 = vpop.f32.mrf.mxu1  ;;  %v4804_v14 = vadd.f32 %v4803_v55, %v4802_v39  ;;  %v6369_v33 = vadd.f32 %v4829_v29, %v2443_v30 }
 0x18b   :  { %v4805_v32 = vpop.f32.mrf.mxu0  ;;  %v4832_v26 = vadd.f32 %v4831_v62, %v4830_v47 }
 0x18c   :  { %v4833_v51 = vpop.f32.mrf.mxu1  ;;  %v2446_v4 = vadd.f32 %v4804_v14, %v2165_v50 }
 0x18d   :  { %v4806_v52 = vpop.f32.mrf.mxu0 }
 0x18e   :  { %v4834_v53 = vpop.f32.mrf.mxu1  ;;  %v4807_v18 = vadd.f32 %v4806_v52, %v4805_v32  ;;  %v6367_v35 = vadd.f32 %v4832_v26, %v2446_v4 }
 0x18f   :  { %v4808_v58 = vpop.f32.mrf.mxu0  ;;  %v4835_v21 = vadd.f32 %v4834_v53, %v4833_v51 }
 0x190   :  { %v4836_v60 = vpop.f32.mrf.mxu1  ;;  %v2451_v23 = vadd.f32 %v4807_v18, %v2170_v24  ;;  %v2517_v41 = vmul.f32 %v6367_v35, %v6367_v35  ;;  %v2506_v45 = vadd.f32 %v6367_v35, %v6369_v33 }
 0x191   :  { %v4809_v61 = vpop.f32.mrf.mxu0 }
 0x192   :  { %v4837_v0 = vpop.f32.mrf.mxu1  ;;  %v4810_v44 = vadd.f32 %v4809_v61, %v4808_v58  ;;  %v6371_v37 = vadd.f32 %v4835_v21, %v2451_v23 }
 0x193   :  { %v4838_v36 = vadd.f32 %v4837_v0, %v4836_v60 }
 0x194   :  { %v2454_v6 = vadd.f32 %v4810_v44, %v2173_v56  ;;  %v2516_v44 = vmul.f32 %v6369_v33, %v6369_v33  ;;  %v2518_v4 = vmul.f32 %v6371_v37, %v6371_v37  ;;  %v2507_v62 = vadd.f32 %v2506_v45, %v6371_v37 }
 0x196   :  { %v6375_v42 = vadd.f32 %v4838_v36, %v2454_v6  ;;  %v2520_v53 = vadd.f32 %v2517_v41, %v2516_v44 }
 0x198   :  { %v2519_v58 = vmul.f32 %v6375_v42, %v6375_v42  ;;  %v2508_v61 = vadd.f32 %v2507_v62, %v6375_v42  ;;  %v2521_v9 = vadd.f32 %v2520_v53, %v2518_v4 }
 0x1a3   :  { %v4855_v48 = vpop.f32.mrf.mxu0 }
 0x1a4   :  { %v4883_v59 = vpop.f32.mrf.mxu1 }
 0x1a5   :  { %v4856_v63 = vpop.f32.mrf.mxu0 }
 0x1a6   :  { %v4884_v1 = vpop.f32.mrf.mxu1  ;;  %v4857_v39 = vadd.f32 %v4856_v63, %v4855_v48 }
 0x1a7   :  { %v4858_v2 = vpop.f32.mrf.mxu0  ;;  %v4885_v47 = vadd.f32 %v4884_v1, %v4883_v59 }
 0x1a8   :  { %v4886_v3 = vpop.f32.mrf.mxu1 }
 0x1a9   :  { %v4859_v5 = vpop.f32.mrf.mxu0  ;;  %v3002_v11 = vadd.f32 %v4885_v47, %v4857_v39 }
 0x1aa   :  { %v4887_v7 = vpop.f32.mrf.mxu1  ;;  %v4860_v32 = vadd.f32 %v4859_v5, %v4858_v2  ;;  %v2522_v2 = vadd.f32 %v2521_v9, %v2519_v58  ;;  %v2509_v5 = vrot.slane %v2508_v61, 4 }
 0x1ab   :  { %v4861_v10 = vpop.f32.mrf.mxu0  ;;  %v4888_v51 = vadd.f32 %v4887_v7, %v4886_v3 }
 0x1ac   :  { %v4889_v12 = vpop.f32.mrf.mxu1  ;;  %v2523_v24 = vrot.slane %v2522_v2, 4 }
 0x1ad   :  { %v4862_v19 = vpop.f32.mrf.mxu0  ;;  %v3005_v48 = vadd.f32 %v4888_v51, %v4860_v32 }
 0x1ae   :  { %v4890_v20 = vpop.f32.mrf.mxu1  ;;  %v4863_v59 = vadd.f32 %v4862_v19, %v4861_v10  ;;  %v2524_v41 = vadd.f32 %v2523_v24, %v2522_v2 }
 0x1af   :  { %v4864_v28 = vpop.f32.mrf.mxu0  ;;  %v4891_v63 = vadd.f32 %v4890_v20, %v4889_v12  ;;  %v2510_v12 = vadd.f32 %v2509_v5, %v2508_v61 }
 0x1b0   :  { %v4892_v31 = vpop.f32.mrf.mxu1  ;;  %v2525_v39 = vrot.slane %v2524_v41, 2 }
 0x1b1   :  { %v4865_v38 = vpop.f32.mrf.mxu0  ;;  %v3010_v50 = vadd.f32 %v4891_v63, %v4863_v59 }
 0x1b2   :  { %v4893_v40 = vpop.f32.mrf.mxu1  ;;  %v4866_v56 = vadd.f32 %v4865_v38, %v4864_v28  ;;  %v2511_v28 = vrot.slane %v2510_v12, 2  ;;  %v2526_v58 = vadd.f32 %v2525_v39, %v2524_v41 }
 0x1b3   :  { %v4894_v29 = vadd.f32 %v4893_v40, %v4892_v31 }
 0x1b4   :  { %v2512_v32 = vadd.f32 %v2511_v28, %v2510_v12  ;;  %v4393_v12 = vpack.c.bf16 %v6367_v35, %v6369_v33  ;;  %v4417_v35 = vunpack.c.h.bf16 %v6351_v27  ;;  %v6457_v33 = vld [vmem:[#allocation2_spill] sm:$0xff] }
 0x1c3   :  { %v4911_v43 = vpop.f32.mrf.mxu0 }
 0x1c5   :  { %v4912_v55 = vpop.f32.mrf.mxu0 }
 0x1c6   :  { %v4913_v0 = vadd.f32 %v4912_v55, %v4911_v43  ;;  %v3013_v43 = vadd.f32 %v4894_v29, %v4866_v56  ;;  %v3399_v29 = vlaneseq }
 0x1c7   :  { %v4914_v60 = vpop.f32.mrf.mxu0 }
 0x1c8   :  { %v3283_v7 = vadd.f32 %v4913_v0, %v3002_v11  ;;  %v2513_v0 = vrot.slane %v2512_v32, 1  ;;  %v2527_v11 = vrot.slane %v2526_v58, 1 }
 0x1c9   :  { %v4915_v13 = vpop.f32.mrf.mxu0 }
 0x1ca   :  { %v4916_v1 = vadd.f32 %v4915_v13, %v4914_v60  ;;  %v2514_v59 = vadd.f32 %v2513_v0, %v2512_v32 }
 0x1cb   :  { %v4917_v3 = vpop.f32.mrf.mxu0 }
 0x1cc   :  { %v4939_v46 = vpop.f32.mrf.mxu1  ;;  %v3286_v49 = vadd.f32 %v4916_v1, %v3005_v48  ;;  %v2515_v5 = vadd.f32 %v2514_v59, %v6363_v54  ;;  %v3383_v54 = vld [vmem:[%s6450_s3] sm:$0x1] }
 0x1cd   :  { %v4918_v16 = vpop.f32.mrf.mxu0 }
 0x1ce   :  { %v4940_v52 = vpop.f32.mrf.mxu1  ;;  %v4919_v18 = vadd.f32 %v4918_v16, %v4917_v3 }
 0x1cf   :  { %v4941_v17 = vadd.f32 %v4940_v52, %v4939_v46  ;;  %v4920_v10 = vpop.f32.mrf.mxu0 }
 0x1d0   :  { %v4942_v8 = vpop.f32.mrf.mxu1  ;;  %v3291_v20 = vadd.f32 %v4919_v18, %v3010_v50 }
 0x1d1   :  { %v6389_v19 = vadd.f32 %v4941_v17, %v3283_v7  ;;  %v4921_v21 = vpop.f32.mrf.mxu0 }
 0x1d2   :  { %v4943_v57 = vpop.f32.mrf.mxu1  ;;  %v4922_v46 = vadd.f32 %v4921_v21, %v4920_v10  ;;  %v3400_v10 = vshrl.u32 %v3399_v29, 7  ;;  %v4413_v21 = vunpack.c.h.bf16 %v6341_v34 }
 0x1d3   :  { %v4944_v15 = vadd.f32 %v4943_v57, %v4942_v8  ;;  %v3356_v31 = vmul.f32 %v6389_v19, %v6389_v19  ;;  %v2528_v57 = vadd.f32 %v2527_v11, %v2526_v58 }
 0x1d4   :  { %v4945_v14 = vpop.f32.mrf.mxu1  ;;  %v3294_v44 = vadd.f32 %v4922_v46, %v3013_v43  ;;  %v4431_v46 = vunpack.c.h.bf16 %v6457_v33 }
 0x1d5   :  { %v6387_v30 = vadd.f32 %v4944_v15, %v3286_v49 }
 0x1d6   :  { %v4946_v22 = vpop.f32.mrf.mxu1 }
 0x1d7   :  { %v4947_v26 = vadd.f32 %v4946_v22, %v4945_v14  ;;  %v3357_v45 = vmul.f32 %v6387_v30, %v6387_v30  ;;  %v3346_v38 = vadd.f32 %v6387_v30, %v6389_v19  ;;  %v2529_v14 = vadd.f32 %v2528_v57, %v6365_v25 }
 0x1d8   :  { %v4948_v23 = vpop.f32.mrf.mxu1  ;;  %v4412_v25 = vunpack.c.l.bf16 %v6341_v34  ;;  %v4403_v41 = vpack.c.bf16 %v6387_v30, %v6389_v19  ;;  %v4449_v34 = vunpack.c.h.bf16 %v4393_v12 }
 0x1d9   :  { %v3340_v6 = vadd.f32 %v4947_v26, %v3291_v20  ;;  %v3360_v47 = vadd.f32 %v3357_v45, %v3356_v31  ;;  %v4398_v20 = vpack.c.bf16 %v6375_v42, %v6371_v37  ;;  %v3401_v26 = vsub.s32 0, %v3400_v10  ;;  %v6458_v31 = vld [vmem:[#allocation3_spill] sm:$0xff] }
 0x1da   :  { %v4949_v36 = vpop.f32.mrf.mxu1  ;;  %v4430_v45 = vunpack.c.l.bf16 %v6457_v33  ;;  %v4434_v37 = vunpack.c.l.bf16 %v6458_v31  ;;  %v4435_v42 = vunpack.c.h.bf16 %v6458_v31 }
 0x1db   :  { %v3358_v40 = vmul.f32 %v3340_v6, %v3340_v6  ;;  %v4950_v4 = vadd.f32 %v4949_v36, %v4948_v23  ;;  %v3347_v55 = vadd.f32 %v3346_v38, %v3340_v6  ;;  %v4416_v36 = vunpack.c.l.bf16 %v6351_v27 }
 0x1dc   :  { %v4448_v38 = vunpack.c.l.bf16 %v4393_v12  ;;  %v4452_v30 = vunpack.c.l.bf16 %v4398_v20  ;;  %v4453_v19 = vunpack.c.h.bf16 %v4398_v20  ;;  %v4466_v27 = vunpack.c.l.bf16 %v4403_v41 }
 0x1dd   :  { %v3343_v62 = vadd.f32 %v4950_v4, %v3294_v44  ;;  %v3361_v51 = vadd.f32 %v3360_v47, %v3358_v40  ;;  %v3387_v40 = vld [vmem:[%s6451_s4] sm:$0x1]  ;;  %v4467_v4 = vunpack.c.h.bf16 %v4403_v41 }
 0x1df   :  { %v3348_v52 = vadd.f32 %v3347_v55, %v3343_v62  ;;  %v3359_v53 = vmul.f32 %v3343_v62, %v3343_v62  ;;  %v6411_v43 = vpack.c.bf16 %v3343_v62, %v3340_v6 }
 0x1e1   :  { %v3349_v60 = vrot.slane %v3348_v52, 4  ;;  %v3362_v61 = vadd.f32 %v3361_v51, %v3359_v53  ;;  %v4470_v39 = vunpack.c.l.bf16 %v6411_v43  ;;  %v4471_v47 = vunpack.c.h.bf16 %v6411_v43 }
 0x1e3   :  { %v3350_v8 = vadd.f32 %v3349_v60, %v3348_v52  ;;  %v3363_v9 = vrot.slane %v3362_v61, 4 }
 0x1e5   :  { %v3351_v13 = vrot.slane %v3350_v8, 2  ;;  %v3364_v48 = vadd.f32 %v3363_v9, %v3362_v61 }
 0x1e7   :  { %v3352_v63 = vadd.f32 %v3351_v13, %v3350_v8  ;;  %v3365_v1 = vrot.slane %v3364_v48, 2 }
 0x1e9   :  { %v3353_v2 = vrot.slane %v3352_v63, 1  ;;  %v3366_v3 = vadd.f32 %v3365_v1, %v3364_v48 }
 0x1eb   :  { %v3354_v7 = vadd.f32 %v3353_v2, %v3352_v63  ;;  %v3367_v49 = vrot.slane %v3366_v3, 1 }
 0x1ed   :  { %v3355_v15 = vadd.f32 %v3354_v7, %v2515_v5  ;;  %v3368_v16 = vadd.f32 %v3367_v49, %v3366_v3 }
 0x1ef   :  { %v3369_v50 = vadd.f32 %v3368_v16, %v2529_v14  ;;  %v3379_v17 = vmul.f32 0.0078125, %v3355_v15 }
 0x1f1   :  { %v3380_v18 = vmul.f32 0.0078125, %v3369_v50  ;;  %v3381_v22 = vmul.f32 %v3379_v17, %v3379_v17 }
 0x1f3   :  { %v3382_v24 = vsub.f32 %v3380_v18, %v3381_v22 }
 0x1f5   :  { %v3384_v56 = vadd.f32 1e-05, %v3382_v24 }
 0x1f7   :  { %5271 = vrsqrt.f32 %v3384_v56 }
 0x204   :  { %v5272_v23 = vpop.eup %5271 }
 0x205   :  { %v3386_v28 = vmul.f32 %v5272_v23, %v3383_v54 }
 0x207   :  { %v3388_v6 = vmul.f32 %v3386_v28, %v3379_v17  ;;  %v3402_v44 = vrot.slane %v3386_v28, %v3401_v26 }
 0x209   :  { %v3389_v55 = vsub.f32 %v3387_v40, %v3388_v6  ;;  %v3404_v62 = vmul.f32 %v4412_v25, %v3402_v44  ;;  %v3405_v32 = vmul.f32 %v4413_v21, %v3402_v44  ;;  %v3406_v51 = vmul.f32 %v4416_v36, %v3402_v44 }
 0x20a   :  { %v3407_v52 = vmul.f32 %v4417_v35, %v3402_v44  ;;  %v3438_v53 = vmul.f32 %v4430_v45, %v3402_v44  ;;  %v3439_v58 = vmul.f32 %v4431_v46, %v3402_v44  ;;  %v3440_v60 = vmul.f32 %v4434_v37, %v3402_v44 }
 0x20b   :  { %v3412_v61 = vrot.slane %v3389_v55, %v3401_v26  ;;  %v3441_v0 = vmul.f32 %v4435_v42, %v3402_v44  ;;  %v3466_v8 = vmul.f32 %v4448_v38, %v3402_v44  ;;  %v3467_v9 = vmul.f32 %v4449_v34, %v3402_v44 }
 0x20c   :  { %v3468_v11 = vmul.f32 %v4452_v30, %v3402_v44  ;;  %v3469_v13 = vmul.f32 %v4453_v19, %v3402_v44  ;;  %v3494_v48 = vmul.f32 %v4466_v27, %v3402_v44  ;;  %v3495_v59 = vmul.f32 %v4467_v4, %v3402_v44 }
 0x20d   :  { %v3414_v63 = vadd.f32 %v3412_v61, %v3404_v62  ;;  %v3415_v1 = vadd.f32 %v3412_v61, %v3405_v32  ;;  %v3416_v57 = vadd.f32 %v3412_v61, %v3406_v51  ;;  %v3417_v2 = vadd.f32 %v3412_v61, %v3407_v52 }
 0x20e   :  { %v3442_v3 = vadd.f32 %v3438_v53, %v3412_v61  ;;  %v3443_v5 = vadd.f32 %v3439_v58, %v3412_v61  ;;  %v3444_v7 = vadd.f32 %v3440_v60, %v3412_v61  ;;  %v3445_v49 = vadd.f32 %v3441_v0, %v3412_v61 }
 0x20f   :  { %v3418_v14 = vmax.f32 %v3414_v63, 0.0  ;;  %v3419_v15 = vmax.f32 %v3415_v1, 0.0  ;;  %v3420_v16 = vmax.f32 %v3416_v57, 0.0  ;;  %v3421_v50 = vmax.f32 %v3417_v2, 0.0 }
 0x210   :  { %v3446_v17 = vmax.f32 %v3442_v3, 0.0  ;;  %v3447_v18 = vmax.f32 %v3443_v5, 0.0  ;;  %v3448_v22 = vmax.f32 %v3444_v7, 0.0  ;;  %v3449_v24 = vmax.f32 %v3445_v49, 0.0 }
 0x211   :  { %v4421_v56 = vpack.c.bf16 %v3419_v15, %v3418_v14  ;;  %v4426_v29 = vpack.c.bf16 %v3421_v50, %v3420_v16  ;;  %v3470_v10 = vadd.f32 %v3466_v8, %v3412_v61  ;;  %v3471_v12 = vadd.f32 %v3467_v9, %v3412_v61 }
 0x212   :  { %v4439_v54 = vpack.c.bf16 %v3447_v18, %v3446_v17  ;;  %v4444_v25 = vpack.c.bf16 %v3449_v24, %v3448_v22  ;;  %v3472_v20 = vadd.f32 %v3468_v11, %v3412_v61  ;;  %v3473_v26 = vadd.f32 %v3469_v13, %v3412_v61 }
 0x213   :  { %4422 = vst [vmem:[%s6452_s5] sm:$0xff] %v4421_v56   ;;  %4490 = vst [vmem:[%s6452_s5 + $0x8] sm:$0xff] %v4426_v29   ;;  %v3474_v23 = vmax.f32 %v3470_v10, 0.0  ;;  %v3475_v21 = vmax.f32 %v3471_v12, 0.0  ;;  %v3496_v36 = vmul.f32 %v4470_v39, %v3402_v44  ;;  %v3497_v41 = vmul.f32 %v4471_v47, %v3402_v44 }
 0x214   :  { %4493 = vst [vmem:[%s6452_s5 + $0x10] sm:$0xff] %v4439_v54   ;;  %4494 = vst [vmem:[%s6452_s5 + $0x18] sm:$0xff] %v4444_v25   ;;  %v3476_v43 = vmax.f32 %v3472_v20, 0.0  ;;  %v3477_v35 = vmax.f32 %v3473_v26, 0.0  ;;  %v3498_v33 = vadd.f32 %v3494_v48, %v3412_v61  ;;  %v3499_v45 = vadd.f32 %v3495_v59, %v3412_v61 }
 0x215   :  { %v4457_v46 = vpack.c.bf16 %v3475_v21, %v3474_v23  ;;  %v3500_v28 = vadd.f32 %v3496_v36, %v3412_v61  ;;  %v3501_v31 = vadd.f32 %v3497_v41, %v3412_v61 }
 0x216   :  { %v4462_v37 = vpack.c.bf16 %v3477_v35, %v3476_v43  ;;  %v3502_v42 = vmax.f32 %v3498_v33, 0.0  ;;  %v3503_v38 = vmax.f32 %v3499_v45, 0.0 }
 0x217   :  { %4497 = vst [vmem:[%s6452_s5 + $0x20] sm:$0xff] %v4457_v46   ;;  %v3504_v34 = vmax.f32 %v3500_v28, 0.0  ;;  %v3505_v40 = vmax.f32 %v3501_v31, 0.0 }
 0x218   :  { %4498 = vst [vmem:[%s6452_s5 + $0x28] sm:$0xff] %v4462_v37   ;;  %v4475_v30 = vpack.c.bf16 %v3503_v38, %v3502_v42 }
 0x219   :  { %v4480_v19 = vpack.c.bf16 %v3505_v40, %v3504_v34 }
 0x21a   :  { %4501 = vst [vmem:[%s6452_s5 + $0x30] sm:$0xff] %v4475_v30  }
 0x21b   :  { %4502 = vst [vmem:[%s6452_s5 + $0x38] sm:$0xff] %v4480_v19  }

// kernel: generator_forward.6
= control target key start
LH: loop header
LB: loop body
LE: loop exit
PB: predicated region body
PF: predicated region fallthrough
CT: control target
= control target key end

     0   :  { %s7322_s2 = inlined_call_operand.vmem [shape: bf16[8,256,128], index: 2, kind: input, shape index: {}]   ;;  %s7323_s0 = inlined_call_operand.vmem [shape: bf16[10,16,256], index: 0, kind: input, shape index: {}]   ;;  %s7324_s1 = inlined_call_operand.vmem [shape: bf16[10,16,256], index: 1, kind: input, shape index: {}]   ;;  %s7325_s3 = inlined_call_operand.vmem [shape: f32[1,128], index: 3, kind: input, shape index: {}]   ;;  %s7326_s4 = inlined_call_operand.vmem [shape: f32[1,128], index: 4, kind: input, shape index: {}]   ;;  %s7327_s5 = inlined_call_operand.vmem [shape: bf16[4,8,16,128], index: 5, kind: output, shape index: {}]  }
   0x1   :  { %v5859_v0 = vld [vmem:[%s7322_s2 + $0xf8] sm:$0xff]   ;;  %v5863_v4 = vld [vmem:[%s7322_s2 + $0xf0] sm:$0xff]   ;;  %v5867_v8 = vld [vmem:[%s7322_s2 + $0xe8] sm:$0xff]  }
   0x2   :  { %v5860_v1 = vld [vmem:[%s7322_s2 + $0x78] sm:$0xff]   ;;  %5347 = vmatprep.subr.bf16.mxu0 %v5859_v0  ;;  %v5864_v5 = vld [vmem:[%s7322_s2 + $0x70] sm:$0xff]   ;;  %v5868_v9 = vld [vmem:[%s7322_s2 + $0x68] sm:$0xff]  }
   0x3   :  { %v5861_v2 = vld [vmem:[%s7322_s2 + $0xb8] sm:$0xff]   ;;  %5411 = vmatprep.subr.bf16.mxu1 %v5860_v1  ;;  %v5865_v6 = vld [vmem:[%s7322_s2 + $0xb0] sm:$0xff]   ;;  %v5869_v10 = vld [vmem:[%s7322_s2 + $0xa8] sm:$0xff]  }
   0x4   :  { %v5862_v3 = vld [vmem:[%s7322_s2 + $0x38] sm:$0xff]   ;;  %5348 = vmatpush3.bf16.msra.mxu0 %v5861_v2  ;;  %v5866_v7 = vld [vmem:[%s7322_s2 + $0x30] sm:$0xff]   ;;  %v5870_v11 = vld [vmem:[%s7322_s2 + $0x28] sm:$0xff]  }
   0x5   :  { %5412 = vmatpush3.bf16.msra.mxu1 %v5862_v3  ;;  %5349 = vmatprep.subr.bf16.mxu0 %v5863_v4  ;;  %v5871_v12 = vld [vmem:[%s7322_s2 + $0xe0] sm:$0xff]   ;;  %v5875_v16 = vld [vmem:[%s7322_s2 + $0xd8] sm:$0xff]   ;;  %v5879_v20 = vld [vmem:[%s7322_s2 + $0xd0] sm:$0xff]  }
   0x6   :  { %5413 = vmatprep.subr.bf16.mxu1 %v5864_v5  ;;  %v5872_v13 = vld [vmem:[%s7322_s2 + $0x60] sm:$0xff]   ;;  %v5876_v17 = vld [vmem:[%s7322_s2 + $0x58] sm:$0xff]   ;;  %v5880_v21 = vld [vmem:[%s7322_s2 + $0x50] sm:$0xff]  }
   0x7   :  { %v5873_v14 = vld [vmem:[%s7322_s2 + $0xa0] sm:$0xff]   ;;  %v5877_v18 = vld [vmem:[%s7322_s2 + $0x98] sm:$0xff]   ;;  %v5881_v22 = vld [vmem:[%s7322_s2 + $0x90] sm:$0xff]  }
   0x8   :  { %5350 = vmatpush3.bf16.msra.mxu0 %v5865_v6  ;;  %v5874_v15 = vld [vmem:[%s7322_s2 + $0x20] sm:$0xff]   ;;  %v5878_v19 = vld [vmem:[%s7322_s2 + $0x18] sm:$0xff]   ;;  %v5882_v23 = vld [vmem:[%s7322_s2 + $0x10] sm:$0xff]  }
   0x9   :  { %5414 = vmatpush3.bf16.msra.mxu1 %v5866_v7  ;;  %5351 = vmatprep.subr.bf16.mxu0 %v5867_v8  ;;  %v5883_v24 = vld [vmem:[%s7322_s2 + $0xc8] sm:$0xff]   ;;  %v5887_v28 = vld [vmem:[%s7322_s2 + $0xc0] sm:$0xff]   ;;  %v6181_v32 = vld [vmem:[%s7323_s0 + $0x10] ss:$8 sps:$4 sm:$0xff]  }
   0xa   :  { %5415 = vmatprep.subr.bf16.mxu1 %v5868_v9  ;;  %v5884_v25 = vld [vmem:[%s7322_s2 + $0x48] sm:$0xff]   ;;  %v5888_v29 = vld [vmem:[%s7322_s2 + $0x40] sm:$0xff]   ;;  %v6186_v33 = vld [vmem:[%s7323_s0 + $0x14] ss:$8 sps:$4 sm:$0xff]  }
   0xb   :  { %v5885_v26 = vld [vmem:[%s7322_s2 + $0x88] sm:$0xff]   ;;  %v5889_v30 = vld [vmem:[%s7322_s2 + $0x80] sm:$0xff]   ;;  %327 = vmatprep.mubr.bf16.mxu0 %v6186_v33  ;;  %v5897_v36 = vld [vmem:[%s7322_s2 + $0x1f8] sm:$0xff]  }
   0xc   :  { %5352 = vmatpush3.bf16.msra.mxu0 %v5869_v10  ;;  %v5886_v27 = vld [vmem:[%s7322_s2 + $0x8] sm:$0xff]   ;;  %v5890_v31 = vld [vmem:[%s7322_s2] sm:$0xff]   ;;  %v5898_v37 = vld [vmem:[%s7322_s2 + $0x178] sm:$0xff]  }
   0xd   :  { %5416 = vmatpush3.bf16.msra.mxu1 %v5870_v11  ;;  %5353 = vmatprep.subr.bf16.mxu0 %v5871_v12  ;;  %v5894_v34 = vld [vmem:[%s7323_s0] ss:$8 sps:$4 sm:$0xff]   ;;  %v5896_v35 = vld [vmem:[%s7323_s0 + $0x4] ss:$8 sps:$4 sm:$0xff]   ;;  %v5899_v38 = vld [vmem:[%s7322_s2 + $0x1b8] sm:$0xff]  }
   0xe   :  { %5417 = vmatprep.subr.bf16.mxu1 %v5872_v13  ;;  %600 = vmatprep.mubr.bf16.mxu1 %v5896_v35  ;;  %v5900_v39 = vld [vmem:[%s7322_s2 + $0x138] sm:$0xff]   ;;  %v6212_v40 = vld [vmem:[%s7323_s0 + $0x24] ss:$8 sps:$4 sm:$0xff]   ;;  %v6217_v41 = vld [vmem:[%s7323_s0 + $0x20] ss:$8 sps:$4 sm:$0xff]  }
   0xf   :  { %v5904_v42 = vld [vmem:[%s7322_s2 + $0x1f0] sm:$0xff]   ;;  %v5911_v48 = vld [vmem:[%s7322_s2 + $0x1e8] sm:$0xff]   ;;  %v5918_v53 = vld [vmem:[%s7322_s2 + $0x1e0] sm:$0xff]  }
  0x10   :  { %5354 = vmatpush3.bf16.msra.mxu0 %v5873_v14  ;;  %v5905_v43 = vld [vmem:[%s7322_s2 + $0x170] sm:$0xff]   ;;  %v5912_v49 = vld [vmem:[%s7322_s2 + $0x168] sm:$0xff]   ;;  %v5919_v54 = vld [vmem:[%s7322_s2 + $0x160] sm:$0xff]  }
  0x11   :  { %5418 = vmatpush3.bf16.msra.mxu1 %v5874_v15  ;;  %5355 = vmatprep.subr.bf16.mxu0 %v5875_v16  ;;  %v5906_v44 = vld [vmem:[%s7322_s2 + $0x1b0] sm:$0xff]   ;;  %v5913_v50 = vld [vmem:[%s7322_s2 + $0x1a8] sm:$0xff]   ;;  %v5920_v55 = vld [vmem:[%s7322_s2 + $0x1a0] sm:$0xff]  }
  0x12   :  { %5419 = vmatprep.subr.bf16.mxu1 %v5876_v17  ;;  %v5907_v45 = vld [vmem:[%s7322_s2 + $0x130] sm:$0xff]   ;;  %v5914_v51 = vld [vmem:[%s7322_s2 + $0x128] sm:$0xff]   ;;  %v5921_v56 = vld [vmem:[%s7322_s2 + $0x120] sm:$0xff]  }
  0x13   :  { %v6236_v46 = vld [vmem:[%s7323_s0 + $0x34] ss:$8 sps:$4 sm:$0xff]   ;;  %v6243_v47 = vld [vmem:[%s7323_s0 + $0x30] ss:$8 sps:$4 sm:$0xff]   ;;  %v6261_v52 = vld [vmem:[%s7323_s0 + $0x44] ss:$8 sps:$4 sm:$0xff]  }
  0x14   :  { %5356 = vmatpush3.bf16.msra.mxu0 %v5877_v18  ;;  %v6282_v57 = vld [vmem:[%s7323_s0 + $0x40] ss:$8 sps:$4 sm:$0xff]   ;;  %v6287_v58 = vld [vmem:[%s7323_s0 + $0x54] ss:$8 sps:$4 sm:$0xff]   ;;  %v6308_v63 = vld [vmem:[%s7323_s0 + $0x50] ss:$8 sps:$4 sm:$0xff]  }
  0x15   :  { %5420 = vmatpush3.bf16.msra.mxu1 %v5878_v19  ;;  %5357 = vmatprep.subr.bf16.mxu0 %v5879_v20  ;;  %v5925_v59 = vld [vmem:[%s7322_s2 + $0x1d8] sm:$0xff]   ;;  %v5932_v0 = vld [vmem:[%s7322_s2 + $0x1d0] sm:$0xff]   ;;  %v6316_v1 = vld [vmem:[%s7323_s0 + $0x64] ss:$8 sps:$4 sm:$0xff]  }
  0x16   :  { %5421 = vmatprep.subr.bf16.mxu1 %v5880_v21  ;;  %v5926_v60 = vld [vmem:[%s7322_s2 + $0x158] sm:$0xff]   ;;  %v5933_v2 = vld [vmem:[%s7322_s2 + $0x150] sm:$0xff]   ;;  %v5939_v5 = vld [vmem:[%s7322_s2 + $0x1c8] sm:$0xff]  }
  0x17   :  { %v5927_v61 = vld [vmem:[%s7322_s2 + $0x198] sm:$0xff]   ;;  %v5934_v3 = vld [vmem:[%s7322_s2 + $0x190] sm:$0xff]   ;;  %v5940_v6 = vld [vmem:[%s7322_s2 + $0x148] sm:$0xff]  }
  0x18   :  { %5358 = vmatpush3.bf16.msra.mxu0 %v5881_v22  ;;  %v5928_v62 = vld [vmem:[%s7322_s2 + $0x118] sm:$0xff]   ;;  %v5935_v4 = vld [vmem:[%s7322_s2 + $0x110] sm:$0xff]   ;;  %v5941_v7 = vld [vmem:[%s7322_s2 + $0x188] sm:$0xff]  }
  0x19   :  { %5422 = vmatpush3.bf16.msra.mxu1 %v5882_v23  ;;  %5359 = vmatprep.subr.bf16.mxu0 %v5883_v24  ;;  %v5942_v8 = vld [vmem:[%s7322_s2 + $0x108] sm:$0xff]   ;;  %v6351_v10 = vld [vmem:[%s7323_s0 + $0x74] ss:$8 sps:$4 sm:$0xff]   ;;  %v5946_v11 = vld [vmem:[%s7322_s2 + $0x1c0] sm:$0xff]  }
  0x1a   :  { %5423 = vmatprep.subr.bf16.mxu1 %v5884_v25  ;;  %v6346_v9 = vld [vmem:[%s7323_s0 + $0x60] ss:$8 sps:$4 sm:$0xff]   ;;  %v6372_v15 = vld [vmem:[%s7323_s0 + $0x70] ss:$8 sps:$4 sm:$0xff]   ;;  %v6383_v18 = vld [vmem:[%s7323_s0 + $0x84] ss:$8 sps:$4 sm:$0xff]  }
  0x1b   :  { %v5947_v12 = vld [vmem:[%s7322_s2 + $0x140] sm:$0xff]   ;;  %v5956_v16 = vld [vmem:[%s7322_s2 + $0x2f8] sm:$0xff]   ;;  %v5971_v35 = vld [vmem:[%s7322_s2 + $0x268] sm:$0xff]  }
  0x1c   :  { %5360 = vmatpush3.bf16.msra.mxu0 %v5885_v26  ;;  %v5948_v13 = vld [vmem:[%s7322_s2 + $0x180] sm:$0xff]   ;;  %v5957_v17 = vld [vmem:[%s7322_s2 + $0x278] sm:$0xff]  }
  0x1d   :  { %5424 = vmatpush3.bf16.msra.mxu1 %v5886_v27  ;;  %5361 = vmatprep.subr.bf16.mxu0 %v5887_v28  ;;  %v5949_v14 = vld [vmem:[%s7322_s2 + $0x100] sm:$0xff]   ;;  %v6397_v20 = vld [vmem:[%s7324_s1 + $0x14] ss:$8 sps:$4 sm:$0xff]   ;;  %v6408_v22 = vld [vmem:[%s7324_s1 + $0x10] ss:$8 sps:$4 sm:$0xff]  }
  0x1e   :  { %5425 = vmatprep.subr.bf16.mxu1 %v5888_v29  ;;  %v6392_v19 = vld [vmem:[%s7323_s0 + $0x80] ss:$8 sps:$4 sm:$0xff]   ;;  %v5955_v21 = vld [vmem:[%s7324_s1 + $0x4] ss:$8 sps:$4 sm:$0xff]   ;;  %v5958_v24 = vld [vmem:[%s7322_s2 + $0x2b8] sm:$0xff]  }
  0x1f   :  { %v5953_v23 = vld [vmem:[%s7324_s1] ss:$8 sps:$4 sm:$0xff]   ;;  %v5959_v25 = vld [vmem:[%s7322_s2 + $0x238] sm:$0xff]   ;;  %v6422_v26 = vld [vmem:[%s7324_s1 + $0x24] ss:$8 sps:$4 sm:$0xff]  }
  0x20   :  { %5362 = vmatpush3.bf16.msra.mxu0 %v5889_v30  ;;  %v5963_v27 = vld [vmem:[%s7322_s2 + $0x2f0] sm:$0xff]  }
  0x21   :  { %5426 = vmatpush3.bf16.msra.mxu1 %v5890_v31  ;;  %5475 = vmatprep.subr.bf16.mxu0 %v5897_v36  ;;  %v5964_v28 = vld [vmem:[%s7322_s2 + $0x270] sm:$0xff]   ;;  %v6441_v31 = vld [vmem:[%s7324_s1 + $0x20] ss:$8 sps:$4 sm:$0xff]  }
  0x22   :  { %5539 = vmatprep.subr.bf16.mxu1 %v5898_v37  ;;  %v5965_v29 = vld [vmem:[%s7322_s2 + $0x2b0] sm:$0xff]   ;;  %v5972_v37 = vld [vmem:[%s7322_s2 + $0x2a8] sm:$0xff]  }
  0x23   :  { %328 = vmatmul.mubr.bf16.vlgmr.msra.gmra.mxu0 %v6181_v32  ;;  %v5966_v30 = vld [vmem:[%s7322_s2 + $0x230] sm:$0xff]  }
  0x24   :  { %601 = vmatmul.mubr.bf16.vlgmr.msra.gmra.mxu1 %v5894_v34  ;;  %5476 = vmatpush3.bf16.msra.mxu0 %v5899_v38  ;;  %v5970_v34 = vld [vmem:[%s7322_s2 + $0x2e8] sm:$0xff]   ;;  %v6453_v36 = vld [vmem:[%s7324_s1 + $0x34] ss:$8 sps:$4 sm:$0xff]  }
  0x25   :  { %608 = vmatprep.mubr.bf16.mxu1 %v6186_v33  ;;  %5540 = vmatpush3.bf16.msra.mxu1 %v5900_v39  ;;  %v5973_v38 = vld [vmem:[%s7322_s2 + $0x228] sm:$0xff]   ;;  %v5977_v39 = vld [vmem:[%s7322_s2 + $0x2e0] sm:$0xff]  }
  0x26   :  { %335 = vmatprep.mubr.bf16.mxu0 %v6212_v40  ;;  %5477 = vmatprep.subr.bf16.mxu0 %v5904_v42  ;;  %v5978_v42 = vld [vmem:[%s7322_s2 + $0x260] sm:$0xff]  }
  0x27   :  { %5541 = vmatprep.subr.bf16.mxu1 %v5905_v43  ;;  %v6474_v43 = vld [vmem:[%s7324_s1 + $0x30] ss:$8 sps:$4 sm:$0xff]  }
  0x28   :  { %5478 = vmatpush3.bf16.msra.mxu0 %v5906_v44  ;;  %v5979_v44 = vld [vmem:[%s7322_s2 + $0x2a0] sm:$0xff]  }
  0x29   :  { %5542 = vmatpush3.bf16.msra.mxu1 %v5907_v45  ;;  %5479 = vmatprep.subr.bf16.mxu0 %v5911_v48  ;;  %v5980_v45 = vld [vmem:[%s7322_s2 + $0x220] sm:$0xff]   ;;  %v5984_v48 = vld [vmem:[%s7322_s2 + $0x2d8] sm:$0xff]  }
  0x2a   :  { %5543 = vmatprep.subr.bf16.mxu1 %v5912_v49  ;;  %v5985_v49 = vld [vmem:[%s7322_s2 + $0x258] sm:$0xff]  }
  0x2b   :  { %336 = vmatmul.mubr.bf16.gmra.mxu0 %v6217_v41 }
  0x2c   :  { %609 = vmatmul.mubr.bf16.gmra.mxu1 %v6181_v32  ;;  %343 = vmatprep.mubr.bf16.mxu0 %v6236_v46 }
  0x2d   :  { %616 = vmatprep.mubr.bf16.mxu1 %v6212_v40  ;;  %5480 = vmatpush3.bf16.msra.mxu0 %v5913_v50  ;;  %v6491_v50 = vld [vmem:[%s7324_s1 + $0x44] ss:$8 sps:$4 sm:$0xff]  }
  0x2e   :  { %5544 = vmatpush3.bf16.msra.mxu1 %v5914_v51  ;;  %5481 = vmatprep.subr.bf16.mxu0 %v5918_v53  ;;  %v5986_v51 = vld [vmem:[%s7322_s2 + $0x298] sm:$0xff]  }
  0x2f   :  { %5545 = vmatprep.subr.bf16.mxu1 %v5919_v54  ;;  %v5987_v53 = vld [vmem:[%s7322_s2 + $0x218] sm:$0xff]   ;;  %v5991_v54 = vld [vmem:[%s7322_s2 + $0x2d0] sm:$0xff]  }
  0x31   :  { %5482 = vmatpush3.bf16.msra.mxu0 %v5920_v55  ;;  %v5992_v55 = vld [vmem:[%s7322_s2 + $0x250] sm:$0xff]  }
  0x32   :  { %5546 = vmatpush3.bf16.msra.mxu1 %v5921_v56  ;;  %5483 = vmatprep.subr.bf16.mxu0 %v5925_v59  ;;  %v5993_v56 = vld [vmem:[%s7322_s2 + $0x290] sm:$0xff]   ;;  %v6515_v59 = vld [vmem:[%s7324_s1 + $0x40] ss:$8 sps:$4 sm:$0xff]  }
  0x33   :  { %344 = vmatmul.mubr.bf16.gmra.mxu0 %v6243_v47  ;;  %5547 = vmatprep.subr.bf16.mxu1 %v5926_v60  ;;  %v5994_v60 = vld [vmem:[%s7322_s2 + $0x210] sm:$0xff]  }
  0x34   :  { %617 = vmatmul.mubr.bf16.gmra.mxu1 %v6217_v41  ;;  %351 = vmatprep.mubr.bf16.mxu0 %v6261_v52 }
  0x35   :  { %624 = vmatprep.mubr.bf16.mxu1 %v6236_v46  ;;  %5484 = vmatpush3.bf16.msra.mxu0 %v5927_v61  ;;  %v6523_v61 = vld [vmem:[%s7324_s1 + $0x54] ss:$8 sps:$4 sm:$0xff]  }
  0x36   :  { %5548 = vmatpush3.bf16.msra.mxu1 %v5928_v62  ;;  %5485 = vmatprep.subr.bf16.mxu0 %v5932_v0  ;;  %v5998_v62 = vld [vmem:[%s7322_s2 + $0x2c8] sm:$0xff]  }
  0x37   :  { %5549 = vmatprep.subr.bf16.mxu1 %v5933_v2  ;;  %v5999_v0 = vld [vmem:[%s7322_s2 + $0x248] sm:$0xff]  }
  0x38   :  { %v6000_v2 = vld [vmem:[%s7322_s2 + $0x288] sm:$0xff]  }
  0x39   :  { %5486 = vmatpush3.bf16.msra.mxu0 %v5934_v3  ;;  %v6001_v3 = vld [vmem:[%s7322_s2 + $0x208] sm:$0xff]  }
  0x3a   :  { %5550 = vmatpush3.bf16.msra.mxu1 %v5935_v4  ;;  %5487 = vmatprep.subr.bf16.mxu0 %v5939_v5  ;;  %v6005_v4 = vld [vmem:[%s7322_s2 + $0x2c0] sm:$0xff]  }
  0x3b   :  { %352 = vmatmul.mubr.bf16.gmra.mxu0 %v6282_v57  ;;  %5551 = vmatprep.subr.bf16.mxu1 %v5940_v6  ;;  %v6006_v5 = vld [vmem:[%s7322_s2 + $0x240] sm:$0xff]  }
  0x3c   :  { %625 = vmatmul.mubr.bf16.gmra.mxu1 %v6243_v47  ;;  %359 = vmatprep.mubr.bf16.mxu0 %v6287_v58  ;;  %v6007_v6 = vld [vmem:[%s7322_s2 + $0x280] sm:$0xff]  }
  0x3d   :  { %632 = vmatprep.mubr.bf16.mxu1 %v6261_v52  ;;  %5488 = vmatpush3.bf16.msra.mxu0 %v5941_v7  ;;  %v6553_v7 = vld [vmem:[%s7324_s1 + $0x50] ss:$8 sps:$4 sm:$0xff]  }
  0x3e   :  { %5552 = vmatpush3.bf16.msra.mxu1 %v5942_v8  ;;  %5489 = vmatprep.subr.bf16.mxu0 %v5946_v11  ;;  %v6008_v8 = vld [vmem:[%s7322_s2 + $0x200] sm:$0xff]   ;;  %v6009_v11 = vld [vmem:[%s7322_s2 + $0x3f8] sm:$0xff]  }
  0x3f   :  { %5553 = vmatprep.subr.bf16.mxu1 %v5947_v12  ;;  %v6010_v12 = vld [vmem:[%s7322_s2 + $0x378] sm:$0xff]  }
  0x41   :  { %5490 = vmatpush3.bf16.msra.mxu0 %v5948_v13  ;;  %v6567_v13 = vld [vmem:[%s7324_s1 + $0x64] ss:$8 sps:$4 sm:$0xff]  }
  0x42   :  { %5554 = vmatpush3.bf16.msra.mxu1 %v5949_v14  ;;  %5603 = vmatprep.subr.bf16.mxu0 %v5956_v16  ;;  %v6576_v14 = vld [vmem:[%s7324_s1 + $0x60] ss:$8 sps:$4 sm:$0xff]   ;;  %v6581_v16 = vld [vmem:[%s7324_s1 + $0x74] ss:$8 sps:$4 sm:$0xff]  }
  0x43   :  { %360 = vmatmul.mubr.bf16.gmra.mxu0 %v6308_v63  ;;  %5667 = vmatprep.subr.bf16.mxu1 %v5957_v17  ;;  %v6590_v17 = vld [vmem:[%s7324_s1 + $0x70] ss:$8 sps:$4 sm:$0xff]  }
  0x44   :  { %633 = vmatmul.mubr.bf16.gmra.mxu1 %v6282_v57  ;;  %367 = vmatprep.mubr.bf16.mxu0 %v6316_v1 }
  0x45   :  { %640 = vmatprep.mubr.bf16.mxu1 %v6287_v58 }
  0x4b   :  { %368 = vmatmul.mubr.bf16.gmra.mxu0 %v6346_v9 }
  0x4c   :  { %641 = vmatmul.mubr.bf16.gmra.mxu1 %v6308_v63  ;;  %375 = vmatprep.mubr.bf16.mxu0 %v6351_v10 }
  0x4d   :  { %648 = vmatprep.mubr.bf16.mxu1 %v6316_v1 }
  0x53   :  { %376 = vmatmul.mubr.bf16.gmra.mxu0 %v6372_v15 }
  0x54   :  { %649 = vmatmul.mubr.bf16.gmra.mxu1 %v6346_v9  ;;  %383 = vmatprep.mubr.bf16.mxu0 %v6383_v18 }
  0x55   :  { %656 = vmatprep.mubr.bf16.mxu1 %v6351_v10 }
  0x5b   :  { %384 = vmatmul.mubr.bf16.gmra.mxu0 %v6392_v19 }
  0x5c   :  { %657 = vmatmul.mubr.bf16.gmra.mxu1 %v6372_v15  ;;  %1112 = vmatprep.mubr.bf16.mxu0 %v6397_v20 }
  0x5d   :  { %1385 = vmatprep.mubr.bf16.mxu1 %v5955_v21  ;;  %v6595_v21 = vld [vmem:[%s7324_s1 + $0x84] ss:$8 sps:$4 sm:$0xff]  }
  0x63   :  { %1113 = vmatmul.mubr.bf16.vlgmr.msra.gmra.mxu0 %v6408_v22 }
  0x64   :  { %1386 = vmatmul.mubr.bf16.vlgmr.msra.gmra.mxu1 %v5953_v23  ;;  %5604 = vmatpush3.bf16.msra.mxu0 %v5958_v24  ;;  %v6604_v23 = vld [vmem:[%s7324_s1 + $0x80] ss:$8 sps:$4 sm:$0xff]   ;;  %v6011_v24 = vld [vmem:[%s7322_s2 + $0x3b8] sm:$0xff]  }
  0x65   :  { %5668 = vmatpush3.bf16.msra.mxu1 %v5959_v25  ;;  %1120 = vmatprep.mubr.bf16.mxu0 %v6422_v26  ;;  %v6012_v25 = vld [vmem:[%s7322_s2 + $0x338] sm:$0xff]  }
  0x66   :  { %1393 = vmatprep.mubr.bf16.mxu1 %v6397_v20  ;;  %5605 = vmatprep.subr.bf16.mxu0 %v5963_v27  ;;  %v6013_v27 = vld [vmem:[%s7322_s2 + $0x3f0] sm:$0xff]  }
  0x67   :  { %5669 = vmatprep.subr.bf16.mxu1 %v5964_v28  ;;  %v6014_v28 = vld [vmem:[%s7322_s2 + $0x370] sm:$0xff]  }
  0x68   :  { %5606 = vmatpush3.bf16.msra.mxu0 %v5965_v29  ;;  %v6016_v29 = vld [vmem:[%s7322_s2 + $0x330] sm:$0xff]  }
  0x69   :  { %5670 = vmatpush3.bf16.msra.mxu1 %v5966_v30  ;;  %5607 = vmatprep.subr.bf16.mxu0 %v5970_v34  ;;  %v6017_v30 = vld [vmem:[%s7322_s2 + $0x3e8] sm:$0xff]  }
  0x6a   :  { %5671 = vmatprep.subr.bf16.mxu1 %v5971_v35  ;;  %v6019_v34 = vld [vmem:[%s7322_s2 + $0x3a8] sm:$0xff]  }
  0x6b   :  { %1121 = vmatmul.mubr.bf16.gmra.mxu0 %v6441_v31  ;;  %v6020_v35 = vld [vmem:[%s7322_s2 + $0x328] sm:$0xff]  }
  0x6c   :  { %1394 = vmatmul.mubr.bf16.gmra.mxu1 %v6408_v22  ;;  %1128 = vmatprep.mubr.bf16.mxu0 %v6453_v36 }
  0x6d   :  { %1401 = vmatprep.mubr.bf16.mxu1 %v6422_v26  ;;  %5608 = vmatpush3.bf16.msra.mxu0 %v5972_v37  ;;  %v6022_v37 = vld [vmem:[%s7322_s2 + $0x360] sm:$0xff]  }
  0x6e   :  { %5672 = vmatpush3.bf16.msra.mxu1 %v5973_v38  ;;  %5609 = vmatprep.subr.bf16.mxu0 %v5977_v39  ;;  %v6023_v38 = vld [vmem:[%s7322_s2 + $0x3a0] sm:$0xff]  }
  0x6f   :  { %5673 = vmatprep.subr.bf16.mxu1 %v5978_v42  ;;  %v6024_v39 = vld [vmem:[%s7322_s2 + $0x320] sm:$0xff]   ;;  %v6025_v42 = vld [vmem:[%s7322_s2 + $0x3d8] sm:$0xff]  }
  0x71   :  { %5610 = vmatpush3.bf16.msra.mxu0 %v5979_v44  ;;  %v6028_v44 = vld [vmem:[%s7322_s2 + $0x318] sm:$0xff]  }
  0x72   :  { %5674 = vmatpush3.bf16.msra.mxu1 %v5980_v45  ;;  %5611 = vmatprep.subr.bf16.mxu0 %v5984_v48  ;;  %v6029_v45 = vld [vmem:[%s7322_s2 + $0x3d0] sm:$0xff]  }
  0x73   :  { %1129 = vmatmul.mubr.bf16.gmra.mxu0 %v6474_v43  ;;  %5675 = vmatprep.subr.bf16.mxu1 %v5985_v49  ;;  %v6030_v48 = vld [vmem:[%s7322_s2 + $0x350] sm:$0xff]  }
  0x74   :  { %1402 = vmatmul.mubr.bf16.gmra.mxu1 %v6441_v31  ;;  %1136 = vmatprep.mubr.bf16.mxu0 %v6491_v50  ;;  %v6031_v49 = vld [vmem:[%s7322_s2 + $0x390] sm:$0xff]  }
  0x75   :  { %1409 = vmatprep.mubr.bf16.mxu1 %v6453_v36  ;;  %5612 = vmatpush3.bf16.msra.mxu0 %v5986_v51  ;;  %v6032_v51 = vld [vmem:[%s7322_s2 + $0x310] sm:$0xff]  }
  0x76   :  { %5676 = vmatpush3.bf16.msra.mxu1 %v5987_v53  ;;  %5613 = vmatprep.subr.bf16.mxu0 %v5991_v54  ;;  %v6033_v53 = vld [vmem:[%s7322_s2 + $0x3c8] sm:$0xff]  }
  0x77   :  { %5677 = vmatprep.subr.bf16.mxu1 %v5992_v55  ;;  %v6036_v54 = vld [vmem:[%s7322_s2 + $0x308] sm:$0xff]   ;;  %v6040_v55 = vld [vmem:[%s7322_s2 + $0x3c0] sm:$0xff]  }
  0x79   :  { %5614 = vmatpush3.bf16.msra.mxu0 %v5993_v56  ;;  %v6041_v56 = vld [vmem:[%s7322_s2 + $0x340] sm:$0xff]  }
  0x7a   :  { %5678 = vmatpush3.bf16.msra.mxu1 %v5994_v60  ;;  %5615 = vmatprep.subr.bf16.mxu0 %v5998_v62  ;;  %v6042_v60 = vld [vmem:[%s7322_s2 + $0x380] sm:$0xff]  }
  0x7b   :  { %1137 = vmatmul.mubr.bf16.gmra.mxu0 %v6515_v59  ;;  %5679 = vmatprep.subr.bf16.mxu1 %v5999_v0  ;;  %v6043_v62 = vld [vmem:[%s7322_s2 + $0x300] sm:$0xff]  }
  0x7c   :  { %1410 = vmatmul.mubr.bf16.gmra.mxu1 %v6474_v43  ;;  %1144 = vmatprep.mubr.bf16.mxu0 %v6523_v61 }
  0x7d   :  { %1417 = vmatprep.mubr.bf16.mxu1 %v6491_v50  ;;  %5616 = vmatpush3.bf16.msra.mxu0 %v6000_v2 }
  0x7e   :  { %5680 = vmatpush3.bf16.msra.mxu1 %v6001_v3  ;;  %5617 = vmatprep.subr.bf16.mxu0 %v6005_v4 }
  0x7f   :  { %5681 = vmatprep.subr.bf16.mxu1 %v6006_v5 }
  0x81   :  { %5618 = vmatpush3.bf16.msra.mxu0 %v6007_v6 }
  0x82   :  { %5682 = vmatpush3.bf16.msra.mxu1 %v6008_v8  ;;  %5731 = vmatprep.subr.bf16.mxu0 %v6009_v11 }
  0x83   :  { %1145 = vmatmul.mubr.bf16.gmra.mxu0 %v6553_v7  ;;  %5795 = vmatprep.subr.bf16.mxu1 %v6010_v12 }
  0x84   :  { %1418 = vmatmul.mubr.bf16.gmra.mxu1 %v6515_v59  ;;  %1152 = vmatprep.mubr.bf16.mxu0 %v6567_v13 }
  0x85   :  { %1425 = vmatprep.mubr.bf16.mxu1 %v6523_v61 }
  0x8b   :  { %1153 = vmatmul.mubr.bf16.gmra.mxu0 %v6576_v14 }
  0x8c   :  { %1426 = vmatmul.mubr.bf16.gmra.mxu1 %v6553_v7  ;;  %1160 = vmatprep.mubr.bf16.mxu0 %v6581_v16 }
  0x8d   :  { %1433 = vmatprep.mubr.bf16.mxu1 %v6567_v13 }
  0x93   :  { %1161 = vmatmul.mubr.bf16.gmra.mxu0 %v6590_v17 }
  0x94   :  { %1434 = vmatmul.mubr.bf16.gmra.mxu1 %v6576_v14  ;;  %1168 = vmatprep.mubr.bf16.mxu0 %v6595_v21 }
  0x95   :  { %1441 = vmatprep.mubr.bf16.mxu1 %v6581_v16 }
  0x9b   :  { %1169 = vmatmul.mubr.bf16.gmra.mxu0 %v6604_v23 }
  0x9c   :  { %1442 = vmatmul.mubr.bf16.gmra.mxu1 %v6590_v17  ;;  %1898 = vmatprep.mubr.bf16.mxu0 %v6212_v40 }
  0x9d   :  { %2171 = vmatprep.mubr.bf16.mxu1 %v6186_v33  ;;  %v6015_v33 = vld [vmem:[%s7322_s2 + $0x3b0] sm:$0xff]  }
  0xa3   :  { %1899 = vmatmul.mubr.bf16.vlgmr.msra.gmra.mxu0 %v6217_v41 }
  0xa4   :  { %2172 = vmatmul.mubr.bf16.vlgmr.msra.gmra.mxu1 %v6181_v32  ;;  %5732 = vmatpush3.bf16.msra.mxu0 %v6011_v24  ;;  %v6018_v32 = vld [vmem:[%s7322_s2 + $0x368] sm:$0xff]  }
  0xa5   :  { %5796 = vmatpush3.bf16.msra.mxu1 %v6012_v25  ;;  %1906 = vmatprep.mubr.bf16.mxu0 %v6236_v46 }
  0xa6   :  { %2179 = vmatprep.mubr.bf16.mxu1 %v6212_v40  ;;  %5733 = vmatprep.subr.bf16.mxu0 %v6013_v27  ;;  %v6021_v40 = vld [vmem:[%s7322_s2 + $0x3e0] sm:$0xff]  }
  0xa7   :  { %5797 = vmatprep.subr.bf16.mxu1 %v6014_v28 }
  0xa8   :  { %5734 = vmatpush3.bf16.msra.mxu0 %v6015_v33 }
  0xa9   :  { %5798 = vmatpush3.bf16.msra.mxu1 %v6016_v29  ;;  %5735 = vmatprep.subr.bf16.mxu0 %v6017_v30 }
  0xaa   :  { %5799 = vmatprep.subr.bf16.mxu1 %v6018_v32 }
  0xab   :  { %1907 = vmatmul.mubr.bf16.gmra.mxu0 %v6243_v47 }
  0xac   :  { %2180 = vmatmul.mubr.bf16.gmra.mxu1 %v6217_v41  ;;  %1914 = vmatprep.mubr.bf16.mxu0 %v6261_v52  ;;  %v6026_v41 = vld [vmem:[%s7322_s2 + $0x358] sm:$0xff]  }
  0xad   :  { %2187 = vmatprep.mubr.bf16.mxu1 %v6236_v46  ;;  %5736 = vmatpush3.bf16.msra.mxu0 %v6019_v34  ;;  %v6027_v46 = vld [vmem:[%s7322_s2 + $0x398] sm:$0xff]  }
  0xae   :  { %5800 = vmatpush3.bf16.msra.mxu1 %v6020_v35  ;;  %5737 = vmatprep.subr.bf16.mxu0 %v6021_v40 }
  0xaf   :  { %5801 = vmatprep.subr.bf16.mxu1 %v6022_v37 }
  0xb1   :  { %5738 = vmatpush3.bf16.msra.mxu0 %v6023_v38 }
  0xb2   :  { %5802 = vmatpush3.bf16.msra.mxu1 %v6024_v39  ;;  %5739 = vmatprep.subr.bf16.mxu0 %v6025_v42 }
  0xb3   :  { %1915 = vmatmul.mubr.bf16.gmra.mxu0 %v6282_v57  ;;  %5803 = vmatprep.subr.bf16.mxu1 %v6026_v41 }
  0xb4   :  { %2188 = vmatmul.mubr.bf16.gmra.mxu1 %v6243_v47  ;;  %1922 = vmatprep.mubr.bf16.mxu0 %v6287_v58  ;;  %v6034_v47 = vld [vmem:[%s7322_s2 + $0x348] sm:$0xff]  }
  0xb5   :  { %2195 = vmatprep.mubr.bf16.mxu1 %v6261_v52  ;;  %5740 = vmatpush3.bf16.msra.mxu0 %v6027_v46  ;;  %v6035_v52 = vld [vmem:[%s7322_s2 + $0x388] sm:$0xff]  }
  0xb6   :  { %5804 = vmatpush3.bf16.msra.mxu1 %v6028_v44  ;;  %5741 = vmatprep.subr.bf16.mxu0 %v6029_v45 }
  0xb7   :  { %5805 = vmatprep.subr.bf16.mxu1 %v6030_v48 }
  0xb9   :  { %5742 = vmatpush3.bf16.msra.mxu0 %v6031_v49 }
  0xba   :  { %5806 = vmatpush3.bf16.msra.mxu1 %v6032_v51  ;;  %5743 = vmatprep.subr.bf16.mxu0 %v6033_v53 }
  0xbb   :  { %1923 = vmatmul.mubr.bf16.gmra.mxu0 %v6308_v63  ;;  %5807 = vmatprep.subr.bf16.mxu1 %v6034_v47 }
  0xbc   :  { %2196 = vmatmul.mubr.bf16.gmra.mxu1 %v6282_v57  ;;  %1930 = vmatprep.mubr.bf16.mxu0 %v6316_v1  ;;  %v6037_v57 = vld [vmem:[%s7323_s0 + $0x94] ss:$8 sps:$4 sm:$0xff]  }
  0xbd   :  { %2203 = vmatprep.mubr.bf16.mxu1 %v6287_v58  ;;  %5744 = vmatpush3.bf16.msra.mxu0 %v6035_v52  ;;  %v6039_v58 = vld [vmem:[%s7323_s0 + $0x90] ss:$8 sps:$4 sm:$0xff]  }
  0xbe   :  { %5808 = vmatpush3.bf16.msra.mxu1 %v6036_v54  ;;  %5745 = vmatprep.subr.bf16.mxu0 %v6040_v55 }
  0xbf   :  { %5809 = vmatprep.subr.bf16.mxu1 %v6041_v56 }
  0xc1   :  { %5746 = vmatpush3.bf16.msra.mxu0 %v6042_v60 }
  0xc2   :  { %5810 = vmatpush3.bf16.msra.mxu1 %v6043_v62 }
  0xc3   :  { %1931 = vmatmul.mubr.bf16.gmra.mxu0 %v6346_v9 }
  0xc4   :  { %2204 = vmatmul.mubr.bf16.gmra.mxu1 %v6308_v63  ;;  %1938 = vmatprep.mubr.bf16.mxu0 %v6351_v10 }
  0xc5   :  { %2211 = vmatprep.mubr.bf16.mxu1 %v6316_v1 }
  0xcb   :  { %1939 = vmatmul.mubr.bf16.gmra.mxu0 %v6372_v15 }
  0xcc   :  { %2212 = vmatmul.mubr.bf16.gmra.mxu1 %v6346_v9  ;;  %1946 = vmatprep.mubr.bf16.mxu0 %v6383_v18 }
  0xcd   :  { %2219 = vmatprep.mubr.bf16.mxu1 %v6351_v10 }
  0xd3   :  { %1947 = vmatmul.mubr.bf16.gmra.mxu0 %v6392_v19 }
  0xd4   :  { %2220 = vmatmul.mubr.bf16.gmra.mxu1 %v6372_v15  ;;  %1954 = vmatprep.mubr.bf16.mxu0 %v6037_v57 }
  0xd5   :  { %2227 = vmatprep.mubr.bf16.mxu1 %v6383_v18 }
  0xdb   :  { %1955 = vmatmul.mubr.bf16.gmra.mxu0 %v6039_v58 }
  0xdc   :  { %2228 = vmatmul.mubr.bf16.gmra.mxu1 %v6392_v19  ;;  %2684 = vmatprep.mubr.bf16.mxu0 %v6422_v26 }
  0xdd   :  { %2957 = vmatprep.mubr.bf16.mxu1 %v6397_v20 }
  0xe3   :  { %v5363_v63 = vpop.f32.mrf.mxu0  ;;  %2685 = vmatmul.mubr.bf16.vlgmr.msra.gmra.mxu0 %v6441_v31 }
  0xe4   :  { %v5427_v1 = vpop.f32.mrf.mxu1  ;;  %2958 = vmatmul.mubr.bf16.vlgmr.msra.gmra.mxu1 %v6408_v22  ;;  %2692 = vmatprep.mubr.bf16.mxu0 %v6453_v36 }
  0xe5   :  { %v5364_v9 = vpop.f32.mrf.mxu0  ;;  %2965 = vmatprep.mubr.bf16.mxu1 %v6422_v26 }
  0xe6   :  { %v5365_v10 = vadd.f32 %v5364_v9, %v5363_v63  ;;  %v5428_v15 = vpop.f32.mrf.mxu1 }
  0xe7   :  { %v5429_v18 = vadd.f32 %v5428_v15, %v5427_v1  ;;  %v5366_v0 = vpop.f32.mrf.mxu0 }
  0xe8   :  { %v5430_v19 = vpop.f32.mrf.mxu1 }
  0xe9   :  { %v603_v2 = vadd.f32 %v5429_v18, %v5365_v10  ;;  %v5367_v3 = vpop.f32.mrf.mxu0 }
  0xea   :  { %v5368_v4 = vadd.f32 %v5367_v3, %v5366_v0  ;;  %v5431_v20 = vpop.f32.mrf.mxu1 }
  0xeb   :  { %v5432_v5 = vadd.f32 %v5431_v20, %v5430_v19  ;;  %v5369_v6 = vpop.f32.mrf.mxu0  ;;  %2693 = vmatmul.mubr.bf16.gmra.mxu0 %v6474_v43  ;;  %v687_v11 = vmul.f32 %v603_v2, %v603_v2 }
  0xec   :  { %v5433_v8 = vpop.f32.mrf.mxu1  ;;  %2966 = vmatmul.mubr.bf16.gmra.mxu1 %v6441_v31  ;;  %2700 = vmatprep.mubr.bf16.mxu0 %v6491_v50 }
  0xed   :  { %v606_v22 = vadd.f32 %v5432_v5, %v5368_v4  ;;  %v5370_v26 = vpop.f32.mrf.mxu0  ;;  %2973 = vmatprep.mubr.bf16.mxu1 %v6453_v36 }
  0xee   :  { %v5371_v12 = vadd.f32 %v5370_v26, %v5369_v6  ;;  %v5434_v24 = vpop.f32.mrf.mxu1 }
  0xef   :  { %v665_v25 = vadd.f32 %v606_v22, %v603_v2  ;;  %v688_v27 = vmul.f32 %v606_v22, %v606_v22  ;;  %v6744_v28 = vpack.c.bf16 %v606_v22, %v603_v2  ;;  %v5435_v33 = vadd.f32 %v5434_v24, %v5433_v8  ;;  %v5372_v29 = vpop.f32.mrf.mxu0 }
  0xf0   :  { %v5436_v30 = vpop.f32.mrf.mxu1 }
  0xf1   :  { %v703_v32 = vadd.f32 %v688_v27, %v687_v11  ;;  %v611_v34 = vadd.f32 %v5435_v33, %v5371_v12  ;;  %v5373_v35 = vpop.f32.mrf.mxu0 }
  0xf2   :  { %v5374_v31 = vadd.f32 %v5373_v35, %v5372_v29  ;;  %v5437_v40 = vpop.f32.mrf.mxu1 }
  0xf3   :  { %v666_v37 = vadd.f32 %v665_v25, %v611_v34  ;;  %v689_v38 = vmul.f32 %v611_v34, %v611_v34  ;;  %v5438_v39 = vadd.f32 %v5437_v40, %v5436_v30  ;;  %v5375_v42 = vpop.f32.mrf.mxu0  ;;  %2701 = vmatmul.mubr.bf16.gmra.mxu0 %v6515_v59 }
  0xf4   :  { %v5439_v36 = vpop.f32.mrf.mxu1  ;;  %2974 = vmatmul.mubr.bf16.gmra.mxu1 %v6474_v43  ;;  %2708 = vmatprep.mubr.bf16.mxu0 %v6523_v61 }
  0xf5   :  { %v704_v41 = vadd.f32 %v703_v32, %v689_v38  ;;  %v614_v46 = vadd.f32 %v5438_v39, %v5374_v31  ;;  %v5376_v44 = vpop.f32.mrf.mxu0  ;;  %2981 = vmatprep.mubr.bf16.mxu1 %v6491_v50 }
  0xf6   :  { %v5377_v45 = vadd.f32 %v5376_v44, %v5375_v42  ;;  %v5440_v48 = vpop.f32.mrf.mxu1 }
  0xf7   :  { %v667_v49 = vadd.f32 %v666_v37, %v614_v46  ;;  %v690_v51 = vmul.f32 %v614_v46, %v614_v46  ;;  %v6750_v53 = vpack.c.bf16 %v614_v46, %v611_v34  ;;  %v5441_v47 = vadd.f32 %v5440_v48, %v5439_v36  ;;  %v5378_v52 = vpop.f32.mrf.mxu0 }
  0xf8   :  { %v5442_v54 = vpop.f32.mrf.mxu1 }
  0xf9   :  { %v705_v55 = vadd.f32 %v704_v41, %v690_v51  ;;  %v619_v56 = vadd.f32 %v5441_v47, %v5377_v45  ;;  %v5379_v60 = vpop.f32.mrf.mxu0 }
  0xfa   :  { %v5380_v43 = vadd.f32 %v5379_v60, %v5378_v52  ;;  %v5443_v62 = vpop.f32.mrf.mxu1 }
  0xfb   :  { %v668_v57 = vadd.f32 %v667_v49, %v619_v56  ;;  %v691_v58 = vmul.f32 %v619_v56, %v619_v56  ;;  %v5444_v63 = vadd.f32 %v5443_v62, %v5442_v54  ;;  %v5381_v1 = vpop.f32.mrf.mxu0  ;;  %2709 = vmatmul.mubr.bf16.gmra.mxu0 %v6553_v7 }
  0xfc   :  { %v5445_v50 = vpop.f32.mrf.mxu1  ;;  %2982 = vmatmul.mubr.bf16.gmra.mxu1 %v6515_v59  ;;  %2716 = vmatprep.mubr.bf16.mxu0 %v6567_v13 }
  0xfd   :  { %v706_v9 = vadd.f32 %v705_v55, %v691_v58  ;;  %v622_v10 = vadd.f32 %v5444_v63, %v5380_v43  ;;  %v5382_v15 = vpop.f32.mrf.mxu0  ;;  %2989 = vmatprep.mubr.bf16.mxu1 %v6523_v61 }
  0xfe   :  { %v5383_v18 = vadd.f32 %v5382_v15, %v5381_v1  ;;  %v5446_v0 = vpop.f32.mrf.mxu1 }
  0xff   :  { %v669_v19 = vadd.f32 %v668_v57, %v622_v10  ;;  %v692_v2 = vmul.f32 %v622_v10, %v622_v10  ;;  %v6756_v3 = vpack.c.bf16 %v622_v10, %v619_v56  ;;  %v5447_v4 = vadd.f32 %v5446_v0, %v5445_v50  ;;  %v5384_v20 = vpop.f32.mrf.mxu0 }
 0x100   :  { %v5448_v5 = vpop.f32.mrf.mxu1 }
 0x101   :  { %v707_v6 = vadd.f32 %v706_v9, %v692_v2  ;;  %v627_v8 = vadd.f32 %v5447_v4, %v5383_v18  ;;  %v5385_v22 = vpop.f32.mrf.mxu0 }
 0x102   :  { %v5386_v59 = vadd.f32 %v5385_v22, %v5384_v20  ;;  %v5449_v26 = vpop.f32.mrf.mxu1 }
 0x103   :  { %v670_v11 = vadd.f32 %v669_v19, %v627_v8  ;;  %v693_v12 = vmul.f32 %v627_v8, %v627_v8  ;;  %v5450_v24 = vadd.f32 %v5449_v26, %v5448_v5  ;;  %v5387_v25 = vpop.f32.mrf.mxu0  ;;  %2717 = vmatmul.mubr.bf16.gmra.mxu0 %v6576_v14 }
 0x104   :  { %v5451_v61 = vpop.f32.mrf.mxu1  ;;  %2990 = vmatmul.mubr.bf16.gmra.mxu1 %v6553_v7  ;;  %2724 = vmatprep.mubr.bf16.mxu0 %v6581_v16 }
 0x105   :  { %v708_v27 = vadd.f32 %v707_v6, %v693_v12  ;;  %v630_v33 = vadd.f32 %v5450_v24, %v5386_v59  ;;  %v5388_v29 = vpop.f32.mrf.mxu0  ;;  %2997 = vmatprep.mubr.bf16.mxu1 %v6567_v13 }
 0x106   :  { %v5389_v30 = vadd.f32 %v5388_v29, %v5387_v25  ;;  %v5452_v32 = vpop.f32.mrf.mxu1 }
 0x107   :  { %v671_v34 = vadd.f32 %v670_v11, %v630_v33  ;;  %v694_v35 = vmul.f32 %v630_v33, %v630_v33  ;;  %v6762_v31 = vpack.c.bf16 %v630_v33, %v627_v8  ;;  %v5453_v40 = vadd.f32 %v5452_v32, %v5451_v61  ;;  %v5390_v37 = vpop.f32.mrf.mxu0 }
 0x108   :  { %v5454_v38 = vpop.f32.mrf.mxu1 }
 0x109   :  { %v709_v39 = vadd.f32 %v708_v27, %v694_v35  ;;  %v635_v42 = vadd.f32 %v5453_v40, %v5389_v30  ;;  %v5391_v36 = vpop.f32.mrf.mxu0 }
 0x10a   :  { %v5392_v7 = vadd.f32 %v5391_v36, %v5390_v37  ;;  %v5455_v41 = vpop.f32.mrf.mxu1 }
 0x10b   :  { %v672_v46 = vadd.f32 %v671_v34, %v635_v42  ;;  %v695_v44 = vmul.f32 %v635_v42, %v635_v42  ;;  %v5456_v45 = vadd.f32 %v5455_v41, %v5454_v38  ;;  %v5393_v48 = vpop.f32.mrf.mxu0  ;;  %2725 = vmatmul.mubr.bf16.gmra.mxu0 %v6590_v17 }
 0x10c   :  { %v5457_v13 = vpop.f32.mrf.mxu1  ;;  %2998 = vmatmul.mubr.bf16.gmra.mxu1 %v6576_v14  ;;  %2732 = vmatprep.mubr.bf16.mxu0 %v6595_v21  ;;  %v6046_v14 = vld [vmem:[%s7324_s1 + $0x94] ss:$8 sps:$4 sm:$0xff]  }
 0x10d   :  { %v710_v49 = vadd.f32 %v709_v39, %v695_v44  ;;  %v638_v51 = vadd.f32 %v5456_v45, %v5392_v7  ;;  %v5394_v47 = vpop.f32.mrf.mxu0  ;;  %3005 = vmatprep.mubr.bf16.mxu1 %v6581_v16  ;;  %v6049_v16 = vld [vmem:[%s7324_s1 + $0x84] ss:$8 sps:$4 sm:$0xff]  }
 0x10e   :  { %v5395_v52 = vadd.f32 %v5394_v47, %v5393_v48  ;;  %v5458_v54 = vpop.f32.mrf.mxu1 }
 0x10f   :  { %v673_v55 = vadd.f32 %v672_v46, %v638_v51  ;;  %v696_v56 = vmul.f32 %v638_v51, %v638_v51  ;;  %v6768_v60 = vpack.c.bf16 %v638_v51, %v635_v42  ;;  %v5459_v43 = vadd.f32 %v5458_v54, %v5457_v13  ;;  %v5396_v62 = vpop.f32.mrf.mxu0 }
 0x110   :  { %v5460_v57 = vpop.f32.mrf.mxu1 }
 0x111   :  { %v711_v58 = vadd.f32 %v710_v49, %v696_v56  ;;  %v643_v21 = vadd.f32 %v5459_v43, %v5395_v52  ;;  %v5397_v63 = vpop.f32.mrf.mxu0 }
 0x112   :  { %v5398_v1 = vadd.f32 %v5397_v63, %v5396_v62  ;;  %v5461_v50 = vpop.f32.mrf.mxu1 }
 0x113   :  { %v674_v9 = vadd.f32 %v673_v55, %v643_v21  ;;  %v697_v10 = vmul.f32 %v643_v21, %v643_v21  ;;  %v5462_v15 = vadd.f32 %v5461_v50, %v5460_v57  ;;  %v5399_v18 = vpop.f32.mrf.mxu0  ;;  %2733 = vmatmul.mubr.bf16.gmra.mxu0 %v6604_v23  ;;  %v6044_v23 = vld [vmem:[%s7324_s1 + $0x90] ss:$8 sps:$4 sm:$0xff]  }
 0x114   :  { %v5463_v0 = vpop.f32.mrf.mxu1  ;;  %3006 = vmatmul.mubr.bf16.gmra.mxu1 %v6590_v17  ;;  %2740 = vmatprep.mubr.bf16.mxu0 %v6046_v14  ;;  %v6047_v17 = vld [vmem:[%s7324_s1 + $0x80] ss:$8 sps:$4 sm:$0xff]  }
 0x115   :  { %v712_v19 = vadd.f32 %v711_v58, %v697_v10  ;;  %v646_v2 = vadd.f32 %v5462_v15, %v5398_v1  ;;  %v5400_v4 = vpop.f32.mrf.mxu0  ;;  %3013 = vmatprep.mubr.bf16.mxu1 %v6049_v16 }
 0x116   :  { %v5401_v20 = vadd.f32 %v5400_v4, %v5399_v18  ;;  %v5464_v5 = vpop.f32.mrf.mxu1 }
 0x117   :  { %v675_v6 = vadd.f32 %v674_v9, %v646_v2  ;;  %v698_v8 = vmul.f32 %v646_v2, %v646_v2  ;;  %v6778_v22 = vpack.c.bf16 %v646_v2, %v643_v21  ;;  %v5465_v59 = vadd.f32 %v5464_v5, %v5463_v0  ;;  %v5402_v26 = vpop.f32.mrf.mxu0 }
 0x118   :  { %v5466_v11 = vpop.f32.mrf.mxu1 }
 0x119   :  { %v713_v12 = vadd.f32 %v712_v19, %v698_v8  ;;  %v651_v24 = vadd.f32 %v5465_v59, %v5401_v20  ;;  %v5403_v25 = vpop.f32.mrf.mxu0 }
 0x11a   :  { %v5404_v61 = vadd.f32 %v5403_v25, %v5402_v26  ;;  %v5467_v27 = vpop.f32.mrf.mxu1 }
 0x11b   :  { %v676_v33 = vadd.f32 %v675_v6, %v651_v24  ;;  %v699_v29 = vmul.f32 %v651_v24, %v651_v24  ;;  %v5468_v30 = vadd.f32 %v5467_v27, %v5466_v11  ;;  %v5405_v32 = vpop.f32.mrf.mxu0  ;;  %2741 = vmatmul.mubr.bf16.gmra.mxu0 %v6044_v23 }
 0x11c   :  { %v5469_v34 = vpop.f32.mrf.mxu1  ;;  %3014 = vmatmul.mubr.bf16.gmra.mxu1 %v6047_v17 }
 0x11d   :  { %v714_v35 = vadd.f32 %v713_v12, %v699_v29  ;;  %v654_v40 = vadd.f32 %v5468_v30, %v5404_v61  ;;  %v5406_v37 = vpop.f32.mrf.mxu0 }
 0x11e   :  { %v5407_v38 = vadd.f32 %v5406_v37, %v5405_v32  ;;  %v5470_v39 = vpop.f32.mrf.mxu1 }
 0x11f   :  { %v677_v42 = vadd.f32 %v676_v33, %v654_v40  ;;  %v700_v36 = vmul.f32 %v654_v40, %v654_v40  ;;  %v6786_v7 = vpack.c.bf16 %v654_v40, %v651_v24  ;;  %v5471_v41 = vadd.f32 %v5470_v39, %v5469_v34  ;;  %v5408_v46 = vpop.f32.mrf.mxu0 }
 0x120   :  { %v5472_v44 = vpop.f32.mrf.mxu1 }
 0x121   :  { %v715_v45 = vadd.f32 %v714_v35, %v700_v36  ;;  %v659_v48 = vadd.f32 %v5471_v41, %v5407_v38  ;;  %v5409_v13 = vpop.f32.mrf.mxu0 }
 0x122   :  { %v5410_v49 = vadd.f32 %v5409_v13, %v5408_v46  ;;  %v5473_v51 = vpop.f32.mrf.mxu1 }
 0x123   :  { %v678_v47 = vadd.f32 %v677_v42, %v659_v48  ;;  %v701_v52 = vmul.f32 %v659_v48, %v659_v48  ;;  %v5474_v54 = vadd.f32 %v5473_v51, %v5472_v44  ;;  %v5491_v55 = vpop.f32.mrf.mxu0 }
 0x124   :  { %v5555_v56 = vpop.f32.mrf.mxu1 }
 0x125   :  { %v716_v43 = vadd.f32 %v715_v45, %v701_v52  ;;  %v662_v62 = vadd.f32 %v5474_v54, %v5410_v49  ;;  %v5492_v57 = vpop.f32.mrf.mxu0 }
 0x126   :  { %v5493_v14 = vadd.f32 %v5492_v57, %v5491_v55  ;;  %v5556_v58 = vpop.f32.mrf.mxu1 }
 0x127   :  { %v6788_v21 = vadd.f32 %v678_v47, %v662_v62  ;;  %v702_v63 = vmul.f32 %v662_v62, %v662_v62  ;;  %v6790_v16 = vpack.c.bf16 %v662_v62, %v659_v48  ;;  %v5557_v1 = vadd.f32 %v5556_v58, %v5555_v56  ;;  %v5494_v50 = vpop.f32.mrf.mxu0 }
 0x128   :  { %v5558_v9 = vpop.f32.mrf.mxu1 }
 0x129   :  { %v6792_v10 = vadd.f32 %v716_v43, %v702_v63  ;;  %v5495_v15 = vpop.f32.mrf.mxu0  ;;  %v1388_v18 = vadd.f32 %v5557_v1, %v5493_v14 }
 0x12a   :  { %v5496_v0 = vadd.f32 %v5495_v15, %v5494_v50  ;;  %v5559_v19 = vpop.f32.mrf.mxu1 }
 0x12b   :  { %v5560_v2 = vadd.f32 %v5559_v19, %v5558_v9  ;;  %v5497_v4 = vpop.f32.mrf.mxu0  ;;  %v1472_v26 = vmul.f32 %v1388_v18, %v1388_v18 }
 0x12c   :  { %v5561_v20 = vpop.f32.mrf.mxu1 }
 0x12d   :  { %v1391_v5 = vadd.f32 %v5560_v2, %v5496_v0  ;;  %v5498_v6 = vpop.f32.mrf.mxu0 }
 0x12e   :  { %v5499_v8 = vadd.f32 %v5498_v6, %v5497_v4  ;;  %v5562_v59 = vpop.f32.mrf.mxu1 }
 0x12f   :  { %v1450_v23 = vadd.f32 %v1391_v5, %v1388_v18  ;;  %v1473_v11 = vmul.f32 %v1391_v5, %v1391_v5  ;;  %v5500_v17 = vpop.f32.mrf.mxu0  ;;  %v6794_v12 = vpack.c.bf16 %v1391_v5, %v1388_v18  ;;  %v5563_v24 = vadd.f32 %v5562_v59, %v5561_v20 }
 0x130   :  { %v5564_v25 = vpop.f32.mrf.mxu1 }
 0x131   :  { %v1488_v61 = vadd.f32 %v1473_v11, %v1472_v26  ;;  %v5501_v27 = vpop.f32.mrf.mxu0  ;;  %v1396_v33 = vadd.f32 %v5563_v24, %v5499_v8 }
 0x132   :  { %v5502_v29 = vadd.f32 %v5501_v27, %v5500_v17  ;;  %v5565_v30 = vpop.f32.mrf.mxu1 }
 0x133   :  { %v5566_v32 = vadd.f32 %v5565_v30, %v5564_v25  ;;  %v5503_v34 = vpop.f32.mrf.mxu0  ;;  %v1451_v35 = vadd.f32 %v1450_v23, %v1396_v33  ;;  %v1474_v40 = vmul.f32 %v1396_v33, %v1396_v33 }
 0x134   :  { %v5567_v37 = vpop.f32.mrf.mxu1 }
 0x135   :  { %v1399_v38 = vadd.f32 %v5566_v32, %v5502_v29  ;;  %v5504_v39 = vpop.f32.mrf.mxu0  ;;  %v1489_v42 = vadd.f32 %v1488_v61, %v1474_v40 }
 0x136   :  { %v5505_v36 = vadd.f32 %v5504_v39, %v5503_v34  ;;  %v5568_v41 = vpop.f32.mrf.mxu1 }
 0x137   :  { %v1452_v46 = vadd.f32 %v1451_v35, %v1399_v38  ;;  %v1475_v44 = vmul.f32 %v1399_v38, %v1399_v38  ;;  %v6796_v45 = vpack.c.bf16 %v1399_v38, %v1396_v33  ;;  %v5569_v48 = vadd.f32 %v5568_v41, %v5567_v37  ;;  %v5506_v13 = vpop.f32.mrf.mxu0 }
 0x138   :  { %v5570_v49 = vpop.f32.mrf.mxu1 }
 0x139   :  { %v1490_v51 = vadd.f32 %v1489_v42, %v1475_v44  ;;  %v1404_v47 = vadd.f32 %v5569_v48, %v5505_v36  ;;  %v5507_v52 = vpop.f32.mrf.mxu0 }
 0x13a   :  { %v5508_v54 = vadd.f32 %v5507_v52, %v5506_v13  ;;  %v5571_v55 = vpop.f32.mrf.mxu1 }
 0x13b   :  { %v1453_v56 = vadd.f32 %v1452_v46, %v1404_v47  ;;  %v1476_v43 = vmul.f32 %v1404_v47, %v1404_v47  ;;  %v5572_v62 = vadd.f32 %v5571_v55, %v5570_v49  ;;  %v5509_v57 = vpop.f32.mrf.mxu0 }
 0x13c   :  { %v5573_v14 = vpop.f32.mrf.mxu1 }
 0x13d   :  { %v1491_v58 = vadd.f32 %v1490_v51, %v1476_v43  ;;  %v1407_v63 = vadd.f32 %v5572_v62, %v5508_v54  ;;  %v5510_v1 = vpop.f32.mrf.mxu0 }
 0x13e   :  { %v5511_v50 = vadd.f32 %v5510_v1, %v5509_v57  ;;  %v5574_v9 = vpop.f32.mrf.mxu1 }
 0x13f   :  { %v1454_v15 = vadd.f32 %v1453_v56, %v1407_v63  ;;  %v1477_v18 = vmul.f32 %v1407_v63, %v1407_v63  ;;  %v6798_v0 = vpack.c.bf16 %v1407_v63, %v1404_v47  ;;  %v5575_v19 = vadd.f32 %v5574_v9, %v5573_v14  ;;  %v5512_v2 = vpop.f32.mrf.mxu0 }
 0x140   :  { %v5576_v4 = vpop.f32.mrf.mxu1 }
 0x141   :  { %v1492_v20 = vadd.f32 %v1491_v58, %v1477_v18  ;;  %v1412_v5 = vadd.f32 %v5575_v19, %v5511_v50  ;;  %v5513_v6 = vpop.f32.mrf.mxu0 }
 0x142   :  { %v5514_v8 = vadd.f32 %v5513_v6, %v5512_v2  ;;  %v5577_v59 = vpop.f32.mrf.mxu1 }
 0x143   :  { %v1455_v26 = vadd.f32 %v1454_v15, %v1412_v5  ;;  %v1478_v23 = vmul.f32 %v1412_v5, %v1412_v5  ;;  %v5578_v11 = vadd.f32 %v5577_v59, %v5576_v4  ;;  %v5515_v17 = vpop.f32.mrf.mxu0 }
 0x144   :  { %v5579_v24 = vpop.f32.mrf.mxu1 }
 0x145   :  { %v1493_v25 = vadd.f32 %v1492_v20, %v1478_v23  ;;  %v1415_v61 = vadd.f32 %v5578_v11, %v5514_v8  ;;  %v5516_v27 = vpop.f32.mrf.mxu0 }
 0x146   :  { %v5517_v33 = vadd.f32 %v5516_v27, %v5515_v17  ;;  %v5580_v29 = vpop.f32.mrf.mxu1 }
 0x147   :  { %v1456_v30 = vadd.f32 %v1455_v26, %v1415_v61  ;;  %v1479_v32 = vmul.f32 %v1415_v61, %v1415_v61  ;;  %v6800_v34 = vpack.c.bf16 %v1415_v61, %v1412_v5  ;;  %v5581_v35 = vadd.f32 %v5580_v29, %v5579_v24  ;;  %v5518_v40 = vpop.f32.mrf.mxu0 }
 0x148   :  { %v5582_v37 = vpop.f32.mrf.mxu1 }
 0x149   :  { %v1494_v38 = vadd.f32 %v1493_v25, %v1479_v32  ;;  %v1420_v39 = vadd.f32 %v5581_v35, %v5517_v33  ;;  %v5519_v42 = vpop.f32.mrf.mxu0 }
 0x14a   :  { %v5520_v36 = vadd.f32 %v5519_v42, %v5518_v40  ;;  %v5583_v41 = vpop.f32.mrf.mxu1 }
 0x14b   :  { %v1457_v46 = vadd.f32 %v1456_v30, %v1420_v39  ;;  %v1480_v44 = vmul.f32 %v1420_v39, %v1420_v39  ;;  %v5584_v48 = vadd.f32 %v5583_v41, %v5582_v37  ;;  %v5521_v13 = vpop.f32.mrf.mxu0 }
 0x14c   :  { %v5585_v49 = vpop.f32.mrf.mxu1 }
 0x14d   :  { %v1495_v51 = vadd.f32 %v1494_v38, %v1480_v44  ;;  %v1423_v47 = vadd.f32 %v5584_v48, %v5520_v36  ;;  %v5522_v52 = vpop.f32.mrf.mxu0 }
 0x14e   :  { %v5523_v54 = vadd.f32 %v5522_v52, %v5521_v13  ;;  %v5586_v55 = vpop.f32.mrf.mxu1 }
 0x14f   :  { %v1458_v56 = vadd.f32 %v1457_v46, %v1423_v47  ;;  %v1481_v43 = vmul.f32 %v1423_v47, %v1423_v47  ;;  %v6802_v62 = vpack.c.bf16 %v1423_v47, %v1420_v39  ;;  %v5587_v57 = vadd.f32 %v5586_v55, %v5585_v49  ;;  %v5524_v14 = vpop.f32.mrf.mxu0 }
 0x150   :  { %v5588_v58 = vpop.f32.mrf.mxu1  ;;  %v680_v46 = vrot.slane %v6788_v21, 4  ;;  %v718_v55 = vrot.slane %v6792_v10, 4 }
 0x151   :  { %v1496_v63 = vadd.f32 %v1495_v51, %v1481_v43  ;;  %v1428_v1 = vadd.f32 %v5587_v57, %v5523_v54  ;;  %v5525_v50 = vpop.f32.mrf.mxu0 }
 0x152   :  { %v5526_v9 = vadd.f32 %v5525_v50, %v5524_v14  ;;  %v5589_v15 = vpop.f32.mrf.mxu1  ;;  %v681_v14 = vadd.f32 %v680_v46, %v6788_v21 }
 0x153   :  { %v1459_v18 = vadd.f32 %v1458_v56, %v1428_v1  ;;  %v1482_v19 = vmul.f32 %v1428_v1, %v1428_v1  ;;  %v5590_v2 = vadd.f32 %v5589_v15, %v5588_v58  ;;  %v5527_v4 = vpop.f32.mrf.mxu0 }
 0x154   :  { %v5591_v20 = vpop.f32.mrf.mxu1 }
 0x155   :  { %v1497_v5 = vadd.f32 %v1496_v63, %v1482_v19  ;;  %v1431_v6 = vadd.f32 %v5590_v2, %v5526_v9  ;;  %v5528_v8 = vpop.f32.mrf.mxu0  ;;  %v719_v19 = vadd.f32 %v718_v55, %v6792_v10 }
 0x156   :  { %v5529_v59 = vadd.f32 %v5528_v8, %v5527_v4  ;;  %v5592_v26 = vpop.f32.mrf.mxu1 }
 0x157   :  { %v1460_v23 = vadd.f32 %v1459_v18, %v1431_v6  ;;  %v1483_v11 = vmul.f32 %v1431_v6, %v1431_v6  ;;  %v6804_v17 = vpack.c.bf16 %v1431_v6, %v1428_v1  ;;  %v5593_v24 = vadd.f32 %v5592_v26, %v5591_v20  ;;  %v5530_v25 = vpop.f32.mrf.mxu0 }
 0x158   :  { %v5594_v61 = vpop.f32.mrf.mxu1 }
 0x159   :  { %v1498_v27 = vadd.f32 %v1497_v5, %v1483_v11  ;;  %v1436_v33 = vadd.f32 %v5593_v24, %v5529_v59  ;;  %v5531_v29 = vpop.f32.mrf.mxu0  ;;  %v682_v5 = vrot.slane %v681_v14, 2 }
 0x15a   :  { %v5532_v30 = vadd.f32 %v5531_v29, %v5530_v25  ;;  %v5595_v32 = vpop.f32.mrf.mxu1  ;;  %v720_v25 = vrot.slane %v719_v19, 2 }
 0x15b   :  { %v1461_v35 = vadd.f32 %v1460_v23, %v1436_v33  ;;  %v1484_v40 = vmul.f32 %v1436_v33, %v1436_v33  ;;  %v5596_v37 = vadd.f32 %v5595_v32, %v5594_v61  ;;  %v5533_v38 = vpop.f32.mrf.mxu0  ;;  %v683_v29 = vadd.f32 %v682_v5, %v681_v14 }
 0x15c   :  { %v5597_v39 = vpop.f32.mrf.mxu1 }
 0x15d   :  { %v1499_v42 = vadd.f32 %v1498_v27, %v1484_v40  ;;  %v1439_v36 = vadd.f32 %v5596_v37, %v5532_v30  ;;  %v5534_v41 = vpop.f32.mrf.mxu0 }
 0x15e   :  { %v5535_v44 = vadd.f32 %v5534_v41, %v5533_v38  ;;  %v5598_v48 = vpop.f32.mrf.mxu1 }
 0x15f   :  { %v1462_v13 = vadd.f32 %v1461_v35, %v1439_v36  ;;  %v1485_v49 = vmul.f32 %v1439_v36, %v1439_v36  ;;  %v6807_v51 = vpack.c.bf16 %v1439_v36, %v1436_v33  ;;  %v5599_v47 = vadd.f32 %v5598_v48, %v5597_v39  ;;  %v5536_v52 = vpop.f32.mrf.mxu0 }
 0x160   :  { %v5600_v54 = vpop.f32.mrf.mxu1  ;;  %v684_v48 = vrot.slane %v683_v29, 1 }
 0x161   :  { %v1500_v56 = vadd.f32 %v1499_v42, %v1485_v49  ;;  %v1444_v43 = vadd.f32 %v5599_v47, %v5535_v44  ;;  %v5537_v57 = vpop.f32.mrf.mxu0  ;;  %v721_v42 = vadd.f32 %v720_v25, %v719_v19 }
 0x162   :  { %v5538_v58 = vadd.f32 %v5537_v57, %v5536_v52  ;;  %v5601_v63 = vpop.f32.mrf.mxu1 }
 0x163   :  { %v1463_v1 = vadd.f32 %v1462_v13, %v1444_v43  ;;  %v1486_v50 = vmul.f32 %v1444_v43, %v1444_v43  ;;  %v5602_v9 = vadd.f32 %v5601_v63, %v5600_v54  ;;  %v5619_v15 = vpop.f32.mrf.mxu0  ;;  %v722_v63 = vrot.slane %v721_v42, 1 }
 0x164   :  { %v5683_v18 = vpop.f32.mrf.mxu1 }
 0x165   :  { %v1501_v2 = vadd.f32 %v1500_v56, %v1486_v50  ;;  %v1447_v4 = vadd.f32 %v5602_v9, %v5538_v58  ;;  %v5620_v20 = vpop.f32.mrf.mxu0 }
 0x166   :  { %v5621_v6 = vadd.f32 %v5620_v20, %v5619_v15  ;;  %v5684_v8 = vpop.f32.mrf.mxu1 }
 0x167   :  { %v1464_v59 = vadd.f32 %v1463_v1, %v1447_v4  ;;  %v1487_v26 = vmul.f32 %v1447_v4, %v1447_v4  ;;  %v6812_v23 = vpack.c.bf16 %v1447_v4, %v1444_v43  ;;  %v5685_v21 = vadd.f32 %v5684_v8, %v5683_v18  ;;  %v5622_v11 = vpop.f32.mrf.mxu0 }
 0x168   :  { %v5686_v24 = vpop.f32.mrf.mxu1  ;;  %v685_v4 = vadd.f32 %v684_v48, %v683_v29 }
 0x169   :  { %v1465_v61 = vrot.slane %v1464_v59, 4  ;;  %v1502_v27 = vadd.f32 %v1501_v2, %v1487_v26  ;;  %v5623_v33 = vpop.f32.mrf.mxu0  ;;  %v2174_v30 = vadd.f32 %v5685_v21, %v5621_v6 }
 0x16a   :  { %v5624_v10 = vadd.f32 %v5623_v33, %v5622_v11  ;;  %v5687_v32 = vpop.f32.mrf.mxu1  ;;  %v723_v11 = vadd.f32 %v722_v63, %v721_v42 }
 0x16b   :  { %v1466_v35 = vadd.f32 %v1465_v61, %v1464_v59  ;;  %v1503_v40 = vrot.slane %v1502_v27, 4  ;;  %v5688_v37 = vadd.f32 %v5687_v32, %v5686_v24  ;;  %v5625_v38 = vpop.f32.mrf.mxu0  ;;  %v2258_v13 = vmul.f32 %v2174_v30, %v2174_v30 }
 0x16c   :  { %v5689_v39 = vpop.f32.mrf.mxu1 }
 0x16d   :  { %v1467_v36 = vrot.slane %v1466_v35, 2  ;;  %v1504_v41 = vadd.f32 %v1503_v40, %v1502_v27  ;;  %v2177_v46 = vadd.f32 %v5688_v37, %v5624_v10  ;;  %v5626_v44 = vpop.f32.mrf.mxu0 }
 0x16e   :  { %v5627_v49 = vadd.f32 %v5626_v44, %v5625_v38  ;;  %v5690_v47 = vpop.f32.mrf.mxu1 }
 0x16f   :  { %v1468_v52 = vadd.f32 %v1467_v36, %v1466_v35  ;;  %v1505_v54 = vrot.slane %v1504_v41, 2  ;;  %v2236_v55 = vadd.f32 %v2177_v46, %v2174_v30  ;;  %v2259_v56 = vmul.f32 %v2177_v46, %v2177_v46  ;;  %v5628_v43 = vpop.f32.mrf.mxu0 }
 0x170   :  { %v6814_v57 = vpack.c.bf16 %v2177_v46, %v2174_v30  ;;  %v5691_v14 = vadd.f32 %v5690_v47, %v5689_v39  ;;  %v5692_v58 = vpop.f32.mrf.mxu1 }
 0x171   :  { %v1469_v1 = vrot.slane %v1468_v52, 1  ;;  %v1506_v50 = vadd.f32 %v1505_v54, %v1504_v41  ;;  %v2274_v9 = vadd.f32 %v2259_v56, %v2258_v13  ;;  %v5629_v15 = vpop.f32.mrf.mxu0 }
 0x172   :  { %v2182_v18 = vadd.f32 %v5691_v14, %v5627_v49  ;;  %v5630_v19 = vadd.f32 %v5629_v15, %v5628_v43  ;;  %v5693_v2 = vpop.f32.mrf.mxu1 }
 0x173   :  { %v1470_v20 = vadd.f32 %v1469_v1, %v1468_v52  ;;  %v1507_v5 = vrot.slane %v1506_v50, 1  ;;  %v5694_v6 = vadd.f32 %v5693_v2, %v5692_v58  ;;  %v5631_v8 = vpop.f32.mrf.mxu0 }
 0x174   :  { %v2237_v59 = vadd.f32 %v2236_v55, %v2182_v18  ;;  %v2260_v26 = vmul.f32 %v2182_v18, %v2182_v18  ;;  %v5695_v21 = vpop.f32.mrf.mxu1 }
 0x175   :  { %v6816_v24 = vadd.f32 %v1470_v20, %v685_v4  ;;  %v1508_v25 = vadd.f32 %v1507_v5, %v1506_v50  ;;  %v2185_v61 = vadd.f32 %v5694_v6, %v5630_v19  ;;  %v5632_v27 = vpop.f32.mrf.mxu0 }
 0x176   :  { %v2275_v33 = vadd.f32 %v2274_v9, %v2260_v26  ;;  %v5633_v30 = vadd.f32 %v5632_v27, %v5631_v8  ;;  %v5696_v10 = vpop.f32.mrf.mxu1 }
 0x177   :  { %v6818_v32 = vadd.f32 %v1508_v25, %v723_v11  ;;  %v2238_v35 = vadd.f32 %v2237_v59, %v2185_v61  ;;  %v2261_v29 = vmul.f32 %v2185_v61, %v2185_v61  ;;  %v6820_v40 = vpack.c.bf16 %v2185_v61, %v2182_v18  ;;  %v5634_v37 = vpop.f32.mrf.mxu0 }
 0x178   :  { %v5697_v38 = vadd.f32 %v5696_v10, %v5695_v21  ;;  %v5698_v39 = vpop.f32.mrf.mxu1 }
 0x179   :  { %v2276_v36 = vadd.f32 %v2275_v33, %v2261_v29  ;;  %v5635_v41 = vpop.f32.mrf.mxu0 }
 0x17a   :  { %v2190_v42 = vadd.f32 %v5697_v38, %v5633_v30  ;;  %v5636_v46 = vadd.f32 %v5635_v41, %v5634_v37  ;;  %v5699_v44 = vpop.f32.mrf.mxu1 }
 0x17b   :  { %v5700_v48 = vadd.f32 %v5699_v44, %v5698_v39  ;;  %v5637_v13 = vpop.f32.mrf.mxu0 }
 0x17c   :  { %v2239_v49 = vadd.f32 %v2238_v35, %v2190_v42  ;;  %v2262_v47 = vmul.f32 %v2190_v42, %v2190_v42  ;;  %v5701_v52 = vpop.f32.mrf.mxu1 }
 0x17d   :  { %v2193_v54 = vadd.f32 %v5700_v48, %v5636_v46  ;;  %v5638_v55 = vpop.f32.mrf.mxu0 }
 0x17e   :  { %v2277_v56 = vadd.f32 %v2276_v36, %v2262_v47  ;;  %v5639_v43 = vadd.f32 %v5638_v55, %v5637_v13  ;;  %v5702_v14 = vpop.f32.mrf.mxu1 }
 0x17f   :  { %v2240_v58 = vadd.f32 %v2239_v49, %v2193_v54  ;;  %v2263_v63 = vmul.f32 %v2193_v54, %v2193_v54  ;;  %v6822_v1 = vpack.c.bf16 %v2193_v54, %v2190_v42  ;;  %v5703_v50 = vadd.f32 %v5702_v14, %v5701_v52  ;;  %v5640_v9 = vpop.f32.mrf.mxu0 }
 0x180   :  { %v5704_v15 = vpop.f32.mrf.mxu1 }
 0x181   :  { %v2278_v18 = vadd.f32 %v2277_v56, %v2263_v63  ;;  %v2198_v19 = vadd.f32 %v5703_v50, %v5639_v43  ;;  %v5641_v2 = vpop.f32.mrf.mxu0 }
 0x182   :  { %v5642_v4 = vadd.f32 %v5641_v2, %v5640_v9  ;;  %v5705_v20 = vpop.f32.mrf.mxu1 }
 0x183   :  { %v2241_v5 = vadd.f32 %v2240_v58, %v2198_v19  ;;  %v2264_v6 = vmul.f32 %v2198_v19, %v2198_v19  ;;  %v5706_v8 = vadd.f32 %v5705_v20, %v5704_v15  ;;  %v5643_v59 = vpop.f32.mrf.mxu0 }
 0x184   :  { %v5707_v26 = vpop.f32.mrf.mxu1 }
 0x185   :  { %v2279_v21 = vadd.f32 %v2278_v18, %v2264_v6  ;;  %v2201_v11 = vadd.f32 %v5706_v8, %v5642_v4  ;;  %v5644_v25 = vpop.f32.mrf.mxu0 }
 0x186   :  { %v5645_v61 = vadd.f32 %v5644_v25, %v5643_v59  ;;  %v5708_v27 = vpop.f32.mrf.mxu1 }
 0x187   :  { %v2242_v33 = vadd.f32 %v2241_v5, %v2201_v11  ;;  %v2265_v30 = vmul.f32 %v2201_v11, %v2201_v11  ;;  %v6824_v10 = vpack.c.bf16 %v2201_v11, %v2198_v19  ;;  %v5709_v35 = vadd.f32 %v5708_v27, %v5707_v26  ;;  %v5646_v29 = vpop.f32.mrf.mxu0 }
 0x188   :  { %v5710_v37 = vpop.f32.mrf.mxu1 }
 0x189   :  { %v2280_v38 = vadd.f32 %v2279_v21, %v2265_v30  ;;  %v2206_v39 = vadd.f32 %v5709_v35, %v5645_v61  ;;  %v5647_v36 = vpop.f32.mrf.mxu0 }
 0x18a   :  { %v5648_v41 = vadd.f32 %v5647_v36, %v5646_v29  ;;  %v5711_v42 = vpop.f32.mrf.mxu1 }
 0x18b   :  { %v2243_v46 = vadd.f32 %v2242_v33, %v2206_v39  ;;  %v2266_v44 = vmul.f32 %v2206_v39, %v2206_v39  ;;  %v5712_v48 = vadd.f32 %v5711_v42, %v5710_v37  ;;  %v5649_v13 = vpop.f32.mrf.mxu0 }
 0x18c   :  { %v5713_v49 = vpop.f32.mrf.mxu1 }
 0x18d   :  { %v2281_v47 = vadd.f32 %v2280_v38, %v2266_v44  ;;  %v2209_v52 = vadd.f32 %v5712_v48, %v5648_v41  ;;  %v5650_v54 = vpop.f32.mrf.mxu0 }
 0x18e   :  { %v5651_v55 = vadd.f32 %v5650_v54, %v5649_v13  ;;  %v5714_v56 = vpop.f32.mrf.mxu1 }
 0x18f   :  { %v2244_v43 = vadd.f32 %v2243_v46, %v2209_v52  ;;  %v2267_v14 = vmul.f32 %v2209_v52, %v2209_v52  ;;  %v6826_v58 = vpack.c.bf16 %v2209_v52, %v2206_v39  ;;  %v5715_v63 = vadd.f32 %v5714_v56, %v5713_v49  ;;  %v5652_v50 = vpop.f32.mrf.mxu0 }
 0x190   :  { %v5716_v9 = vpop.f32.mrf.mxu1 }
 0x191   :  { %v2282_v15 = vadd.f32 %v2281_v47, %v2267_v14  ;;  %v2214_v18 = vadd.f32 %v5715_v63, %v5651_v55  ;;  %v5653_v19 = vpop.f32.mrf.mxu0 }
 0x192   :  { %v5654_v2 = vadd.f32 %v5653_v19, %v5652_v50  ;;  %v5717_v4 = vpop.f32.mrf.mxu1 }
 0x193   :  { %v2245_v20 = vadd.f32 %v2244_v43, %v2214_v18  ;;  %v2268_v5 = vmul.f32 %v2214_v18, %v2214_v18  ;;  %v5718_v6 = vadd.f32 %v5717_v4, %v5716_v9  ;;  %v5655_v8 = vpop.f32.mrf.mxu0 }
 0x194   :  { %v5719_v59 = vpop.f32.mrf.mxu1 }
 0x195   :  { %v2283_v26 = vadd.f32 %v2282_v15, %v2268_v5  ;;  %v2217_v21 = vadd.f32 %v5718_v6, %v5654_v2  ;;  %v5656_v11 = vpop.f32.mrf.mxu0 }
 0x196   :  { %v5657_v25 = vadd.f32 %v5656_v11, %v5655_v8  ;;  %v5720_v61 = vpop.f32.mrf.mxu1 }
 0x197   :  { %v2246_v27 = vadd.f32 %v2245_v20, %v2217_v21  ;;  %v2269_v33 = vmul.f32 %v2217_v21, %v2217_v21  ;;  %v6828_v30 = vpack.c.bf16 %v2217_v21, %v2214_v18  ;;  %v5721_v35 = vadd.f32 %v5720_v61, %v5719_v59  ;;  %v5658_v29 = vpop.f32.mrf.mxu0 }
 0x198   :  { %v5722_v37 = vpop.f32.mrf.mxu1 }
 0x199   :  { %v2284_v38 = vadd.f32 %v2283_v26, %v2269_v33  ;;  %v2222_v39 = vadd.f32 %v5721_v35, %v5657_v25  ;;  %v5659_v36 = vpop.f32.mrf.mxu0 }
 0x19a   :  { %v5660_v41 = vadd.f32 %v5659_v36, %v5658_v29  ;;  %v5723_v42 = vpop.f32.mrf.mxu1 }
 0x19b   :  { %v2247_v46 = vadd.f32 %v2246_v27, %v2222_v39  ;;  %v2270_v44 = vmul.f32 %v2222_v39, %v2222_v39  ;;  %v5724_v48 = vadd.f32 %v5723_v42, %v5722_v37  ;;  %v5661_v13 = vpop.f32.mrf.mxu0 }
 0x19c   :  { %v5725_v49 = vpop.f32.mrf.mxu1 }
 0x19d   :  { %v2285_v47 = vadd.f32 %v2284_v38, %v2270_v44  ;;  %v2225_v52 = vadd.f32 %v5724_v48, %v5660_v41  ;;  %v5662_v54 = vpop.f32.mrf.mxu0 }
 0x19e   :  { %v5663_v55 = vadd.f32 %v5662_v54, %v5661_v13  ;;  %v5726_v56 = vpop.f32.mrf.mxu1 }
 0x19f   :  { %v2248_v43 = vadd.f32 %v2247_v46, %v2225_v52  ;;  %v2271_v14 = vmul.f32 %v2225_v52, %v2225_v52  ;;  %v6830_v63 = vpack.c.bf16 %v2225_v52, %v2222_v39  ;;  %v5727_v50 = vadd.f32 %v5726_v56, %v5725_v49  ;;  %v5664_v9 = vpop.f32.mrf.mxu0 }
 0x1a0   :  { %v5728_v15 = vpop.f32.mrf.mxu1 }
 0x1a1   :  { %v2286_v18 = vadd.f32 %v2285_v47, %v2271_v14  ;;  %v2230_v19 = vadd.f32 %v5727_v50, %v5663_v55  ;;  %v5665_v2 = vpop.f32.mrf.mxu0 }
 0x1a2   :  { %v5666_v4 = vadd.f32 %v5665_v2, %v5664_v9  ;;  %v5729_v20 = vpop.f32.mrf.mxu1 }
 0x1a3   :  { %v2249_v5 = vadd.f32 %v2248_v43, %v2230_v19  ;;  %v2272_v6 = vmul.f32 %v2230_v19, %v2230_v19  ;;  %v5730_v8 = vadd.f32 %v5729_v20, %v5728_v15  ;;  %v5747_v59 = vpop.f32.mrf.mxu0 }
 0x1a4   :  { %v5811_v26 = vpop.f32.mrf.mxu1 }
 0x1a5   :  { %v2287_v21 = vadd.f32 %v2286_v18, %v2272_v6  ;;  %v2233_v11 = vadd.f32 %v5730_v8, %v5666_v4  ;;  %v5748_v25 = vpop.f32.mrf.mxu0 }
 0x1a6   :  { %v5812_v61 = vpop.f32.mrf.mxu1  ;;  %v5749_v41 = vadd.f32 %v5748_v25, %v5747_v59 }
 0x1a7   :  { %v2250_v27 = vadd.f32 %v2249_v5, %v2233_v11  ;;  %v2273_v33 = vmul.f32 %v2233_v11, %v2233_v11  ;;  %v6832_v35 = vpack.c.bf16 %v2233_v11, %v2230_v19  ;;  %v5750_v29 = vpop.f32.mrf.mxu0  ;;  %v5813_v42 = vadd.f32 %v5812_v61, %v5811_v26 }
 0x1a8   :  { %v5814_v37 = vpop.f32.mrf.mxu1 }
 0x1a9   :  { %v2251_v38 = vrot.slane %v2250_v27, 4  ;;  %v2288_v39 = vadd.f32 %v2287_v21, %v2273_v33  ;;  %v5751_v36 = vpop.f32.mrf.mxu0  ;;  %v6836_v14 = vadd.f32 %v5813_v42, %v5749_v41 }
 0x1aa   :  { %v5752_v46 = vadd.f32 %v5751_v36, %v5750_v29  ;;  %v5815_v44 = vpop.f32.mrf.mxu1 }
 0x1ab   :  { %v2252_v48 = vadd.f32 %v2251_v38, %v2250_v27  ;;  %v2289_v13 = vrot.slane %v2288_v39, 4  ;;  %v5816_v49 = vadd.f32 %v5815_v44, %v5814_v37  ;;  %v5753_v47 = vpop.f32.mrf.mxu0 }
 0x1ac   :  { %v5817_v52 = vpop.f32.mrf.mxu1 }
 0x1ad   :  { %v2253_v54 = vrot.slane %v2252_v48, 2  ;;  %v2290_v55 = vadd.f32 %v2289_v13, %v2288_v39  ;;  %v6834_v56 = vadd.f32 %v5816_v49, %v5752_v46  ;;  %v5754_v43 = vpop.f32.mrf.mxu0 }
 0x1ae   :  { %v5818_v50 = vpop.f32.mrf.mxu1  ;;  %v5755_v5 = vadd.f32 %v5754_v43, %v5753_v47 }
 0x1af   :  { %v2254_v9 = vadd.f32 %v2253_v54, %v2252_v48  ;;  %v2291_v15 = vrot.slane %v2290_v55, 2  ;;  %v5756_v18 = vpop.f32.mrf.mxu0  ;;  %v6840_v19 = vpack.c.bf16 %v6834_v56, %v6836_v14  ;;  %v5819_v6 = vadd.f32 %v5818_v50, %v5817_v52 }
 0x1b0   :  { %v5820_v2 = vpop.f32.mrf.mxu1 }
 0x1b1   :  { %v2255_v4 = vrot.slane %v2254_v9, 1  ;;  %v2292_v20 = vadd.f32 %v2291_v15, %v2290_v55  ;;  %v5757_v8 = vpop.f32.mrf.mxu0  ;;  %v2968_v37 = vadd.f32 %v5819_v6, %v5755_v5 }
 0x1b2   :  { %v5758_v59 = vadd.f32 %v5757_v8, %v5756_v18  ;;  %v5821_v26 = vpop.f32.mrf.mxu1 }
 0x1b3   :  { %v2256_v21 = vadd.f32 %v2255_v4, %v2254_v9  ;;  %v2293_v11 = vrot.slane %v2292_v20, 1  ;;  %v5822_v25 = vadd.f32 %v5821_v26, %v5820_v2  ;;  %v5759_v61 = vpop.f32.mrf.mxu0 }
 0x1b4   :  { %v5823_v27 = vpop.f32.mrf.mxu1 }
 0x1b5   :  { %v6843_v33 = vadd.f32 %v2256_v21, %v6816_v24  ;;  %v2294_v29 = vadd.f32 %v2293_v11, %v2292_v20  ;;  %v2971_v38 = vadd.f32 %v5822_v25, %v5758_v59  ;;  %v5760_v39 = vpop.f32.mrf.mxu0 }
 0x1b6   :  { %v5824_v36 = vpop.f32.mrf.mxu1  ;;  %v5761_v48 = vadd.f32 %v5760_v39, %v5759_v61 }
 0x1b7   :  { %v6846_v41 = vadd.f32 %v2294_v29, %v6818_v32  ;;  %v6848_v42 = vpack.c.bf16 %v2971_v38, %v2968_v37  ;;  %v5762_v46 = vpop.f32.mrf.mxu0  ;;  %v5825_v13 = vadd.f32 %v5824_v36, %v5823_v27  ;;  %v3045_v36 = vmul.f32 %v6834_v56, %v6834_v56 }
 0x1b8   :  { %v5826_v44 = vpop.f32.mrf.mxu1 }
 0x1b9   :  { %v5763_v49 = vpop.f32.mrf.mxu0  ;;  %v2976_v43 = vadd.f32 %v5825_v13, %v5761_v48 }
 0x1ba   :  { %v5764_v47 = vadd.f32 %v5763_v49, %v5762_v46  ;;  %v5827_v52 = vpop.f32.mrf.mxu1  ;;  %v3044_v49 = vmul.f32 %v6836_v14, %v6836_v14 }
 0x1bb   :  { %v5828_v54 = vadd.f32 %v5827_v52, %v5826_v44  ;;  %v5765_v24 = vpop.f32.mrf.mxu0 }
 0x1bc   :  { %v5829_v55 = vpop.f32.mrf.mxu1 }
 0x1bd   :  { %v2979_v50 = vadd.f32 %v5828_v54, %v5764_v47  ;;  %v5766_v9 = vpop.f32.mrf.mxu0  ;;  %v3046_v47 = vmul.f32 %v2968_v37, %v2968_v37 }
 0x1be   :  { %v5830_v15 = vpop.f32.mrf.mxu1  ;;  %v5767_v4 = vadd.f32 %v5766_v9, %v5765_v24  ;;  %v3022_v24 = vadd.f32 %v6834_v56, %v6836_v14 }
 0x1bf   :  { %v6850_v18 = vpack.c.bf16 %v2979_v50, %v2976_v43  ;;  %v5768_v32 = vpop.f32.mrf.mxu0  ;;  %v5831_v20 = vadd.f32 %v5830_v15, %v5829_v55  ;;  %v3060_v15 = vadd.f32 %v3045_v36, %v3044_v49 }
 0x1c0   :  { %v5832_v2 = vpop.f32.mrf.mxu1 }
 0x1c1   :  { %7333 = vst [vmem:[#allocation2_spill] sm:$0xff] %v6850_v18  ;;  %v5769_v5 = vpop.f32.mrf.mxu0  ;;  %v2984_v11 = vadd.f32 %v5831_v20, %v5767_v4  ;;  %v3023_v4 = vadd.f32 %v3022_v24, %v2968_v37 }
 0x1c2   :  { %v5770_v6 = vadd.f32 %v5769_v5, %v5768_v32  ;;  %v5833_v8 = vpop.f32.mrf.mxu1  ;;  %v3047_v32 = vmul.f32 %v2971_v38, %v2971_v38 }
 0x1c3   :  { %v5834_v59 = vadd.f32 %v5833_v8, %v5832_v2  ;;  %v5771_v26 = vpop.f32.mrf.mxu0  ;;  %v3061_v8 = vadd.f32 %v3060_v15, %v3046_v47 }
 0x1c4   :  { %v5835_v21 = vpop.f32.mrf.mxu1 }
 0x1c5   :  { %v2987_v25 = vadd.f32 %v5834_v59, %v5770_v6  ;;  %v5772_v61 = vpop.f32.mrf.mxu0  ;;  %v3048_v59 = vmul.f32 %v2976_v43, %v2976_v43 }
 0x1c6   :  { %v5836_v27 = vpop.f32.mrf.mxu1  ;;  %v5773_v44 = vadd.f32 %v5772_v61, %v5771_v26 }
 0x1c7   :  { %v6852_v29 = vpack.c.bf16 %v2987_v25, %v2984_v11  ;;  %v5774_v39 = vpop.f32.mrf.mxu0  ;;  %v5837_v48 = vadd.f32 %v5836_v27, %v5835_v21  ;;  %v3024_v21 = vadd.f32 %v3023_v4, %v2971_v38 }
 0x1c8   :  { %v5838_v46 = vpop.f32.mrf.mxu1 }
 0x1c9   :  { %7334 = vst [vmem:[#allocation3_spill] sm:$0xff] %v6852_v29  ;;  %v5775_v13 = vpop.f32.mrf.mxu0  ;;  %v2992_v20 = vadd.f32 %v5837_v48, %v5773_v44  ;;  %v3025_v56 = vadd.f32 %v3024_v21, %v2976_v43 }
 0x1ca   :  { %v5776_v52 = vadd.f32 %v5775_v13, %v5774_v39  ;;  %v5839_v54 = vpop.f32.mrf.mxu1  ;;  %v3062_v39 = vadd.f32 %v3061_v8, %v3047_v32  ;;  %v3049_v13 = vmul.f32 %v2979_v50, %v2979_v50 }
 0x1cb   :  { %v5840_v55 = vadd.f32 %v5839_v54, %v5838_v46  ;;  %v5777_v9 = vpop.f32.mrf.mxu0  ;;  %v3050_v54 = vmul.f32 %v2984_v11, %v2984_v11  ;;  %v3026_v48 = vadd.f32 %v3025_v56, %v2979_v50  ;;  %v3052_v18 = vmul.f32 %v2992_v20, %v2992_v20 }
 0x1cc   :  { %v5841_v2 = vpop.f32.mrf.mxu1  ;;  %v3063_v49 = vadd.f32 %v3062_v39, %v3048_v59 }
 0x1cd   :  { %v2995_v5 = vadd.f32 %v5840_v55, %v5776_v52  ;;  %v5778_v6 = vpop.f32.mrf.mxu0  ;;  %v3051_v55 = vmul.f32 %v2987_v25, %v2987_v25  ;;  %v3027_v15 = vadd.f32 %v3026_v48, %v2984_v11 }
 0x1ce   :  { %v5842_v26 = vpop.f32.mrf.mxu1  ;;  %v5779_v14 = vadd.f32 %v5778_v6, %v5777_v9  ;;  %v3064_v24 = vadd.f32 %v3063_v49, %v3049_v13 }
 0x1cf   :  { %v6860_v61 = vpack.c.bf16 %v2995_v5, %v2992_v20  ;;  %v5780_v27 = vpop.f32.mrf.mxu0  ;;  %v5843_v46 = vadd.f32 %v5842_v26, %v5841_v2  ;;  %v3028_v9 = vadd.f32 %v3027_v15, %v2987_v25  ;;  %v3053_v50 = vmul.f32 %v2995_v5, %v2995_v5 }
 0x1d0   :  { %v5844_v29 = vpop.f32.mrf.mxu1  ;;  %v3065_v8 = vadd.f32 %v3064_v24, %v3050_v54 }
 0x1d1   :  { %7335 = vst [vmem:[#allocation4_spill] sm:$0xff] %v6860_v61  ;;  %v5781_v36 = vpop.f32.mrf.mxu0  ;;  %v3000_v4 = vadd.f32 %v5843_v46, %v5779_v14 }
 0x1d2   :  { %v5782_v37 = vadd.f32 %v5781_v36, %v5780_v27  ;;  %v5845_v44 = vpop.f32.mrf.mxu1  ;;  %v3066_v21 = vadd.f32 %v3065_v8, %v3051_v55  ;;  %v3029_v27 = vadd.f32 %v3028_v9, %v2992_v20 }
 0x1d3   :  { %v5846_v52 = vadd.f32 %v5845_v44, %v5844_v29  ;;  %v5783_v47 = vpop.f32.mrf.mxu0  ;;  %v3054_v56 = vmul.f32 %v3000_v4, %v3000_v4 }
 0x1d4   :  { %v5847_v38 = vpop.f32.mrf.mxu1  ;;  %v3067_v13 = vadd.f32 %v3066_v21, %v3052_v18  ;;  %v3030_v46 = vadd.f32 %v3029_v27, %v2995_v5 }
 0x1d5   :  { %v3003_v61 = vadd.f32 %v5846_v52, %v5782_v37  ;;  %v5784_v32 = vpop.f32.mrf.mxu0 }
 0x1d6   :  { %v5848_v43 = vpop.f32.mrf.mxu1  ;;  %v5785_v6 = vadd.f32 %v5784_v32, %v5783_v47  ;;  %v3068_v37 = vadd.f32 %v3067_v13, %v3053_v50  ;;  %v3031_v44 = vadd.f32 %v3030_v46, %v3000_v4 }
 0x1d7   :  { %v6862_v2 = vpack.c.bf16 %v3003_v61, %v3000_v4  ;;  %v5849_v59 = vadd.f32 %v5848_v43, %v5847_v38  ;;  %v5786_v26 = vpop.f32.mrf.mxu0  ;;  %v3055_v48 = vmul.f32 %v3003_v61, %v3003_v61 }
 0x1d8   :  { %v5850_v29 = vpop.f32.mrf.mxu1  ;;  %v3069_v24 = vadd.f32 %v3068_v37, %v3054_v56  ;;  %v3032_v15 = vadd.f32 %v3031_v44, %v3003_v61 }
 0x1d9   :  { %v5787_v39 = vpop.f32.mrf.mxu0  ;;  %v3008_v36 = vadd.f32 %v5849_v59, %v5785_v6 }
 0x1da   :  { %v5788_v11 = vadd.f32 %v5787_v39, %v5786_v26  ;;  %v5851_v14 = vpop.f32.mrf.mxu1  ;;  %v3070_v5 = vadd.f32 %v3069_v24, %v3055_v48 }
 0x1db   :  { %v5852_v49 = vadd.f32 %v5851_v14, %v5850_v29  ;;  %v5789_v54 = vpop.f32.mrf.mxu0  ;;  %v3056_v20 = vmul.f32 %v3008_v36, %v3008_v36  ;;  %v3033_v9 = vadd.f32 %v3032_v15, %v3008_v36 }
 0x1dc   :  { %v5853_v25 = vpop.f32.mrf.mxu1 }
 0x1dd   :  { %v3011_v52 = vadd.f32 %v5852_v49, %v5788_v11  ;;  %v5790_v47 = vpop.f32.mrf.mxu0  ;;  %v3071_v50 = vadd.f32 %v3070_v5, %v3056_v20 }
 0x1de   :  { %v5791_v55 = vadd.f32 %v5790_v47, %v5789_v54  ;;  %v5854_v38 = vpop.f32.mrf.mxu1 }
 0x1df   :  { %v6864_v32 = vpack.c.bf16 %v3011_v52, %v3008_v36  ;;  %v5855_v18 = vadd.f32 %v5854_v38, %v5853_v25  ;;  %v5792_v8 = vpop.f32.mrf.mxu0  ;;  %v3057_v6 = vmul.f32 %v3011_v52, %v3011_v52  ;;  %v3034_v29 = vadd.f32 %v3033_v9, %v3011_v52 }
 0x1e0   :  { %v5856_v43 = vpop.f32.mrf.mxu1 }
 0x1e1   :  { %v3016_v59 = vadd.f32 %v5855_v18, %v5791_v55  ;;  %v5793_v26 = vpop.f32.mrf.mxu0  ;;  %v3072_v13 = vadd.f32 %v3071_v50, %v3057_v6  ;;  %v4976_v50 = vunpack.c.l.bf16 %v6756_v3 }
 0x1e2   :  { %v5794_v21 = vadd.f32 %v5793_v26, %v5792_v8  ;;  %v5857_v4 = vpop.f32.mrf.mxu1  ;;  %v4968_v26 = vunpack.c.l.bf16 %v6744_v28 }
 0x1e3   :  { %v3058_v27 = vmul.f32 %v3016_v59, %v3016_v59  ;;  %v5858_v39 = vadd.f32 %v5857_v4, %v5856_v43  ;;  %v3035_v56 = vadd.f32 %v3034_v29, %v3016_v59  ;;  %v4972_v4 = vunpack.c.l.bf16 %v6750_v53 }
 0x1e4   :  { %v4980_v29 = vunpack.c.l.bf16 %v6762_v31 }
 0x1e5   :  { %v3019_v61 = vadd.f32 %v5858_v39, %v5794_v21  ;;  %v3073_v11 = vadd.f32 %v3072_v13, %v3058_v27  ;;  %v4969_v21 = vunpack.c.h.bf16 %v6744_v28  ;;  %v4981_v27 = vunpack.c.h.bf16 %v6762_v31 }
 0x1e6   :  { %v4984_v39 = vunpack.c.l.bf16 %v6768_v60  ;;  %v4985_v13 = vunpack.c.h.bf16 %v6768_v60 }
 0x1e7   :  { %v3036_v14 = vadd.f32 %v3035_v56, %v3019_v61  ;;  %v3059_v46 = vmul.f32 %v3019_v61, %v3019_v61  ;;  %v6866_v49 = vpack.c.bf16 %v3019_v61, %v3016_v59  ;;  %v4988_v56 = vunpack.c.l.bf16 %v6778_v22 }
 0x1e8   :  { %v4989_v61 = vunpack.c.h.bf16 %v6778_v22 }
 0x1e9   :  { %7336 = vst [vmem:[#allocation5_spill] sm:$0xff] %v6866_v49  ;;  %v3037_v54 = vrot.slane %v3036_v14, 4  ;;  %v3074_v37 = vadd.f32 %v3073_v11, %v3059_v46  ;;  %v4992_v11 = vunpack.c.l.bf16 %v6786_v7  ;;  %v4993_v46 = vunpack.c.h.bf16 %v6786_v7 }
 0x1eb   :  { %v3038_v36 = vadd.f32 %v3037_v54, %v3036_v14  ;;  %v3075_v25 = vrot.slane %v3074_v37, 4  ;;  %v3207_v14 = vlaneseq  ;;  %v4996_v54 = vunpack.c.l.bf16 %v6790_v16 }
 0x1ed   :  { %v3039_v44 = vrot.slane %v3038_v36, 2  ;;  %v3076_v48 = vadd.f32 %v3075_v25, %v3074_v37  ;;  %v4997_v37 = vunpack.c.h.bf16 %v6790_v16  ;;  %v7342_v16 = vunpack.c.h.bf16 %v6796_v45 }
 0x1ef   :  { %v3040_v47 = vadd.f32 %v3039_v44, %v3038_v36  ;;  %v3077_v24 = vrot.slane %v3076_v48, 2  ;;  %v5040_v36 = vunpack.c.l.bf16 %v6794_v12  ;;  %v7339_v44 = vld [vmem:[#allocation4_spill] sm:$0xff] }
 0x1f1   :  { %v3041_v55 = vrot.slane %v3040_v47, 1  ;;  %v3078_v52 = vadd.f32 %v3077_v24, %v3076_v48  ;;  %v7338_v48 = vld [vmem:[#allocation3_spill] sm:$0xff] }
 0x1f3   :  { %v3042_v38 = vadd.f32 %v3041_v55, %v3040_v47  ;;  %v3079_v15 = vrot.slane %v3078_v52, 1 }
 0x1f5   :  { %v3043_v20 = vadd.f32 %v3042_v38, %v6843_v33  ;;  %v3080_v18 = vadd.f32 %v3079_v15, %v3078_v52  ;;  %v4973_v33 = vunpack.c.h.bf16 %v6750_v53  ;;  %v3167_v15 = vld [vmem:[%s7325_s3] sm:$0x1] }
 0x1f6   :  { %v3171_v52 = vld [vmem:[%s7326_s4] sm:$0x1] }
 0x1f7   :  { %v3081_v8 = vadd.f32 %v3080_v18, %v6846_v41  ;;  %v6870_v43 = vmul.f32 0.001953125, %v3043_v20  ;;  %v4977_v41 = vunpack.c.h.bf16 %v6756_v3 }
 0x1f9   :  { %v3164_v5 = vmul.f32 0.001953125, %v3081_v8  ;;  %v3165_v9 = vmul.f32 %v6870_v43, %v6870_v43  ;;  %v6902_v8 = vshrl.u32 %v3207_v14, 7 }
 0x1fb   :  { %v3166_v6 = vsub.f32 %v3164_v5, %v3165_v9  ;;  %v3209_v20 = vsub.s32 0, %v6902_v8  ;;  %v7337_v8 = vld [vmem:[#allocation2_spill] sm:$0xff] }
 0x1fd   :  { %v3168_v59 = vadd.f32 1e-05, %v3166_v6 }
 0x1ff   :  { %6050 = vrsqrt.f32 %v3168_v59 }
 0x20c   :  { %v6051_v38 = vpop.eup %6050 }
 0x20d   :  { %v3170_v14 = vmul.f32 %v6051_v38, %v3167_v15 }
 0x20f   :  { %v3172_v47 = vmul.f32 %v3170_v14, %v6870_v43  ;;  %v6944_v18 = vrot.slane %v3170_v14, %v3209_v20 }
 0x211   :  { %v3173_v9 = vsub.f32 %v3171_v52, %v3172_v47  ;;  %v3212_v5 = vmul.f32 %v4968_v26, %v6944_v18  ;;  %v3213_v24 = vmul.f32 %v4969_v21, %v6944_v18  ;;  %v3214_v43 = vmul.f32 %v4972_v4, %v6944_v18 }
 0x212   :  { %v3215_v14 = vmul.f32 %v4973_v33, %v6944_v18  ;;  %v3216_v47 = vmul.f32 %v4976_v50, %v6944_v18  ;;  %v3217_v26 = vmul.f32 %v4977_v41, %v6944_v18  ;;  %v3218_v28 = vmul.f32 %v4980_v29, %v6944_v18 }
 0x213   :  { %v3219_v21 = vmul.f32 %v4981_v27, %v6944_v18  ;;  %v3220_v53 = vmul.f32 %v4984_v39, %v6944_v18  ;;  %v3221_v4 = vmul.f32 %v4985_v13, %v6944_v18  ;;  %v3222_v3 = vmul.f32 %v4988_v56, %v6944_v18 }
 0x214   :  { %v3223_v33 = vmul.f32 %v4989_v61, %v6944_v18  ;;  %v3224_v31 = vmul.f32 %v4992_v11, %v6944_v18  ;;  %v3225_v50 = vmul.f32 %v4993_v46, %v6944_v18  ;;  %v3226_v60 = vmul.f32 %v4996_v54, %v6944_v18 }
 0x215   :  { %v3227_v41 = vmul.f32 %v4997_v37, %v6944_v18  ;;  %v6998_v29 = vrot.slane %v3173_v9, %v3209_v20  ;;  %v7003_v22 = vmul.f32 %v5040_v36, %v6944_v18  ;;  %v7340_v27 = vunpack.c.h.bf16 %v6794_v12 }
 0x216   :  { %v7341_v39 = vunpack.c.l.bf16 %v6796_v45  ;;  %v7018_v56 = vmul.f32 %v7342_v16, %v6944_v18  ;;  %v7343_v61 = vunpack.c.l.bf16 %v6798_v0  ;;  %v7344_v12 = vunpack.c.h.bf16 %v6798_v0 }
 0x217   :  { %v7008_v7 = vmul.f32 %v7340_v27, %v6944_v18  ;;  %v3234_v54 = vadd.f32 %v6998_v29, %v3212_v5  ;;  %v3235_v37 = vadd.f32 %v6998_v29, %v3213_v24  ;;  %v3236_v36 = vadd.f32 %v6998_v29, %v3214_v43 }
 0x218   :  { %v7013_v13 = vmul.f32 %v7341_v39, %v6944_v18  ;;  %v7023_v11 = vmul.f32 %v7343_v61, %v6944_v18  ;;  %v7028_v46 = vmul.f32 %v7344_v12, %v6944_v18  ;;  %v3237_v45 = vadd.f32 %v6998_v29, %v3215_v14 }
 0x219   :  { %v3238_v52 = vadd.f32 %v6998_v29, %v3216_v47  ;;  %v3239_v20 = vadd.f32 %v6998_v29, %v3217_v26  ;;  %v3240_v9 = vadd.f32 %v6998_v29, %v3218_v28  ;;  %v3241_v27 = vadd.f32 %v6998_v29, %v3219_v21 }
 0x21a   :  { %v3242_v0 = vadd.f32 %v6998_v29, %v3220_v53  ;;  %v3243_v39 = vadd.f32 %v6998_v29, %v3221_v4  ;;  %v3244_v5 = vadd.f32 %v6998_v29, %v3222_v3  ;;  %v3245_v24 = vadd.f32 %v6998_v29, %v3223_v33 }
 0x21b   :  { %v3246_v43 = vadd.f32 %v6998_v29, %v3224_v31  ;;  %v3247_v14 = vadd.f32 %v6998_v29, %v3225_v50  ;;  %v3248_v47 = vadd.f32 %v6998_v29, %v3226_v60  ;;  %v3249_v26 = vadd.f32 %v6998_v29, %v3227_v41 }
 0x21c   :  { %v3250_v16 = vmax.f32 %v3234_v54, 0.0  ;;  %v3251_v28 = vmax.f32 %v3235_v37, 0.0  ;;  %v3252_v61 = vmax.f32 %v3236_v36, 0.0  ;;  %v3253_v21 = vmax.f32 %v3237_v45, 0.0 }
 0x21d   :  { %v3254_v12 = vmax.f32 %v3238_v52, 0.0  ;;  %v3255_v53 = vmax.f32 %v3239_v20, 0.0  ;;  %v3256_v6 = vmax.f32 %v3240_v9, 0.0  ;;  %v3257_v4 = vmax.f32 %v3241_v27, 0.0 }
 0x21e   :  { %v3258_v25 = vmax.f32 %v3242_v0, 0.0  ;;  %v3259_v3 = vmax.f32 %v3243_v39, 0.0  ;;  %v3260_v15 = vmax.f32 %v3244_v5, 0.0  ;;  %v3261_v33 = vmax.f32 %v3245_v24, 0.0 }
 0x21f   :  { %v3262_v38 = vmax.f32 %v3246_v43, 0.0  ;;  %v3263_v31 = vmax.f32 %v3247_v14, 0.0  ;;  %v3264_v55 = vmax.f32 %v3248_v47, 0.0  ;;  %v3265_v50 = vmax.f32 %v3249_v26, 0.0 }
 0x220   :  { %v5001_v59 = vpack.c.bf16 %v3251_v28, %v3250_v16  ;;  %v5006_v60 = vpack.c.bf16 %v3253_v21, %v3252_v61  ;;  %v5011_v49 = vpack.c.bf16 %v3255_v53, %v3254_v12  ;;  %v5016_v41 = vpack.c.bf16 %v3257_v4, %v3256_v6 }
 0x221   :  { %v5021_v54 = vpack.c.bf16 %v3259_v3, %v3258_v25  ;;  %v5026_v37 = vpack.c.bf16 %v3261_v33, %v3260_v15  ;;  %v5031_v36 = vpack.c.bf16 %v3263_v31, %v3262_v38  ;;  %v5036_v45 = vpack.c.bf16 %v3265_v50, %v3264_v55 }
 0x222   :  { %5002 = vst [vmem:[%s7327_s5] sm:$0xff] %v5001_v59   ;;  %5292 = vst [vmem:[%s7327_s5 + $0x8] sm:$0xff] %v5006_v60   ;;  %v7345_v25 = vunpack.c.l.bf16 %v6800_v34  ;;  %v7346_v6 = vunpack.c.h.bf16 %v6800_v34  ;;  %v7347_v38 = vunpack.c.l.bf16 %v6802_v62  ;;  %v7348_v52 = vunpack.c.h.bf16 %v6802_v62 }
 0x223   :  { %5293 = vst [vmem:[%s7327_s5 + $0x10] sm:$0xff] %v5011_v49   ;;  %5294 = vst [vmem:[%s7327_s5 + $0x18] sm:$0xff] %v5016_v41   ;;  %v7349_v34 = vunpack.c.l.bf16 %v6804_v17  ;;  %v7350_v20 = vunpack.c.h.bf16 %v6804_v17  ;;  %v7351_v27 = vunpack.c.l.bf16 %v6807_v51  ;;  %v7352_v39 = vunpack.c.h.bf16 %v6807_v51 }
 0x224   :  { %v3384_v55 = vmul.f32 %v7345_v25, %v6944_v18  ;;  %v3385_v59 = vmul.f32 %v7346_v6, %v6944_v18  ;;  %v3386_v15 = vmul.f32 %v7347_v38, %v6944_v18  ;;  %v3387_v49 = vmul.f32 %v7348_v52, %v6944_v18  ;;  %5295 = vst [vmem:[%s7327_s5 + $0x20] sm:$0xff] %v5021_v54  }
 0x225   :  { %5296 = vst [vmem:[%s7327_s5 + $0x28] sm:$0xff] %v5026_v37   ;;  %5297 = vst [vmem:[%s7327_s5 + $0x30] sm:$0xff] %v5031_v36   ;;  %v3388_v62 = vmul.f32 %v7349_v34, %v6944_v18  ;;  %v3389_v9 = vmul.f32 %v7350_v20, %v6944_v18  ;;  %v3390_v0 = vmul.f32 %v7351_v27, %v6944_v18  ;;  %v7353_v24 = vunpack.c.l.bf16 %v6812_v23 }
 0x226   :  { %5298 = vst [vmem:[%s7327_s5 + $0x38] sm:$0xff] %v5036_v45   ;;  %v3391_v5 = vmul.f32 %v7352_v39, %v6944_v18  ;;  %v7354_v14 = vunpack.c.h.bf16 %v6812_v23  ;;  %v3394_v17 = vadd.f32 %v7003_v22, %v6998_v29  ;;  %v3395_v26 = vadd.f32 %v7008_v7, %v6998_v29 }
 0x227   :  { %v3392_v43 = vmul.f32 %v7353_v24, %v6944_v18  ;;  %v3396_v16 = vadd.f32 %v7013_v13, %v6998_v29  ;;  %v3397_v51 = vadd.f32 %v7018_v56, %v6998_v29  ;;  %v3398_v28 = vadd.f32 %v7023_v11, %v6998_v29 }
 0x228   :  { %v3393_v47 = vmul.f32 %v7354_v14, %v6944_v18  ;;  %v3399_v61 = vadd.f32 %v7028_v46, %v6998_v29  ;;  %v3400_v23 = vadd.f32 %v3384_v55, %v6998_v29  ;;  %v3401_v21 = vadd.f32 %v3385_v59, %v6998_v29 }
 0x229   :  { %v3402_v22 = vadd.f32 %v3386_v15, %v6998_v29  ;;  %v3403_v7 = vadd.f32 %v3387_v49, %v6998_v29  ;;  %v3404_v12 = vadd.f32 %v3388_v62, %v6998_v29  ;;  %v3405_v13 = vadd.f32 %v3389_v9, %v6998_v29 }
 0x22a   :  { %v3406_v56 = vadd.f32 %v3390_v0, %v6998_v29  ;;  %v3407_v53 = vadd.f32 %v3391_v5, %v6998_v29  ;;  %v3408_v11 = vadd.f32 %v3392_v43, %v6998_v29  ;;  %v3409_v46 = vadd.f32 %v3393_v47, %v6998_v29 }
 0x22b   :  { %v3410_v4 = vmax.f32 %v3394_v17, 0.0  ;;  %v3411_v3 = vmax.f32 %v3395_v26, 0.0  ;;  %v3412_v33 = vmax.f32 %v3396_v16, 0.0  ;;  %v3413_v31 = vmax.f32 %v3397_v51, 0.0 }
 0x22c   :  { %v3414_v50 = vmax.f32 %v3398_v28, 0.0  ;;  %v3415_v60 = vmax.f32 %v3399_v61, 0.0  ;;  %v3416_v41 = vmax.f32 %v3400_v23, 0.0  ;;  %v3417_v54 = vmax.f32 %v3401_v21, 0.0 }
 0x22d   :  { %v3418_v37 = vmax.f32 %v3402_v22, 0.0  ;;  %v3419_v36 = vmax.f32 %v3403_v7, 0.0  ;;  %v3420_v45 = vmax.f32 %v3404_v12, 0.0  ;;  %v3421_v25 = vmax.f32 %v3405_v13, 0.0 }
 0x22e   :  { %v3422_v55 = vmax.f32 %v3406_v56, 0.0  ;;  %v3423_v6 = vmax.f32 %v3407_v53, 0.0  ;;  %v3424_v59 = vmax.f32 %v3408_v11, 0.0  ;;  %v3425_v38 = vmax.f32 %v3409_v46, 0.0 }
 0x22f   :  { %v5073_v15 = vpack.c.bf16 %v3411_v3, %v3410_v4  ;;  %v5078_v52 = vpack.c.bf16 %v3413_v31, %v3412_v33  ;;  %v5083_v49 = vpack.c.bf16 %v3415_v60, %v3414_v50  ;;  %v5088_v34 = vpack.c.bf16 %v3417_v54, %v3416_v41 }
 0x230   :  { %v5093_v62 = vpack.c.bf16 %v3419_v36, %v3418_v37  ;;  %v5098_v20 = vpack.c.bf16 %v3421_v25, %v3420_v45  ;;  %v5103_v9 = vpack.c.bf16 %v3423_v6, %v3422_v55  ;;  %v5108_v27 = vpack.c.bf16 %v3425_v38, %v3424_v59 }
 0x231   :  { %5307 = vst [vmem:[%s7327_s5 + $0x40] sm:$0xff] %v5073_v15   ;;  %5308 = vst [vmem:[%s7327_s5 + $0x48] sm:$0xff] %v5078_v52   ;;  %v7355_v0 = vunpack.c.l.bf16 %v6814_v57  ;;  %v7356_v5 = vunpack.c.h.bf16 %v6814_v57  ;;  %v7357_v57 = vunpack.c.l.bf16 %v6820_v40  ;;  %v7358_v14 = vunpack.c.h.bf16 %v6820_v40 }
 0x232   :  { %5309 = vst [vmem:[%s7327_s5 + $0x50] sm:$0xff] %v5083_v49   ;;  %5310 = vst [vmem:[%s7327_s5 + $0x58] sm:$0xff] %v5088_v34   ;;  %v7359_v17 = vunpack.c.l.bf16 %v6822_v1  ;;  %v7360_v16 = vunpack.c.h.bf16 %v6822_v1  ;;  %v7361_v40 = vunpack.c.l.bf16 %v6824_v10  ;;  %v7362_v61 = vunpack.c.h.bf16 %v6824_v10 }
 0x233   :  { %v3538_v39 = vmul.f32 %v7355_v0, %v6944_v18  ;;  %v3539_v24 = vmul.f32 %v7356_v5, %v6944_v18  ;;  %5311 = vst [vmem:[%s7327_s5 + $0x60] sm:$0xff] %v5093_v62   ;;  %5312 = vst [vmem:[%s7327_s5 + $0x68] sm:$0xff] %v5098_v20   ;;  %v3540_v43 = vmul.f32 %v7357_v57, %v6944_v18  ;;  %v7363_v1 = vunpack.c.l.bf16 %v6826_v58 }
 0x234   :  { %v3541_v47 = vmul.f32 %v7358_v14, %v6944_v18  ;;  %v3542_v26 = vmul.f32 %v7359_v17, %v6944_v18  ;;  %v3543_v51 = vmul.f32 %v7360_v16, %v6944_v18  ;;  %5313 = vst [vmem:[%s7327_s5 + $0x70] sm:$0xff] %v5103_v9   ;;  %5314 = vst [vmem:[%s7327_s5 + $0x78] sm:$0xff] %v5108_v27   ;;  %v7364_v22 = vunpack.c.h.bf16 %v6826_v58 }
 0x235   :  { %v3544_v28 = vmul.f32 %v7361_v40, %v6944_v18  ;;  %v3545_v23 = vmul.f32 %v7362_v61, %v6944_v18  ;;  %v3546_v21 = vmul.f32 %v7363_v1, %v6944_v18  ;;  %v7365_v12 = vunpack.c.l.bf16 %v6828_v30 }
 0x236   :  { %v3547_v7 = vmul.f32 %v7364_v22, %v6944_v18  ;;  %v7366_v56 = vunpack.c.h.bf16 %v6828_v30  ;;  %v7367_v10 = vunpack.c.l.bf16 %v6830_v63  ;;  %v7368_v46 = vunpack.c.h.bf16 %v6830_v63 }
 0x237   :  { %v3548_v13 = vmul.f32 %v7365_v12, %v6944_v18  ;;  %v7369_v58 = vunpack.c.l.bf16 %v6832_v35  ;;  %v7370_v33 = vunpack.c.h.bf16 %v6832_v35  ;;  %v3554_v50 = vadd.f32 %v3538_v39, %v6998_v29 }
 0x238   :  { %v3549_v53 = vmul.f32 %v7366_v56, %v6944_v18  ;;  %v3550_v11 = vmul.f32 %v7367_v10, %v6944_v18  ;;  %v3551_v4 = vmul.f32 %v7368_v46, %v6944_v18  ;;  %v3555_v30 = vadd.f32 %v3539_v24, %v6998_v29 }
 0x239   :  { %v3552_v3 = vmul.f32 %v7369_v58, %v6944_v18  ;;  %v3553_v31 = vmul.f32 %v7370_v33, %v6944_v18  ;;  %v3556_v60 = vadd.f32 %v3540_v43, %v6998_v29  ;;  %v3557_v41 = vadd.f32 %v3541_v47, %v6998_v29 }
 0x23a   :  { %v3558_v54 = vadd.f32 %v3542_v26, %v6998_v29  ;;  %v3559_v63 = vadd.f32 %v3543_v51, %v6998_v29  ;;  %v3560_v37 = vadd.f32 %v3544_v28, %v6998_v29  ;;  %v3561_v36 = vadd.f32 %v3545_v23, %v6998_v29 }
 0x23b   :  { %v3562_v45 = vadd.f32 %v3546_v21, %v6998_v29  ;;  %v3563_v35 = vadd.f32 %v3547_v7, %v6998_v29  ;;  %v3564_v25 = vadd.f32 %v3548_v13, %v6998_v29  ;;  %v3565_v55 = vadd.f32 %v3549_v53, %v6998_v29 }
 0x23c   :  { %v3566_v6 = vadd.f32 %v3550_v11, %v6998_v29  ;;  %v3567_v59 = vadd.f32 %v3551_v4, %v6998_v29  ;;  %v3568_v38 = vadd.f32 %v3552_v3, %v6998_v29  ;;  %v3569_v15 = vadd.f32 %v3553_v31, %v6998_v29 }
 0x23d   :  { %v3570_v52 = vmax.f32 %v3554_v50, 0.0  ;;  %v3571_v49 = vmax.f32 %v3555_v30, 0.0  ;;  %v3572_v34 = vmax.f32 %v3556_v60, 0.0  ;;  %v3573_v62 = vmax.f32 %v3557_v41, 0.0 }
 0x23e   :  { %v3574_v20 = vmax.f32 %v3558_v54, 0.0  ;;  %v3575_v9 = vmax.f32 %v3559_v63, 0.0  ;;  %v3576_v27 = vmax.f32 %v3560_v37, 0.0  ;;  %v3577_v0 = vmax.f32 %v3561_v36, 0.0 }
 0x23f   :  { %v3578_v39 = vmax.f32 %v3562_v45, 0.0  ;;  %v3579_v5 = vmax.f32 %v3563_v35, 0.0  ;;  %v3580_v24 = vmax.f32 %v3564_v25, 0.0  ;;  %v3581_v57 = vmax.f32 %v3565_v55, 0.0  ;;  %v7385_v35 = vld [vmem:[#allocation5_spill] sm:$0xff] }
 0x240   :  { %v3582_v43 = vmax.f32 %v3566_v6, 0.0  ;;  %v3583_v14 = vmax.f32 %v3567_v59, 0.0  ;;  %v3584_v47 = vmax.f32 %v3568_v38, 0.0  ;;  %v3585_v17 = vmax.f32 %v3569_v15, 0.0 }
 0x241   :  { %v5145_v26 = vpack.c.bf16 %v3571_v49, %v3570_v52  ;;  %v5150_v16 = vpack.c.bf16 %v3573_v62, %v3572_v34  ;;  %v5155_v51 = vpack.c.bf16 %v3575_v9, %v3574_v20  ;;  %v5160_v40 = vpack.c.bf16 %v3577_v0, %v3576_v27 }
 0x242   :  { %v5165_v28 = vpack.c.bf16 %v3579_v5, %v3578_v39  ;;  %v5170_v61 = vpack.c.bf16 %v3581_v57, %v3580_v24  ;;  %v5175_v23 = vpack.c.bf16 %v3583_v14, %v3582_v43  ;;  %v5180_v1 = vpack.c.bf16 %v3585_v17, %v3584_v47 }
 0x243   :  { %5323 = vst [vmem:[%s7327_s5 + $0x80] sm:$0xff] %v5145_v26   ;;  %5324 = vst [vmem:[%s7327_s5 + $0x88] sm:$0xff] %v5150_v16   ;;  %v7371_v21 = vunpack.c.l.bf16 %v6840_v19  ;;  %v7372_v7 = vunpack.c.h.bf16 %v6840_v19  ;;  %v7373_v19 = vunpack.c.l.bf16 %v6848_v42  ;;  %v7374_v56 = vunpack.c.h.bf16 %v6848_v42 }
 0x244   :  { %5325 = vst [vmem:[%s7327_s5 + $0x90] sm:$0xff] %v5155_v51   ;;  %5326 = vst [vmem:[%s7327_s5 + $0x98] sm:$0xff] %v5160_v40   ;;  %v7375_v10 = vunpack.c.l.bf16 %v7337_v8  ;;  %v7376_v46 = vunpack.c.h.bf16 %v7337_v8  ;;  %v7377_v42 = vunpack.c.l.bf16 %v7338_v48  ;;  %v7378_v3 = vunpack.c.h.bf16 %v7338_v48 }
 0x245   :  { %v3698_v22 = vmul.f32 %v7371_v21, %v6944_v18  ;;  %v3699_v12 = vmul.f32 %v7372_v7, %v6944_v18  ;;  %5327 = vst [vmem:[%s7327_s5 + $0xa0] sm:$0xff] %v5165_v28   ;;  %5328 = vst [vmem:[%s7327_s5 + $0xa8] sm:$0xff] %v5170_v61   ;;  %v3700_v13 = vmul.f32 %v7373_v19, %v6944_v18  ;;  %v7379_v8 = vunpack.c.l.bf16 %v7339_v44 }
 0x246   :  { %v3701_v53 = vmul.f32 %v7374_v56, %v6944_v18  ;;  %v3702_v11 = vmul.f32 %v7375_v10, %v6944_v18  ;;  %v3703_v4 = vmul.f32 %v7376_v46, %v6944_v18  ;;  %5329 = vst [vmem:[%s7327_s5 + $0xb0] sm:$0xff] %v5175_v23   ;;  %5330 = vst [vmem:[%s7327_s5 + $0xb8] sm:$0xff] %v5180_v1   ;;  %v7380_v50 = vunpack.c.h.bf16 %v7339_v44 }
 0x247   :  { %v3704_v58 = vmul.f32 %v7377_v42, %v6944_v18  ;;  %v3705_v33 = vmul.f32 %v7378_v3, %v6944_v18  ;;  %v3706_v31 = vmul.f32 %v7379_v8, %v6944_v18  ;;  %v7381_v60 = vunpack.c.l.bf16 %v6862_v2 }
 0x248   :  { %v3707_v30 = vmul.f32 %v7380_v50, %v6944_v18  ;;  %v7382_v54 = vunpack.c.h.bf16 %v6862_v2  ;;  %v7383_v48 = vunpack.c.l.bf16 %v6864_v32  ;;  %v7384_v36 = vunpack.c.h.bf16 %v6864_v32 }
 0x249   :  { %v3708_v41 = vmul.f32 %v7381_v60, %v6944_v18  ;;  %v7386_v44 = vunpack.c.l.bf16 %v7385_v35  ;;  %v7387_v55 = vunpack.c.h.bf16 %v7385_v35  ;;  %v3714_v59 = vadd.f32 %v3698_v22, %v6998_v29 }
 0x24a   :  { %v3709_v63 = vmul.f32 %v7382_v54, %v6944_v18  ;;  %v3710_v37 = vmul.f32 %v7383_v48, %v6944_v18  ;;  %v3711_v45 = vmul.f32 %v7384_v36, %v6944_v18  ;;  %v3715_v2 = vadd.f32 %v3699_v12, %v6998_v29 }
 0x24b   :  { %v3712_v25 = vmul.f32 %v7386_v44, %v6944_v18  ;;  %v3713_v6 = vmul.f32 %v7387_v55, %v6944_v18  ;;  %v3716_v38 = vadd.f32 %v3700_v13, %v6998_v29  ;;  %v3717_v15 = vadd.f32 %v3701_v53, %v6998_v29 }
 0x24c   :  { %v3718_v52 = vadd.f32 %v3702_v11, %v6998_v29  ;;  %v3719_v32 = vadd.f32 %v3703_v4, %v6998_v29  ;;  %v3720_v49 = vadd.f32 %v3704_v58, %v6998_v29  ;;  %v3721_v34 = vadd.f32 %v3705_v33, %v6998_v29 }
 0x24d   :  { %v3722_v62 = vadd.f32 %v3706_v31, %v6998_v29  ;;  %v3723_v18 = vadd.f32 %v3707_v30, %v6998_v29  ;;  %v3724_v20 = vadd.f32 %v3708_v41, %v6998_v29  ;;  %v3725_v9 = vadd.f32 %v3709_v63, %v6998_v29 }
 0x24e   :  { %v3726_v27 = vadd.f32 %v3710_v37, %v6998_v29  ;;  %v3727_v0 = vadd.f32 %v3711_v45, %v6998_v29  ;;  %v3728_v39 = vadd.f32 %v3712_v25, %v6998_v29  ;;  %v3729_v5 = vadd.f32 %v3713_v6, %v6998_v29 }
 0x24f   :  { %v3730_v24 = vmax.f32 %v3714_v59, 0.0  ;;  %v3731_v57 = vmax.f32 %v3715_v2, 0.0  ;;  %v3732_v43 = vmax.f32 %v3716_v38, 0.0  ;;  %v3733_v14 = vmax.f32 %v3717_v15, 0.0 }
 0x250   :  { %v3734_v47 = vmax.f32 %v3718_v52, 0.0  ;;  %v3735_v17 = vmax.f32 %v3719_v32, 0.0  ;;  %v3736_v26 = vmax.f32 %v3720_v49, 0.0  ;;  %v3737_v16 = vmax.f32 %v3721_v34, 0.0 }
 0x251   :  { %v3738_v51 = vmax.f32 %v3722_v62, 0.0  ;;  %v3739_v40 = vmax.f32 %v3723_v18, 0.0  ;;  %v3740_v28 = vmax.f32 %v3724_v20, 0.0  ;;  %v3741_v61 = vmax.f32 %v3725_v9, 0.0 }
 0x252   :  { %v3742_v23 = vmax.f32 %v3726_v27, 0.0  ;;  %v3743_v1 = vmax.f32 %v3727_v0, 0.0  ;;  %v3744_v21 = vmax.f32 %v3728_v39, 0.0  ;;  %v3745_v22 = vmax.f32 %v3729_v5, 0.0 }
 0x253   :  { %v5217_v7 = vpack.c.bf16 %v3731_v57, %v3730_v24  ;;  %v5222_v12 = vpack.c.bf16 %v3733_v14, %v3732_v43  ;;  %v5227_v19 = vpack.c.bf16 %v3735_v17, %v3734_v47  ;;  %v5232_v29 = vpack.c.bf16 %v3737_v16, %v3736_v26 }
 0x254   :  { %v5237_v13 = vpack.c.bf16 %v3739_v40, %v3738_v51  ;;  %v5242_v56 = vpack.c.bf16 %v3741_v61, %v3740_v28  ;;  %v5247_v53 = vpack.c.bf16 %v3743_v1, %v3742_v23  ;;  %v5252_v10 = vpack.c.bf16 %v3745_v22, %v3744_v21 }
 0x255   :  { %5339 = vst [vmem:[%s7327_s5 + $0xc0] sm:$0xff] %v5217_v7   ;;  %5340 = vst [vmem:[%s7327_s5 + $0xc8] sm:$0xff] %v5222_v12  }
 0x256   :  { %5341 = vst [vmem:[%s7327_s5 + $0xd0] sm:$0xff] %v5227_v19   ;;  %5342 = vst [vmem:[%s7327_s5 + $0xd8] sm:$0xff] %v5232_v29  }
 0x257   :  { %5343 = vst [vmem:[%s7327_s5 + $0xe0] sm:$0xff] %v5237_v13   ;;  %5344 = vst [vmem:[%s7327_s5 + $0xe8] sm:$0xff] %v5242_v56  }
 0x258   :  { %5345 = vst [vmem:[%s7327_s5 + $0xf0] sm:$0xff] %v5247_v53   ;;  %5346 = vst [vmem:[%s7327_s5 + $0xf8] sm:$0xff] %v5252_v10  }

// kernel: generator_forward.7
= control target key start
LH: loop header
LB: loop body
LE: loop exit
PB: predicated region body
PF: predicated region fallthrough
CT: control target
= control target key end

     0   :  { %s5688_s12 = smov 0   ;;  %s5690_s13 = smov 0   ;;  %s6533_s0 = inlined_call_operand.vmem [shape: bf16[18,32,128], index: 0, kind: input, shape index: {}]   ;;  %s6534_s1 = inlined_call_operand.vmem [shape: bf16[18,32,128], index: 1, kind: input, shape index: {}]   ;;  %s6535_s2 = inlined_call_operand.vmem [shape: bf16[8,128,128], index: 2, kind: input, shape index: {}]   ;;  %s6536_s3 = inlined_call_operand.vmem [shape: f32[4,16,32,128], index: 3, kind: output, shape index: {}]  }
   0x1   :  { %s5692_s14 = smov 0   ;;  %s5694_s15 = smov 0  }
   0x2   :  { %s5696_s16 = smov 0  }
   0x3 LB: > { %s25_s17 = sadd.s32 1, %s5662_s15  ;;  %s4206_s18 = sadd.s32 4294967295, %s5666_s16   ;;  %s5666_s16 = sphi %s5696_s16, %s13_s16   ;;  %s5662_s15 = sphi %s5694_s15, %s6542_s15   ;;  %s5658_s14 = sphi %s5692_s14, %s6541_s14   ;;  %s5654_s13 = sphi %s5690_s13, %s6540_s13   ;;  %s5650_s12 = sphi %s5688_s12, %s6539_s12  }
   0x4   : > { %p27_p0 = scmp.ge.s32.totalorder %s25_s17, 2  ;;  %p39_p1 = scmp.ne.s32.totalorder %s5654_s13, %s5650_s12 }
   0x5   : > { %p40_p2 = scmp.eq.s32.totalorder %s5666_s16, 0  ;;  %p123_p4 = scmp.eq.s32.totalorder %s4206_s18, 1 }
   0x6   : > { %s6544_s17 = smov (%p27_p0, %s25_s17), 0  ;;  %s32_s21 = sadd.s32 1, %s5654_s13 }
   0x7   : > { %p5720_p3 = por %p40_p2, %p39_p1  ;;  %s29_s20 = ssub.s32 %s5662_s15, %s6544_s17 }
   0x8   : > { %p30_p5 = scmp.eq.s32.totalorder %s29_s20, 0  ;;  %p5727_p6 = por %p123_p4, %p39_p1 }
   0x9   : > { %p4210_p7 = scmp.ge.s32.totalorder %s5666_s16, 2 }
   0xa   : > { %s5732_s23 = scalar_select %p30_p5, %s5654_s13, %s32_s21  }
   0xb   : > { %152 = sbr.rel (%p4210_p7) target bundleno = 42 (0x2a), region = 20 }
  0x10   : > { %155 = sbr.rel (!%p5720_p3) target bundleno = 29 (0x1d), region = 24  ;;  %s157_s24 = sand.u32 (%p5720_p3), 1, %s5654_s13  }
  0x11   : > { %s4814_s25 = sshll.u32 (%p5720_p3), %s5662_s15, 3  ;;  %s5393_s26 = smul.u32 (%p5720_p3), 144, %s157_s24 }
  0x12   : > { %s5742_s29 = scalar_lea.vmem (%p5720_p3), %s6533_s0, %s4814_s25 }
  0x13   : > { %v179_v0 = vld [vmem:[%s5742_s29] sm:$0xff] (%p5720_p3)   ;;  %v183_v1 = vld [vmem:[%s5742_s29 + $0x10] sm:$0xff] (%p5720_p3)   ;;  %s159_s30 = scalar_lea.vmem (%p5720_p3), [#allocation2], %s5393_s26 }
  0x14   : > { %v187_v2 = vld [vmem:[%s5742_s29 + $0x20] sm:$0xff] (%p5720_p3)   ;;  %v191_v3 = vld [vmem:[%s5742_s29 + $0x30] sm:$0xff] (%p5720_p3)   ;;  %180 = vst [vmem:[%s159_s30] sm:$0xff] (%p5720_p3), %v179_v0   ;;  %184 = vst [vmem:[%s159_s30 + $0x8] sm:$0xff] (%p5720_p3), %v183_v1  }
  0x15   : > { %v195_v4 = vld [vmem:[%s5742_s29 + $0x40] sm:$0xff]   ;;  %v199_v5 = vld [vmem:[%s5742_s29 + $0x50] sm:$0xff]   ;;  %188 = vst [vmem:[%s159_s30 + $0x10] sm:$0xff] %v187_v2   ;;  %192 = vst [vmem:[%s159_s30 + $0x18] sm:$0xff] %v191_v3  }
  0x16   : > { %196 = vst [vmem:[%s159_s30 + $0x20] sm:$0xff] %v195_v4   ;;  %200 = vst [vmem:[%s159_s30 + $0x28] sm:$0xff] %v199_v5   ;;  %v203_v6 = vld [vmem:[%s5742_s29 + $0x60] sm:$0xff]   ;;  %v207_v7 = vld [vmem:[%s5742_s29 + $0x70] sm:$0xff]  }
  0x17   : > { %v211_v8 = vld [vmem:[%s5742_s29 + $0x80] sm:$0xff]   ;;  %204 = vst [vmem:[%s159_s30 + $0x30] sm:$0xff] %v203_v6   ;;  %208 = vst [vmem:[%s159_s30 + $0x38] sm:$0xff] %v207_v7   ;;  %v215_v9 = vld [vmem:[%s5742_s29 + $0x90] sm:$0xff]  }
  0x18   : > { %212 = vst [vmem:[%s159_s30 + $0x40] sm:$0xff] %v211_v8   ;;  %v219_v10 = vld [vmem:[%s5742_s29 + $0xa0] sm:$0xff]   ;;  %v223_v11 = vld [vmem:[%s5742_s29 + $0xb0] sm:$0xff]   ;;  %216 = vst [vmem:[%s159_s30 + $0x48] sm:$0xff] %v215_v9  }
  0x19   : > { %220 = vst [vmem:[%s159_s30 + $0x50] sm:$0xff] %v219_v10   ;;  %224 = vst [vmem:[%s159_s30 + $0x58] sm:$0xff] %v223_v11   ;;  %v227_v12 = vld [vmem:[%s5742_s29 + $0xc0] sm:$0xff]   ;;  %v231_v13 = vld [vmem:[%s5742_s29 + $0xd0] sm:$0xff]  }
  0x1a   : > { %v235_v14 = vld [vmem:[%s5742_s29 + $0xe0] sm:$0xff]   ;;  %228 = vst [vmem:[%s159_s30 + $0x60] sm:$0xff] %v227_v12   ;;  %232 = vst [vmem:[%s159_s30 + $0x68] sm:$0xff] %v231_v13   ;;  %v239_v15 = vld [vmem:[%s5742_s29 + $0xf0] sm:$0xff]  }
  0x1b   : > { %236 = vst [vmem:[%s159_s30 + $0x70] sm:$0xff] %v235_v14   ;;  %v243_v16 = vld [vmem:[%s5742_s29 + $0x100] sm:$0xff]   ;;  %v247_v17 = vld [vmem:[%s5742_s29 + $0x110] sm:$0xff]   ;;  %240 = vst [vmem:[%s159_s30 + $0x78] sm:$0xff] %v239_v15  }
  0x1c   : > { %244 = vst [vmem:[%s159_s30 + $0x80] sm:$0xff] %v243_v16   ;;  %248 = vst [vmem:[%s159_s30 + $0x88] sm:$0xff] %v247_v17  }
  0x1d PF: > { %346 = sbr.rel (!%p5720_p3) target bundleno = 42 (0x2a), region = 65  ;;  %s348_s4 = sand.u32 (%p5720_p3), 1, %s5654_s13  }
  0x1e   : > { %s4815_s5 = sshll.u32 (%p5720_p3), %s5662_s15, 3  ;;  %s5394_s6 = smul.u32 (%p5720_p3), 144, %s348_s4 }
  0x1f   : > { %s5769_s9 = scalar_lea.vmem (%p5720_p3), %s6534_s1, %s4815_s5 }
  0x20   : > { %v370_v18 = vld [vmem:[%s5769_s9] sm:$0xff] (%p5720_p3)   ;;  %v374_v19 = vld [vmem:[%s5769_s9 + $0x10] sm:$0xff] (%p5720_p3)   ;;  %s350_s10 = scalar_lea.vmem (%p5720_p3), [#allocation3], %s5394_s6 }
  0x21   : > { %v378_v20 = vld [vmem:[%s5769_s9 + $0x20] sm:$0xff] (%p5720_p3)   ;;  %v382_v21 = vld [vmem:[%s5769_s9 + $0x30] sm:$0xff] (%p5720_p3)   ;;  %371 = vst [vmem:[%s350_s10] sm:$0xff] (%p5720_p3), %v370_v18   ;;  %375 = vst [vmem:[%s350_s10 + $0x8] sm:$0xff] (%p5720_p3), %v374_v19  }
  0x22   : > { %v386_v22 = vld [vmem:[%s5769_s9 + $0x40] sm:$0xff]   ;;  %v390_v23 = vld [vmem:[%s5769_s9 + $0x50] sm:$0xff]   ;;  %379 = vst [vmem:[%s350_s10 + $0x10] sm:$0xff] %v378_v20   ;;  %383 = vst [vmem:[%s350_s10 + $0x18] sm:$0xff] %v382_v21  }
  0x23   : > { %387 = vst [vmem:[%s350_s10 + $0x20] sm:$0xff] %v386_v22   ;;  %391 = vst [vmem:[%s350_s10 + $0x28] sm:$0xff] %v390_v23   ;;  %v394_v24 = vld [vmem:[%s5769_s9 + $0x60] sm:$0xff]   ;;  %v398_v25 = vld [vmem:[%s5769_s9 + $0x70] sm:$0xff]  }
  0x24   : > { %v402_v26 = vld [vmem:[%s5769_s9 + $0x80] sm:$0xff]   ;;  %395 = vst [vmem:[%s350_s10 + $0x30] sm:$0xff] %v394_v24   ;;  %399 = vst [vmem:[%s350_s10 + $0x38] sm:$0xff] %v398_v25   ;;  %v406_v27 = vld [vmem:[%s5769_s9 + $0x90] sm:$0xff]  }
  0x25   : > { %403 = vst [vmem:[%s350_s10 + $0x40] sm:$0xff] %v402_v26   ;;  %v410_v28 = vld [vmem:[%s5769_s9 + $0xa0] sm:$0xff]   ;;  %v414_v29 = vld [vmem:[%s5769_s9 + $0xb0] sm:$0xff]   ;;  %407 = vst [vmem:[%s350_s10 + $0x48] sm:$0xff] %v406_v27  }
  0x26   : > { %411 = vst [vmem:[%s350_s10 + $0x50] sm:$0xff] %v410_v28   ;;  %415 = vst [vmem:[%s350_s10 + $0x58] sm:$0xff] %v414_v29   ;;  %v418_v30 = vld [vmem:[%s5769_s9 + $0xc0] sm:$0xff]   ;;  %v422_v31 = vld [vmem:[%s5769_s9 + $0xd0] sm:$0xff]  }
  0x27   : > { %v426_v32 = vld [vmem:[%s5769_s9 + $0xe0] sm:$0xff]   ;;  %419 = vst [vmem:[%s350_s10 + $0x60] sm:$0xff] %v418_v30   ;;  %423 = vst [vmem:[%s350_s10 + $0x68] sm:$0xff] %v422_v31   ;;  %v430_v33 = vld [vmem:[%s5769_s9 + $0xf0] sm:$0xff]  }
  0x28   : > { %427 = vst [vmem:[%s350_s10 + $0x70] sm:$0xff] %v426_v32   ;;  %v434_v34 = vld [vmem:[%s5769_s9 + $0x100] sm:$0xff]   ;;  %v438_v35 = vld [vmem:[%s5769_s9 + $0x110] sm:$0xff]   ;;  %431 = vst [vmem:[%s350_s10 + $0x78] sm:$0xff] %v430_v33  }
  0x29   : > { %435 = vst [vmem:[%s350_s10 + $0x80] sm:$0xff] %v434_v34   ;;  %439 = vst [vmem:[%s350_s10 + $0x88] sm:$0xff] %v438_v35  }
  0x2a PF: > { %p4215_p8 = scmp.ge.s32.totalorder %s5666_s16, 1  ;;  %p536_p9 = scmp.lt.s32.totalorder %s5666_s16, 3 }
  0x2c   : > { %p537_p10 = pnand %p4215_p8, %p536_p9 }
  0x2d   : > { %s543_s4 = sand.u32 (!%p537_p10), 1, %s5650_s12  }
  0x2e   : > { %540 = sbr.rel (%p537_p10) target bundleno = 568 (0x238), region = 106  ;;  %s4216_s11 = sshll.u32 (!%p537_p10), %s543_s4, 10 }
  0x2f   : > { %s5818_s9 = smul.u32 (!%p537_p10), 144, %s543_s4 }
  0x31   : > { %s5833_s26 = scalar_lea.vmem (!%p537_p10), [#allocation2], %s5818_s9  ;;  %s5918_s10 = scalar_lea.vmem (!%p537_p10), [#allocation3], %s5818_s9 }
  0x33   : > { %v5436_v36 = vld [vmem:[%s6535_s2 + $0x78] sm:$0xff]   ;;  %v5438_v38 = vld [vmem:[%s6535_s2 + $0x70] sm:$0xff]   ;;  %v5440_v40 = vld [vmem:[%s6535_s2 + $0x68] sm:$0xff]   ;;  %s4816_s12 = sshll.u32 (%p5727_p6), %s5658_s14, 4 }
  0x34   : > { %v5437_v37 = vld [vmem:[%s6535_s2 + $0x38] sm:$0xff]   ;;  %5009 = vmatprep.subr.bf16.mxu0 %v5436_v36  ;;  %v5439_v39 = vld [vmem:[%s6535_s2 + $0x30] sm:$0xff]   ;;  %v5441_v41 = vld [vmem:[%s6535_s2 + $0x28] sm:$0xff]   ;;  %s6263_s18 = scalar_lea.vmem (%p5727_p6), %s6536_s3, %s4816_s12 }
  0x35   : > { %5057 = vmatprep.subr.bf16.mxu1 %v5437_v37  ;;  %5010 = vmatpush3.bf16.msra.mxu0 %v5436_v36  ;;  %v5442_v42 = vld [vmem:[%s6535_s2 + $0x60] sm:$0xff]   ;;  %v5444_v44 = vld [vmem:[%s6535_s2 + $0x58] sm:$0xff]   ;;  %v5446_v46 = vld [vmem:[%s6535_s2 + $0x50] sm:$0xff]  }
  0x36   : > { %5058 = vmatpush3.bf16.msra.mxu1 %v5437_v37  ;;  %5011 = vmatprep.subr.bf16.mxu0 %v5438_v38  ;;  %v5443_v43 = vld [vmem:[%s6535_s2 + $0x20] sm:$0xff]   ;;  %v5445_v45 = vld [vmem:[%s6535_s2 + $0x18] sm:$0xff]   ;;  %v5447_v47 = vld [vmem:[%s6535_s2 + $0x10] sm:$0xff]  }
  0x37   : > { %5059 = vmatprep.subr.bf16.mxu1 %v5439_v39  ;;  %v5452_v48 = vld [vmem:[%s5833_s26 + $0x8] sm:$0xff]   ;;  %v5453_v49 = vld [vmem:[%s5833_s26] sm:$0xff]   ;;  %v5454_v54 = vld [vmem:[%s5833_s26 + $0x10] sm:$0xff]  }
  0x38   : > { %5025 = vmatprep.mubr.bf16.mxu0 %v5452_v48  ;;  %5073 = vmatprep.mubr.bf16.mxu1 %v5453_v49  ;;  %v5448_v50 = vld [vmem:[%s6535_s2 + $0x48] sm:$0xff]   ;;  %v5450_v52 = vld [vmem:[%s6535_s2 + $0x40] sm:$0xff]   ;;  %v5456_v55 = vld [vmem:[%s6535_s2 + $0xf8] sm:$0xff]  }
  0x39   : > { %5012 = vmatpush3.bf16.msra.mxu0 %v5438_v38  ;;  %v5449_v51 = vld [vmem:[%s6535_s2 + $0x8] sm:$0xff]   ;;  %v5451_v53 = vld [vmem:[%s6535_s2] sm:$0xff]   ;;  %v5457_v56 = vld [vmem:[%s6535_s2 + $0xb8] sm:$0xff]  }
  0x3a   : > { %5060 = vmatpush3.bf16.msra.mxu1 %v5439_v39  ;;  %5013 = vmatprep.subr.bf16.mxu0 %v5440_v40  ;;  %v5455_v57 = vld [vmem:[%s5833_s26 + $0x8] sm:$0xff]   ;;  %v5458_v58 = vld [vmem:[%s5833_s26 + $0x18] sm:$0xff]   ;;  %v5459_v59 = vld [vmem:[%s5833_s26 + $0x10] sm:$0xff]  }
  0x3b   : > { %5061 = vmatprep.subr.bf16.mxu1 %v5441_v41  ;;  %v5462_v60 = vld [vmem:[%s6535_s2 + $0xf0] sm:$0xff]   ;;  %v5468_v63 = vld [vmem:[%s6535_s2 + $0xe8] sm:$0xff]   ;;  %v5474_v4 = vld [vmem:[%s6535_s2 + $0xe0] sm:$0xff]  }
  0x3c   : > { %v5463_v61 = vld [vmem:[%s6535_s2 + $0xb0] sm:$0xff]   ;;  %v5469_v0 = vld [vmem:[%s6535_s2 + $0xa8] sm:$0xff]   ;;  %v5475_v5 = vld [vmem:[%s6535_s2 + $0xa0] sm:$0xff]  }
  0x3d   : > { %5014 = vmatpush3.bf16.msra.mxu0 %v5440_v40  ;;  %v5460_v62 = vld [vmem:[%s5833_s26 + $0x20] sm:$0xff]   ;;  %v5461_v1 = vld [vmem:[%s5833_s26 + $0x18] sm:$0xff]   ;;  %v5464_v2 = vld [vmem:[%s5833_s26 + $0x28] sm:$0xff]  }
  0x3e   : > { %5062 = vmatpush3.bf16.msra.mxu1 %v5441_v41  ;;  %5015 = vmatprep.subr.bf16.mxu0 %v5442_v42  ;;  %v5465_v3 = vld [vmem:[%s5833_s26 + $0x20] sm:$0xff]   ;;  %v5466_v6 = vld [vmem:[%s5833_s26 + $0x30] sm:$0xff]   ;;  %v5467_v7 = vld [vmem:[%s5833_s26 + $0x28] sm:$0xff]  }
  0x3f   : > { %5063 = vmatprep.subr.bf16.mxu1 %v5443_v43  ;;  %v5480_v8 = vld [vmem:[%s6535_s2 + $0xd8] sm:$0xff]   ;;  %v5471_v11 = vld [vmem:[%s5833_s26 + $0x30] sm:$0xff]   ;;  %v5472_v14 = vld [vmem:[%s5833_s26 + $0x40] sm:$0xff]  }
  0x40   : > { %v5481_v9 = vld [vmem:[%s6535_s2 + $0x98] sm:$0xff]   ;;  %v5486_v12 = vld [vmem:[%s6535_s2 + $0xd0] sm:$0xff]   ;;  %v5492_v18 = vld [vmem:[%s6535_s2 + $0xc8] sm:$0xff]  }
  0x41   : > { %5016 = vmatpush3.bf16.msra.mxu0 %v5442_v42  ;;  %v5470_v10 = vld [vmem:[%s5833_s26 + $0x38] sm:$0xff]   ;;  %v5487_v13 = vld [vmem:[%s6535_s2 + $0x90] sm:$0xff]   ;;  %v5476_v16 = vld [vmem:[%s5833_s26 + $0x48] sm:$0xff]  }
  0x42   : > { %5064 = vmatpush3.bf16.msra.mxu1 %v5443_v43  ;;  %5017 = vmatprep.subr.bf16.mxu0 %v5444_v44  ;;  %v5473_v15 = vld [vmem:[%s5833_s26 + $0x38] sm:$0xff]   ;;  %v5477_v17 = vld [vmem:[%s5833_s26 + $0x40] sm:$0xff]   ;;  %v5478_v20 = vld [vmem:[%s5833_s26 + $0x50] sm:$0xff]  }
  0x43   : > { %5065 = vmatprep.subr.bf16.mxu1 %v5445_v45  ;;  %v5493_v19 = vld [vmem:[%s6535_s2 + $0x88] sm:$0xff]   ;;  %v5498_v23 = vld [vmem:[%s6535_s2 + $0xc0] sm:$0xff]   ;;  %v5504_v27 = vld [vmem:[%s6535_s2 + $0x178] sm:$0xff]  }
  0x44   : > { %v5479_v21 = vld [vmem:[%s5833_s26 + $0x48] sm:$0xff]   ;;  %v5482_v22 = vld [vmem:[%s5833_s26 + $0x58] sm:$0xff]   ;;  %v5499_v24 = vld [vmem:[%s6535_s2 + $0x80] sm:$0xff]  }
  0x45   : > { %5018 = vmatpush3.bf16.msra.mxu0 %v5444_v44  ;;  %v5483_v25 = vld [vmem:[%s5833_s26 + $0x50] sm:$0xff]   ;;  %v5484_v26 = vld [vmem:[%s5833_s26 + $0x60] sm:$0xff]   ;;  %v5505_v28 = vld [vmem:[%s6535_s2 + $0x138] sm:$0xff]  }
  0x46   : > { %5066 = vmatpush3.bf16.msra.mxu1 %v5445_v45  ;;  %5019 = vmatprep.subr.bf16.mxu0 %v5446_v46  ;;  %v5485_v29 = vld [vmem:[%s5833_s26 + $0x58] sm:$0xff]   ;;  %v5488_v30 = vld [vmem:[%s5833_s26 + $0x68] sm:$0xff]   ;;  %v5489_v31 = vld [vmem:[%s5833_s26 + $0x60] sm:$0xff]  }
  0x47   : > { %5067 = vmatprep.subr.bf16.mxu1 %v5447_v47  ;;  %v5490_v32 = vld [vmem:[%s5833_s26 + $0x70] sm:$0xff]   ;;  %v5491_v33 = vld [vmem:[%s5833_s26 + $0x68] sm:$0xff]   ;;  %v5494_v34 = vld [vmem:[%s5833_s26 + $0x78] sm:$0xff]  }
  0x48   : > { %v5495_v35 = vld [vmem:[%s5833_s26 + $0x70] sm:$0xff]   ;;  %v5496_v36 = vld [vmem:[%s5833_s26 + $0x80] sm:$0xff]   ;;  %v5497_v37 = vld [vmem:[%s5833_s26 + $0x78] sm:$0xff]  }
  0x49   : > { %5020 = vmatpush3.bf16.msra.mxu0 %v5446_v46  ;;  %v5500_v38 = vld [vmem:[%s5918_s10 + $0x8] sm:$0xff]   ;;  %v5501_v39 = vld [vmem:[%s5918_s10] sm:$0xff]   ;;  %v5502_v40 = vld [vmem:[%s5918_s10 + $0x10] sm:$0xff]  }
  0x4a   : > { %5068 = vmatpush3.bf16.msra.mxu1 %v5447_v47  ;;  %5021 = vmatprep.subr.bf16.mxu0 %v5448_v50  ;;  %v5503_v41 = vld [vmem:[%s5918_s10 + $0x8] sm:$0xff]   ;;  %v5506_v42 = vld [vmem:[%s5918_s10 + $0x18] sm:$0xff]   ;;  %v5507_v43 = vld [vmem:[%s5918_s10 + $0x10] sm:$0xff]  }
  0x4b   : > { %5069 = vmatprep.subr.bf16.mxu1 %v5449_v51  ;;  %v5510_v44 = vld [vmem:[%s6535_s2 + $0x170] sm:$0xff]   ;;  %v5516_v47 = vld [vmem:[%s6535_s2 + $0x168] sm:$0xff]  }
  0x4c   : > { %v5511_v45 = vld [vmem:[%s6535_s2 + $0x130] sm:$0xff]   ;;  %v5517_v48 = vld [vmem:[%s6535_s2 + $0x128] sm:$0xff]  }
  0x4d   : > { %5022 = vmatpush3.bf16.msra.mxu0 %v5448_v50  ;;  %v5508_v46 = vld [vmem:[%s5918_s10 + $0x20] sm:$0xff]   ;;  %v5509_v49 = vld [vmem:[%s5918_s10 + $0x18] sm:$0xff]   ;;  %v5512_v50 = vld [vmem:[%s5918_s10 + $0x28] sm:$0xff]  }
  0x4e   : > { %5070 = vmatpush3.bf16.msra.mxu1 %v5449_v51  ;;  %5023 = vmatprep.subr.bf16.mxu0 %v5450_v52  ;;  %v5513_v51 = vld [vmem:[%s5918_s10 + $0x20] sm:$0xff]  }
  0x4f   : > { %5071 = vmatprep.subr.bf16.mxu1 %v5451_v53 }
  0x51   : > { %5024 = vmatpush3.bf16.msra.mxu0 %v5450_v52  ;;  %v5522_v52 = vld [vmem:[%s6535_s2 + $0x160] sm:$0xff]  }
  0x52   : > { %5072 = vmatpush3.bf16.msra.mxu1 %v5451_v53  ;;  %5105 = vmatprep.subr.bf16.mxu0 %v5456_v55  ;;  %v5523_v53 = vld [vmem:[%s6535_s2 + $0x120] sm:$0xff]  }
  0x53   : > { %5153 = vmatprep.subr.bf16.mxu1 %v5457_v56 }
  0x54   : > { %5026 = vmatmul.mubr.bf16.vlgmr.msra.gmra.mxu0 %v5454_v54  ;;  %v5514_v54 = vld [vmem:[%s5918_s10 + $0x30] sm:$0xff]  }
  0x55   : > { %5074 = vmatmul.mubr.bf16.vlgmr.msra.gmra.mxu1 %v5455_v57  ;;  %5106 = vmatpush3.bf16.msra.mxu0 %v5456_v55  ;;  %v5515_v55 = vld [vmem:[%s5918_s10 + $0x28] sm:$0xff]  }
  0x56   : > { %5154 = vmatpush3.bf16.msra.mxu1 %v5457_v56  ;;  %5029 = vmatprep.mubr.bf16.mxu0 %v5458_v58  ;;  %v5528_v56 = vld [vmem:[%s6535_s2 + $0x158] sm:$0xff]  }
  0x57   : > { %5077 = vmatprep.mubr.bf16.mxu1 %v5459_v59  ;;  %5107 = vmatprep.subr.bf16.mxu0 %v5462_v60  ;;  %v5529_v57 = vld [vmem:[%s6535_s2 + $0x118] sm:$0xff]   ;;  %v5519_v59 = vld [vmem:[%s5918_s10 + $0x30] sm:$0xff]  }
  0x58   : > { %5155 = vmatprep.subr.bf16.mxu1 %v5463_v61  ;;  %v5518_v58 = vld [vmem:[%s5918_s10 + $0x38] sm:$0xff]  }
  0x59   : > { %5108 = vmatpush3.bf16.msra.mxu0 %v5462_v60  ;;  %v5534_v60 = vld [vmem:[%s6535_s2 + $0x150] sm:$0xff]  }
  0x5a   : > { %5156 = vmatpush3.bf16.msra.mxu1 %v5463_v61  ;;  %5109 = vmatprep.subr.bf16.mxu0 %v5468_v63  ;;  %v5535_v61 = vld [vmem:[%s6535_s2 + $0x110] sm:$0xff]  }
  0x5b   : > { %5157 = vmatprep.subr.bf16.mxu1 %v5469_v0 }
  0x5c   : > { %5030 = vmatmul.mubr.bf16.gmra.mxu0 %v5460_v62  ;;  %v5520_v62 = vld [vmem:[%s5918_s10 + $0x40] sm:$0xff]  }
  0x5d   : > { %5078 = vmatmul.mubr.bf16.gmra.mxu1 %v5461_v1  ;;  %5033 = vmatprep.mubr.bf16.mxu0 %v5464_v2  ;;  %v5541_v1 = vld [vmem:[%s6535_s2 + $0x108] sm:$0xff]  }
  0x5e   : > { %5081 = vmatprep.mubr.bf16.mxu1 %v5465_v3  ;;  %5110 = vmatpush3.bf16.msra.mxu0 %v5468_v63  ;;  %v5521_v63 = vld [vmem:[%s5918_s10 + $0x38] sm:$0xff]   ;;  %v5524_v2 = vld [vmem:[%s5918_s10 + $0x48] sm:$0xff]   ;;  %v5525_v3 = vld [vmem:[%s5918_s10 + $0x40] sm:$0xff]  }
  0x5f   : > { %5158 = vmatpush3.bf16.msra.mxu1 %v5469_v0  ;;  %5111 = vmatprep.subr.bf16.mxu0 %v5474_v4  ;;  %v5540_v0 = vld [vmem:[%s6535_s2 + $0x148] sm:$0xff]  }
  0x60   : > { %5159 = vmatprep.subr.bf16.mxu1 %v5475_v5 }
  0x62   : > { %5112 = vmatpush3.bf16.msra.mxu0 %v5474_v4  ;;  %v5546_v4 = vld [vmem:[%s6535_s2 + $0x140] sm:$0xff]  }
  0x63   : > { %5160 = vmatpush3.bf16.msra.mxu1 %v5475_v5  ;;  %5113 = vmatprep.subr.bf16.mxu0 %v5480_v8  ;;  %v5547_v5 = vld [vmem:[%s6535_s2 + $0x100] sm:$0xff]  }
  0x64   : > { %5034 = vmatmul.mubr.bf16.gmra.mxu0 %v5466_v6  ;;  %5161 = vmatprep.subr.bf16.mxu1 %v5481_v9  ;;  %v5526_v6 = vld [vmem:[%s5918_s10 + $0x50] sm:$0xff]  }
  0x65   : > { %5082 = vmatmul.mubr.bf16.gmra.mxu1 %v5467_v7  ;;  %5037 = vmatprep.mubr.bf16.mxu0 %v5470_v10  ;;  %v5527_v7 = vld [vmem:[%s5918_s10 + $0x48] sm:$0xff]   ;;  %v5530_v10 = vld [vmem:[%s5918_s10 + $0x58] sm:$0xff]  }
  0x66   : > { %5085 = vmatprep.mubr.bf16.mxu1 %v5471_v11  ;;  %5114 = vmatpush3.bf16.msra.mxu0 %v5480_v8  ;;  %v5552_v8 = vld [vmem:[%s6535_s2 + $0x1f8] sm:$0xff]   ;;  %v5531_v11 = vld [vmem:[%s5918_s10 + $0x50] sm:$0xff]  }
  0x67   : > { %5162 = vmatpush3.bf16.msra.mxu1 %v5481_v9  ;;  %5115 = vmatprep.subr.bf16.mxu0 %v5486_v12  ;;  %v5553_v9 = vld [vmem:[%s6535_s2 + $0x1b8] sm:$0xff]  }
  0x68   : > { %5163 = vmatprep.subr.bf16.mxu1 %v5487_v13 }
  0x6a   : > { %5116 = vmatpush3.bf16.msra.mxu0 %v5486_v12  ;;  %v5532_v12 = vld [vmem:[%s5918_s10 + $0x60] sm:$0xff]  }
  0x6b   : > { %5164 = vmatpush3.bf16.msra.mxu1 %v5487_v13  ;;  %5117 = vmatprep.subr.bf16.mxu0 %v5492_v18  ;;  %v5533_v13 = vld [vmem:[%s5918_s10 + $0x58] sm:$0xff]  }
  0x6c   : > { %5038 = vmatmul.mubr.bf16.gmra.mxu0 %v5472_v14  ;;  %5165 = vmatprep.subr.bf16.mxu1 %v5493_v19  ;;  %v5536_v14 = vld [vmem:[%s5918_s10 + $0x68] sm:$0xff]  }
  0x6d   : > { %5086 = vmatmul.mubr.bf16.gmra.mxu1 %v5473_v15  ;;  %5041 = vmatprep.mubr.bf16.mxu0 %v5476_v16  ;;  %v5537_v15 = vld [vmem:[%s5918_s10 + $0x60] sm:$0xff]   ;;  %v5538_v16 = vld [vmem:[%s5918_s10 + $0x70] sm:$0xff]  }
  0x6e   : > { %5089 = vmatprep.mubr.bf16.mxu1 %v5477_v17  ;;  %5118 = vmatpush3.bf16.msra.mxu0 %v5492_v18  ;;  %v5539_v17 = vld [vmem:[%s5918_s10 + $0x68] sm:$0xff]   ;;  %v5542_v18 = vld [vmem:[%s5918_s10 + $0x78] sm:$0xff]  }
  0x6f   : > { %5166 = vmatpush3.bf16.msra.mxu1 %v5493_v19  ;;  %5119 = vmatprep.subr.bf16.mxu0 %v5498_v23  ;;  %v5543_v19 = vld [vmem:[%s5918_s10 + $0x70] sm:$0xff]  }
  0x70   : > { %5167 = vmatprep.subr.bf16.mxu1 %v5499_v24 }
  0x72   : > { %5120 = vmatpush3.bf16.msra.mxu0 %v5498_v23  ;;  %v5549_v23 = vld [vmem:[%s5833_s26 + $0x8] sm:$0xff]  }
  0x73   : > { %5168 = vmatpush3.bf16.msra.mxu1 %v5499_v24  ;;  %5201 = vmatprep.subr.bf16.mxu0 %v5504_v27  ;;  %v5550_v24 = vld [vmem:[%s5833_s26 + $0x18] sm:$0xff]  }
  0x74   : > { %5042 = vmatmul.mubr.bf16.gmra.mxu0 %v5478_v20  ;;  %5249 = vmatprep.subr.bf16.mxu1 %v5505_v28  ;;  %v5544_v20 = vld [vmem:[%s5918_s10 + $0x80] sm:$0xff]  }
  0x75   : > { %5090 = vmatmul.mubr.bf16.gmra.mxu1 %v5479_v21  ;;  %5045 = vmatprep.mubr.bf16.mxu0 %v5482_v22  ;;  %v5545_v21 = vld [vmem:[%s5918_s10 + $0x78] sm:$0xff]   ;;  %v5548_v22 = vld [vmem:[%s5833_s26 + $0x10] sm:$0xff]  }
  0x76   : > { %5093 = vmatprep.mubr.bf16.mxu1 %v5483_v25  ;;  %v5551_v25 = vld [vmem:[%s5833_s26 + $0x10] sm:$0xff]  }
  0x7c   : > { %5046 = vmatmul.mubr.bf16.gmra.mxu0 %v5484_v26  ;;  %v5554_v26 = vld [vmem:[%s5833_s26 + $0x20] sm:$0xff]  }
  0x7d   : > { %5094 = vmatmul.mubr.bf16.gmra.mxu1 %v5485_v29  ;;  %5049 = vmatprep.mubr.bf16.mxu0 %v5488_v30  ;;  %v5559_v29 = vld [vmem:[%s6535_s2 + $0x1b0] sm:$0xff]   ;;  %v5556_v30 = vld [vmem:[%s5833_s26 + $0x28] sm:$0xff]  }
  0x7e   : > { %5097 = vmatprep.mubr.bf16.mxu1 %v5489_v31  ;;  %v5564_v31 = vld [vmem:[%s6535_s2 + $0x1e8] sm:$0xff]  }
  0x84   : > { %5050 = vmatmul.mubr.bf16.gmra.mxu0 %v5490_v32  ;;  %v5565_v32 = vld [vmem:[%s6535_s2 + $0x1a8] sm:$0xff]  }
  0x85   : > { %5098 = vmatmul.mubr.bf16.gmra.mxu1 %v5491_v33  ;;  %5053 = vmatprep.mubr.bf16.mxu0 %v5494_v34  ;;  %v5557_v33 = vld [vmem:[%s5833_s26 + $0x20] sm:$0xff]   ;;  %v5560_v34 = vld [vmem:[%s5833_s26 + $0x30] sm:$0xff]  }
  0x86   : > { %5101 = vmatprep.mubr.bf16.mxu1 %v5495_v35  ;;  %v5561_v35 = vld [vmem:[%s5833_s26 + $0x28] sm:$0xff]  }
  0x8c   : > { %5054 = vmatmul.mubr.bf16.gmra.mxu0 %v5496_v36  ;;  %v5570_v36 = vld [vmem:[%s6535_s2 + $0x1e0] sm:$0xff]  }
  0x8d   : > { %5102 = vmatmul.mubr.bf16.gmra.mxu1 %v5497_v37  ;;  %5121 = vmatprep.mubr.bf16.mxu0 %v5500_v38  ;;  %v5571_v37 = vld [vmem:[%s6535_s2 + $0x1a0] sm:$0xff]   ;;  %v5562_v38 = vld [vmem:[%s5833_s26 + $0x38] sm:$0xff]  }
  0x8e   : > { %5169 = vmatprep.mubr.bf16.mxu1 %v5501_v39  ;;  %v5563_v39 = vld [vmem:[%s5833_s26 + $0x30] sm:$0xff]  }
  0x94   : > { %5122 = vmatmul.mubr.bf16.vlgmr.msra.gmra.mxu0 %v5502_v40  ;;  %v5576_v40 = vld [vmem:[%s6535_s2 + $0x1d8] sm:$0xff]  }
  0x95   : > { %5170 = vmatmul.mubr.bf16.vlgmr.msra.gmra.mxu1 %v5503_v41  ;;  %5202 = vmatpush3.bf16.msra.mxu0 %v5504_v27  ;;  %v5555_v27 = vld [vmem:[%s5833_s26 + $0x18] sm:$0xff]  }
  0x96   : > { %5250 = vmatpush3.bf16.msra.mxu1 %v5505_v28  ;;  %5125 = vmatprep.mubr.bf16.mxu0 %v5506_v42  ;;  %v5558_v28 = vld [vmem:[%s6535_s2 + $0x1f0] sm:$0xff]   ;;  %v5577_v41 = vld [vmem:[%s6535_s2 + $0x198] sm:$0xff]  }
  0x97   : > { %5173 = vmatprep.mubr.bf16.mxu1 %v5507_v43  ;;  %5203 = vmatprep.subr.bf16.mxu0 %v5510_v44  ;;  %v5566_v42 = vld [vmem:[%s5833_s26 + $0x40] sm:$0xff]   ;;  %v5567_v43 = vld [vmem:[%s5833_s26 + $0x38] sm:$0xff]  }
  0x98   : > { %5251 = vmatprep.subr.bf16.mxu1 %v5511_v45 }
  0x99   : > { %5204 = vmatpush3.bf16.msra.mxu0 %v5510_v44  ;;  %v5582_v44 = vld [vmem:[%s6535_s2 + $0x1d0] sm:$0xff]  }
  0x9a   : > { %5252 = vmatpush3.bf16.msra.mxu1 %v5511_v45  ;;  %5205 = vmatprep.subr.bf16.mxu0 %v5516_v47  ;;  %v5583_v45 = vld [vmem:[%s6535_s2 + $0x190] sm:$0xff]  }
  0x9b   : > { %5253 = vmatprep.subr.bf16.mxu1 %v5517_v48 }
  0x9c   : > { %5126 = vmatmul.mubr.bf16.gmra.mxu0 %v5508_v46  ;;  %v5568_v46 = vld [vmem:[%s5833_s26 + $0x48] sm:$0xff]  }
  0x9d   : > { %5174 = vmatmul.mubr.bf16.gmra.mxu1 %v5509_v49  ;;  %5129 = vmatprep.mubr.bf16.mxu0 %v5512_v50  ;;  %v5589_v49 = vld [vmem:[%s6535_s2 + $0x188] sm:$0xff]   ;;  %v5572_v50 = vld [vmem:[%s5833_s26 + $0x50] sm:$0xff]  }
  0x9e   : > { %5177 = vmatprep.mubr.bf16.mxu1 %v5513_v51  ;;  %5206 = vmatpush3.bf16.msra.mxu0 %v5516_v47  ;;  %v5569_v47 = vld [vmem:[%s5833_s26 + $0x40] sm:$0xff]   ;;  %v5573_v51 = vld [vmem:[%s5833_s26 + $0x48] sm:$0xff]  }
  0x9f   : > { %5254 = vmatpush3.bf16.msra.mxu1 %v5517_v48  ;;  %5207 = vmatprep.subr.bf16.mxu0 %v5522_v52  ;;  %v5588_v48 = vld [vmem:[%s6535_s2 + $0x1c8] sm:$0xff]  }
  0xa0   : > { %5255 = vmatprep.subr.bf16.mxu1 %v5523_v53 }
  0xa2   : > { %5208 = vmatpush3.bf16.msra.mxu0 %v5522_v52  ;;  %v5594_v52 = vld [vmem:[%s6535_s2 + $0x1c0] sm:$0xff]  }
  0xa3   : > { %5256 = vmatpush3.bf16.msra.mxu1 %v5523_v53  ;;  %5209 = vmatprep.subr.bf16.mxu0 %v5528_v56  ;;  %v5595_v53 = vld [vmem:[%s6535_s2 + $0x180] sm:$0xff]  }
  0xa4   : > { %5130 = vmatmul.mubr.bf16.gmra.mxu0 %v5514_v54  ;;  %5257 = vmatprep.subr.bf16.mxu1 %v5529_v57  ;;  %v5574_v54 = vld [vmem:[%s5833_s26 + $0x58] sm:$0xff]  }
  0xa5   : > { %5178 = vmatmul.mubr.bf16.gmra.mxu1 %v5515_v55  ;;  %5133 = vmatprep.mubr.bf16.mxu0 %v5518_v58  ;;  %v5575_v55 = vld [vmem:[%s5833_s26 + $0x50] sm:$0xff]   ;;  %v5580_v58 = vld [vmem:[%s5833_s26 + $0x68] sm:$0xff]  }
  0xa6   : > { %5181 = vmatprep.mubr.bf16.mxu1 %v5519_v59  ;;  %5210 = vmatpush3.bf16.msra.mxu0 %v5528_v56  ;;  %v5578_v56 = vld [vmem:[%s5833_s26 + $0x60] sm:$0xff]  }
  0xa7   : > { %5258 = vmatpush3.bf16.msra.mxu1 %v5529_v57  ;;  %5211 = vmatprep.subr.bf16.mxu0 %v5534_v60  ;;  %v5579_v57 = vld [vmem:[%s5833_s26 + $0x58] sm:$0xff]   ;;  %v5581_v59 = vld [vmem:[%s5833_s26 + $0x60] sm:$0xff]  }
  0xa8   : > { %5259 = vmatprep.subr.bf16.mxu1 %v5535_v61 }
  0xaa   : > { %5212 = vmatpush3.bf16.msra.mxu0 %v5534_v60  ;;  %v5584_v60 = vld [vmem:[%s5833_s26 + $0x70] sm:$0xff]  }
  0xab   : > { %5260 = vmatpush3.bf16.msra.mxu1 %v5535_v61  ;;  %5213 = vmatprep.subr.bf16.mxu0 %v5540_v0  ;;  %v5585_v61 = vld [vmem:[%s5833_s26 + $0x68] sm:$0xff]  }
  0xac   : > { %5134 = vmatmul.mubr.bf16.gmra.mxu0 %v5520_v62  ;;  %5261 = vmatprep.subr.bf16.mxu1 %v5541_v1  ;;  %v5586_v62 = vld [vmem:[%s5833_s26 + $0x78] sm:$0xff]  }
  0xad   : > { %5182 = vmatmul.mubr.bf16.gmra.mxu1 %v5521_v63  ;;  %5137 = vmatprep.mubr.bf16.mxu0 %v5524_v2  ;;  %v5587_v63 = vld [vmem:[%s5833_s26 + $0x70] sm:$0xff]   ;;  %v5592_v2 = vld [vmem:[%s5833_s26 + $0x88] sm:$0xff]  }
  0xae   : > { %5185 = vmatprep.mubr.bf16.mxu1 %v5525_v3  ;;  %5214 = vmatpush3.bf16.msra.mxu0 %v5540_v0  ;;  %v5590_v0 = vld [vmem:[%s5833_s26 + $0x80] sm:$0xff]  }
  0xaf   : > { %5262 = vmatpush3.bf16.msra.mxu1 %v5541_v1  ;;  %5215 = vmatprep.subr.bf16.mxu0 %v5546_v4  ;;  %v5591_v1 = vld [vmem:[%s5833_s26 + $0x78] sm:$0xff]   ;;  %v5593_v3 = vld [vmem:[%s5833_s26 + $0x80] sm:$0xff]   ;;  %s6098_s26 = scalar_lea.vmem [#allocation4], %s4216_s11 }
  0xb0   : > { %5263 = vmatprep.subr.bf16.mxu1 %v5547_v5 }
  0xb2   : > { %5216 = vmatpush3.bf16.msra.mxu0 %v5546_v4  ;;  %v5596_v4 = vld [vmem:[%s5918_s10 + $0x10] sm:$0xff]  }
  0xb3   : > { %5264 = vmatpush3.bf16.msra.mxu1 %v5547_v5  ;;  %5297 = vmatprep.subr.bf16.mxu0 %v5552_v8  ;;  %v5597_v5 = vld [vmem:[%s5918_s10 + $0x8] sm:$0xff]  }
  0xb4   : > { %5138 = vmatmul.mubr.bf16.gmra.mxu0 %v5526_v6  ;;  %5345 = vmatprep.subr.bf16.mxu1 %v5553_v9  ;;  %v5598_v6 = vld [vmem:[%s5918_s10 + $0x18] sm:$0xff]  }
  0xb5   : > { %5186 = vmatmul.mubr.bf16.gmra.mxu1 %v5527_v7  ;;  %5141 = vmatprep.mubr.bf16.mxu0 %v5530_v10  ;;  %v5599_v7 = vld [vmem:[%s5918_s10 + $0x10] sm:$0xff]  }
  0xb6   : > { %5189 = vmatprep.mubr.bf16.mxu1 %v5531_v11 }
  0xbc   : > { %5142 = vmatmul.mubr.bf16.gmra.mxu0 %v5532_v12 }
  0xbd   : > { %5190 = vmatmul.mubr.bf16.gmra.mxu1 %v5533_v13  ;;  %5145 = vmatprep.mubr.bf16.mxu0 %v5536_v14 }
  0xbe   : > { %5193 = vmatprep.mubr.bf16.mxu1 %v5537_v15 }
  0xc4   : > { %5146 = vmatmul.mubr.bf16.gmra.mxu0 %v5538_v16 }
  0xc5   : > { %5194 = vmatmul.mubr.bf16.gmra.mxu1 %v5539_v17  ;;  %5149 = vmatprep.mubr.bf16.mxu0 %v5542_v18  ;;  %v5602_v17 = vld [vmem:[%s5918_s10 + $0x28] sm:$0xff]  }
  0xc6   : > { %5197 = vmatprep.mubr.bf16.mxu1 %v5543_v19  ;;  %v5603_v19 = vld [vmem:[%s5918_s10 + $0x20] sm:$0xff]  }
  0xcc   : > { %5150 = vmatmul.mubr.bf16.gmra.mxu0 %v5544_v20  ;;  %v5604_v20 = vld [vmem:[%s5918_s10 + $0x30] sm:$0xff]  }
  0xcd   : > { %5198 = vmatmul.mubr.bf16.gmra.mxu1 %v5545_v21  ;;  %5217 = vmatprep.mubr.bf16.mxu0 %v5548_v22 }
  0xce   : > { %5265 = vmatprep.mubr.bf16.mxu1 %v5549_v23  ;;  %v5605_v23 = vld [vmem:[%s5918_s10 + $0x28] sm:$0xff]  }
  0xd4   : > { %5218 = vmatmul.mubr.bf16.vlgmr.msra.gmra.mxu0 %v5550_v24 }
  0xd5   : > { %5266 = vmatmul.mubr.bf16.vlgmr.msra.gmra.mxu1 %v5551_v25  ;;  %5298 = vmatpush3.bf16.msra.mxu0 %v5552_v8  ;;  %v5600_v8 = vld [vmem:[%s5918_s10 + $0x20] sm:$0xff]  }
  0xd6   : > { %5346 = vmatpush3.bf16.msra.mxu1 %v5553_v9  ;;  %5221 = vmatprep.mubr.bf16.mxu0 %v5554_v26  ;;  %v5601_v9 = vld [vmem:[%s5918_s10 + $0x18] sm:$0xff]  }
  0xd7   : > { %5269 = vmatprep.mubr.bf16.mxu1 %v5555_v27  ;;  %5299 = vmatprep.subr.bf16.mxu0 %v5558_v28 }
  0xd8   : > { %5347 = vmatprep.subr.bf16.mxu1 %v5559_v29 }
  0xd9   : > { %5300 = vmatpush3.bf16.msra.mxu0 %v5558_v28 }
  0xda   : > { %5348 = vmatpush3.bf16.msra.mxu1 %v5559_v29  ;;  %5301 = vmatprep.subr.bf16.mxu0 %v5564_v31 }
  0xdb   : > { %5349 = vmatprep.subr.bf16.mxu1 %v5565_v32 }
  0xdc   : > { %5222 = vmatmul.mubr.bf16.gmra.mxu0 %v5556_v30 }
  0xdd   : > { %5270 = vmatmul.mubr.bf16.gmra.mxu1 %v5557_v33  ;;  %5225 = vmatprep.mubr.bf16.mxu0 %v5560_v34  ;;  %v5606_v33 = vld [vmem:[%s5918_s10 + $0x38] sm:$0xff]  }
  0xde   : > { %5273 = vmatprep.mubr.bf16.mxu1 %v5561_v35  ;;  %5302 = vmatpush3.bf16.msra.mxu0 %v5564_v31  ;;  %v5607_v35 = vld [vmem:[%s5918_s10 + $0x30] sm:$0xff]  }
  0xdf   : > { %5350 = vmatpush3.bf16.msra.mxu1 %v5565_v32  ;;  %5303 = vmatprep.subr.bf16.mxu0 %v5570_v36 }
  0xe0   : > { %5351 = vmatprep.subr.bf16.mxu1 %v5571_v37 }
  0xe2   : > { %5304 = vmatpush3.bf16.msra.mxu0 %v5570_v36  ;;  %v5608_v36 = vld [vmem:[%s5918_s10 + $0x40] sm:$0xff]  }
  0xe3   : > { %5352 = vmatpush3.bf16.msra.mxu1 %v5571_v37  ;;  %5305 = vmatprep.subr.bf16.mxu0 %v5576_v40 }
  0xe4   : > { %5226 = vmatmul.mubr.bf16.gmra.mxu0 %v5562_v38  ;;  %5353 = vmatprep.subr.bf16.mxu1 %v5577_v41 }
  0xe5   : > { %5274 = vmatmul.mubr.bf16.gmra.mxu1 %v5563_v39  ;;  %5229 = vmatprep.mubr.bf16.mxu0 %v5566_v42  ;;  %v5609_v39 = vld [vmem:[%s5918_s10 + $0x38] sm:$0xff]  }
  0xe6   : > { %5277 = vmatprep.mubr.bf16.mxu1 %v5567_v43  ;;  %5306 = vmatpush3.bf16.msra.mxu0 %v5576_v40 }
  0xe7   : > { %5354 = vmatpush3.bf16.msra.mxu1 %v5577_v41  ;;  %5307 = vmatprep.subr.bf16.mxu0 %v5582_v44 }
  0xe8   : > { %5355 = vmatprep.subr.bf16.mxu1 %v5583_v45 }
  0xea   : > { %5308 = vmatpush3.bf16.msra.mxu0 %v5582_v44 }
  0xeb   : > { %5356 = vmatpush3.bf16.msra.mxu1 %v5583_v45  ;;  %5309 = vmatprep.subr.bf16.mxu0 %v5588_v48 }
  0xec   : > { %5230 = vmatmul.mubr.bf16.gmra.mxu0 %v5568_v46  ;;  %5357 = vmatprep.subr.bf16.mxu1 %v5589_v49 }
  0xed   : > { %5278 = vmatmul.mubr.bf16.gmra.mxu1 %v5569_v47  ;;  %5233 = vmatprep.mubr.bf16.mxu0 %v5572_v50 }
  0xee   : > { %5281 = vmatprep.mubr.bf16.mxu1 %v5573_v51  ;;  %5310 = vmatpush3.bf16.msra.mxu0 %v5588_v48  ;;  %v5611_v51 = vld [vmem:[%s5918_s10 + $0x40] sm:$0xff]  }
  0xef   : > { %5358 = vmatpush3.bf16.msra.mxu1 %v5589_v49  ;;  %5311 = vmatprep.subr.bf16.mxu0 %v5594_v52  ;;  %v5610_v49 = vld [vmem:[%s5918_s10 + $0x48] sm:$0xff]  }
  0xf0   : > { %5359 = vmatprep.subr.bf16.mxu1 %v5595_v53 }
  0xf2   : > { %5312 = vmatpush3.bf16.msra.mxu0 %v5594_v52  ;;  %v5612_v52 = vld [vmem:[%s5918_s10 + $0x50] sm:$0xff]  }
  0xf3   : > { %5360 = vmatpush3.bf16.msra.mxu1 %v5595_v53 }
  0xf4   : > { %5234 = vmatmul.mubr.bf16.gmra.mxu0 %v5574_v54 }
  0xf5   : > { %5282 = vmatmul.mubr.bf16.gmra.mxu1 %v5575_v55  ;;  %5237 = vmatprep.mubr.bf16.mxu0 %v5578_v56  ;;  %v5613_v55 = vld [vmem:[%s5918_s10 + $0x48] sm:$0xff]  }
  0xf6   : > { %5285 = vmatprep.mubr.bf16.mxu1 %v5579_v57 }
  0xfc   : > { %5238 = vmatmul.mubr.bf16.gmra.mxu0 %v5580_v58 }
  0xfd   : > { %5286 = vmatmul.mubr.bf16.gmra.mxu1 %v5581_v59  ;;  %5241 = vmatprep.mubr.bf16.mxu0 %v5584_v60 }
  0xfe   : > { %5289 = vmatprep.mubr.bf16.mxu1 %v5585_v61 }
 0x104   : > { %5242 = vmatmul.mubr.bf16.gmra.mxu0 %v5586_v62 }
 0x105   : > { %5290 = vmatmul.mubr.bf16.gmra.mxu1 %v5587_v63  ;;  %5245 = vmatprep.mubr.bf16.mxu0 %v5590_v0 }
 0x106   : > { %5293 = vmatprep.mubr.bf16.mxu1 %v5591_v1  ;;  %v5614_v1 = vld [vmem:[%s5918_s10 + $0x58] sm:$0xff]  }
 0x10c   : > { %5246 = vmatmul.mubr.bf16.gmra.mxu0 %v5592_v2 }
 0x10d   : > { %5294 = vmatmul.mubr.bf16.gmra.mxu1 %v5593_v3  ;;  %5313 = vmatprep.mubr.bf16.mxu0 %v5596_v4  ;;  %v5615_v3 = vld [vmem:[%s5918_s10 + $0x50] sm:$0xff]   ;;  %v5616_v4 = vld [vmem:[%s5918_s10 + $0x60] sm:$0xff]  }
 0x10e   : > { %5361 = vmatprep.mubr.bf16.mxu1 %v5597_v5 }
 0x114   : > { %v5027_v10 = vpop.f32.mrf.mxu0  ;;  %5314 = vmatmul.mubr.bf16.vlgmr.msra.gmra.mxu0 %v5598_v6 }
 0x115   : > { %v5075_v11 = vpop.f32.mrf.mxu1  ;;  %5362 = vmatmul.mubr.bf16.vlgmr.msra.gmra.mxu1 %v5599_v7  ;;  %5317 = vmatprep.mubr.bf16.mxu0 %v5600_v8  ;;  %v5617_v7 = vld [vmem:[%s5918_s10 + $0x58] sm:$0xff]  }
 0x116   : > { %v1178_v12 = vadd.f32 %v5075_v11, %v5027_v10  ;;  %v864_v13 = vpop.f32.mrf.mxu0  ;;  %5365 = vmatprep.mubr.bf16.mxu1 %v5601_v9 }
 0x117   : > { %v1169_v14 = vpop.f32.mrf.mxu1 }
 0x118   : > { %1298 = vst [vmem:[%s6098_s26 + $0x10] sm:$0xff] %v1178_v12  ;;  %v1170_v15 = vadd.f32 %v1169_v14, %v864_v13  ;;  %v5028_v16 = vpop.f32.mrf.mxu0 }
 0x119   : > { %v5076_v18 = vpop.f32.mrf.mxu1 }
 0x11a   : > { %1296 = vst [vmem:[%s6098_s26] sm:$0xff] %v1170_v15  ;;  %v1181_v21 = vadd.f32 %v5076_v18, %v5028_v16  ;;  %v867_v22 = vpop.f32.mrf.mxu0 }
 0x11b   : > { %v1172_v24 = vpop.f32.mrf.mxu1 }
 0x11c   : > { %1299 = vst [vmem:[%s6098_s26 + $0x18] sm:$0xff] %v1181_v21  ;;  %v1173_v25 = vadd.f32 %v1172_v24, %v867_v22  ;;  %v5031_v26 = vpop.f32.mrf.mxu0  ;;  %5318 = vmatmul.mubr.bf16.gmra.mxu0 %v5602_v17  ;;  %v5618_v17 = vld [vmem:[%s5918_s10 + $0x68] sm:$0xff]  }
 0x11d   : > { %v5079_v27 = vpop.f32.mrf.mxu1  ;;  %5366 = vmatmul.mubr.bf16.gmra.mxu1 %v5603_v19  ;;  %5321 = vmatprep.mubr.bf16.mxu0 %v5604_v20  ;;  %v5619_v19 = vld [vmem:[%s5918_s10 + $0x60] sm:$0xff]   ;;  %v5620_v20 = vld [vmem:[%s5918_s10 + $0x70] sm:$0xff]  }
 0x11e   : > { %1297 = vst [vmem:[%s6098_s26 + $0x8] sm:$0xff] %v1173_v25  ;;  %v1194_v28 = vadd.f32 %v5079_v27, %v5031_v26  ;;  %v880_v29 = vpop.f32.mrf.mxu0  ;;  %5369 = vmatprep.mubr.bf16.mxu1 %v5605_v23  ;;  %v5621_v23 = vld [vmem:[%s5918_s10 + $0x68] sm:$0xff]  }
 0x11f   : > { %v1185_v30 = vpop.f32.mrf.mxu1 }
 0x120   : > { %1302 = vst [vmem:[%s6098_s26 + $0x30] sm:$0xff] %v1194_v28  ;;  %v1186_v31 = vadd.f32 %v1185_v30, %v880_v29  ;;  %v5032_v32 = vpop.f32.mrf.mxu0 }
 0x121   : > { %v5080_v34 = vpop.f32.mrf.mxu1 }
 0x122   : > { %1300 = vst [vmem:[%s6098_s26 + $0x20] sm:$0xff] %v1186_v31  ;;  %v1197_v37 = vadd.f32 %v5080_v34, %v5032_v32  ;;  %v883_v38 = vpop.f32.mrf.mxu0 }
 0x123   : > { %v1188_v40 = vpop.f32.mrf.mxu1 }
 0x124   : > { %1303 = vst [vmem:[%s6098_s26 + $0x38] sm:$0xff] %v1197_v37  ;;  %v1189_v41 = vadd.f32 %v1188_v40, %v883_v38  ;;  %v5035_v42 = vpop.f32.mrf.mxu0  ;;  %5322 = vmatmul.mubr.bf16.gmra.mxu0 %v5606_v33  ;;  %v5622_v33 = vld [vmem:[%s5918_s10 + $0x78] sm:$0xff]  }
 0x125   : > { %v5083_v43 = vpop.f32.mrf.mxu1  ;;  %5370 = vmatmul.mubr.bf16.gmra.mxu1 %v5607_v35  ;;  %5325 = vmatprep.mubr.bf16.mxu0 %v5608_v36  ;;  %v5623_v35 = vld [vmem:[%s5918_s10 + $0x70] sm:$0xff]   ;;  %v5624_v36 = vld [vmem:[%s5918_s10 + $0x80] sm:$0xff]  }
 0x126   : > { %1301 = vst [vmem:[%s6098_s26 + $0x28] sm:$0xff] %v1189_v41  ;;  %v1210_v44 = vadd.f32 %v5083_v43, %v5035_v42  ;;  %v896_v45 = vpop.f32.mrf.mxu0  ;;  %5373 = vmatprep.mubr.bf16.mxu1 %v5609_v39  ;;  %v5625_v39 = vld [vmem:[%s5918_s10 + $0x78] sm:$0xff]  }
 0x127   : > { %v1201_v46 = vpop.f32.mrf.mxu1 }
 0x128   : > { %1306 = vst [vmem:[%s6098_s26 + $0x50] sm:$0xff] %v1210_v44  ;;  %v1202_v47 = vadd.f32 %v1201_v46, %v896_v45  ;;  %v5036_v48 = vpop.f32.mrf.mxu0 }
 0x129   : > { %v5084_v50 = vpop.f32.mrf.mxu1 }
 0x12a   : > { %1304 = vst [vmem:[%s6098_s26 + $0x40] sm:$0xff] %v1202_v47  ;;  %v1213_v53 = vadd.f32 %v5084_v50, %v5036_v48  ;;  %v899_v54 = vpop.f32.mrf.mxu0 }
 0x12b   : > { %v1204_v56 = vpop.f32.mrf.mxu1 }
 0x12c   : > { %1307 = vst [vmem:[%s6098_s26 + $0x58] sm:$0xff] %v1213_v53  ;;  %v1205_v57 = vadd.f32 %v1204_v56, %v899_v54  ;;  %v5039_v58 = vpop.f32.mrf.mxu0  ;;  %5326 = vmatmul.mubr.bf16.gmra.mxu0 %v5610_v49  ;;  %v5626_v49 = vld [vmem:[%s5918_s10 + $0x88] sm:$0xff]  }
 0x12d   : > { %v5087_v59 = vpop.f32.mrf.mxu1  ;;  %5374 = vmatmul.mubr.bf16.gmra.mxu1 %v5611_v51  ;;  %5329 = vmatprep.mubr.bf16.mxu0 %v5612_v52  ;;  %v5627_v51 = vld [vmem:[%s5918_s10 + $0x80] sm:$0xff]  }
 0x12e   : > { %1305 = vst [vmem:[%s6098_s26 + $0x48] sm:$0xff] %v1205_v57  ;;  %v1226_v60 = vadd.f32 %v5087_v59, %v5039_v58  ;;  %v912_v61 = vpop.f32.mrf.mxu0  ;;  %5377 = vmatprep.mubr.bf16.mxu1 %v5613_v55 }
 0x12f   : > { %v1217_v62 = vpop.f32.mrf.mxu1 }
 0x130   : > { %1310 = vst [vmem:[%s6098_s26 + $0x70] sm:$0xff] %v1226_v60  ;;  %v1218_v63 = vadd.f32 %v1217_v62, %v912_v61  ;;  %v5040_v0 = vpop.f32.mrf.mxu0 }
 0x131   : > { %v5088_v2 = vpop.f32.mrf.mxu1 }
 0x132   : > { %1308 = vst [vmem:[%s6098_s26 + $0x60] sm:$0xff] %v1218_v63  ;;  %v1229_v5 = vadd.f32 %v5088_v2, %v5040_v0  ;;  %v915_v6 = vpop.f32.mrf.mxu0 }
 0x133   : > { %v1220_v8 = vpop.f32.mrf.mxu1 }
 0x134   : > { %1311 = vst [vmem:[%s6098_s26 + $0x78] sm:$0xff] %v1229_v5  ;;  %v1221_v9 = vadd.f32 %v1220_v8, %v915_v6  ;;  %v5043_v10 = vpop.f32.mrf.mxu0  ;;  %5330 = vmatmul.mubr.bf16.gmra.mxu0 %v5614_v1 }
 0x135   : > { %v5091_v11 = vpop.f32.mrf.mxu1  ;;  %5378 = vmatmul.mubr.bf16.gmra.mxu1 %v5615_v3  ;;  %5333 = vmatprep.mubr.bf16.mxu0 %v5616_v4 }
 0x136   : > { %1309 = vst [vmem:[%s6098_s26 + $0x68] sm:$0xff] %v1221_v9  ;;  %v1242_v12 = vadd.f32 %v5091_v11, %v5043_v10  ;;  %v928_v13 = vpop.f32.mrf.mxu0  ;;  %5381 = vmatprep.mubr.bf16.mxu1 %v5617_v7 }
 0x137   : > { %v1233_v14 = vpop.f32.mrf.mxu1 }
 0x138   : > { %1314 = vst [vmem:[%s6098_s26 + $0x90] sm:$0xff] %v1242_v12  ;;  %v1234_v15 = vadd.f32 %v1233_v14, %v928_v13  ;;  %v5044_v16 = vpop.f32.mrf.mxu0 }
 0x139   : > { %v5092_v18 = vpop.f32.mrf.mxu1 }
 0x13a   : > { %1312 = vst [vmem:[%s6098_s26 + $0x80] sm:$0xff] %v1234_v15  ;;  %v1245_v21 = vadd.f32 %v5092_v18, %v5044_v16  ;;  %v931_v22 = vpop.f32.mrf.mxu0 }
 0x13b   : > { %v1236_v24 = vpop.f32.mrf.mxu1 }
 0x13c   : > { %1315 = vst [vmem:[%s6098_s26 + $0x98] sm:$0xff] %v1245_v21  ;;  %v1237_v25 = vadd.f32 %v1236_v24, %v931_v22  ;;  %v5047_v26 = vpop.f32.mrf.mxu0  ;;  %5334 = vmatmul.mubr.bf16.gmra.mxu0 %v5618_v17 }
 0x13d   : > { %v5095_v27 = vpop.f32.mrf.mxu1  ;;  %5382 = vmatmul.mubr.bf16.gmra.mxu1 %v5619_v19  ;;  %5337 = vmatprep.mubr.bf16.mxu0 %v5620_v20 }
 0x13e   : > { %1313 = vst [vmem:[%s6098_s26 + $0x88] sm:$0xff] %v1237_v25  ;;  %v1258_v28 = vadd.f32 %v5095_v27, %v5047_v26  ;;  %v944_v29 = vpop.f32.mrf.mxu0  ;;  %5385 = vmatprep.mubr.bf16.mxu1 %v5621_v23 }
 0x13f   : > { %v1249_v30 = vpop.f32.mrf.mxu1 }
 0x140   : > { %1318 = vst [vmem:[%s6098_s26 + $0xb0] sm:$0xff] %v1258_v28  ;;  %v1250_v31 = vadd.f32 %v1249_v30, %v944_v29  ;;  %v5048_v32 = vpop.f32.mrf.mxu0 }
 0x141   : > { %v5096_v34 = vpop.f32.mrf.mxu1 }
 0x142   : > { %1316 = vst [vmem:[%s6098_s26 + $0xa0] sm:$0xff] %v1250_v31  ;;  %v1261_v37 = vadd.f32 %v5096_v34, %v5048_v32  ;;  %v947_v38 = vpop.f32.mrf.mxu0 }
 0x143   : > { %v1252_v40 = vpop.f32.mrf.mxu1 }
 0x144   : > { %1319 = vst [vmem:[%s6098_s26 + $0xb8] sm:$0xff] %v1261_v37  ;;  %v1253_v41 = vadd.f32 %v1252_v40, %v947_v38  ;;  %v5051_v42 = vpop.f32.mrf.mxu0  ;;  %5338 = vmatmul.mubr.bf16.gmra.mxu0 %v5622_v33 }
 0x145   : > { %v5099_v43 = vpop.f32.mrf.mxu1  ;;  %5386 = vmatmul.mubr.bf16.gmra.mxu1 %v5623_v35  ;;  %5341 = vmatprep.mubr.bf16.mxu0 %v5624_v36 }
 0x146   : > { %1317 = vst [vmem:[%s6098_s26 + $0xa8] sm:$0xff] %v1253_v41  ;;  %v1274_v44 = vadd.f32 %v5099_v43, %v5051_v42  ;;  %v960_v45 = vpop.f32.mrf.mxu0  ;;  %5389 = vmatprep.mubr.bf16.mxu1 %v5625_v39 }
 0x147   : > { %v1265_v46 = vpop.f32.mrf.mxu1 }
 0x148   : > { %1322 = vst [vmem:[%s6098_s26 + $0xd0] sm:$0xff] %v1274_v44  ;;  %v1266_v47 = vadd.f32 %v1265_v46, %v960_v45  ;;  %v5052_v48 = vpop.f32.mrf.mxu0 }
 0x149   : > { %v5100_v50 = vpop.f32.mrf.mxu1 }
 0x14a   : > { %1320 = vst [vmem:[%s6098_s26 + $0xc0] sm:$0xff] %v1266_v47  ;;  %v1277_v52 = vadd.f32 %v5100_v50, %v5052_v48  ;;  %v963_v53 = vpop.f32.mrf.mxu0 }
 0x14b   : > { %v1268_v54 = vpop.f32.mrf.mxu1 }
 0x14c   : > { %1323 = vst [vmem:[%s6098_s26 + $0xd8] sm:$0xff] %v1277_v52  ;;  %v1269_v55 = vadd.f32 %v1268_v54, %v963_v53  ;;  %v5055_v56 = vpop.f32.mrf.mxu0  ;;  %5342 = vmatmul.mubr.bf16.gmra.mxu0 %v5626_v49 }
 0x14d   : > { %v5103_v57 = vpop.f32.mrf.mxu1  ;;  %5390 = vmatmul.mubr.bf16.gmra.mxu1 %v5627_v51 }
 0x14e   : > { %1321 = vst [vmem:[%s6098_s26 + $0xc8] sm:$0xff] %v1269_v55  ;;  %v1290_v58 = vadd.f32 %v5103_v57, %v5055_v56  ;;  %v976_v59 = vpop.f32.mrf.mxu0 }
 0x14f   : > { %v1281_v60 = vpop.f32.mrf.mxu1 }
 0x150   : > { %1326 = vst [vmem:[%s6098_s26 + $0xf0] sm:$0xff] %v1290_v58  ;;  %v1282_v61 = vadd.f32 %v1281_v60, %v976_v59  ;;  %v5056_v62 = vpop.f32.mrf.mxu0 }
 0x151   : > { %v5104_v63 = vpop.f32.mrf.mxu1 }
 0x152   : > { %1324 = vst [vmem:[%s6098_s26 + $0xe0] sm:$0xff] %v1282_v61  ;;  %v1293_v0 = vadd.f32 %v5104_v63, %v5056_v62  ;;  %v979_v1 = vpop.f32.mrf.mxu0 }
 0x153   : > { %v1284_v2 = vpop.f32.mrf.mxu1 }
 0x154   : > { %1327 = vst [vmem:[%s6098_s26 + $0xf8] sm:$0xff] %v1293_v0  ;;  %v1285_v3 = vadd.f32 %v1284_v2, %v979_v1  ;;  %v5123_v4 = vpop.f32.mrf.mxu0 }
 0x155   : > { %v5171_v5 = vpop.f32.mrf.mxu1 }
 0x156   : > { %1325 = vst [vmem:[%s6098_s26 + $0xe8] sm:$0xff] %v1285_v3  ;;  %v1919_v6 = vadd.f32 %v5171_v5, %v5123_v4  ;;  %v1605_v7 = vpop.f32.mrf.mxu0 }
 0x157   : > { %v1910_v8 = vpop.f32.mrf.mxu1 }
 0x158   : > { %4427 = vst [vmem:[%s6098_s26 + $0x110] sm:$0xff] %v1919_v6  ;;  %v1911_v9 = vadd.f32 %v1910_v8, %v1605_v7  ;;  %v5124_v10 = vpop.f32.mrf.mxu0 }
 0x159   : > { %v5172_v11 = vpop.f32.mrf.mxu1 }
 0x15a   : > { %4425 = vst [vmem:[%s6098_s26 + $0x100] sm:$0xff] %v1911_v9  ;;  %v1922_v12 = vadd.f32 %v5172_v11, %v5124_v10  ;;  %v1608_v13 = vpop.f32.mrf.mxu0 }
 0x15b   : > { %v1913_v14 = vpop.f32.mrf.mxu1 }
 0x15c   : > { %4428 = vst [vmem:[%s6098_s26 + $0x118] sm:$0xff] %v1922_v12  ;;  %v1914_v15 = vadd.f32 %v1913_v14, %v1608_v13  ;;  %v5127_v16 = vpop.f32.mrf.mxu0 }
 0x15d   : > { %v5175_v17 = vpop.f32.mrf.mxu1 }
 0x15e   : > { %4426 = vst [vmem:[%s6098_s26 + $0x108] sm:$0xff] %v1914_v15  ;;  %v1935_v18 = vadd.f32 %v5175_v17, %v5127_v16  ;;  %v1621_v19 = vpop.f32.mrf.mxu0 }
 0x15f   : > { %v1926_v20 = vpop.f32.mrf.mxu1 }
 0x160   : > { %4431 = vst [vmem:[%s6098_s26 + $0x130] sm:$0xff] %v1935_v18  ;;  %v1927_v21 = vadd.f32 %v1926_v20, %v1621_v19  ;;  %v5128_v22 = vpop.f32.mrf.mxu0 }
 0x161   : > { %v5176_v23 = vpop.f32.mrf.mxu1 }
 0x162   : > { %4429 = vst [vmem:[%s6098_s26 + $0x120] sm:$0xff] %v1927_v21  ;;  %v1938_v24 = vadd.f32 %v5176_v23, %v5128_v22  ;;  %v1624_v25 = vpop.f32.mrf.mxu0 }
 0x163   : > { %v1929_v26 = vpop.f32.mrf.mxu1 }
 0x164   : > { %4432 = vst [vmem:[%s6098_s26 + $0x138] sm:$0xff] %v1938_v24  ;;  %v1930_v27 = vadd.f32 %v1929_v26, %v1624_v25  ;;  %v5131_v28 = vpop.f32.mrf.mxu0 }
 0x165   : > { %v5179_v29 = vpop.f32.mrf.mxu1 }
 0x166   : > { %4430 = vst [vmem:[%s6098_s26 + $0x128] sm:$0xff] %v1930_v27  ;;  %v1951_v30 = vadd.f32 %v5179_v29, %v5131_v28  ;;  %v1637_v31 = vpop.f32.mrf.mxu0 }
 0x167   : > { %v1942_v32 = vpop.f32.mrf.mxu1 }
 0x168   : > { %4435 = vst [vmem:[%s6098_s26 + $0x150] sm:$0xff] %v1951_v30  ;;  %v1943_v33 = vadd.f32 %v1942_v32, %v1637_v31  ;;  %v5132_v34 = vpop.f32.mrf.mxu0 }
 0x169   : > { %v5180_v35 = vpop.f32.mrf.mxu1 }
 0x16a   : > { %4433 = vst [vmem:[%s6098_s26 + $0x140] sm:$0xff] %v1943_v33  ;;  %v1954_v36 = vadd.f32 %v5180_v35, %v5132_v34  ;;  %v1640_v37 = vpop.f32.mrf.mxu0 }
 0x16b   : > { %v1945_v38 = vpop.f32.mrf.mxu1 }
 0x16c   : > { %4436 = vst [vmem:[%s6098_s26 + $0x158] sm:$0xff] %v1954_v36  ;;  %v1946_v39 = vadd.f32 %v1945_v38, %v1640_v37  ;;  %v5135_v40 = vpop.f32.mrf.mxu0 }
 0x16d   : > { %v5183_v41 = vpop.f32.mrf.mxu1 }
 0x16e   : > { %4434 = vst [vmem:[%s6098_s26 + $0x148] sm:$0xff] %v1946_v39  ;;  %v1967_v42 = vadd.f32 %v5183_v41, %v5135_v40  ;;  %v1653_v43 = vpop.f32.mrf.mxu0 }
 0x16f   : > { %v1958_v44 = vpop.f32.mrf.mxu1 }
 0x170   : > { %4439 = vst [vmem:[%s6098_s26 + $0x170] sm:$0xff] %v1967_v42  ;;  %v1959_v45 = vadd.f32 %v1958_v44, %v1653_v43  ;;  %v5136_v46 = vpop.f32.mrf.mxu0 }
 0x171   : > { %v5184_v47 = vpop.f32.mrf.mxu1 }
 0x172   : > { %4437 = vst [vmem:[%s6098_s26 + $0x160] sm:$0xff] %v1959_v45  ;;  %v1970_v48 = vadd.f32 %v5184_v47, %v5136_v46  ;;  %v1656_v49 = vpop.f32.mrf.mxu0 }
 0x173   : > { %v1961_v50 = vpop.f32.mrf.mxu1 }
 0x174   : > { %4440 = vst [vmem:[%s6098_s26 + $0x178] sm:$0xff] %v1970_v48  ;;  %v1962_v51 = vadd.f32 %v1961_v50, %v1656_v49  ;;  %v5139_v52 = vpop.f32.mrf.mxu0 }
 0x175   : > { %v5187_v53 = vpop.f32.mrf.mxu1 }
 0x176   : > { %4438 = vst [vmem:[%s6098_s26 + $0x168] sm:$0xff] %v1962_v51  ;;  %v1983_v54 = vadd.f32 %v5187_v53, %v5139_v52  ;;  %v1669_v55 = vpop.f32.mrf.mxu0 }
 0x177   : > { %v1974_v56 = vpop.f32.mrf.mxu1 }
 0x178   : > { %4443 = vst [vmem:[%s6098_s26 + $0x190] sm:$0xff] %v1983_v54  ;;  %v1975_v57 = vadd.f32 %v1974_v56, %v1669_v55  ;;  %v5140_v58 = vpop.f32.mrf.mxu0 }
 0x179   : > { %v5188_v59 = vpop.f32.mrf.mxu1 }
 0x17a   : > { %4441 = vst [vmem:[%s6098_s26 + $0x180] sm:$0xff] %v1975_v57  ;;  %v1986_v60 = vadd.f32 %v5188_v59, %v5140_v58  ;;  %v1672_v61 = vpop.f32.mrf.mxu0 }
 0x17b   : > { %v1977_v62 = vpop.f32.mrf.mxu1 }
 0x17c   : > { %4444 = vst [vmem:[%s6098_s26 + $0x198] sm:$0xff] %v1986_v60  ;;  %v1978_v63 = vadd.f32 %v1977_v62, %v1672_v61  ;;  %v5143_v0 = vpop.f32.mrf.mxu0 }
 0x17d   : > { %v5191_v1 = vpop.f32.mrf.mxu1 }
 0x17e   : > { %4442 = vst [vmem:[%s6098_s26 + $0x188] sm:$0xff] %v1978_v63  ;;  %v1999_v2 = vadd.f32 %v5191_v1, %v5143_v0  ;;  %v1685_v3 = vpop.f32.mrf.mxu0 }
 0x17f   : > { %v1990_v4 = vpop.f32.mrf.mxu1 }
 0x180   : > { %4447 = vst [vmem:[%s6098_s26 + $0x1b0] sm:$0xff] %v1999_v2  ;;  %v1991_v5 = vadd.f32 %v1990_v4, %v1685_v3  ;;  %v5144_v6 = vpop.f32.mrf.mxu0 }
 0x181   : > { %v5192_v7 = vpop.f32.mrf.mxu1 }
 0x182   : > { %4445 = vst [vmem:[%s6098_s26 + $0x1a0] sm:$0xff] %v1991_v5  ;;  %v2002_v8 = vadd.f32 %v5192_v7, %v5144_v6  ;;  %v1688_v9 = vpop.f32.mrf.mxu0 }
 0x183   : > { %v1993_v10 = vpop.f32.mrf.mxu1 }
 0x184   : > { %4448 = vst [vmem:[%s6098_s26 + $0x1b8] sm:$0xff] %v2002_v8  ;;  %v1994_v11 = vadd.f32 %v1993_v10, %v1688_v9  ;;  %v5147_v12 = vpop.f32.mrf.mxu0 }
 0x185   : > { %v5195_v13 = vpop.f32.mrf.mxu1 }
 0x186   : > { %4446 = vst [vmem:[%s6098_s26 + $0x1a8] sm:$0xff] %v1994_v11  ;;  %v2015_v14 = vadd.f32 %v5195_v13, %v5147_v12  ;;  %v1701_v15 = vpop.f32.mrf.mxu0 }
 0x187   : > { %v2006_v16 = vpop.f32.mrf.mxu1 }
 0x188   : > { %4451 = vst [vmem:[%s6098_s26 + $0x1d0] sm:$0xff] %v2015_v14  ;;  %v2007_v17 = vadd.f32 %v2006_v16, %v1701_v15  ;;  %v5148_v18 = vpop.f32.mrf.mxu0 }
 0x189   : > { %v5196_v19 = vpop.f32.mrf.mxu1 }
 0x18a   : > { %4449 = vst [vmem:[%s6098_s26 + $0x1c0] sm:$0xff] %v2007_v17  ;;  %v2018_v20 = vadd.f32 %v5196_v19, %v5148_v18  ;;  %v1704_v21 = vpop.f32.mrf.mxu0 }
 0x18b   : > { %v2009_v22 = vpop.f32.mrf.mxu1 }
 0x18c   : > { %4452 = vst [vmem:[%s6098_s26 + $0x1d8] sm:$0xff] %v2018_v20  ;;  %v2010_v23 = vadd.f32 %v2009_v22, %v1704_v21  ;;  %v5151_v24 = vpop.f32.mrf.mxu0 }
 0x18d   : > { %v5199_v25 = vpop.f32.mrf.mxu1 }
 0x18e   : > { %4450 = vst [vmem:[%s6098_s26 + $0x1c8] sm:$0xff] %v2010_v23  ;;  %v2031_v26 = vadd.f32 %v5199_v25, %v5151_v24  ;;  %v1717_v27 = vpop.f32.mrf.mxu0 }
 0x18f   : > { %v2022_v28 = vpop.f32.mrf.mxu1 }
 0x190   : > { %4455 = vst [vmem:[%s6098_s26 + $0x1f0] sm:$0xff] %v2031_v26  ;;  %v2023_v29 = vadd.f32 %v2022_v28, %v1717_v27  ;;  %v5152_v30 = vpop.f32.mrf.mxu0 }
 0x191   : > { %v5200_v31 = vpop.f32.mrf.mxu1 }
 0x192   : > { %4453 = vst [vmem:[%s6098_s26 + $0x1e0] sm:$0xff] %v2023_v29  ;;  %v2034_v32 = vadd.f32 %v5200_v31, %v5152_v30  ;;  %v1720_v33 = vpop.f32.mrf.mxu0 }
 0x193   : > { %v2025_v34 = vpop.f32.mrf.mxu1 }
 0x194   : > { %4456 = vst [vmem:[%s6098_s26 + $0x1f8] sm:$0xff] %v2034_v32  ;;  %v2026_v35 = vadd.f32 %v2025_v34, %v1720_v33  ;;  %v5219_v36 = vpop.f32.mrf.mxu0 }
 0x195   : > { %v5267_v37 = vpop.f32.mrf.mxu1 }
 0x196   : > { %4454 = vst [vmem:[%s6098_s26 + $0x1e8] sm:$0xff] %v2026_v35  ;;  %v2661_v38 = vadd.f32 %v5267_v37, %v5219_v36  ;;  %v2347_v39 = vpop.f32.mrf.mxu0 }
 0x197   : > { %v2652_v40 = vpop.f32.mrf.mxu1 }
 0x198   : > { %4603 = vst [vmem:[%s6098_s26 + $0x210] sm:$0xff] %v2661_v38  ;;  %v2653_v41 = vadd.f32 %v2652_v40, %v2347_v39  ;;  %v5220_v42 = vpop.f32.mrf.mxu0 }
 0x199   : > { %v5268_v43 = vpop.f32.mrf.mxu1 }
 0x19a   : > { %4601 = vst [vmem:[%s6098_s26 + $0x200] sm:$0xff] %v2653_v41  ;;  %v2664_v44 = vadd.f32 %v5268_v43, %v5220_v42  ;;  %v2350_v45 = vpop.f32.mrf.mxu0 }
 0x19b   : > { %v2655_v46 = vpop.f32.mrf.mxu1 }
 0x19c   : > { %4604 = vst [vmem:[%s6098_s26 + $0x218] sm:$0xff] %v2664_v44  ;;  %v2656_v47 = vadd.f32 %v2655_v46, %v2350_v45  ;;  %v5223_v48 = vpop.f32.mrf.mxu0 }
 0x19d   : > { %v5271_v49 = vpop.f32.mrf.mxu1 }
 0x19e   : > { %4602 = vst [vmem:[%s6098_s26 + $0x208] sm:$0xff] %v2656_v47  ;;  %v2677_v50 = vadd.f32 %v5271_v49, %v5223_v48  ;;  %v2363_v51 = vpop.f32.mrf.mxu0 }
 0x19f   : > { %v2668_v52 = vpop.f32.mrf.mxu1 }
 0x1a0   : > { %4607 = vst [vmem:[%s6098_s26 + $0x230] sm:$0xff] %v2677_v50  ;;  %v2669_v53 = vadd.f32 %v2668_v52, %v2363_v51  ;;  %v5224_v54 = vpop.f32.mrf.mxu0 }
 0x1a1   : > { %v5272_v55 = vpop.f32.mrf.mxu1 }
 0x1a2   : > { %4605 = vst [vmem:[%s6098_s26 + $0x220] sm:$0xff] %v2669_v53  ;;  %v2680_v56 = vadd.f32 %v5272_v55, %v5224_v54  ;;  %v2366_v57 = vpop.f32.mrf.mxu0 }
 0x1a3   : > { %v2671_v58 = vpop.f32.mrf.mxu1 }
 0x1a4   : > { %4608 = vst [vmem:[%s6098_s26 + $0x238] sm:$0xff] %v2680_v56  ;;  %v2672_v59 = vadd.f32 %v2671_v58, %v2366_v57  ;;  %v5227_v60 = vpop.f32.mrf.mxu0 }
 0x1a5   : > { %v5275_v61 = vpop.f32.mrf.mxu1 }
 0x1a6   : > { %4606 = vst [vmem:[%s6098_s26 + $0x228] sm:$0xff] %v2672_v59  ;;  %v2693_v62 = vadd.f32 %v5275_v61, %v5227_v60  ;;  %v2379_v63 = vpop.f32.mrf.mxu0 }
 0x1a7   : > { %v2684_v0 = vpop.f32.mrf.mxu1 }
 0x1a8   : > { %4611 = vst [vmem:[%s6098_s26 + $0x250] sm:$0xff] %v2693_v62  ;;  %v2685_v1 = vadd.f32 %v2684_v0, %v2379_v63  ;;  %v5228_v2 = vpop.f32.mrf.mxu0 }
 0x1a9   : > { %v5276_v3 = vpop.f32.mrf.mxu1 }
 0x1aa   : > { %4609 = vst [vmem:[%s6098_s26 + $0x240] sm:$0xff] %v2685_v1  ;;  %v2696_v4 = vadd.f32 %v5276_v3, %v5228_v2  ;;  %v2382_v5 = vpop.f32.mrf.mxu0 }
 0x1ab   : > { %v2687_v6 = vpop.f32.mrf.mxu1 }
 0x1ac   : > { %4612 = vst [vmem:[%s6098_s26 + $0x258] sm:$0xff] %v2696_v4  ;;  %v2688_v7 = vadd.f32 %v2687_v6, %v2382_v5  ;;  %v5231_v8 = vpop.f32.mrf.mxu0 }
 0x1ad   : > { %v5279_v9 = vpop.f32.mrf.mxu1 }
 0x1ae   : > { %4610 = vst [vmem:[%s6098_s26 + $0x248] sm:$0xff] %v2688_v7  ;;  %v2709_v10 = vadd.f32 %v5279_v9, %v5231_v8  ;;  %v2395_v11 = vpop.f32.mrf.mxu0 }
 0x1af   : > { %v2700_v12 = vpop.f32.mrf.mxu1 }
 0x1b0   : > { %4615 = vst [vmem:[%s6098_s26 + $0x270] sm:$0xff] %v2709_v10  ;;  %v2701_v13 = vadd.f32 %v2700_v12, %v2395_v11  ;;  %v5232_v14 = vpop.f32.mrf.mxu0 }
 0x1b1   : > { %v5280_v15 = vpop.f32.mrf.mxu1 }
 0x1b2   : > { %4613 = vst [vmem:[%s6098_s26 + $0x260] sm:$0xff] %v2701_v13  ;;  %v2712_v16 = vadd.f32 %v5280_v15, %v5232_v14  ;;  %v2398_v17 = vpop.f32.mrf.mxu0 }
 0x1b3   : > { %v2703_v18 = vpop.f32.mrf.mxu1 }
 0x1b4   : > { %4616 = vst [vmem:[%s6098_s26 + $0x278] sm:$0xff] %v2712_v16  ;;  %v2704_v19 = vadd.f32 %v2703_v18, %v2398_v17  ;;  %v5235_v20 = vpop.f32.mrf.mxu0 }
 0x1b5   : > { %v5283_v21 = vpop.f32.mrf.mxu1 }
 0x1b6   : > { %4614 = vst [vmem:[%s6098_s26 + $0x268] sm:$0xff] %v2704_v19  ;;  %v2725_v22 = vadd.f32 %v5283_v21, %v5235_v20  ;;  %v2411_v23 = vpop.f32.mrf.mxu0 }
 0x1b7   : > { %v2716_v24 = vpop.f32.mrf.mxu1 }
 0x1b8   : > { %4619 = vst [vmem:[%s6098_s26 + $0x290] sm:$0xff] %v2725_v22  ;;  %v2717_v25 = vadd.f32 %v2716_v24, %v2411_v23  ;;  %v5236_v26 = vpop.f32.mrf.mxu0 }
 0x1b9   : > { %v5284_v27 = vpop.f32.mrf.mxu1 }
 0x1ba   : > { %4617 = vst [vmem:[%s6098_s26 + $0x280] sm:$0xff] %v2717_v25  ;;  %v2728_v28 = vadd.f32 %v5284_v27, %v5236_v26  ;;  %v2414_v29 = vpop.f32.mrf.mxu0 }
 0x1bb   : > { %v2719_v30 = vpop.f32.mrf.mxu1 }
 0x1bc   : > { %4620 = vst [vmem:[%s6098_s26 + $0x298] sm:$0xff] %v2728_v28  ;;  %v2720_v31 = vadd.f32 %v2719_v30, %v2414_v29  ;;  %v5239_v32 = vpop.f32.mrf.mxu0 }
 0x1bd   : > { %v5287_v33 = vpop.f32.mrf.mxu1 }
 0x1be   : > { %4618 = vst [vmem:[%s6098_s26 + $0x288] sm:$0xff] %v2720_v31  ;;  %v2741_v34 = vadd.f32 %v5287_v33, %v5239_v32  ;;  %v2427_v35 = vpop.f32.mrf.mxu0 }
 0x1bf   : > { %v2732_v36 = vpop.f32.mrf.mxu1 }
 0x1c0   : > { %4623 = vst [vmem:[%s6098_s26 + $0x2b0] sm:$0xff] %v2741_v34  ;;  %v2733_v37 = vadd.f32 %v2732_v36, %v2427_v35  ;;  %v5240_v38 = vpop.f32.mrf.mxu0 }
 0x1c1   : > { %v5288_v39 = vpop.f32.mrf.mxu1 }
 0x1c2   : > { %4621 = vst [vmem:[%s6098_s26 + $0x2a0] sm:$0xff] %v2733_v37  ;;  %v2744_v40 = vadd.f32 %v5288_v39, %v5240_v38  ;;  %v2430_v41 = vpop.f32.mrf.mxu0 }
 0x1c3   : > { %v2735_v42 = vpop.f32.mrf.mxu1 }
 0x1c4   : > { %4624 = vst [vmem:[%s6098_s26 + $0x2b8] sm:$0xff] %v2744_v40  ;;  %v2736_v43 = vadd.f32 %v2735_v42, %v2430_v41  ;;  %v5243_v44 = vpop.f32.mrf.mxu0 }
 0x1c5   : > { %v5291_v45 = vpop.f32.mrf.mxu1 }
 0x1c6   : > { %4622 = vst [vmem:[%s6098_s26 + $0x2a8] sm:$0xff] %v2736_v43  ;;  %v2757_v46 = vadd.f32 %v5291_v45, %v5243_v44  ;;  %v2443_v47 = vpop.f32.mrf.mxu0 }
 0x1c7   : > { %v2748_v48 = vpop.f32.mrf.mxu1 }
 0x1c8   : > { %4627 = vst [vmem:[%s6098_s26 + $0x2d0] sm:$0xff] %v2757_v46  ;;  %v2749_v49 = vadd.f32 %v2748_v48, %v2443_v47  ;;  %v5244_v50 = vpop.f32.mrf.mxu0 }
 0x1c9   : > { %v5292_v51 = vpop.f32.mrf.mxu1 }
 0x1ca   : > { %4625 = vst [vmem:[%s6098_s26 + $0x2c0] sm:$0xff] %v2749_v49  ;;  %v2760_v52 = vadd.f32 %v5292_v51, %v5244_v50  ;;  %v2446_v53 = vpop.f32.mrf.mxu0 }
 0x1cb   : > { %v2751_v54 = vpop.f32.mrf.mxu1 }
 0x1cc   : > { %4628 = vst [vmem:[%s6098_s26 + $0x2d8] sm:$0xff] %v2760_v52  ;;  %v2752_v55 = vadd.f32 %v2751_v54, %v2446_v53  ;;  %v5247_v56 = vpop.f32.mrf.mxu0 }
 0x1cd   : > { %v5295_v57 = vpop.f32.mrf.mxu1 }
 0x1ce   : > { %4626 = vst [vmem:[%s6098_s26 + $0x2c8] sm:$0xff] %v2752_v55  ;;  %v2773_v58 = vadd.f32 %v5295_v57, %v5247_v56  ;;  %v2459_v59 = vpop.f32.mrf.mxu0 }
 0x1cf   : > { %v2764_v60 = vpop.f32.mrf.mxu1 }
 0x1d0   : > { %4631 = vst [vmem:[%s6098_s26 + $0x2f0] sm:$0xff] %v2773_v58  ;;  %v2765_v61 = vadd.f32 %v2764_v60, %v2459_v59  ;;  %v5248_v62 = vpop.f32.mrf.mxu0 }
 0x1d1   : > { %v5296_v63 = vpop.f32.mrf.mxu1 }
 0x1d2   : > { %4629 = vst [vmem:[%s6098_s26 + $0x2e0] sm:$0xff] %v2765_v61  ;;  %v2776_v0 = vadd.f32 %v5296_v63, %v5248_v62  ;;  %v2462_v1 = vpop.f32.mrf.mxu0 }
 0x1d3   : > { %v2767_v2 = vpop.f32.mrf.mxu1 }
 0x1d4   : > { %4632 = vst [vmem:[%s6098_s26 + $0x2f8] sm:$0xff] %v2776_v0  ;;  %v2768_v3 = vadd.f32 %v2767_v2, %v2462_v1  ;;  %v5315_v4 = vpop.f32.mrf.mxu0 }
 0x1d5   : > { %v5363_v5 = vpop.f32.mrf.mxu1 }
 0x1d6   : > { %4630 = vst [vmem:[%s6098_s26 + $0x2e8] sm:$0xff] %v2768_v3  ;;  %v3403_v6 = vadd.f32 %v5363_v5, %v5315_v4  ;;  %v3089_v7 = vpop.f32.mrf.mxu0 }
 0x1d7   : > { %v3394_v8 = vpop.f32.mrf.mxu1 }
 0x1d8   : > { %4779 = vst [vmem:[%s6098_s26 + $0x310] sm:$0xff] %v3403_v6  ;;  %v3395_v9 = vadd.f32 %v3394_v8, %v3089_v7  ;;  %v5316_v10 = vpop.f32.mrf.mxu0 }
 0x1d9   : > { %v5364_v11 = vpop.f32.mrf.mxu1 }
 0x1da   : > { %4777 = vst [vmem:[%s6098_s26 + $0x300] sm:$0xff] %v3395_v9  ;;  %v3406_v12 = vadd.f32 %v5364_v11, %v5316_v10  ;;  %v3092_v13 = vpop.f32.mrf.mxu0 }
 0x1db   : > { %v3397_v14 = vpop.f32.mrf.mxu1 }
 0x1dc   : > { %4780 = vst [vmem:[%s6098_s26 + $0x318] sm:$0xff] %v3406_v12  ;;  %v3398_v15 = vadd.f32 %v3397_v14, %v3092_v13  ;;  %v5319_v16 = vpop.f32.mrf.mxu0 }
 0x1dd   : > { %v5367_v17 = vpop.f32.mrf.mxu1 }
 0x1de   : > { %4778 = vst [vmem:[%s6098_s26 + $0x308] sm:$0xff] %v3398_v15  ;;  %v3419_v18 = vadd.f32 %v5367_v17, %v5319_v16  ;;  %v3105_v19 = vpop.f32.mrf.mxu0 }
 0x1df   : > { %v3410_v20 = vpop.f32.mrf.mxu1 }
 0x1e0   : > { %4783 = vst [vmem:[%s6098_s26 + $0x330] sm:$0xff] %v3419_v18  ;;  %v3411_v21 = vadd.f32 %v3410_v20, %v3105_v19  ;;  %v5320_v22 = vpop.f32.mrf.mxu0 }
 0x1e1   : > { %v5368_v23 = vpop.f32.mrf.mxu1 }
 0x1e2   : > { %4781 = vst [vmem:[%s6098_s26 + $0x320] sm:$0xff] %v3411_v21  ;;  %v3422_v24 = vadd.f32 %v5368_v23, %v5320_v22  ;;  %v3108_v25 = vpop.f32.mrf.mxu0 }
 0x1e3   : > { %v3413_v26 = vpop.f32.mrf.mxu1 }
 0x1e4   : > { %4784 = vst [vmem:[%s6098_s26 + $0x338] sm:$0xff] %v3422_v24  ;;  %v3414_v27 = vadd.f32 %v3413_v26, %v3108_v25  ;;  %v5323_v28 = vpop.f32.mrf.mxu0 }
 0x1e5   : > { %v5371_v29 = vpop.f32.mrf.mxu1 }
 0x1e6   : > { %4782 = vst [vmem:[%s6098_s26 + $0x328] sm:$0xff] %v3414_v27  ;;  %v3435_v30 = vadd.f32 %v5371_v29, %v5323_v28  ;;  %v3121_v31 = vpop.f32.mrf.mxu0 }
 0x1e7   : > { %v3426_v32 = vpop.f32.mrf.mxu1 }
 0x1e8   : > { %4787 = vst [vmem:[%s6098_s26 + $0x350] sm:$0xff] %v3435_v30  ;;  %v3427_v33 = vadd.f32 %v3426_v32, %v3121_v31  ;;  %v5324_v34 = vpop.f32.mrf.mxu0 }
 0x1e9   : > { %v5372_v35 = vpop.f32.mrf.mxu1 }
 0x1ea   : > { %4785 = vst [vmem:[%s6098_s26 + $0x340] sm:$0xff] %v3427_v33  ;;  %v3438_v36 = vadd.f32 %v5372_v35, %v5324_v34  ;;  %v3124_v37 = vpop.f32.mrf.mxu0 }
 0x1eb   : > { %v3429_v38 = vpop.f32.mrf.mxu1 }
 0x1ec   : > { %4788 = vst [vmem:[%s6098_s26 + $0x358] sm:$0xff] %v3438_v36  ;;  %v3430_v39 = vadd.f32 %v3429_v38, %v3124_v37  ;;  %v5327_v40 = vpop.f32.mrf.mxu0  ;;  %v3847_v36 = vld [vmem:[%s6098_s26] sm:$0xff] (%p5727_p6)  ;;  %v3849_v37 = vld [vmem:[%s6098_s26 + $0x8] sm:$0xff] (%p5727_p6)  ;;  %v3851_v38 = vld [vmem:[%s6098_s26 + $0x10] sm:$0xff] (%p5727_p6) }
 0x1ed   : > { %v5375_v41 = vpop.f32.mrf.mxu1  ;;  %3848 = vst [vmem:[%s6263_s18] sm:$0xff] (%p5727_p6), %v3847_v36  ;;  %3850 = vst [vmem:[%s6263_s18 + $0x8] sm:$0xff] (%p5727_p6), %v3849_v37  ;;  %v3975_v36 = vld [vmem:[%s6098_s26 + $0x200] sm:$0xff] (%p5727_p6)  ;;  %v3977_v37 = vld [vmem:[%s6098_s26 + $0x208] sm:$0xff] (%p5727_p6) }
 0x1ee   : > { %4786 = vst [vmem:[%s6098_s26 + $0x348] sm:$0xff] %v3430_v39  ;;  %v3451_v42 = vadd.f32 %v5375_v41, %v5327_v40  ;;  %v3137_v43 = vpop.f32.mrf.mxu0  ;;  %v3853_v39 = vld [vmem:[%s6098_s26 + $0x18] sm:$0xff] (%p5727_p6)  ;;  %v3855_v40 = vld [vmem:[%s6098_s26 + $0x20] sm:$0xff] (%p5727_p6)  ;;  %v3857_v41 = vld [vmem:[%s6098_s26 + $0x28] sm:$0xff] (%p5727_p6) }
 0x1ef   : > { %v3442_v44 = vpop.f32.mrf.mxu1  ;;  %3852 = vst [vmem:[%s6263_s18 + $0x20] sm:$0xff] (%p5727_p6), %v3851_v38  ;;  %3854 = vst [vmem:[%s6263_s18 + $0x28] sm:$0xff] (%p5727_p6), %v3853_v39  ;;  %v3979_v38 = vld [vmem:[%s6098_s26 + $0x210] sm:$0xff] (%p5727_p6)  ;;  %v3981_v39 = vld [vmem:[%s6098_s26 + $0x218] sm:$0xff] (%p5727_p6) }
 0x1f0   : > { %4791 = vst [vmem:[%s6098_s26 + $0x370] sm:$0xff] %v3451_v42  ;;  %v3443_v45 = vadd.f32 %v3442_v44, %v3137_v43  ;;  %v5328_v46 = vpop.f32.mrf.mxu0  ;;  %3856 = vst [vmem:[%s6263_s18 + $0x40] sm:$0xff] (%p5727_p6), %v3855_v40  ;;  %v3859_v42 = vld [vmem:[%s6098_s26 + $0x30] sm:$0xff] (%p5727_p6)  ;;  %v3861_v43 = vld [vmem:[%s6098_s26 + $0x38] sm:$0xff] (%p5727_p6) }
 0x1f1   : > { %v5376_v47 = vpop.f32.mrf.mxu1  ;;  %3858 = vst [vmem:[%s6263_s18 + $0x48] sm:$0xff] (%p5727_p6), %v3857_v41  ;;  %v3863_v44 = vld [vmem:[%s6098_s26 + $0x40] sm:$0xff] (%p5727_p6)  ;;  %3860 = vst [vmem:[%s6263_s18 + $0x60] sm:$0xff] (%p5727_p6), %v3859_v42  ;;  %v3985_v41 = vld [vmem:[%s6098_s26 + $0x228] sm:$0xff] (%p5727_p6) }
 0x1f2   : > { %4789 = vst [vmem:[%s6098_s26 + $0x360] sm:$0xff] %v3443_v45  ;;  %v3454_v48 = vadd.f32 %v5376_v47, %v5328_v46  ;;  %v3140_v49 = vpop.f32.mrf.mxu0  ;;  %3862 = vst [vmem:[%s6263_s18 + $0x68] sm:$0xff] (%p5727_p6), %v3861_v43  ;;  %v3865_v45 = vld [vmem:[%s6098_s26 + $0x48] sm:$0xff] (%p5727_p6)  ;;  %v3867_v46 = vld [vmem:[%s6098_s26 + $0x50] sm:$0xff] (%p5727_p6) }
 0x1f3   : > { %v3445_v50 = vpop.f32.mrf.mxu1  ;;  %3864 = vst [vmem:[%s6263_s18 + $0x80] sm:$0xff] (%p5727_p6), %v3863_v44  ;;  %v3869_v47 = vld [vmem:[%s6098_s26 + $0x58] sm:$0xff] (%p5727_p6)  ;;  %3866 = vst [vmem:[%s6263_s18 + $0x88] sm:$0xff] (%p5727_p6), %v3865_v45  ;;  %v3983_v40 = vld [vmem:[%s6098_s26 + $0x220] sm:$0xff] (%p5727_p6) }
 0x1f4   : > { %4792 = vst [vmem:[%s6098_s26 + $0x378] sm:$0xff] %v3454_v48  ;;  %v3446_v51 = vadd.f32 %v3445_v50, %v3140_v49  ;;  %v5331_v52 = vpop.f32.mrf.mxu0  ;;  %3868 = vst [vmem:[%s6263_s18 + $0xa0] sm:$0xff] (%p5727_p6), %v3867_v46  ;;  %v3871_v48 = vld [vmem:[%s6098_s26 + $0x60] sm:$0xff] (%p5727_p6)  ;;  %v3873_v49 = vld [vmem:[%s6098_s26 + $0x68] sm:$0xff] (%p5727_p6) }
 0x1f5   : > { %v5379_v53 = vpop.f32.mrf.mxu1  ;;  %3870 = vst [vmem:[%s6263_s18 + $0xa8] sm:$0xff] (%p5727_p6), %v3869_v47  ;;  %v3875_v50 = vld [vmem:[%s6098_s26 + $0x70] sm:$0xff] (%p5727_p6)  ;;  %3872 = vst [vmem:[%s6263_s18 + $0xc0] sm:$0xff] (%p5727_p6), %v3871_v48  ;;  %v3989_v43 = vld [vmem:[%s6098_s26 + $0x238] sm:$0xff] (%p5727_p6) }
 0x1f6   : > { %4790 = vst [vmem:[%s6098_s26 + $0x368] sm:$0xff] %v3446_v51  ;;  %v3467_v54 = vadd.f32 %v5379_v53, %v5331_v52  ;;  %v3153_v55 = vpop.f32.mrf.mxu0  ;;  %3874 = vst [vmem:[%s6263_s18 + $0xc8] sm:$0xff] (%p5727_p6), %v3873_v49  ;;  %v3877_v51 = vld [vmem:[%s6098_s26 + $0x78] sm:$0xff] (%p5727_p6)  ;;  %v3879_v52 = vld [vmem:[%s6098_s26 + $0x80] sm:$0xff] (%p5727_p6) }
 0x1f7   : > { %v3458_v56 = vpop.f32.mrf.mxu1  ;;  %3876 = vst [vmem:[%s6263_s18 + $0xe0] sm:$0xff] (%p5727_p6), %v3875_v50  ;;  %v3881_v53 = vld [vmem:[%s6098_s26 + $0x88] sm:$0xff] (%p5727_p6)  ;;  %3878 = vst [vmem:[%s6263_s18 + $0xe8] sm:$0xff] (%p5727_p6), %v3877_v51  ;;  %v3987_v42 = vld [vmem:[%s6098_s26 + $0x230] sm:$0xff] (%p5727_p6) }
 0x1f8   : > { %4795 = vst [vmem:[%s6098_s26 + $0x390] sm:$0xff] %v3467_v54  ;;  %v3459_v57 = vadd.f32 %v3458_v56, %v3153_v55  ;;  %v5332_v58 = vpop.f32.mrf.mxu0  ;;  %3880 = vst [vmem:[%s6263_s18 + $0x100] sm:$0xff] (%p5727_p6), %v3879_v52  ;;  %v3883_v54 = vld [vmem:[%s6098_s26 + $0x90] sm:$0xff] (%p5727_p6)  ;;  %v3885_v55 = vld [vmem:[%s6098_s26 + $0x98] sm:$0xff] (%p5727_p6) }
 0x1f9   : > { %v5380_v59 = vpop.f32.mrf.mxu1  ;;  %3882 = vst [vmem:[%s6263_s18 + $0x108] sm:$0xff] (%p5727_p6), %v3881_v53  ;;  %v3887_v56 = vld [vmem:[%s6098_s26 + $0xa0] sm:$0xff] (%p5727_p6)  ;;  %3884 = vst [vmem:[%s6263_s18 + $0x120] sm:$0xff] (%p5727_p6), %v3883_v54  ;;  %v3993_v45 = vld [vmem:[%s6098_s26 + $0x248] sm:$0xff] (%p5727_p6) }
 0x1fa   : > { %4793 = vst [vmem:[%s6098_s26 + $0x380] sm:$0xff] %v3459_v57  ;;  %v3470_v60 = vadd.f32 %v5380_v59, %v5332_v58  ;;  %v3156_v61 = vpop.f32.mrf.mxu0  ;;  %3886 = vst [vmem:[%s6263_s18 + $0x128] sm:$0xff] (%p5727_p6), %v3885_v55  ;;  %v3889_v57 = vld [vmem:[%s6098_s26 + $0xa8] sm:$0xff] (%p5727_p6)  ;;  %v3891_v58 = vld [vmem:[%s6098_s26 + $0xb0] sm:$0xff] (%p5727_p6) }
 0x1fb   : > { %v3461_v62 = vpop.f32.mrf.mxu1  ;;  %3888 = vst [vmem:[%s6263_s18 + $0x140] sm:$0xff] (%p5727_p6), %v3887_v56  ;;  %v3893_v59 = vld [vmem:[%s6098_s26 + $0xb8] sm:$0xff] (%p5727_p6)  ;;  %3890 = vst [vmem:[%s6263_s18 + $0x148] sm:$0xff] (%p5727_p6), %v3889_v57  ;;  %v3991_v44 = vld [vmem:[%s6098_s26 + $0x240] sm:$0xff] (%p5727_p6) }
 0x1fc   : > { %4796 = vst [vmem:[%s6098_s26 + $0x398] sm:$0xff] %v3470_v60  ;;  %v3462_v63 = vadd.f32 %v3461_v62, %v3156_v61  ;;  %v5335_v0 = vpop.f32.mrf.mxu0  ;;  %3892 = vst [vmem:[%s6263_s18 + $0x160] sm:$0xff] (%p5727_p6), %v3891_v58  ;;  %v3895_v60 = vld [vmem:[%s6098_s26 + $0xc0] sm:$0xff] (%p5727_p6)  ;;  %v3897_v61 = vld [vmem:[%s6098_s26 + $0xc8] sm:$0xff] (%p5727_p6) }
 0x1fd   : > { %v5383_v1 = vpop.f32.mrf.mxu1  ;;  %3894 = vst [vmem:[%s6263_s18 + $0x168] sm:$0xff] (%p5727_p6), %v3893_v59  ;;  %v3899_v62 = vld [vmem:[%s6098_s26 + $0xd0] sm:$0xff] (%p5727_p6)  ;;  %3896 = vst [vmem:[%s6263_s18 + $0x180] sm:$0xff] (%p5727_p6), %v3895_v60  ;;  %v3997_v47 = vld [vmem:[%s6098_s26 + $0x258] sm:$0xff] (%p5727_p6) }
 0x1fe   : > { %4794 = vst [vmem:[%s6098_s26 + $0x388] sm:$0xff] %v3462_v63  ;;  %v3483_v2 = vadd.f32 %v5383_v1, %v5335_v0  ;;  %v3169_v3 = vpop.f32.mrf.mxu0  ;;  %3898 = vst [vmem:[%s6263_s18 + $0x188] sm:$0xff] (%p5727_p6), %v3897_v61  ;;  %v3901_v63 = vld [vmem:[%s6098_s26 + $0xd8] sm:$0xff] (%p5727_p6)  ;;  %v3903_v0 = vld [vmem:[%s6098_s26 + $0xe0] sm:$0xff] (%p5727_p6) }
 0x1ff   : > { %v3474_v4 = vpop.f32.mrf.mxu1  ;;  %3900 = vst [vmem:[%s6263_s18 + $0x1a0] sm:$0xff] (%p5727_p6), %v3899_v62  ;;  %v3905_v1 = vld [vmem:[%s6098_s26 + $0xe8] sm:$0xff] (%p5727_p6)  ;;  %3902 = vst [vmem:[%s6263_s18 + $0x1a8] sm:$0xff] (%p5727_p6), %v3901_v63  ;;  %v3995_v46 = vld [vmem:[%s6098_s26 + $0x250] sm:$0xff] (%p5727_p6) }
 0x200   : > { %4799 = vst [vmem:[%s6098_s26 + $0x3b0] sm:$0xff] %v3483_v2  ;;  %v3475_v5 = vadd.f32 %v3474_v4, %v3169_v3  ;;  %v5336_v6 = vpop.f32.mrf.mxu0  ;;  %3904 = vst [vmem:[%s6263_s18 + $0x1c0] sm:$0xff] (%p5727_p6), %v3903_v0  ;;  %v3907_v2 = vld [vmem:[%s6098_s26 + $0xf0] sm:$0xff] (%p5727_p6)  ;;  %v3909_v3 = vld [vmem:[%s6098_s26 + $0xf8] sm:$0xff] (%p5727_p6) }
 0x201   : > { %v5384_v7 = vpop.f32.mrf.mxu1  ;;  %3906 = vst [vmem:[%s6263_s18 + $0x1c8] sm:$0xff] (%p5727_p6), %v3905_v1  ;;  %v3911_v4 = vld [vmem:[%s6098_s26 + $0x100] sm:$0xff] (%p5727_p6)  ;;  %3908 = vst [vmem:[%s6263_s18 + $0x1e0] sm:$0xff] (%p5727_p6), %v3907_v2  ;;  %v4001_v49 = vld [vmem:[%s6098_s26 + $0x268] sm:$0xff] (%p5727_p6) }
 0x202   : > { %4797 = vst [vmem:[%s6098_s26 + $0x3a0] sm:$0xff] %v3475_v5  ;;  %v3486_v8 = vadd.f32 %v5384_v7, %v5336_v6  ;;  %v3172_v9 = vpop.f32.mrf.mxu0  ;;  %3910 = vst [vmem:[%s6263_s18 + $0x1e8] sm:$0xff] (%p5727_p6), %v3909_v3  ;;  %v3913_v5 = vld [vmem:[%s6098_s26 + $0x108] sm:$0xff] (%p5727_p6)  ;;  %v3915_v6 = vld [vmem:[%s6098_s26 + $0x110] sm:$0xff] (%p5727_p6) }
 0x203   : > { %v3477_v10 = vpop.f32.mrf.mxu1  ;;  %3912 = vst [vmem:[%s6263_s18 + $0x200] sm:$0xff] (%p5727_p6), %v3911_v4  ;;  %v3917_v7 = vld [vmem:[%s6098_s26 + $0x118] sm:$0xff] (%p5727_p6)  ;;  %3914 = vst [vmem:[%s6263_s18 + $0x208] sm:$0xff] (%p5727_p6), %v3913_v5  ;;  %v3999_v48 = vld [vmem:[%s6098_s26 + $0x260] sm:$0xff] (%p5727_p6) }
 0x204   : > { %4800 = vst [vmem:[%s6098_s26 + $0x3b8] sm:$0xff] %v3486_v8  ;;  %v3478_v11 = vadd.f32 %v3477_v10, %v3172_v9  ;;  %v5339_v12 = vpop.f32.mrf.mxu0  ;;  %3916 = vst [vmem:[%s6263_s18 + $0x220] sm:$0xff] (%p5727_p6), %v3915_v6  ;;  %v3919_v8 = vld [vmem:[%s6098_s26 + $0x120] sm:$0xff] (%p5727_p6)  ;;  %v3921_v9 = vld [vmem:[%s6098_s26 + $0x128] sm:$0xff] (%p5727_p6) }
 0x205   : > { %v5387_v13 = vpop.f32.mrf.mxu1  ;;  %3918 = vst [vmem:[%s6263_s18 + $0x228] sm:$0xff] (%p5727_p6), %v3917_v7  ;;  %v3923_v10 = vld [vmem:[%s6098_s26 + $0x130] sm:$0xff] (%p5727_p6)  ;;  %3920 = vst [vmem:[%s6263_s18 + $0x240] sm:$0xff] (%p5727_p6), %v3919_v8  ;;  %v4005_v51 = vld [vmem:[%s6098_s26 + $0x278] sm:$0xff] (%p5727_p6) }
 0x206   : > { %4798 = vst [vmem:[%s6098_s26 + $0x3a8] sm:$0xff] %v3478_v11  ;;  %v3499_v14 = vadd.f32 %v5387_v13, %v5339_v12  ;;  %v3185_v15 = vpop.f32.mrf.mxu0  ;;  %3922 = vst [vmem:[%s6263_s18 + $0x248] sm:$0xff] (%p5727_p6), %v3921_v9  ;;  %v3925_v11 = vld [vmem:[%s6098_s26 + $0x138] sm:$0xff] (%p5727_p6)  ;;  %v3927_v12 = vld [vmem:[%s6098_s26 + $0x140] sm:$0xff] (%p5727_p6) }
 0x207   : > { %v3490_v16 = vpop.f32.mrf.mxu1  ;;  %3924 = vst [vmem:[%s6263_s18 + $0x260] sm:$0xff] (%p5727_p6), %v3923_v10  ;;  %v3929_v13 = vld [vmem:[%s6098_s26 + $0x148] sm:$0xff] (%p5727_p6)  ;;  %3926 = vst [vmem:[%s6263_s18 + $0x268] sm:$0xff] (%p5727_p6), %v3925_v11  ;;  %v4003_v50 = vld [vmem:[%s6098_s26 + $0x270] sm:$0xff] (%p5727_p6) }
 0x208   : > { %4803 = vst [vmem:[%s6098_s26 + $0x3d0] sm:$0xff] %v3499_v14  ;;  %v3491_v17 = vadd.f32 %v3490_v16, %v3185_v15  ;;  %v5340_v18 = vpop.f32.mrf.mxu0  ;;  %3928 = vst [vmem:[%s6263_s18 + $0x280] sm:$0xff] (%p5727_p6), %v3927_v12  ;;  %v3931_v14 = vld [vmem:[%s6098_s26 + $0x150] sm:$0xff] (%p5727_p6)  ;;  %v3933_v15 = vld [vmem:[%s6098_s26 + $0x158] sm:$0xff] (%p5727_p6) }
 0x209   : > { %v5388_v19 = vpop.f32.mrf.mxu1  ;;  %3930 = vst [vmem:[%s6263_s18 + $0x288] sm:$0xff] (%p5727_p6), %v3929_v13  ;;  %v3935_v16 = vld [vmem:[%s6098_s26 + $0x160] sm:$0xff] (%p5727_p6)  ;;  %3932 = vst [vmem:[%s6263_s18 + $0x2a0] sm:$0xff] (%p5727_p6), %v3931_v14  ;;  %v4009_v53 = vld [vmem:[%s6098_s26 + $0x288] sm:$0xff] (%p5727_p6) }
 0x20a   : > { %4801 = vst [vmem:[%s6098_s26 + $0x3c0] sm:$0xff] %v3491_v17  ;;  %v3502_v20 = vadd.f32 %v5388_v19, %v5340_v18  ;;  %v3188_v21 = vpop.f32.mrf.mxu0  ;;  %3934 = vst [vmem:[%s6263_s18 + $0x2a8] sm:$0xff] (%p5727_p6), %v3933_v15  ;;  %v3937_v17 = vld [vmem:[%s6098_s26 + $0x168] sm:$0xff] (%p5727_p6)  ;;  %v3939_v18 = vld [vmem:[%s6098_s26 + $0x170] sm:$0xff] (%p5727_p6) }
 0x20b   : > { %v3493_v22 = vpop.f32.mrf.mxu1  ;;  %3936 = vst [vmem:[%s6263_s18 + $0x2c0] sm:$0xff] (%p5727_p6), %v3935_v16  ;;  %v3941_v19 = vld [vmem:[%s6098_s26 + $0x178] sm:$0xff] (%p5727_p6)  ;;  %3938 = vst [vmem:[%s6263_s18 + $0x2c8] sm:$0xff] (%p5727_p6), %v3937_v17  ;;  %v4007_v52 = vld [vmem:[%s6098_s26 + $0x280] sm:$0xff] (%p5727_p6) }
 0x20c   : > { %4804 = vst [vmem:[%s6098_s26 + $0x3d8] sm:$0xff] %v3502_v20  ;;  %v3494_v23 = vadd.f32 %v3493_v22, %v3188_v21  ;;  %v5343_v24 = vpop.f32.mrf.mxu0  ;;  %3940 = vst [vmem:[%s6263_s18 + $0x2e0] sm:$0xff] (%p5727_p6), %v3939_v18  ;;  %v3943_v20 = vld [vmem:[%s6098_s26 + $0x180] sm:$0xff] (%p5727_p6)  ;;  %v3945_v21 = vld [vmem:[%s6098_s26 + $0x188] sm:$0xff] (%p5727_p6) }
 0x20d   : > { %v5391_v25 = vpop.f32.mrf.mxu1  ;;  %3942 = vst [vmem:[%s6263_s18 + $0x2e8] sm:$0xff] (%p5727_p6), %v3941_v19  ;;  %v3947_v22 = vld [vmem:[%s6098_s26 + $0x190] sm:$0xff] (%p5727_p6)  ;;  %3944 = vst [vmem:[%s6263_s18 + $0x300] sm:$0xff] (%p5727_p6), %v3943_v20  ;;  %v4013_v55 = vld [vmem:[%s6098_s26 + $0x298] sm:$0xff] (%p5727_p6) }
 0x20e   : > { %4802 = vst [vmem:[%s6098_s26 + $0x3c8] sm:$0xff] %v3494_v23  ;;  %v3515_v26 = vadd.f32 %v5391_v25, %v5343_v24  ;;  %v3201_v27 = vpop.f32.mrf.mxu0  ;;  %3946 = vst [vmem:[%s6263_s18 + $0x308] sm:$0xff] (%p5727_p6), %v3945_v21  ;;  %v3949_v23 = vld [vmem:[%s6098_s26 + $0x198] sm:$0xff] (%p5727_p6)  ;;  %v3951_v24 = vld [vmem:[%s6098_s26 + $0x1a0] sm:$0xff] (%p5727_p6) }
 0x20f   : > { %v3506_v28 = vpop.f32.mrf.mxu1  ;;  %3948 = vst [vmem:[%s6263_s18 + $0x320] sm:$0xff] (%p5727_p6), %v3947_v22  ;;  %v3953_v25 = vld [vmem:[%s6098_s26 + $0x1a8] sm:$0xff] (%p5727_p6)  ;;  %3950 = vst [vmem:[%s6263_s18 + $0x328] sm:$0xff] (%p5727_p6), %v3949_v23  ;;  %v4011_v54 = vld [vmem:[%s6098_s26 + $0x290] sm:$0xff] (%p5727_p6) }
 0x210   : > { %4807 = vst [vmem:[%s6098_s26 + $0x3f0] sm:$0xff] %v3515_v26  ;;  %v3507_v29 = vadd.f32 %v3506_v28, %v3201_v27  ;;  %v5344_v30 = vpop.f32.mrf.mxu0  ;;  %3952 = vst [vmem:[%s6263_s18 + $0x340] sm:$0xff] (%p5727_p6), %v3951_v24  ;;  %v3955_v26 = vld [vmem:[%s6098_s26 + $0x1b0] sm:$0xff] (%p5727_p6)  ;;  %v3957_v27 = vld [vmem:[%s6098_s26 + $0x1b8] sm:$0xff] (%p5727_p6) }
 0x211   : > { %v5392_v31 = vpop.f32.mrf.mxu1  ;;  %3954 = vst [vmem:[%s6263_s18 + $0x348] sm:$0xff] (%p5727_p6), %v3953_v25  ;;  %v3959_v28 = vld [vmem:[%s6098_s26 + $0x1c0] sm:$0xff] (%p5727_p6)  ;;  %3956 = vst [vmem:[%s6263_s18 + $0x360] sm:$0xff] (%p5727_p6), %v3955_v26  ;;  %v4017_v57 = vld [vmem:[%s6098_s26 + $0x2a8] sm:$0xff] (%p5727_p6) }
 0x212   : > { %4805 = vst [vmem:[%s6098_s26 + $0x3e0] sm:$0xff] %v3507_v29  ;;  %v3518_v32 = vadd.f32 %v5392_v31, %v5344_v30  ;;  %v3204_v33 = vpop.f32.mrf.mxu0  ;;  %3560 = sbr.rel (!%p5727_p6) target bundleno = 568 (0x238), region = 118  ;;  %3958 = vst [vmem:[%s6263_s18 + $0x368] sm:$0xff] (%p5727_p6), %v3957_v27  ;;  %v3961_v29 = vld [vmem:[%s6098_s26 + $0x1c8] sm:$0xff] (%p5727_p6)  ;;  %v3963_v30 = vld [vmem:[%s6098_s26 + $0x1d0] sm:$0xff] (%p5727_p6) }
 0x213   : > { %v3509_v34 = vpop.f32.mrf.mxu1  ;;  %3960 = vst [vmem:[%s6263_s18 + $0x380] sm:$0xff] (%p5727_p6), %v3959_v28  ;;  %v3965_v31 = vld [vmem:[%s6098_s26 + $0x1d8] sm:$0xff] (%p5727_p6)  ;;  %3962 = vst [vmem:[%s6263_s18 + $0x388] sm:$0xff] (%p5727_p6), %v3961_v29  ;;  %v4015_v56 = vld [vmem:[%s6098_s26 + $0x2a0] sm:$0xff] (%p5727_p6) }
 0x214   : > { %4808 = vst [vmem:[%s6098_s26 + $0x3f8] sm:$0xff] %v3518_v32  ;;  %v3510_v35 = vadd.f32 %v3509_v34, %v3204_v33  ;;  %3964 = vst [vmem:[%s6263_s18 + $0x3a0] sm:$0xff] (%p5727_p6), %v3963_v30  ;;  %v3967_v32 = vld [vmem:[%s6098_s26 + $0x1e0] sm:$0xff] (%p5727_p6)  ;;  %v3969_v33 = vld [vmem:[%s6098_s26 + $0x1e8] sm:$0xff] (%p5727_p6) }
 0x215   : > { %3966 = vst [vmem:[%s6263_s18 + $0x3a8] sm:$0xff] (%p5727_p6), %v3965_v31  ;;  %v3971_v34 = vld [vmem:[%s6098_s26 + $0x1f0] sm:$0xff] (%p5727_p6)  ;;  %3968 = vst [vmem:[%s6263_s18 + $0x3c0] sm:$0xff] (%p5727_p6), %v3967_v32  ;;  %v4021_v59 = vld [vmem:[%s6098_s26 + $0x2b8] sm:$0xff] (%p5727_p6) }
 0x216   : > { %4806 = vst [vmem:[%s6098_s26 + $0x3e8] sm:$0xff] %v3510_v35  ;;  %3970 = vst [vmem:[%s6263_s18 + $0x3c8] sm:$0xff] (%p5727_p6), %v3969_v33  ;;  %v3973_v35 = vld [vmem:[%s6098_s26 + $0x1f8] sm:$0xff] (%p5727_p6)  ;;  %v4019_v58 = vld [vmem:[%s6098_s26 + $0x2b0] sm:$0xff] (%p5727_p6) }
 0x217   : > { %3972 = vst [vmem:[%s6263_s18 + $0x3e0] sm:$0xff] %v3971_v34  ;;  %3974 = vst [vmem:[%s6263_s18 + $0x3e8] sm:$0xff] %v3973_v35  ;;  %v4023_v60 = vld [vmem:[%s6098_s26 + $0x2c0] sm:$0xff]  ;;  %v4025_v61 = vld [vmem:[%s6098_s26 + $0x2c8] sm:$0xff] }
 0x218   : > { %3976 = vst [vmem:[%s6263_s18 + $0x400] sm:$0xff] %v3975_v36  ;;  %3978 = vst [vmem:[%s6263_s18 + $0x408] sm:$0xff] %v3977_v37  ;;  %v4027_v62 = vld [vmem:[%s6098_s26 + $0x2d0] sm:$0xff]  ;;  %v4029_v63 = vld [vmem:[%s6098_s26 + $0x2d8] sm:$0xff] }
 0x219   : > { %3980 = vst [vmem:[%s6263_s18 + $0x420] sm:$0xff] %v3979_v38  ;;  %3982 = vst [vmem:[%s6263_s18 + $0x428] sm:$0xff] %v3981_v39  ;;  %v4031_v0 = vld [vmem:[%s6098_s26 + $0x2e0] sm:$0xff]  ;;  %v4033_v1 = vld [vmem:[%s6098_s26 + $0x2e8] sm:$0xff] }
 0x21a   : > { %3984 = vst [vmem:[%s6263_s18 + $0x440] sm:$0xff] %v3983_v40  ;;  %3986 = vst [vmem:[%s6263_s18 + $0x448] sm:$0xff] %v3985_v41  ;;  %v4035_v2 = vld [vmem:[%s6098_s26 + $0x2f0] sm:$0xff]  ;;  %v4037_v3 = vld [vmem:[%s6098_s26 + $0x2f8] sm:$0xff] }
 0x21b   : > { %3988 = vst [vmem:[%s6263_s18 + $0x460] sm:$0xff] %v3987_v42  ;;  %3990 = vst [vmem:[%s6263_s18 + $0x468] sm:$0xff] %v3989_v43  ;;  %v4039_v4 = vld [vmem:[%s6098_s26 + $0x300] sm:$0xff]  ;;  %v4041_v5 = vld [vmem:[%s6098_s26 + $0x308] sm:$0xff] }
 0x21c   : > { %3992 = vst [vmem:[%s6263_s18 + $0x480] sm:$0xff] %v3991_v44  ;;  %3994 = vst [vmem:[%s6263_s18 + $0x488] sm:$0xff] %v3993_v45  ;;  %v4043_v6 = vld [vmem:[%s6098_s26 + $0x310] sm:$0xff]  ;;  %v4045_v7 = vld [vmem:[%s6098_s26 + $0x318] sm:$0xff] }
 0x21d   : > { %3996 = vst [vmem:[%s6263_s18 + $0x4a0] sm:$0xff] %v3995_v46  ;;  %3998 = vst [vmem:[%s6263_s18 + $0x4a8] sm:$0xff] %v3997_v47  ;;  %v4047_v8 = vld [vmem:[%s6098_s26 + $0x320] sm:$0xff]  ;;  %v4049_v9 = vld [vmem:[%s6098_s26 + $0x328] sm:$0xff] }
 0x21e   : > { %4000 = vst [vmem:[%s6263_s18 + $0x4c0] sm:$0xff] %v3999_v48  ;;  %4002 = vst [vmem:[%s6263_s18 + $0x4c8] sm:$0xff] %v4001_v49  ;;  %v4051_v10 = vld [vmem:[%s6098_s26 + $0x330] sm:$0xff]  ;;  %v4053_v11 = vld [vmem:[%s6098_s26 + $0x338] sm:$0xff] }
 0x21f   : > { %4004 = vst [vmem:[%s6263_s18 + $0x4e0] sm:$0xff] %v4003_v50  ;;  %4006 = vst [vmem:[%s6263_s18 + $0x4e8] sm:$0xff] %v4005_v51  ;;  %v4055_v12 = vld [vmem:[%s6098_s26 + $0x340] sm:$0xff]  ;;  %v4057_v13 = vld [vmem:[%s6098_s26 + $0x348] sm:$0xff] }
 0x220   : > { %4008 = vst [vmem:[%s6263_s18 + $0x500] sm:$0xff] %v4007_v52  ;;  %4010 = vst [vmem:[%s6263_s18 + $0x508] sm:$0xff] %v4009_v53  ;;  %v4059_v14 = vld [vmem:[%s6098_s26 + $0x350] sm:$0xff]  ;;  %v4061_v15 = vld [vmem:[%s6098_s26 + $0x358] sm:$0xff] }
 0x221   : > { %4012 = vst [vmem:[%s6263_s18 + $0x520] sm:$0xff] %v4011_v54  ;;  %4014 = vst [vmem:[%s6263_s18 + $0x528] sm:$0xff] %v4013_v55  ;;  %v4063_v16 = vld [vmem:[%s6098_s26 + $0x360] sm:$0xff]  ;;  %v4065_v17 = vld [vmem:[%s6098_s26 + $0x368] sm:$0xff] }
 0x222   : > { %4016 = vst [vmem:[%s6263_s18 + $0x540] sm:$0xff] %v4015_v56  ;;  %4018 = vst [vmem:[%s6263_s18 + $0x548] sm:$0xff] %v4017_v57  ;;  %v4067_v18 = vld [vmem:[%s6098_s26 + $0x370] sm:$0xff]  ;;  %v4069_v19 = vld [vmem:[%s6098_s26 + $0x378] sm:$0xff] }
 0x223   : > { %4020 = vst [vmem:[%s6263_s18 + $0x560] sm:$0xff] %v4019_v58  ;;  %4022 = vst [vmem:[%s6263_s18 + $0x568] sm:$0xff] %v4021_v59  ;;  %v4071_v20 = vld [vmem:[%s6098_s26 + $0x380] sm:$0xff]  ;;  %v4073_v21 = vld [vmem:[%s6098_s26 + $0x388] sm:$0xff] }
 0x224   : > { %4024 = vst [vmem:[%s6263_s18 + $0x580] sm:$0xff] %v4023_v60  ;;  %4026 = vst [vmem:[%s6263_s18 + $0x588] sm:$0xff] %v4025_v61  ;;  %v4075_v22 = vld [vmem:[%s6098_s26 + $0x390] sm:$0xff]  ;;  %v4077_v23 = vld [vmem:[%s6098_s26 + $0x398] sm:$0xff] }
 0x225   : > { %4028 = vst [vmem:[%s6263_s18 + $0x5a0] sm:$0xff] %v4027_v62  ;;  %4030 = vst [vmem:[%s6263_s18 + $0x5a8] sm:$0xff] %v4029_v63  ;;  %v4079_v24 = vld [vmem:[%s6098_s26 + $0x3a0] sm:$0xff]  ;;  %v4081_v25 = vld [vmem:[%s6098_s26 + $0x3a8] sm:$0xff] }
 0x226   : > { %4032 = vst [vmem:[%s6263_s18 + $0x5c0] sm:$0xff] %v4031_v0  ;;  %4034 = vst [vmem:[%s6263_s18 + $0x5c8] sm:$0xff] %v4033_v1  ;;  %v4083_v26 = vld [vmem:[%s6098_s26 + $0x3b0] sm:$0xff]  ;;  %v4085_v27 = vld [vmem:[%s6098_s26 + $0x3b8] sm:$0xff] }
 0x227   : > { %4036 = vst [vmem:[%s6263_s18 + $0x5e0] sm:$0xff] %v4035_v2  ;;  %4038 = vst [vmem:[%s6263_s18 + $0x5e8] sm:$0xff] %v4037_v3  ;;  %v4087_v28 = vld [vmem:[%s6098_s26 + $0x3c0] sm:$0xff]  ;;  %v4089_v29 = vld [vmem:[%s6098_s26 + $0x3c8] sm:$0xff] }
 0x228   : > { %4040 = vst [vmem:[%s6263_s18 + $0x600] sm:$0xff] %v4039_v4  ;;  %4042 = vst [vmem:[%s6263_s18 + $0x608] sm:$0xff] %v4041_v5  ;;  %v4091_v30 = vld [vmem:[%s6098_s26 + $0x3d0] sm:$0xff]  ;;  %v4093_v31 = vld [vmem:[%s6098_s26 + $0x3d8] sm:$0xff] }
 0x229   : > { %4044 = vst [vmem:[%s6263_s18 + $0x620] sm:$0xff] %v4043_v6  ;;  %4046 = vst [vmem:[%s6263_s18 + $0x628] sm:$0xff] %v4045_v7  ;;  %v4095_v32 = vld [vmem:[%s6098_s26 + $0x3e0] sm:$0xff]  ;;  %v4097_v33 = vld [vmem:[%s6098_s26 + $0x3e8] sm:$0xff] }
 0x22a   : > { %4048 = vst [vmem:[%s6263_s18 + $0x640] sm:$0xff] %v4047_v8  ;;  %4050 = vst [vmem:[%s6263_s18 + $0x648] sm:$0xff] %v4049_v9  ;;  %v4099_v34 = vld [vmem:[%s6098_s26 + $0x3f0] sm:$0xff]  ;;  %v4101_v35 = vld [vmem:[%s6098_s26 + $0x3f8] sm:$0xff] }
 0x22b   : > { %4052 = vst [vmem:[%s6263_s18 + $0x660] sm:$0xff] %v4051_v10  ;;  %4054 = vst [vmem:[%s6263_s18 + $0x668] sm:$0xff] %v4053_v11 }
 0x22c   : > { %4056 = vst [vmem:[%s6263_s18 + $0x680] sm:$0xff] %v4055_v12  ;;  %4058 = vst [vmem:[%s6263_s18 + $0x688] sm:$0xff] %v4057_v13 }
 0x22d   : > { %4060 = vst [vmem:[%s6263_s18 + $0x6a0] sm:$0xff] %v4059_v14  ;;  %4062 = vst [vmem:[%s6263_s18 + $0x6a8] sm:$0xff] %v4061_v15 }
 0x22e   : > { %4064 = vst [vmem:[%s6263_s18 + $0x6c0] sm:$0xff] %v4063_v16  ;;  %4066 = vst [vmem:[%s6263_s18 + $0x6c8] sm:$0xff] %v4065_v17 }
 0x22f   : > { %4068 = vst [vmem:[%s6263_s18 + $0x6e0] sm:$0xff] %v4067_v18  ;;  %4070 = vst [vmem:[%s6263_s18 + $0x6e8] sm:$0xff] %v4069_v19 }
 0x230   : > { %4072 = vst [vmem:[%s6263_s18 + $0x700] sm:$0xff] %v4071_v20  ;;  %4074 = vst [vmem:[%s6263_s18 + $0x708] sm:$0xff] %v4073_v21 }
 0x231   : > { %4076 = vst [vmem:[%s6263_s18 + $0x720] sm:$0xff] %v4075_v22  ;;  %4078 = vst [vmem:[%s6263_s18 + $0x728] sm:$0xff] %v4077_v23 }
 0x232   : > { %4080 = vst [vmem:[%s6263_s18 + $0x740] sm:$0xff] %v4079_v24  ;;  %4082 = vst [vmem:[%s6263_s18 + $0x748] sm:$0xff] %v4081_v25 }
 0x233   : > { %4084 = vst [vmem:[%s6263_s18 + $0x760] sm:$0xff] %v4083_v26  ;;  %4086 = vst [vmem:[%s6263_s18 + $0x768] sm:$0xff] %v4085_v27 }
 0x234   : > { %4088 = vst [vmem:[%s6263_s18 + $0x780] sm:$0xff] %v4087_v28  ;;  %4090 = vst [vmem:[%s6263_s18 + $0x788] sm:$0xff] %v4089_v29 }
 0x235   : > { %4092 = vst [vmem:[%s6263_s18 + $0x7a0] sm:$0xff] %v4091_v30  ;;  %4094 = vst [vmem:[%s6263_s18 + $0x7a8] sm:$0xff] %v4093_v31 }
 0x236   : > { %4096 = vst [vmem:[%s6263_s18 + $0x7c0] sm:$0xff] %v4095_v32  ;;  %4098 = vst [vmem:[%s6263_s18 + $0x7c8] sm:$0xff] %v4097_v33 }
 0x237   : > { %4100 = vst [vmem:[%s6263_s18 + $0x7e0] sm:$0xff] %v4099_v34  ;;  %4102 = vst [vmem:[%s6263_s18 + $0x7e8] sm:$0xff] %v4101_v35 }
 0x238 PF: > { %s13_s16 = sadd.s32 1, %s5666_s16   ;;  %s6539_s12 = smov %s5654_s13 }
 0x239   : > { %p10_p11 = scmp.ge.s32.totalorder %s13_s16, 4   ;;  %s6540_s13 = smov %s5732_s23 }
 0x23a   : > { %s6541_s14 = smov %s5662_s15  ;;  %s6542_s15 = smov %s6544_s17 }
 0x23b   :  { %12 = sbr.rel (!%p10_p11) target bundleno = 3 (0x3), region = 212 }

</bundles_post_ra>
